<compile_context>
chip_gen: v5e
topology: v5e:2x2
jax: 0.10.0
libtpu: 0.0.40
codegen_flags: <defaults>
</compile_context>

<pallas_src>
import math
from functools import partial

import jax
import jax.numpy as jnp
from jax import lax
from jax.experimental import pallas as pl
from jax.experimental.pallas import tpu as pltpu

_VMEM_LIMIT = 32 * 1024 * 1024  # raise v5e's 16 MiB default, safe on v7x


# ----------------------------------------------------------------------------
# Relative position bias (glue, plain JAX)
# ----------------------------------------------------------------------------
def _rel_pos_bucket(relative_position, num_buckets, max_distance):
    """Port of _get_rel_pos_bias_bucket (T5-style)."""
    is_negative = (relative_position < 0).astype(jnp.int32)
    rp = jnp.abs(relative_position)
    rp = jnp.clip(rp, 0, max_distance - 1)
    max_exact = num_buckets // 2
    safe_rp = jnp.maximum(rp, 1)  # avoid log(0) -> -inf -> UB int cast
    log_ratio = jnp.log(safe_rp.astype(jnp.float32) / max_exact) / math.log(
        max_distance / max_exact
    )
    large = max_exact + (log_ratio * (num_buckets - max_exact)).astype(jnp.int32)
    return is_negative * num_buckets + jnp.where(rp < max_exact, rp, large)


def _relative_bias(N, num_heads, grid_size, num_buckets, max_distance, bias_table):
    """Returns (H, N, N) relative attention bias (f32)."""
    idx = jnp.arange(N, dtype=jnp.int32)
    row = idx // grid_size
    col = idx % grid_size
    rel_row = row[:, None] - row[None, :]
    rel_col = col[:, None] - col[None, :]
    row_b = _rel_pos_bucket(rel_row, num_buckets, max_distance)
    col_b = _rel_pos_bucket(rel_col, num_buckets, max_distance)
    row_bias = bias_table[jnp.clip(row_b, 0, num_buckets - 1)]  # (N, N, H)
    col_bias = bias_table[jnp.clip(col_b, 0, num_buckets - 1)]  # (N, N, H)
    return (row_bias + col_bias).transpose(2, 0, 1)             # (H, N, N)


def _pick_tile(n, max_tile):
    """Largest tile <= max_tile that divides n and is a multiple of 8."""
    if n <= max_tile:
        return n
    for t in range(max_tile, 7, -1):
        if n % t == 0 and t % 8 == 0:
            return t
    return n  # TODO(synk): pad / mask remainder tiles for awkward N


# ----------------------------------------------------------------------------
# Pallas kernel 1: fused linear  y = x @ W + b   (tiled over batch, N-rows)
#   x / W in compute_dtype (bf16 on the fast path), f32 accumulation, f32 bias.
# ----------------------------------------------------------------------------
def _linear_kernel(x_ref, w_ref, b_ref, o_ref):
    o_ref[0] = (
        jnp.dot(x_ref[0], w_ref[...], preferred_element_type=jnp.float32)
        + b_ref[...]
    ).astype(o_ref.dtype)


def _linear(x, w_t, b_row, out_dtype, *, tile_n=512):
    """x: (B, N, Din), w_t: (Din, Dout), b_row: (1, Dout) f32 -> (B, N, Dout)."""
    B, N, Din = x.shape
    Dout = w_t.shape[1]
    tn = _pick_tile(N, tile_n)
    return pl.pallas_call(
        _linear_kernel,
        out_shape=jax.ShapeDtypeStruct((B, N, Dout), out_dtype),
        grid=(B, N // tn),
        in_specs=[
            pl.BlockSpec((1, tn, Din), lambda b, n: (b, n, 0)),
            pl.BlockSpec((Din, Dout), lambda b, n: (0, 0)),   # constant -> fetched once
            pl.BlockSpec((1, Dout), lambda b, n: (0, 0)),
        ],
        out_specs=pl.BlockSpec((1, tn, Dout), lambda b, n: (b, n, 0)),
        compiler_params=pltpu.CompilerParams(
            dimension_semantics=("parallel", "parallel"),
            vmem_limit_bytes=_VMEM_LIMIT),
    )(x, w_t, b_row)


# ----------------------------------------------------------------------------
# Pallas kernel 2: per-(head, q_tile, batch) attention
#   q is pre-scaled (1/sqrt(head_dim) folded into W_in/b_in in the wrapper).
#   q/k/v/rel arrive already in compute_dtype.
# ----------------------------------------------------------------------------
def _attn_kernel(q_ref, k_ref, v_ref, rel_ref, *out_refs,
                 compute_dtype, need_weights):
    if need_weights:
        ctx_ref, attn_ref = out_refs
    else:
        (ctx_ref,) = out_refs

    q = q_ref[0]                                   # (tq, hd), pre-scaled
    k = k_ref[0]                                   # (N,  hd)
    v = v_ref[0]                                   # (N,  hd)

    # q @ k^T without an explicit transpose (contract head_dim of both).
    s = lax.dot_general(q, k, (((1,), (1,)), ((), ())),
                        preferred_element_type=jnp.float32)      # (tq, N)
    s = s + rel_ref[0].astype(jnp.float32)                        # relative bias

    # TODO(synk): attn_mask / key_padding_mask masking (None in this config).
    s = s - jnp.max(s, axis=-1, keepdims=True)
    p = jnp.exp(s)                                               # f32
    denom = jnp.sum(p, axis=-1, keepdims=True)                   # (tq, 1)

    if need_weights:
        # Exact normalization so returned probability rows sum to 1.
        p_n = p / denom
        attn_ref[0, 0] = p_n.astype(attn_ref.dtype)
        ctx = jnp.dot(p_n.astype(compute_dtype), v,
                      preferred_element_type=jnp.float32)        # (tq, hd)
    else:
        # Cheaper: normalize the (tq, hd) context instead of the (tq, N) probs.
        ctx = jnp.dot(p.astype(compute_dtype), v,
                      preferred_element_type=jnp.float32)
        ctx = ctx * pl.reciprocal(denom, approx=True)

    # dropout p=0.0 -> identity, skipped.
    ctx_ref[0] = ctx.astype(ctx_ref.dtype)


# ----------------------------------------------------------------------------
# Wrapper
# ----------------------------------------------------------------------------
def custom_multihead_attention(x, params, *, num_heads, grid_size=100,
                               num_buckets=32, max_distance=128,
                               compute_dtype=jnp.float32,
                               need_weights=True,
                               weights_dtype=jnp.float32,
                               q_tile=512):
    B, N, D = x.shape
    head_dim = D // num_heads
    assert head_dim * num_heads == D
    # BlockSpec column-slicing of the qkv tensor requires the last block dim to
    # be a multiple of 128.
    # TODO(synk): general head_dim would need full-D blocks + in-kernel slicing.
    assert head_dim % 128 == 0, "this kernel expects head_dim % 128 == 0"
    scaling = head_dim ** (-0.5)
    out_dtype = x.dtype

    rel = _relative_bias(N, num_heads, grid_size, num_buckets, max_distance,
                         params["bias_table"]).astype(compute_dtype)  # (H, N, N)

    # Pre-transpose weights to (in, out), fold 1/sqrt(head_dim) into q columns
    # (algebraically identical to scaling scores), then cast to compute_dtype.
    w_in_t = params["w_in"].T                                    # (D, 3D) f32
    w_in_t = w_in_t.at[:, :D].multiply(scaling)
    b_in = params["b_in"].at[:D].multiply(scaling)[None, :].astype(jnp.float32)
    w_out_t = params["w_out"].T                                  # (D, D)
    b_out = params["b_out"][None, :].astype(jnp.float32)

    xc = x.astype(compute_dtype)
    w_in_c = w_in_t.astype(compute_dtype)
    w_out_c = w_out_t.astype(compute_dtype)

    # ---- in_proj: tiled (tn, D) @ (D, 3D) matmuls; qkv emitted in compute_dtype
    qkv = _linear(xc, w_in_c, b_in, out_dtype=compute_dtype)     # (B, N, 3D)

    # ---- attention over a (head, q_tile, batch) grid -------------------------
    tq = _pick_tile(N, q_tile)
    n_q = N // tq
    attn_kernel = partial(_attn_kernel, compute_dtype=compute_dtype,
                          need_weights=need_weights)

    out_shapes = [jax.ShapeDtypeStruct((B, N, D), compute_dtype)]          # ctx
    out_specs = [pl.BlockSpec((1, tq, head_dim), lambda h, qi, b: (b, qi, h))]
    if need_weights:
        out_shapes.append(
            jax.ShapeDtypeStruct((B, num_heads, N, N), weights_dtype))     # probs
        out_specs.append(
            pl.BlockSpec((1, 1, tq, N), lambda h, qi, b: (b, h, qi, 0)))

    results = pl.pallas_call(
        attn_kernel,
        out_shape=tuple(out_shapes),
        grid=(num_heads, n_q, B),
        in_specs=[
            # per-head q / k / v column slices of qkv, gathered at DMA time
            pl.BlockSpec((1, tq, head_dim), lambda h, qi, b: (b, qi, h)),
            pl.BlockSpec((1, N, head_dim),
                         lambda h, qi, b: (b, 0, num_heads + h)),
            pl.BlockSpec((1, N, head_dim),
                         lambda h, qi, b: (b, 0, 2 * num_heads + h)),
            # per-(head, q_tile) relative-bias tile; index is constant along the
            # innermost (batch) axis -> stays VMEM-resident, no per-batch re-DMA
            pl.BlockSpec((1, tq, N), lambda h, qi, b: (h, qi, 0)),
        ],
        out_specs=tuple(out_specs),
        compiler_params=pltpu.CompilerParams(
            dimension_semantics=("parallel", "parallel", "parallel"),
            vmem_limit_bytes=_VMEM_LIMIT),
    )(qkv, qkv, qkv, rel)

    ctx = results[0]
    attn = results[1] if need_weights else None

    # ---- out_proj: tiled (tn, D) @ (D, D) matmuls ---------------------------
    out = _linear(ctx, w_out_c, b_out, out_dtype=out_dtype)     # (B, N, D)
    return out, attn


# ----------------------------------------------------------------------------
# Deterministic parameter init (synthetic; mirrors module __init__ shapes)
# ----------------------------------------------------------------------------
def init_params(key, embed_dim, num_heads, num_buckets):
    k1, k2, k3, k4, k5 = jax.random.split(key, 5)
    lim = 1.0 / math.sqrt(embed_dim)
    return dict(
        w_in=jax.random.uniform(k1, (3 * embed_dim, embed_dim),
                                minval=-lim, maxval=lim, dtype=jnp.float32),
        b_in=jax.random.uniform(k2, (3 * embed_dim,),
                                minval=-lim, maxval=lim, dtype=jnp.float32),
        w_out=jax.random.uniform(k3, (embed_dim, embed_dim),
                                 minval=-lim, maxval=lim, dtype=jnp.float32),
        b_out=jax.random.uniform(k4, (embed_dim,),
                                 minval=-lim, maxval=lim, dtype=jnp.float32),
        bias_table=jax.random.normal(k5, (num_buckets, num_heads),
                                     dtype=jnp.float32),
    )


# ----------------------------------------------------------------------------
# Pure-JAX reference (correctness check only)
# ----------------------------------------------------------------------------
def reference(x, params, *, num_heads, grid_size, num_buckets, max_distance):
    B, N, D = x.shape
    hd = D // num_heads
    scaling = hd ** (-0.5)
    qkv = x @ params["w_in"].T + params["b_in"]
    q, k, v = jnp.split(qkv, 3, axis=-1)
    q = q.reshape(B, N, num_heads, hd).transpose(0, 2, 1, 3)
    k = k.reshape(B, N, num_heads, hd).transpose(0, 2, 1, 3)
    v = v.reshape(B, N, num_heads, hd).transpose(0, 2, 1, 3)
    s = jnp.einsum("bhqd,bhkd->bhqk", q, k) * scaling
    rel = _relative_bias(N, num_heads, grid_size, num_buckets, max_distance,
                         params["bias_table"])
    s = s + rel[None]
    p = jax.nn.softmax(s, axis=-1)
    o = jnp.einsum("bhqk,bhkd->bhqd", p, v).transpose(0, 2, 1, 3).reshape(B, N, D)
    o = o @ params["w_out"].T + params["b_out"]
    return o, p


# ----------------------------------------------------------------------------
if __name__ == "__main__":
    # Small but lane-aligned shapes: head_dim = N = 128 -> unmasked stores.
    B, N = 2, 128
    embed_dim, num_heads = 512, 4
    grid_size, num_buckets, max_distance = 100, 32, 128

    key = jax.random.PRNGKey(0)
    kx, kp = jax.random.split(key)
    x = jax.random.normal(kx, (B, N, embed_dim), dtype=jnp.float32)
    params = init_params(kp, embed_dim, num_heads, num_buckets)

    ref_out, ref_attn = reference(
        x, params, num_heads=num_heads, grid_size=grid_size,
        num_buckets=num_buckets, max_distance=max_distance)

    # --- f32 path (tight tolerance; exact softmax normalization) ------------
    out, attn = custom_multihead_attention(
        x, params, num_heads=num_heads, grid_size=grid_size,
        num_buckets=num_buckets, max_distance=max_distance)
    out = jax.block_until_ready(out)
    attn = jax.block_until_ready(attn)
    assert out.shape == (B, N, embed_dim)
    assert attn.shape == (B, num_heads, N, N)
    assert jnp.allclose(out, ref_out, atol=2e-3, rtol=2e-3)
    assert jnp.allclose(attn, ref_attn, atol=2e-3, rtol=2e-3)

    # --- f32 path without the probability output (normalizes ctx instead) ---
    out_nw, attn_nw = custom_multihead_attention(
        x, params, num_heads=num_heads, grid_size=grid_size,
        num_buckets=num_buckets, max_distance=max_distance,
        need_weights=False)
    out_nw = jax.block_until_ready(out_nw)
    assert attn_nw is None
    assert jnp.allclose(out_nw, ref_out, atol=1e-2, rtol=1e-2)

    # --- bf16 path: bf16 weights/activations/qkv/ctx/rel, f32 accumulate ----
    out_bf, attn_bf = custom_multihead_attention(
        x, params, num_heads=num_heads, grid_size=grid_size,
        num_buckets=num_buckets, max_distance=max_distance,
        compute_dtype=jnp.bfloat16)
    out_bf = jax.block_until_ready(out_bf)
    attn_bf = jax.block_until_ready(attn_bf)
    assert jnp.allclose(out_bf, ref_out, atol=5e-2, rtol=5e-2)
    assert jnp.allclose(attn_bf, ref_attn, atol=5e-2, rtol=5e-2)

    print("KERNEL_OK")
</pallas_src>

<mosaic_0001>
module attributes {stable_mosaic.version = 11 : i64} {
  func.func @_linear_kernel(%arg0: i32, %arg1: i32, %arg2: memref<1x128x512xf32, #tpu.memory_space<vmem>>, %arg3: memref<512x1536xf32, #tpu.memory_space<vmem>>, %arg4: memref<1x1536xf32, #tpu.memory_space<vmem>>, %arg5: memref<1x128x1536xf32, #tpu.memory_space<vmem>>) attributes {dimension_semantics = [#tpu.dimension_semantics<parallel>, #tpu.dimension_semantics<parallel>], iteration_bounds = array<i64: 2, 1>, scalar_prefetch = 0 : i64, scratch_operands = 0 : i64, tpu.core_type = #tpu.core_type<tc>, window_params = [{transform_indices = @transform_0, window_bounds = array<i64: 1, 128, 512>}, {pipeline_mode = #tpu.pipeline_mode<synchronous>, transform_indices = @transform_1, window_bounds = array<i64: 512, 1536>}, {pipeline_mode = #tpu.pipeline_mode<synchronous>, transform_indices = @transform_2, window_bounds = array<i64: 1, 1536>}, {transform_indices = @transform_3, window_bounds = array<i64: 1, 128, 1536>}]} {
    %c0 = arith.constant 0 : index
    %c0_0 = arith.constant 0 : index
    %c0_1 = arith.constant 0 : index
    %0 = vector.load %arg2[%c0, %c0_0, %c0_1] : memref<1x128x512xf32, #tpu.memory_space<vmem>>, vector<1x128x512xf32>
    %1 = vector.shape_cast %0 : vector<1x128x512xf32> to vector<128x512xf32>
    %c0_2 = arith.constant 0 : index
    %c0_3 = arith.constant 0 : index
    %2 = vector.load %arg3[%c0_2, %c0_3] : memref<512x1536xf32, #tpu.memory_space<vmem>>, vector<512x1536xf32>
    %cst = arith.constant dense<0.000000e+00> : vector<128x1536xf32>
    %3 = tpu.matmul %1, %2, %cst {dimension_numbers = #tpu.dot_dimension_numbers<[1], [0], [0], [1], [0, 0, 1, 1], [], []>} : vector<128x512xf32>, vector<512x1536xf32>, vector<128x1536xf32> -> vector<128x1536xf32>
    %c0_4 = arith.constant 0 : index
    %c0_5 = arith.constant 0 : index
    %4 = vector.load %arg4[%c0_4, %c0_5] : memref<1x1536xf32, #tpu.memory_space<vmem>>, vector<1x1536xf32>
    %5 = vector.broadcast %4 : vector<1x1536xf32> to vector<128x1536xf32>
    %6 = arith.addf %3, %5 : vector<128x1536xf32>
    %c0_6 = arith.constant 0 : index
    %c0_7 = arith.constant 0 : index
    %c0_8 = arith.constant 0 : index
    %7 = vector.load %arg5[%c0_6, %c0_7, %c0_8] : memref<1x128x1536xf32, #tpu.memory_space<vmem>>, vector<1x128x1536xf32>
    %8 = vector.shape_cast %7 : vector<1x128x1536xf32> to vector<128x1536xf32>
    %9 = vector.shape_cast %6 : vector<128x1536xf32> to vector<1x128x1536xf32>
    tpu.vector_store %arg5[%c0_6, %c0_7, %c0_8], %9 {strides = array<i32>} : memref<1x128x1536xf32, #tpu.memory_space<vmem>>, vector<1x128x1536xf32>,
    return
  }
  func.func @transform_0(%arg0: i32, %arg1: i32) -> (i32, i32, i32) {
    %c0_i32 = arith.constant 0 : i32
    %c0_i32_0 = arith.constant 0 : i32
    return %arg0, %arg1, %c0_i32 : i32, i32, i32
  }
  func.func @transform_1(%arg0: i32, %arg1: i32) -> (i32, i32) {
    %c0_i32 = arith.constant 0 : i32
    %c0_i32_0 = arith.constant 0 : i32
    %c0_i32_1 = arith.constant 0 : i32
    return %c0_i32, %c0_i32_0 : i32, i32
  }
  func.func @transform_2(%arg0: i32, %arg1: i32) -> (i32, i32) {
    %c0_i32 = arith.constant 0 : i32
    %c0_i32_0 = arith.constant 0 : i32
    %c0_i32_1 = arith.constant 0 : i32
    return %c0_i32, %c0_i32_0 : i32, i32
  }
  func.func @transform_3(%arg0: i32, %arg1: i32) -> (i32, i32, i32) {
    %c0_i32 = arith.constant 0 : i32
    %c0_i32_0 = arith.constant 0 : i32
    return %arg0, %arg1, %c0_i32 : i32, i32, i32
  }
}

</mosaic_0001>

<bundles_post_ra>
// kernel: tpu_custom_call.1
= control target key start
LH: loop header
LB: loop body
LE: loop exit
PB: predicated region body
PF: predicated region fallthrough
CT: control target
= control target key end

     0   :  { %s7690_s0 = inlined_call_operand.hbm [shape: f32[2,128,512], index: 0, kind: input, shape index: {}]   ;;  %s7691_s1 = inlined_call_operand.hbm [shape: f32[512,1536], index: 1, kind: input, shape index: {}]   ;;  %s7692_s2 = inlined_call_operand.hbm [shape: f32[1,1536], index: 2, kind: input, shape index: {}]   ;;  %s7693_s3 = inlined_call_operand.hbm [shape: f32[2,128,1536], index: 3, kind: output, shape index: {}]  }
   0x1   :  { %7776 = sst [smem:[#allocation26_spill]] %s7691_s1 }
   0x2   :  { %8 = vsyncpa [#allocation3], 0 }
   0x3   :  { %10 = vsyncpa [#allocation3 + $0x1], 0 }
   0x4   :  { %11 = vsyncpa [#allocation6], 0 }
   0x5   :  { %12 = vsyncpa [#allocation4], 0 }
   0x6   :  { %14 = vsyncpa [#allocation4 + $0x1], 0  ;;  %s5178_s12 = smov 0   ;;  %s5180_s13 = smov 0  }
   0x7   :  { %s5182_s14 = smov 0   ;;  %s5184_s15 = smov 0  }
   0x8   :  { %s5186_s16 = smov 0   ;;  %s5188_s17 = smov 0  }
   0x9 LB: > { %s4540_s18 = sadd.s32 4294967295, %s5148_s17   ;;  %s4541_s19 = sadd.s32 4294967294, %s5148_s17   ;;  %s5148_s17 = sphi %s5188_s17, %s20_s17   ;;  %s5144_s16 = sphi %s5186_s16, %s7953_s16   ;;  %s5140_s15 = sphi %s5184_s15, %s7952_s15   ;;  %s5136_s14 = sphi %s5182_s14, %s7951_s14   ;;  %s5132_s13 = sphi %s5180_s13, %s7950_s13   ;;  %s5128_s12 = sphi %s5178_s12, %s7949_s12  }
   0xa   : > { %p54_p0 = scmp.ne.s32.totalorder %s5132_s13, %s5128_s12  ;;  %p5212_p1 = scmp.eq.s32.totalorder %s4540_s18, 0 }
   0xb   : > { %p5216_p2 = scmp.eq.s32.totalorder %s4540_s18, 1  ;;  %p128_p3 = scmp.eq.s32.totalorder %s4541_s19, 1 }
   0xc   : > { %p5222_p4 = por %p5212_p1, %p54_p0  ;;  %p4542_p5 = scmp.ge.s32.totalorder %s5148_s17, 1 }
   0xd   : > { %p5227_p6 = por %p128_p3, %p54_p0  ;;  %p135_p7 = scmp.lt.s32.totalorder %s5148_s17, 3 }
   0xe   : > { %s7781_s1 = sld [smem:[#allocation26_spill]]  ;;  %s5150_s28 = smov [#allocation5]  }
   0xf   : > { %p5235_p8 = pnand %p4542_p5, %p135_p7  ;;  %s148_s29 = sshll.u32 %s5150_s28, 4  ;;  %s149_s29 = int_to_ptr.vmem [resolvable:$true] %s148_s29 }
  0x10   : > { %p4545_p11 = scmp.ge.s32.totalorder %s5148_s17, 2  ;;  %s161_s5 = sshll.u32 %s7692_s2, 4  ;;  %s162_s5 = int_to_ptr.hbm [resolvable:$true] %s161_s5 }
  0x11   : > { %p4571_p9 = pneg %p5235_p8  ;;  %s5151_s6 = smov 1536  }
  0x12   : > { %s5152_s7 = smov 96   ;;  %s5153_s8 = smov [#allocation7]  }
  0x13   : > { %p4572_p10 = pnand %p4571_p9, %p5212_p1  ;;  %s163_s9 = sshll.u32 %s5153_s8, 4  ;;  %s164_s9 = int_to_ptr.vmem [resolvable:$true] %s163_s9 }
  0x14   : > { %s146_s26 = sshll.u32 %s7781_s1, 4  ;;  %s32_s10 = sadd.s32 1, %s5144_s16  ;;  %s147_s26 = int_to_ptr.hbm [resolvable:$true] %s146_s26 }
  0x15   : > { %4574 = dma.hbm_to_vmem [thread:$0]  (!%p4572_p10), %s147_s26, 98304, %s149_s29, [#allocation6], %s5151_s6, %s5151_s6, %s5152_s7  }
  0x16   : > { %4577 = dma.hbm_to_vmem [thread:$0]  (!%p4572_p10), %s162_s5, 192, %s164_s9, [#allocation6]  }
  0x17   : > { %s41_s11 = sadd.s32 1, %s5136_s14  ;;  %p34_p12 = scmp.ge.s32.totalorder %s32_s10, 2 }
  0x18   : > { %p48_p13 = scmp.ne.s32.totalorder %s5136_s14, %s5132_s13  ;;  %p49_p0 = scmp.eq.s32.totalorder %s5148_s17, 0 }
  0x19   : > { %p4588_p3 = scmp.lt.s32.totalorder %s5148_s17, 2  ;;  %s7955_s10 = smov (%p34_p12, %s32_s10), 0 }
  0x1a   : > { %p5255_p5 = por %p49_p0, %p48_p13  ;;  %p5261_p7 = por %p5216_p2, %p48_p13 }
  0x1b   : > { %s36_s24 = ssub.s32 %s5144_s16, %s7955_s10  ;;  %s174_s25 = sand.u32 1, %s5136_s14  }
  0x1c   : > { %p39_p9 = scmp.eq.s32.totalorder %s36_s24, 0  ;;  %s4546_s26 = sshll.u32 %s174_s25, 9 }
  0x1d   : > { %s4556_s28 = sshll.u32 %s5144_s16, 9  ;;  %s178_s7 = scalar_lea.vmem [#allocation2], %s4546_s26 }
  0x1e   : > { %s5270_s29 = scalar_select %p39_p9, %s5136_s14, %s41_s11  }
  0x1f   : > { %s186_s5 = scalar_lea.hbm %s7690_s0, %s4556_s28  ;;  %s189_s8 = sshll.u32 %s178_s7, 4  ;;  %s190_s8 = int_to_ptr.vmem [resolvable:$true] %s189_s8 }
  0x20   : > { %s187_s6 = sshll.u32 %s186_s5, 4  ;;  %p4579_p2 = pnand %p4588_p3, %p5255_p5  ;;  %s188_s6 = int_to_ptr.hbm [resolvable:$true] %s187_s6 }
  0x21   : > { %s175_s21 = scalar_lea.sflag [#allocation3], %s174_s25  ;;  %s5154_s9 = smov 512  }
  0x22   : > { %s5155_s1 = smov 32   ;;  %201 = sbr.rel (%p5235_p8) target bundleno = 1776 (0x6f0), region = 32 }
  0x23   : > { %4581 = dma.hbm_to_vmem [thread:$0]  (!%p4579_p2), %s188_s6, 8192, %s190_s8, %s175_s21, %s5154_s9, %s5154_s9, %s5155_s1  }
  0x27   : > { %s5282_s11 = sand.u32 1, %s5132_s13  }
  0x28   : > { %s4550_s24 = sshll.u32 %s5282_s11, 9  ;;  %s204_s26 = scalar_lea.sflag [#allocation3], %s5282_s11 }
  0x29   : > { %s5286_s28 = scalar_lea.vmem [#allocation2], %s4550_s24 }
  0x2a   : > { %5115 = dma.done.wait (%p5222_p4), %s204_s26, 8192  }
  0x2b   : > { %5117 = vsyncadd (%p5222_p4), %s204_s26, 4294959104 }
  0x2c   : > { %5119 = dma.done.wait (%p5212_p1), [#allocation6], 98496  }
  0x2d   : > { %5121 = vsyncadd (%p5212_p1), [#allocation6], 4294868800  ;;  %v871_v0 = vld [vmem:[#allocation5 + $0x11a0] sm:$0xff]  ;;  %v5297_v62 = vld [vmem:[%s5286_s28 + $0x10] sm:$0xff]  ;;  %s4557_s1 = smul.u32 1536, %s5282_s11  ;;  %s5082_s21 = scalar_lea.hbm %s7693_s3, 3072 }
  0x2e   : > { %v487_v1 = vld [vmem:[#allocation5 + $0x5a0] sm:$0xff]  ;;  %1233 = vmatpush.msra.mxu2 %v871_v0  ;;  %v872_v0 = vld [vmem:[#allocation5 + $0x11a8] sm:$0xff]  ;;  %s4558_s22 = smul.u32 1536, %s5140_s15  ;;  %s4416_s15 = scalar_lea.sflag [#allocation4], %s5282_s11 }
  0x2f   : > { %v859_v2 = vld [vmem:[#allocation5 + $0x1140] sm:$0xff]  ;;  %1103 = vmatpush.msra.mxu0 %v487_v1  ;;  %s5564_s20 = scalar_lea.vmem [#allocation8], %s4557_s1 }
  0x30   : > { %v1063_v3 = vld [vmem:[#allocation5 + $0x17a0] sm:$0xff]  ;;  %1234 = vmatpush.msra.mxu2 %v859_v2  ;;  %v5303_v2 = vld [vmem:[%s5286_s28 + $0x18] sm:$0xff]  ;;  %s4430_s25 = scalar_lea.hbm %s7693_s3, %s4558_s22  ;;  %s4431_s30 = sshll.u32 %s5564_s20, 4  ;;  %s4432_s30 = int_to_ptr.vmem [resolvable:$true] %s4431_s30 }
  0x31   : > { %v475_v4 = vld [vmem:[#allocation5 + $0x540] sm:$0xff]  ;;  %1298 = vmatpush.msra.mxu3 %v1063_v3  ;;  %v488_v3 = vld [vmem:[#allocation5 + $0x5a8] sm:$0xff]  ;;  %s4433_s4 = sshll.u32 %s4430_s25, 4  ;;  %s4434_s4 = int_to_ptr.hbm [resolvable:$true] %s4433_s4 }
  0x32   : > { %v679_v5 = vld [vmem:[#allocation5 + $0xba0] sm:$0xff]  ;;  %1104 = vmatpush.msra.mxu0 %v475_v4  ;;  %v1064_v4 = vld [vmem:[#allocation5 + $0x17a8] sm:$0xff]  ;;  %s5076_s5 = sshra.s32 %s4434_s4, 4  ;;  %s5077_s5 = int_to_ptr.hbm [resolvable:$true] %s5076_s5 }
  0x33   : > { %1168 = vmatpush.msra.mxu1 %v679_v5  ;;  %v847_v6 = vld [vmem:[#allocation5 + $0x10e0] sm:$0xff]  ;;  %s5078_s6 = scalar_lea.hbm %s5077_s5, 1536  ;;  %p5083_p10 = scmp.lt.s32.totalorder %s5077_s5, %s7693_s3 }
  0x34   : > { %v1051_v7 = vld [vmem:[#allocation5 + $0x1740] sm:$0xff]  ;;  %1235 = vmatpush.msra.mxu2 %v847_v6  ;;  %v5308_v6 = vld [vmem:[%s5286_s28 + $0x8] sm:$0xff]  ;;  %p5079_p1 = scmp.ne.s32.totalorder %s5077_s5, %s5078_s6  ;;  %p5084_p12 = scmp.lt.s32.totalorder %s5082_s21, %s5078_s6 }
  0x35   : > { %v463_v8 = vld [vmem:[#allocation5 + $0x4e0] sm:$0xff]  ;;  %1299 = vmatpush.msra.mxu3 %v1051_v7  ;;  %v860_v7 = vld [vmem:[#allocation5 + $0x1148] sm:$0xff] }
  0x36   : > { %v667_v9 = vld [vmem:[#allocation5 + $0xb40] sm:$0xff]  ;;  %1105 = vmatpush.msra.mxu0 %v463_v8  ;;  %v680_v8 = vld [vmem:[#allocation5 + $0xba8] sm:$0xff]  ;;  %p5080_p4 = pnand %p5079_p1, %p5261_p7  ;;  %p5085_p13 = por %p5084_p12, %p5083_p10 }
  0x37   : > { %v1039_v10 = vld [vmem:[#allocation5 + $0x16e0] sm:$0xff]  ;;  %1169 = vmatpush.msra.mxu1 %v667_v9  ;;  %v476_v9 = vld [vmem:[#allocation5 + $0x548] sm:$0xff] }
  0x38   : > { %v835_v11 = vld [vmem:[#allocation5 + $0x1080] sm:$0xff]  ;;  %1300 = vmatpush.msra.mxu3 %v1039_v10  ;;  %v1052_v10 = vld [vmem:[#allocation5 + $0x1748] sm:$0xff]  ;;  %p5081_p8 = pneg %p5080_p4 }
  0x39   : > { %v451_v12 = vld [vmem:[#allocation5 + $0x480] sm:$0xff]  ;;  %1236 = vmatpush.msra.mxu2 %v835_v11  ;;  %v848_v11 = vld [vmem:[#allocation5 + $0x10e8] sm:$0xff] }
  0x3a   : > { %v655_v13 = vld [vmem:[#allocation5 + $0xae0] sm:$0xff]  ;;  %1106 = vmatpush.msra.mxu0 %v451_v12  ;;  %v668_v12 = vld [vmem:[#allocation5 + $0xb48] sm:$0xff]  ;;  %p5086_p0 = pnand %p5085_p13, %p5081_p8 }
  0x3b   : > { %v1027_v14 = vld [vmem:[#allocation5 + $0x1680] sm:$0xff]  ;;  %1170 = vmatpush.msra.mxu1 %v655_v13  ;;  %v464_v13 = vld [vmem:[#allocation5 + $0x4e8] sm:$0xff] }
  0x3c   : > { %v643_v15 = vld [vmem:[#allocation5 + $0xa80] sm:$0xff]  ;;  %1301 = vmatpush.msra.mxu3 %v1027_v14  ;;  %v5313_v14 = vld [vmem:[%s5286_s28 + $0x30] sm:$0xff] }
  0x3d   : > { %v823_v16 = vld [vmem:[#allocation5 + $0x1020] sm:$0xff]  ;;  %1171 = vmatpush.msra.mxu1 %v643_v15  ;;  %v1040_v15 = vld [vmem:[#allocation5 + $0x16e8] sm:$0xff] }
  0x3e   : > { %v439_v17 = vld [vmem:[#allocation5 + $0x420] sm:$0xff]  ;;  %1237 = vmatpush.msra.mxu2 %v823_v16 }
  0x3f   : > { %v1015_v18 = vld [vmem:[#allocation5 + $0x1620] sm:$0xff]  ;;  %1107 = vmatpush.msra.mxu0 %v439_v17  ;;  %v656_v17 = vld [vmem:[#allocation5 + $0xae8] sm:$0xff] }
  0x40   : > { %v631_v19 = vld [vmem:[#allocation5 + $0xa20] sm:$0xff]  ;;  %1302 = vmatpush.msra.mxu3 %v1015_v18  ;;  %v5319_v18 = vld [vmem:[%s5286_s28 + $0x38] sm:$0xff] }
  0x41   : > { %v811_v20 = vld [vmem:[#allocation5 + $0xfc0] sm:$0xff]  ;;  %1172 = vmatpush.msra.mxu1 %v631_v19  ;;  %v836_v19 = vld [vmem:[#allocation5 + $0x1088] sm:$0xff] }
  0x42   : > { %v427_v21 = vld [vmem:[#allocation5 + $0x3c0] sm:$0xff]  ;;  %1238 = vmatpush.msra.mxu2 %v811_v20  ;;  %v452_v20 = vld [vmem:[#allocation5 + $0x488] sm:$0xff] }
  0x43   : > { %v1003_v22 = vld [vmem:[#allocation5 + $0x15c0] sm:$0xff]  ;;  %1108 = vmatpush.msra.mxu0 %v427_v21  ;;  %v1028_v21 = vld [vmem:[#allocation5 + $0x1688] sm:$0xff] }
  0x44   : > { %v619_v23 = vld [vmem:[#allocation5 + $0x9c0] sm:$0xff]  ;;  %1303 = vmatpush.msra.mxu3 %v1003_v22  ;;  %v5324_v22 = vld [vmem:[%s5286_s28 + $0x28] sm:$0xff] }
  0x45   : > { %v799_v24 = vld [vmem:[#allocation5 + $0xf60] sm:$0xff]  ;;  %1173 = vmatpush.msra.mxu1 %v619_v23  ;;  %v824_v23 = vld [vmem:[#allocation5 + $0x1028] sm:$0xff] }
  0x46   : > { %v415_v25 = vld [vmem:[#allocation5 + $0x360] sm:$0xff]  ;;  %1239 = vmatpush.msra.mxu2 %v799_v24  ;;  %v644_v24 = vld [vmem:[#allocation5 + $0xa88] sm:$0xff] }
  0x47   : > { %v991_v26 = vld [vmem:[#allocation5 + $0x1560] sm:$0xff]  ;;  %1109 = vmatpush.msra.mxu0 %v415_v25  ;;  %v440_v25 = vld [vmem:[#allocation5 + $0x428] sm:$0xff] }
  0x48   : > { %v607_v27 = vld [vmem:[#allocation5 + $0x960] sm:$0xff]  ;;  %1304 = vmatpush.msra.mxu3 %v991_v26  ;;  %v1016_v26 = vld [vmem:[#allocation5 + $0x1628] sm:$0xff] }
  0x49   : > { %v787_v28 = vld [vmem:[#allocation5 + $0xf00] sm:$0xff]  ;;  %1174 = vmatpush.msra.mxu1 %v607_v27  ;;  %v812_v27 = vld [vmem:[#allocation5 + $0xfc8] sm:$0xff] }
  0x4a   : > { %v403_v29 = vld [vmem:[#allocation5 + $0x300] sm:$0xff]  ;;  %1240 = vmatpush.msra.mxu2 %v787_v28  ;;  %v632_v28 = vld [vmem:[#allocation5 + $0xa28] sm:$0xff] }
  0x4b   : > { %v979_v30 = vld [vmem:[#allocation5 + $0x1500] sm:$0xff]  ;;  %1110 = vmatpush.msra.mxu0 %v403_v29  ;;  %v428_v29 = vld [vmem:[#allocation5 + $0x3c8] sm:$0xff] }
  0x4c   : > { %v595_v31 = vld [vmem:[#allocation5 + $0x900] sm:$0xff]  ;;  %1305 = vmatpush.msra.mxu3 %v979_v30  ;;  %v5329_v30 = vld [vmem:[%s5286_s28 + $0x50] sm:$0xff] }
  0x4d   : > { %v775_v32 = vld [vmem:[#allocation5 + $0xea0] sm:$0xff]  ;;  %1175 = vmatpush.msra.mxu1 %v595_v31  ;;  %v1004_v31 = vld [vmem:[#allocation5 + $0x15c8] sm:$0xff] }
  0x4e   : > { %v391_v33 = vld [vmem:[#allocation5 + $0x2a0] sm:$0xff]  ;;  %1241 = vmatpush.msra.mxu2 %v775_v32 }
  0x4f   : > { %v967_v34 = vld [vmem:[#allocation5 + $0x14a0] sm:$0xff]  ;;  %1111 = vmatpush.msra.mxu0 %v391_v33  ;;  %v620_v33 = vld [vmem:[#allocation5 + $0x9c8] sm:$0xff] }
  0x50   : > { %v583_v35 = vld [vmem:[#allocation5 + $0x8a0] sm:$0xff]  ;;  %1306 = vmatpush.msra.mxu3 %v967_v34  ;;  %v5335_v34 = vld [vmem:[%s5286_s28 + $0x58] sm:$0xff] }
  0x51   : > { %v763_v36 = vld [vmem:[#allocation5 + $0xe40] sm:$0xff]  ;;  %1176 = vmatpush.msra.mxu1 %v583_v35  ;;  %v800_v35 = vld [vmem:[#allocation5 + $0xf68] sm:$0xff] }
  0x52   : > { %v379_v37 = vld [vmem:[#allocation5 + $0x240] sm:$0xff]  ;;  %1242 = vmatpush.msra.mxu2 %v763_v36  ;;  %v5340_v36 = vld [vmem:[%s5286_s28 + $0x48] sm:$0xff] }
  0x53   : > { %v955_v38 = vld [vmem:[#allocation5 + $0x1440] sm:$0xff]  ;;  %1112 = vmatpush.msra.mxu0 %v379_v37  ;;  %v416_v37 = vld [vmem:[#allocation5 + $0x368] sm:$0xff] }
  0x54   : > { %v571_v39 = vld [vmem:[#allocation5 + $0x840] sm:$0xff]  ;;  %1307 = vmatpush.msra.mxu3 %v955_v38  ;;  %v992_v38 = vld [vmem:[#allocation5 + $0x1568] sm:$0xff] }
  0x55   : > { %v751_v40 = vld [vmem:[#allocation5 + $0xde0] sm:$0xff]  ;;  %1177 = vmatpush.msra.mxu1 %v571_v39  ;;  %v608_v39 = vld [vmem:[#allocation5 + $0x968] sm:$0xff] }
  0x56   : > { %v367_v41 = vld [vmem:[#allocation5 + $0x1e0] sm:$0xff]  ;;  %1243 = vmatpush.msra.mxu2 %v751_v40  ;;  %v5345_v40 = vld [vmem:[%s5286_s28 + $0x70] sm:$0xff] }
  0x57   : > { %v943_v42 = vld [vmem:[#allocation5 + $0x13e0] sm:$0xff]  ;;  %1113 = vmatpush.msra.mxu0 %v367_v41 }
  0x58   : > { %v559_v43 = vld [vmem:[#allocation5 + $0x7e0] sm:$0xff]  ;;  %1308 = vmatpush.msra.mxu3 %v943_v42  ;;  %v5351_v42 = vld [vmem:[%s5286_s28 + $0x78] sm:$0xff] }
  0x59   : > { %v739_v44 = vld [vmem:[#allocation5 + $0xd80] sm:$0xff]  ;;  %1178 = vmatpush.msra.mxu1 %v559_v43  ;;  %v788_v43 = vld [vmem:[#allocation5 + $0xf08] sm:$0xff] }
  0x5a   : > { %v355_v45 = vld [vmem:[#allocation5 + $0x180] sm:$0xff]  ;;  %1244 = vmatpush.msra.mxu2 %v739_v44  ;;  %v5356_v44 = vld [vmem:[%s5286_s28 + $0x68] sm:$0xff] }
  0x5b   : > { %v931_v46 = vld [vmem:[#allocation5 + $0x1380] sm:$0xff]  ;;  %1114 = vmatpush.msra.mxu0 %v355_v45  ;;  %v404_v45 = vld [vmem:[#allocation5 + $0x308] sm:$0xff] }
  0x5c   : > { %v547_v47 = vld [vmem:[#allocation5 + $0x780] sm:$0xff]  ;;  %1309 = vmatpush.msra.mxu3 %v931_v46  ;;  %v980_v46 = vld [vmem:[#allocation5 + $0x1508] sm:$0xff] }
  0x5d   : > { %v727_v48 = vld [vmem:[#allocation5 + $0xd20] sm:$0xff]  ;;  %1179 = vmatpush.msra.mxu1 %v547_v47  ;;  %v596_v47 = vld [vmem:[#allocation5 + $0x908] sm:$0xff] }
  0x5e   : > { %v343_v49 = vld [vmem:[#allocation5 + $0x120] sm:$0xff]  ;;  %1245 = vmatpush.msra.mxu2 %v727_v48  ;;  %v5361_v48 = vld [vmem:[%s5286_s28 + $0x90] sm:$0xff] }
  0x5f   : > { %v919_v50 = vld [vmem:[#allocation5 + $0x1320] sm:$0xff]  ;;  %1115 = vmatpush.msra.mxu0 %v343_v49 }
  0x60   : > { %v535_v51 = vld [vmem:[#allocation5 + $0x720] sm:$0xff]  ;;  %1310 = vmatpush.msra.mxu3 %v919_v50  ;;  %v5367_v50 = vld [vmem:[%s5286_s28 + $0x98] sm:$0xff] }
  0x61   : > { %v715_v52 = vld [vmem:[#allocation5 + $0xcc0] sm:$0xff]  ;;  %1180 = vmatpush.msra.mxu1 %v535_v51  ;;  %v776_v51 = vld [vmem:[#allocation5 + $0xea8] sm:$0xff] }
  0x62   : > { %v331_v53 = vld [vmem:[#allocation5 + $0xc0] sm:$0xff]  ;;  %1246 = vmatpush.msra.mxu2 %v715_v52  ;;  %v5372_v52 = vld [vmem:[%s5286_s28 + $0x88] sm:$0xff] }
  0x63   : > { %v907_v54 = vld [vmem:[#allocation5 + $0x12c0] sm:$0xff]  ;;  %1116 = vmatpush.msra.mxu0 %v331_v53  ;;  %v392_v53 = vld [vmem:[#allocation5 + $0x2a8] sm:$0xff] }
  0x64   : > { %v523_v55 = vld [vmem:[#allocation5 + $0x6c0] sm:$0xff]  ;;  %1311 = vmatpush.msra.mxu3 %v907_v54  ;;  %v968_v54 = vld [vmem:[#allocation5 + $0x14a8] sm:$0xff] }
  0x65   : > { %v703_v56 = vld [vmem:[#allocation5 + $0xc60] sm:$0xff]  ;;  %1181 = vmatpush.msra.mxu1 %v523_v55  ;;  %v584_v55 = vld [vmem:[#allocation5 + $0x8a8] sm:$0xff] }
  0x66   : > { %v319_v57 = vld [vmem:[#allocation5 + $0x60] sm:$0xff]  ;;  %1247 = vmatpush.msra.mxu2 %v703_v56  ;;  %v5377_v56 = vld [vmem:[%s5286_s28 + $0xb0] sm:$0xff] }
  0x67   : > { %v895_v58 = vld [vmem:[#allocation5 + $0x1260] sm:$0xff]  ;;  %1117 = vmatpush.msra.mxu0 %v319_v57 }
  0x68   : > { %v511_v59 = vld [vmem:[#allocation5 + $0x660] sm:$0xff]  ;;  %1312 = vmatpush.msra.mxu3 %v895_v58  ;;  %v5383_v58 = vld [vmem:[%s5286_s28 + $0xb8] sm:$0xff] }
  0x69   : > { %v691_v60 = vld [vmem:[#allocation5 + $0xc00] sm:$0xff]  ;;  %1182 = vmatpush.msra.mxu1 %v511_v59  ;;  %v764_v59 = vld [vmem:[#allocation5 + $0xe48] sm:$0xff] }
  0x6a   : > { %v307_v61 = vld [vmem:[#allocation5] sm:$0xff]  ;;  %1248 = vmatpush.msra.mxu2 %v691_v60  ;;  %v5388_v60 = vld [vmem:[%s5286_s28 + $0xa8] sm:$0xff] }
  0x6b   : > { %v883_v63 = vld [vmem:[#allocation5 + $0x1200] sm:$0xff]  ;;  %1118 = vmatpush.msra.mxu0 %v307_v61  ;;  %1249 = vmatmul.f32.vlgmr.msra.gmra.mxu2 %v5297_v62  ;;  %v380_v61 = vld [vmem:[#allocation5 + $0x248] sm:$0xff] }
  0x6c   : > { %v5300_v1 = vld [vmem:[%s5286_s28] sm:$0xff]  ;;  %1313 = vmatpush.msra.mxu3 %v883_v63  ;;  %1493 = vmatpush.msrb.mxu2 %v872_v0  ;;  %v956_v63 = vld [vmem:[#allocation5 + $0x1448] sm:$0xff] }
  0x6d   : > { %v499_v5 = vld [vmem:[#allocation5 + $0x600] sm:$0xff]  ;;  %1119 = vmatmul.f32.vlgmr.msra.gmra.mxu0 %v5300_v1  ;;  %1314 = vmatmul.f32.vlgmr.msra.gmra.mxu3 %v5303_v2  ;;  %v572_v0 = vld [vmem:[#allocation5 + $0x848] sm:$0xff] }
  0x6e   : > { %1363 = vmatpush.msrb.mxu0 %v488_v3  ;;  %1558 = vmatpush.msrb.mxu3 %v1064_v4  ;;  %v5316_v16 = vld [vmem:[%s5286_s28 + $0x20] sm:$0xff]  ;;  %v5393_v3 = vld [vmem:[%s5286_s28 + $0xd0] sm:$0xff] }
  0x6f   : > { %1183 = vmatpush.msra.mxu1 %v499_v5  ;;  %1494 = vmatpush.msrb.mxu2 %v860_v7  ;;  %v5332_v32 = vld [vmem:[%s5286_s28 + $0x40] sm:$0xff]  ;;  %v5399_v5 = vld [vmem:[%s5286_s28 + $0xd8] sm:$0xff]  ;;  %v752_v7 = vld [vmem:[#allocation5 + $0xde8] sm:$0xff] }
  0x70   : > { %1184 = vmatmul.f32.vlgmr.msra.gmra.mxu1 %v5308_v6  ;;  %1364 = vmatpush.msrb.mxu0 %v476_v9  ;;  %v5348_v41 = vld [vmem:[%s5286_s28 + $0x60] sm:$0xff]  ;;  %v368_v9 = vld [vmem:[#allocation5 + $0x1e8] sm:$0xff] }
  0x71   : > { %1428 = vmatpush.msrb.mxu1 %v680_v8  ;;  %1559 = vmatpush.msrb.mxu3 %v1052_v10  ;;  %v5364_v49 = vld [vmem:[%s5286_s28 + $0x80] sm:$0xff]  ;;  %v5404_v8 = vld [vmem:[%s5286_s28 + $0xc8] sm:$0xff] }
  0x72   : > { %1495 = vmatpush.msrb.mxu2 %v848_v11  ;;  %1365 = vmatpush.msrb.mxu0 %v464_v13  ;;  %v5380_v57 = vld [vmem:[%s5286_s28 + $0xa0] sm:$0xff]  ;;  %v944_v10 = vld [vmem:[#allocation5 + $0x13e8] sm:$0xff] }
  0x73   : > { %1429 = vmatpush.msrb.mxu1 %v668_v12  ;;  %1252 = vmatmul.f32.gmra.mxu2 %v5313_v14  ;;  %v5396_v4 = vld [vmem:[%s5286_s28 + $0xc0] sm:$0xff]  ;;  %v560_v11 = vld [vmem:[#allocation5 + $0x7e8] sm:$0xff]  ;;  %v5409_v12 = vld [vmem:[%s5286_s28 + $0xf0] sm:$0xff] }
  0x74   : > { %1560 = vmatpush.msrb.mxu3 %v1040_v15  ;;  %1496 = vmatpush.msrb.mxu2 %v836_v19  ;;  %v5412_v13 = vld [vmem:[%s5286_s28 + $0xe0] sm:$0xff]  ;;  %v5415_v15 = vld [vmem:[%s5286_s28 + $0xf8] sm:$0xff]  ;;  %v5420_v19 = vld [vmem:[%s5286_s28 + $0xe8] sm:$0xff] }
  0x75   : > { %1122 = vmatmul.f32.gmra.mxu0 %v5316_v16  ;;  %1430 = vmatpush.msrb.mxu1 %v656_v17  ;;  %v740_v17 = vld [vmem:[#allocation5 + $0xd88] sm:$0xff] }
  0x76   : > { %1317 = vmatmul.f32.gmra.mxu3 %v5319_v18  ;;  %1366 = vmatpush.msrb.mxu0 %v452_v20  ;;  %v356_v20 = vld [vmem:[#allocation5 + $0x188] sm:$0xff] }
  0x77   : > { %1561 = vmatpush.msrb.mxu3 %v1028_v21  ;;  %1497 = vmatpush.msrb.mxu2 %v824_v23  ;;  %v932_v21 = vld [vmem:[#allocation5 + $0x1388] sm:$0xff] }
  0x78   : > { %1187 = vmatmul.f32.gmra.mxu1 %v5324_v22  ;;  %1367 = vmatpush.msrb.mxu0 %v440_v25  ;;  %v548_v23 = vld [vmem:[#allocation5 + $0x788] sm:$0xff]  ;;  %v5428_v25 = vld [vmem:[%s5286_s28 + $0x100] sm:$0xff] }
  0x79   : > { %1431 = vmatpush.msrb.mxu1 %v644_v24  ;;  %1562 = vmatpush.msrb.mxu3 %v1016_v26  ;;  %v5425_v24 = vld [vmem:[%s5286_s28 + $0x110] sm:$0xff]  ;;  %v5431_v26 = vld [vmem:[%s5286_s28 + $0x118] sm:$0xff] }
  0x7a   : > { %1498 = vmatpush.msrb.mxu2 %v812_v27  ;;  %1368 = vmatpush.msrb.mxu0 %v428_v29  ;;  %v728_v27 = vld [vmem:[#allocation5 + $0xd28] sm:$0xff] }
  0x7b   : > { %1432 = vmatpush.msrb.mxu1 %v632_v28  ;;  %1255 = vmatmul.f32.gmra.mxu2 %v5329_v30  ;;  %v5436_v28 = vld [vmem:[%s5286_s28 + $0x108] sm:$0xff] }
  0x7c   : > { %1563 = vmatpush.msrb.mxu3 %v1004_v31  ;;  %1499 = vmatpush.msrb.mxu2 %v800_v35  ;;  %v344_v29 = vld [vmem:[#allocation5 + $0x128] sm:$0xff]  ;;  %v5441_v35 = vld [vmem:[%s5286_s28 + $0x130] sm:$0xff] }
  0x7d   : > { %1125 = vmatmul.f32.gmra.mxu0 %v5332_v32  ;;  %1433 = vmatpush.msrb.mxu1 %v620_v33  ;;  %v920_v31 = vld [vmem:[#allocation5 + $0x1328] sm:$0xff] }
  0x7e   : > { %1320 = vmatmul.f32.gmra.mxu3 %v5335_v34  ;;  %1369 = vmatpush.msrb.mxu0 %v416_v37  ;;  %v536_v33 = vld [vmem:[#allocation5 + $0x728] sm:$0xff]  ;;  %v5444_v37 = vld [vmem:[%s5286_s28 + $0x120] sm:$0xff] }
  0x7f   : > { %1564 = vmatpush.msrb.mxu3 %v992_v38  ;;  %1434 = vmatpush.msrb.mxu1 %v608_v39  ;;  %v5447_v38 = vld [vmem:[%s5286_s28 + $0x138] sm:$0xff]  ;;  %v716_v39 = vld [vmem:[#allocation5 + $0xcc8] sm:$0xff] }
  0x80   : > { %1190 = vmatmul.f32.gmra.mxu1 %v5340_v36  ;;  %1500 = vmatpush.msrb.mxu2 %v788_v43  ;;  %v5452_v43 = vld [vmem:[%s5286_s28 + $0x128] sm:$0xff] }
  0x81   : > { %1370 = vmatpush.msrb.mxu0 %v404_v45  ;;  %1565 = vmatpush.msrb.mxu3 %v980_v46  ;;  %v332_v45 = vld [vmem:[#allocation5 + $0xc8] sm:$0xff] }
  0x82   : > { %1435 = vmatpush.msrb.mxu1 %v596_v47  ;;  %1501 = vmatpush.msrb.mxu2 %v776_v51  ;;  %v908_v46 = vld [vmem:[#allocation5 + $0x12c8] sm:$0xff]  ;;  %v5457_v51 = vld [vmem:[%s5286_s28 + $0x150] sm:$0xff] }
  0x83   : > { %1258 = vmatmul.f32.gmra.mxu2 %v5345_v40  ;;  %1371 = vmatpush.msrb.mxu0 %v392_v53  ;;  %v524_v47 = vld [vmem:[#allocation5 + $0x6c8] sm:$0xff]  ;;  %v5460_v53 = vld [vmem:[%s5286_s28 + $0x140] sm:$0xff] }
  0x84   : > { %1566 = vmatpush.msrb.mxu3 %v968_v54  ;;  %1436 = vmatpush.msrb.mxu1 %v584_v55  ;;  %v5463_v54 = vld [vmem:[%s5286_s28 + $0x158] sm:$0xff]  ;;  %v704_v55 = vld [vmem:[#allocation5 + $0xc68] sm:$0xff] }
  0x85   : > { %1128 = vmatmul.f32.gmra.mxu0 %v5348_v41  ;;  %1502 = vmatpush.msrb.mxu2 %v764_v59  ;;  %v5468_v59 = vld [vmem:[%s5286_s28 + $0x148] sm:$0xff] }
  0x86   : > { %1323 = vmatmul.f32.gmra.mxu3 %v5351_v42  ;;  %1372 = vmatpush.msrb.mxu0 %v380_v61  ;;  %v320_v61 = vld [vmem:[#allocation5 + $0x68] sm:$0xff] }
  0x87   : > { %1567 = vmatpush.msrb.mxu3 %v956_v63  ;;  %1437 = vmatpush.msrb.mxu1 %v572_v0  ;;  %v896_v63 = vld [vmem:[#allocation5 + $0x1268] sm:$0xff] }
  0x88   : > { %1193 = vmatmul.f32.gmra.mxu1 %v5356_v44  ;;  %1503 = vmatpush.msrb.mxu2 %v752_v7  ;;  %v512_v0 = vld [vmem:[#allocation5 + $0x668] sm:$0xff]  ;;  %v5473_v7 = vld [vmem:[%s5286_s28 + $0x170] sm:$0xff] }
  0x89   : > { %1373 = vmatpush.msrb.mxu0 %v368_v9  ;;  %1568 = vmatpush.msrb.mxu3 %v944_v10  ;;  %v5476_v9 = vld [vmem:[%s5286_s28 + $0x160] sm:$0xff]  ;;  %v5479_v10 = vld [vmem:[%s5286_s28 + $0x178] sm:$0xff] }
  0x8a   : > { %1438 = vmatpush.msrb.mxu1 %v560_v11  ;;  %1504 = vmatpush.msrb.mxu2 %v740_v17  ;;  %v692_v11 = vld [vmem:[#allocation5 + $0xc08] sm:$0xff] }
  0x8b   : > { %1261 = vmatmul.f32.gmra.mxu2 %v5361_v48  ;;  %1374 = vmatpush.msrb.mxu0 %v356_v20  ;;  %v5484_v17 = vld [vmem:[%s5286_s28 + $0x168] sm:$0xff] }
  0x8c   : > { %1569 = vmatpush.msrb.mxu3 %v932_v21  ;;  %1439 = vmatpush.msrb.mxu1 %v548_v23  ;;  %v308_v20 = vld [vmem:[#allocation5 + $0x8] sm:$0xff] }
  0x8d   : > { %1131 = vmatmul.f32.gmra.mxu0 %v5364_v49  ;;  %1505 = vmatpush.msrb.mxu2 %v728_v27  ;;  %v884_v21 = vld [vmem:[#allocation5 + $0x1208] sm:$0xff]  ;;  %v5489_v27 = vld [vmem:[%s5286_s28 + $0x190] sm:$0xff] }
  0x8e   : > { %1326 = vmatmul.f32.gmra.mxu3 %v5367_v50  ;;  %1375 = vmatpush.msrb.mxu0 %v344_v29  ;;  %v500_v23 = vld [vmem:[#allocation5 + $0x608] sm:$0xff]  ;;  %v5492_v29 = vld [vmem:[%s5286_s28 + $0x180] sm:$0xff] }
  0x8f   : > { %1570 = vmatpush.msrb.mxu3 %v920_v31  ;;  %1440 = vmatpush.msrb.mxu1 %v536_v33  ;;  %v5495_v31 = vld [vmem:[%s5286_s28 + $0x198] sm:$0xff]  ;;  %v873_v33 = vld [vmem:[#allocation5 + $0x11b0] sm:$0xff] }
  0x90   : > { %1196 = vmatmul.f32.gmra.mxu1 %v5372_v52  ;;  %1506 = vmatpush.msrb.mxu2 %v716_v39  ;;  %v5500_v39 = vld [vmem:[%s5286_s28 + $0x188] sm:$0xff] }
  0x91   : > { %1376 = vmatpush.msrb.mxu0 %v332_v45  ;;  %1571 = vmatpush.msrb.mxu3 %v908_v46  ;;  %v489_v45 = vld [vmem:[#allocation5 + $0x5b0] sm:$0xff] }
  0x92   : > { %1441 = vmatpush.msrb.mxu1 %v524_v47  ;;  %1507 = vmatpush.msrb.mxu2 %v704_v55  ;;  %v1065_v46 = vld [vmem:[#allocation5 + $0x17b0] sm:$0xff] }
  0x93   : > { %1264 = vmatmul.f32.gmra.mxu2 %v5377_v56  ;;  %1377 = vmatpush.msrb.mxu0 %v320_v61  ;;  %v681_v47 = vld [vmem:[#allocation5 + $0xbb0] sm:$0xff]  ;;  %v5508_v61 = vld [vmem:[%s5286_s28 + $0x1a0] sm:$0xff] }
  0x94   : > { %1572 = vmatpush.msrb.mxu3 %v896_v63  ;;  %1442 = vmatpush.msrb.mxu1 %v512_v0  ;;  %v5505_v55 = vld [vmem:[%s5286_s28 + $0x1b0] sm:$0xff]  ;;  %7786 = vst [vmem:[#allocation13_spill] sm:$0xff] %v5508_v61  ;;  %v5511_v63 = vld [vmem:[%s5286_s28 + $0x1b8] sm:$0xff] }
  0x95   : > { %1134 = vmatmul.f32.gmra.mxu0 %v5380_v57  ;;  %1508 = vmatpush.msrb.mxu2 %v692_v11  ;;  %7785 = vst [vmem:[#allocation12_spill] sm:$0xff] %v5505_v55  ;;  %v861_v0 = vld [vmem:[#allocation5 + $0x1150] sm:$0xff]  ;;  %v5516_v11 = vld [vmem:[%s5286_s28 + $0x1a8] sm:$0xff] }
  0x96   : > { %1329 = vmatmul.f32.gmra.mxu3 %v5383_v58  ;;  %1378 = vmatpush.msrb.mxu0 %v308_v20  ;;  %7787 = vst [vmem:[#allocation14_spill] sm:$0xff] %v5511_v63  ;;  %v477_v20 = vld [vmem:[#allocation5 + $0x550] sm:$0xff] }
  0x97   : > { %1573 = vmatpush.msrb.mxu3 %v884_v21  ;;  %1443 = vmatpush.msrb.mxu1 %v500_v23  ;;  %7788 = vst [vmem:[#allocation15_spill] sm:$0xff] %v5516_v11  ;;  %v1053_v21 = vld [vmem:[#allocation5 + $0x1750] sm:$0xff] }
  0x98   : > { %1199 = vmatmul.f32.gmra.mxu1 %v5388_v60  ;;  %1753 = vmatpush.msra.mxu2 %v873_v33  ;;  %v669_v23 = vld [vmem:[#allocation5 + $0xb50] sm:$0xff] }
  0x99   : > { %1623 = vmatpush.msra.mxu0 %v489_v45  ;;  %1818 = vmatpush.msra.mxu3 %v1065_v46  ;;  %v5521_v33 = vld [vmem:[%s5286_s28 + $0x1d0] sm:$0xff]  ;;  %v5524_v45 = vld [vmem:[%s5286_s28 + $0x1c0] sm:$0xff]  ;;  %v5527_v46 = vld [vmem:[%s5286_s28 + $0x1d8] sm:$0xff] }
  0x9a   : > { %1688 = vmatpush.msra.mxu1 %v681_v47  ;;  %1754 = vmatpush.msra.mxu2 %v861_v0  ;;  %7789 = vst [vmem:[#allocation16_spill] sm:$0xff] %v5521_v33  ;;  %v849_v47 = vld [vmem:[#allocation5 + $0x10f0] sm:$0xff]  ;;  %v5532_v0 = vld [vmem:[%s5286_s28 + $0x1c8] sm:$0xff] }
  0x9b   : > { %1267 = vmatmul.f32.gmra.mxu2 %v5393_v3  ;;  %1624 = vmatpush.msra.mxu0 %v477_v20  ;;  %7790 = vst [vmem:[#allocation17_spill] sm:$0xff] %v5524_v45  ;;  %v465_v20 = vld [vmem:[#allocation5 + $0x4f0] sm:$0xff] }
  0x9c   : > { %1819 = vmatpush.msra.mxu3 %v1053_v21  ;;  %1689 = vmatpush.msra.mxu1 %v669_v23  ;;  %7791 = vst [vmem:[#allocation18_spill] sm:$0xff] %v5527_v46  ;;  %v1041_v21 = vld [vmem:[#allocation5 + $0x16f0] sm:$0xff] }
  0x9d   : > { %1137 = vmatmul.f32.gmra.mxu0 %v5396_v4  ;;  %7792 = vst [vmem:[#allocation19_spill] sm:$0xff] %v5532_v0  ;;  %1755 = vmatpush.msra.mxu2 %v849_v47  ;;  %v657_v23 = vld [vmem:[#allocation5 + $0xaf0] sm:$0xff]  ;;  %v5546_v47 = vld [vmem:[#allocation7] sm:$0xff] }
  0x9e   : > { %1332 = vmatmul.f32.gmra.mxu3 %v5399_v5  ;;  %1625 = vmatpush.msra.mxu0 %v465_v20  ;;  %7796 = vst [vmem:[#allocation23_spill] sm:$0xff] %v5546_v47  ;;  %v453_v20 = vld [vmem:[#allocation5 + $0x490] sm:$0xff] }
  0x9f   : > { %1820 = vmatpush.msra.mxu3 %v1041_v21  ;;  %1690 = vmatpush.msra.mxu1 %v657_v23  ;;  %v1029_v21 = vld [vmem:[#allocation5 + $0x1690] sm:$0xff]  ;;  %v5554_v23 = vperm.slane %v5546_v47, 0 }
  0xa0   : > { %1202 = vmatmul.f32.gmra.mxu1 %v5404_v8  ;;  %1626 = vmatpush.msra.mxu0 %v453_v20  ;;  %v441_v20 = vld [vmem:[#allocation5 + $0x430] sm:$0xff] }
  0xa1   : > { %1821 = vmatpush.msra.mxu3 %v1029_v21  ;;  %v1017_v21 = vld [vmem:[#allocation5 + $0x1630] sm:$0xff] }
  0xa2   : > { %1627 = vmatpush.msra.mxu0 %v441_v20 }
  0xa3   : > { %1270 = vmatmul.f32.gmra.mxu2 %v5409_v12  ;;  %1822 = vmatpush.msra.mxu3 %v1017_v21  ;;  %v801_v21 = vld [vmem:[#allocation5 + $0xf70] sm:$0xff] }
  0xa5   : > { %1140 = vmatmul.f32.gmra.mxu0 %v5412_v13 }
  0xa6   : > { %1335 = vmatmul.f32.gmra.mxu3 %v5415_v15 }
  0xa8   : > { %1205 = vmatmul.f32.gmra.mxu1 %v5420_v19 }
  0xab   : > { %1273 = vmatmul.f32.gmra.mxu2 %v5425_v24 }
  0xad   : > { %1143 = vmatmul.f32.gmra.mxu0 %v5428_v25 }
  0xae   : > { %1338 = vmatmul.f32.gmra.mxu3 %v5431_v26 }
  0xb0   : > { %1208 = vmatmul.f32.gmra.mxu1 %v5436_v28 }
  0xb3   : > { %1276 = vmatmul.f32.gmra.mxu2 %v5441_v35 }
  0xb5   : > { %1146 = vmatmul.f32.gmra.mxu0 %v5444_v37 }
  0xb6   : > { %1341 = vmatmul.f32.gmra.mxu3 %v5447_v38 }
  0xb8   : > { %1211 = vmatmul.f32.gmra.mxu1 %v5452_v43 }
  0xbb   : > { %1279 = vmatmul.f32.gmra.mxu2 %v5457_v51 }
  0xbd   : > { %1149 = vmatmul.f32.gmra.mxu0 %v5460_v53 }
  0xbe   : > { %1344 = vmatmul.f32.gmra.mxu3 %v5463_v54 }
  0xc0   : > { %1214 = vmatmul.f32.gmra.mxu1 %v5468_v59 }
  0xc3   : > { %1282 = vmatmul.f32.gmra.mxu2 %v5473_v7 }
  0xc5   : > { %1152 = vmatmul.f32.gmra.mxu0 %v5476_v9 }
  0xc6   : > { %1347 = vmatmul.f32.gmra.mxu3 %v5479_v10 }
  0xc8   : > { %1217 = vmatmul.f32.gmra.mxu1 %v5484_v17 }
  0xcb   : > { %1285 = vmatmul.f32.gmra.mxu2 %v5489_v27 }
  0xcd   : > { %1155 = vmatmul.f32.gmra.mxu0 %v5492_v29 }
  0xce   : > { %1350 = vmatmul.f32.gmra.mxu3 %v5495_v31 }
  0xd0   : > { %1220 = vmatmul.f32.gmra.mxu1 %v5500_v39 }
  0xd3   : > { %1288 = vmatmul.f32.gmra.mxu2 %v5505_v55 }
  0xd5   : > { %1158 = vmatmul.f32.gmra.mxu0 %v5508_v61 }
  0xd6   : > { %1353 = vmatmul.f32.gmra.mxu3 %v5511_v63  ;;  %v5543_v63 = vld [vmem:[%s5286_s28 + $0x1f8] sm:$0xff] }
  0xd7   : > { %7795 = vst [vmem:[#allocation22_spill] sm:$0xff] %v5543_v63 }
  0xd8   : > { %1223 = vmatmul.f32.gmra.mxu1 %v5516_v11  ;;  %v5537_v11 = vld [vmem:[%s5286_s28 + $0x1f0] sm:$0xff] }
  0xd9   : > { %7793 = vst [vmem:[#allocation20_spill] sm:$0xff] %v5537_v11 }
  0xdb   : > { %1291 = vmatmul.f32.gmra.mxu2 %v5521_v33  ;;  %v5540_v33 = vld [vmem:[%s5286_s28 + $0x1e0] sm:$0xff] }
  0xdc   : > { %7794 = vst [vmem:[#allocation21_spill] sm:$0xff] %v5540_v33 }
  0xdd   : > { %1161 = vmatmul.f32.gmra.mxu0 %v5524_v45  ;;  %v837_v45 = vld [vmem:[#allocation5 + $0x1090] sm:$0xff] }
  0xde   : > { %1356 = vmatmul.f32.gmra.mxu3 %v5527_v46  ;;  %v5550_v46 = vld [vmem:[%s5286_s28 + $0x1e8] sm:$0xff]  ;;  %1756 = vmatpush.msra.mxu2 %v837_v45  ;;  %v825_v45 = vld [vmem:[#allocation5 + $0x1030] sm:$0xff] }
  0xdf   : > { %7797 = vst [vmem:[#allocation24_spill] sm:$0xff] %v5550_v46 }
  0xe0   : > { %1226 = vmatmul.f32.gmra.mxu1 %v5532_v0  ;;  %1757 = vmatpush.msra.mxu2 %v825_v45 }
  0xe3   : > { %1294 = vmatmul.f32.gmra.mxu2 %v5537_v11  ;;  %v645_v11 = vld [vmem:[#allocation5 + $0xa90] sm:$0xff] }
  0xe4   : > { %1691 = vmatpush.msra.mxu1 %v645_v11 }
  0xe5   : > { %1164 = vmatmul.f32.gmra.mxu0 %v5540_v33 }
  0xe6   : > { %1359 = vmatmul.f32.gmra.mxu3 %v5543_v63 }
  0xe8   : > { %1229 = vmatmul.f32.gmra.mxu1 %v5550_v46 }
  0xea   : > { %v1120_v0 = vpop.f32.mrf.mxu0 }
  0xeb   : > { %v1121_v33 = vadd.f32 %v1120_v0, %v5554_v23  ;;  %1509 = vmatmul.f32.vlgmr.msrb.gmra.mxu2 %v5297_v62  ;;  %v633_v0 = vld [vmem:[#allocation5 + $0xa30] sm:$0xff] }
  0xec   : > { %1692 = vmatpush.msra.mxu1 %v633_v0  ;;  %v993_v0 = vld [vmem:[#allocation5 + $0x1570] sm:$0xff] }
  0xed   : > { %v1185_v61 = vpop.f32.mrf.mxu1  ;;  %1379 = vmatmul.f32.vlgmr.msrb.gmra.mxu0 %v5300_v1 }
  0xee   : > { %v1186_v63 = vadd.f32 %v1185_v61, %v1121_v33  ;;  %1574 = vmatmul.f32.vlgmr.msrb.gmra.mxu3 %v5303_v2  ;;  %v1250_v47 = vpop.f32.mrf.mxu2  ;;  %v813_v2 = vld [vmem:[#allocation5 + $0xfd0] sm:$0xff] }
  0xef   : > { %1758 = vmatpush.msra.mxu2 %v813_v2  ;;  %v1005_v33 = vld [vmem:[#allocation5 + $0x15d0] sm:$0xff] }
  0xf0   : > { %v1251_v11 = vadd.f32 %v1250_v47, %v1186_v63  ;;  %1444 = vmatmul.f32.vlgmr.msrb.gmra.mxu1 %v5308_v6  ;;  %v1315_v46 = vpop.f32.mrf.mxu3  ;;  %v429_v63 = vld [vmem:[#allocation5 + $0x3d0] sm:$0xff]  ;;  %1823 = vmatpush.msra.mxu3 %v1005_v33 }
  0xf1   : > { %1628 = vmatpush.msra.mxu0 %v429_v63  ;;  %v621_v47 = vld [vmem:[#allocation5 + $0x9d0] sm:$0xff]  ;;  %1759 = vmatpush.msra.mxu2 %v801_v21 }
  0xf2   : > { %v1316_v62 = vadd.f32 %v1315_v46, %v1251_v11  ;;  %v1123_v55 = vpop.f32.mrf.mxu0  ;;  %1693 = vmatpush.msra.mxu1 %v621_v47  ;;  %1824 = vmatpush.msra.mxu3 %v993_v0  ;;  %v609_v2 = vld [vmem:[#allocation5 + $0x970] sm:$0xff] }
  0xf3   : > { %v1124_v1 = vadd.f32 %v1123_v55, %v5554_v23  ;;  %1512 = vmatmul.f32.gmra.mxu2 %v5313_v14  ;;  %v789_v63 = vld [vmem:[#allocation5 + $0xf10] sm:$0xff] }
  0xf4   : > { %4223 = vst [vmem:[%s5564_s20] sm:$0xff] %v1316_v62  ;;  %1694 = vmatpush.msra.mxu1 %v609_v2  ;;  %1760 = vmatpush.msra.mxu2 %v789_v63  ;;  %v585_v0 = vld [vmem:[#allocation5 + $0x8b0] sm:$0xff] }
  0xf5   : > { %v1188_v61 = vpop.f32.mrf.mxu1  ;;  %1382 = vmatmul.f32.gmra.mxu0 %v5316_v16  ;;  %v765_v2 = vld [vmem:[#allocation5 + $0xe50] sm:$0xff] }
  0xf6   : > { %v1189_v6 = vadd.f32 %v1188_v61, %v1124_v1  ;;  %1577 = vmatmul.f32.gmra.mxu3 %v5319_v18  ;;  %v1253_v46 = vpop.f32.mrf.mxu2  ;;  %v573_v63 = vld [vmem:[#allocation5 + $0x850] sm:$0xff] }
  0xf8   : > { %v1254_v55 = vadd.f32 %v1253_v46, %v1189_v6  ;;  %1447 = vmatmul.f32.gmra.mxu1 %v5324_v22  ;;  %v417_v22 = vld [vmem:[#allocation5 + $0x370] sm:$0xff] }
  0xf9   : > { %v1318_v45 = vpop.f32.mrf.mxu3  ;;  %1629 = vmatpush.msra.mxu0 %v417_v22  ;;  %v981_v46 = vld [vmem:[#allocation5 + $0x1510] sm:$0xff] }
  0xfa   : > { %v1319_v14 = vadd.f32 %v1318_v45, %v1254_v55  ;;  %v1126_v20 = vpop.f32.mrf.mxu0  ;;  %1825 = vmatpush.msra.mxu3 %v981_v46  ;;  %v597_v45 = vld [vmem:[#allocation5 + $0x910] sm:$0xff] }
  0xfb   : > { %v1127_v16 = vadd.f32 %v1126_v20, %v5554_v23  ;;  %1515 = vmatmul.f32.gmra.mxu2 %v5329_v30  ;;  %1695 = vmatpush.msra.mxu1 %v597_v45 }
  0xfc   : > { %4235 = vst [vmem:[%s5564_s20 + $0x60] sm:$0xff] %v1319_v14 }
  0xfd   : > { %v1191_v18 = vpop.f32.mrf.mxu1  ;;  %1385 = vmatmul.f32.gmra.mxu0 %v5332_v32  ;;  %1696 = vmatpush.msra.mxu1 %v585_v0  ;;  %v729_v0 = vld [vmem:[#allocation5 + $0xd30] sm:$0xff] }
  0xfe   : > { %v1192_v11 = vadd.f32 %v1191_v18, %v1127_v16  ;;  %1580 = vmatmul.f32.gmra.mxu3 %v5335_v34  ;;  %v1256_v62 = vpop.f32.mrf.mxu2  ;;  %v777_v16 = vld [vmem:[#allocation5 + $0xeb0] sm:$0xff] }
  0xff   : > { %1761 = vmatpush.msra.mxu2 %v777_v16  ;;  %v969_v18 = vld [vmem:[#allocation5 + $0x14b0] sm:$0xff]  ;;  %1697 = vmatpush.msra.mxu1 %v573_v63 }
 0x100   : > { %v1257_v1 = vadd.f32 %v1256_v62, %v1192_v11  ;;  %1450 = vmatmul.f32.gmra.mxu1 %v5340_v36  ;;  %v405_v36 = vld [vmem:[#allocation5 + $0x310] sm:$0xff]  ;;  %1826 = vmatpush.msra.mxu3 %v969_v18 }
 0x101   : > { %v1321_v61 = vpop.f32.mrf.mxu3  ;;  %1630 = vmatpush.msra.mxu0 %v405_v36  ;;  %1762 = vmatpush.msra.mxu2 %v765_v2  ;;  %v753_v36 = vld [vmem:[#allocation5 + $0xdf0] sm:$0xff] }
 0x102   : > { %v1322_v30 = vadd.f32 %v1321_v61, %v1257_v1  ;;  %v1129_v6 = vpop.f32.mrf.mxu0  ;;  %v549_v18 = vld [vmem:[#allocation5 + $0x790] sm:$0xff] }
 0x103   : > { %v1130_v32 = vadd.f32 %v1129_v6, %v5554_v23  ;;  %1518 = vmatmul.f32.gmra.mxu2 %v5345_v40  ;;  %v537_v2 = vld [vmem:[#allocation5 + $0x730] sm:$0xff] }
 0x104   : > { %4247 = vst [vmem:[%s5564_s20 + $0xc0] sm:$0xff] %v1322_v30  ;;  %v957_v30 = vld [vmem:[#allocation5 + $0x1450] sm:$0xff]  ;;  %1763 = vmatpush.msra.mxu2 %v753_v36 }
 0x105   : > { %v1194_v34 = vpop.f32.mrf.mxu1  ;;  %1388 = vmatmul.f32.gmra.mxu0 %v5348_v41  ;;  %1827 = vmatpush.msra.mxu3 %v957_v30 }
 0x106   : > { %v1195_v33 = vadd.f32 %v1194_v34, %v1130_v32  ;;  %1583 = vmatmul.f32.gmra.mxu3 %v5351_v42  ;;  %v1259_v55 = vpop.f32.mrf.mxu2 }
 0x108   : > { %v1260_v47 = vadd.f32 %v1259_v55, %v1195_v33  ;;  %1453 = vmatmul.f32.gmra.mxu1 %v5356_v44  ;;  %v393_v44 = vld [vmem:[#allocation5 + $0x2b0] sm:$0xff] }
 0x109   : > { %v1324_v14 = vpop.f32.mrf.mxu3  ;;  %1631 = vmatpush.msra.mxu0 %v393_v44  ;;  %v945_v55 = vld [vmem:[#allocation5 + $0x13f0] sm:$0xff] }
 0x10a   : > { %v1325_v40 = vadd.f32 %v1324_v14, %v1260_v47  ;;  %v1132_v20 = vpop.f32.mrf.mxu0  ;;  %1828 = vmatpush.msra.mxu3 %v945_v55  ;;  %v561_v14 = vld [vmem:[#allocation5 + $0x7f0] sm:$0xff] }
 0x10b   : > { %v1133_v41 = vadd.f32 %v1132_v20, %v5554_v23  ;;  %1521 = vmatmul.f32.gmra.mxu2 %v5361_v48  ;;  %1698 = vmatpush.msra.mxu1 %v561_v14  ;;  %v513_v55 = vld [vmem:[#allocation5 + $0x670] sm:$0xff] }
 0x10c   : > { %4259 = vst [vmem:[%s5564_s20 + $0x120] sm:$0xff] %v1325_v40  ;;  %v693_v14 = vld [vmem:[#allocation5 + $0xc10] sm:$0xff] }
 0x10d   : > { %v1197_v42 = vpop.f32.mrf.mxu1  ;;  %1391 = vmatmul.f32.gmra.mxu0 %v5364_v49  ;;  %1699 = vmatpush.msra.mxu1 %v549_v18 }
 0x10e   : > { %v1198_v21 = vadd.f32 %v1197_v42, %v1133_v41  ;;  %1586 = vmatmul.f32.gmra.mxu3 %v5367_v50  ;;  %v1262_v11 = vpop.f32.mrf.mxu2  ;;  %v741_v41 = vld [vmem:[#allocation5 + $0xd90] sm:$0xff] }
 0x10f   : > { %1764 = vmatpush.msra.mxu2 %v741_v41  ;;  %v933_v42 = vld [vmem:[#allocation5 + $0x1390] sm:$0xff]  ;;  %1700 = vmatpush.msra.mxu1 %v537_v2  ;;  %v7801_v2 = vld [vmem:[#allocation15_spill] sm:$0xff] }
 0x110   : > { %v1263_v22 = vadd.f32 %v1262_v11, %v1198_v21  ;;  %1456 = vmatmul.f32.gmra.mxu1 %v5372_v52  ;;  %v381_v52 = vld [vmem:[#allocation5 + $0x250] sm:$0xff]  ;;  %1829 = vmatpush.msra.mxu3 %v933_v42 }
 0x111   : > { %v1327_v62 = vpop.f32.mrf.mxu3  ;;  %1632 = vmatpush.msra.mxu0 %v381_v52  ;;  %1765 = vmatpush.msra.mxu2 %v729_v0  ;;  %v717_v52 = vld [vmem:[#allocation5 + $0xcd0] sm:$0xff]  ;;  %v862_v0 = vld [vmem:[#allocation5 + $0x1158] sm:$0xff] }
 0x112   : > { %v1328_v48 = vadd.f32 %v1327_v62, %v1263_v22  ;;  %v1135_v1 = vpop.f32.mrf.mxu0  ;;  %v501_v41 = vld [vmem:[#allocation5 + $0x610] sm:$0xff] }
 0x113   : > { %v1136_v49 = vadd.f32 %v1135_v1, %v5554_v23  ;;  %1524 = vmatmul.f32.gmra.mxu2 %v5377_v56 }
 0x114   : > { %4271 = vst [vmem:[%s5564_s20 + $0x180] sm:$0xff] %v1328_v48  ;;  %v921_v48 = vld [vmem:[#allocation5 + $0x1330] sm:$0xff]  ;;  %1766 = vmatpush.msra.mxu2 %v717_v52 }
 0x115   : > { %v1200_v50 = vpop.f32.mrf.mxu1  ;;  %1394 = vmatmul.f32.gmra.mxu0 %v5380_v57  ;;  %1830 = vmatpush.msra.mxu3 %v921_v48  ;;  %v1054_v48 = vld [vmem:[#allocation5 + $0x1758] sm:$0xff] }
 0x116   : > { %v1201_v61 = vadd.f32 %v1200_v50, %v1136_v49  ;;  %1589 = vmatmul.f32.gmra.mxu3 %v5383_v58  ;;  %v1265_v6 = vpop.f32.mrf.mxu2 }
 0x118   : > { %v1266_v32 = vadd.f32 %v1265_v6, %v1201_v61  ;;  %1459 = vmatmul.f32.gmra.mxu1 %v5388_v60  ;;  %v369_v60 = vld [vmem:[#allocation5 + $0x1f0] sm:$0xff] }
 0x119   : > { %v1330_v34 = vpop.f32.mrf.mxu3  ;;  %1633 = vmatpush.msra.mxu0 %v369_v60  ;;  %v909_v6 = vld [vmem:[#allocation5 + $0x12d0] sm:$0xff] }
 0x11a   : > { %v1331_v56 = vadd.f32 %v1330_v34, %v1266_v32  ;;  %v1138_v33 = vpop.f32.mrf.mxu0  ;;  %1831 = vmatpush.msra.mxu3 %v909_v6  ;;  %v525_v34 = vld [vmem:[#allocation5 + $0x6d0] sm:$0xff] }
 0x11b   : > { %v1139_v57 = vadd.f32 %v1138_v33, %v5554_v23  ;;  %1527 = vmatmul.f32.gmra.mxu2 %v5393_v3  ;;  %1701 = vmatpush.msra.mxu1 %v525_v34  ;;  %v7803_v6 = vld [vmem:[#allocation17_spill] sm:$0xff] }
 0x11c   : > { %4283 = vst [vmem:[%s5564_s20 + $0x1e0] sm:$0xff] %v1331_v56  ;;  %v466_v34 = vld [vmem:[#allocation5 + $0x4f8] sm:$0xff] }
 0x11d   : > { %v1203_v58 = vpop.f32.mrf.mxu1  ;;  %1397 = vmatmul.f32.gmra.mxu0 %v5396_v4  ;;  %1702 = vmatpush.msra.mxu1 %v513_v55 }
 0x11e   : > { %v1204_v46 = vadd.f32 %v1203_v58, %v1139_v57  ;;  %1592 = vmatmul.f32.gmra.mxu3 %v5399_v5  ;;  %v1268_v47 = vpop.f32.mrf.mxu2  ;;  %v705_v57 = vld [vmem:[#allocation5 + $0xc70] sm:$0xff] }
 0x11f   : > { %1767 = vmatpush.msra.mxu2 %v705_v57  ;;  %v897_v58 = vld [vmem:[#allocation5 + $0x1270] sm:$0xff]  ;;  %1703 = vmatpush.msra.mxu1 %v501_v41  ;;  %v658_v57 = vld [vmem:[#allocation5 + $0xaf8] sm:$0xff] }
 0x120   : > { %v1269_v45 = vadd.f32 %v1268_v47, %v1204_v46  ;;  %1462 = vmatmul.f32.gmra.mxu1 %v5404_v8  ;;  %v357_v8 = vld [vmem:[#allocation5 + $0x190] sm:$0xff]  ;;  %1832 = vmatpush.msra.mxu3 %v897_v58 }
 0x121   : > { %v1333_v40 = vpop.f32.mrf.mxu3  ;;  %1634 = vmatpush.msra.mxu0 %v357_v8  ;;  %1768 = vmatpush.msra.mxu2 %v693_v14  ;;  %v874_v8 = vld [vmem:[#allocation5 + $0x11b8] sm:$0xff] }
 0x122   : > { %v1334_v3 = vadd.f32 %v1333_v40, %v1269_v45  ;;  %v1141_v20 = vpop.f32.mrf.mxu0  ;;  %v1030_v14 = vld [vmem:[#allocation5 + $0x1698] sm:$0xff] }
 0x123   : > { %v1142_v4 = vadd.f32 %v1141_v20, %v5554_v23  ;;  %1530 = vmatmul.f32.gmra.mxu2 %v5409_v12 }
 0x124   : > { %4295 = vst [vmem:[%s5564_s20 + $0x240] sm:$0xff] %v1334_v3  ;;  %v885_v3 = vld [vmem:[#allocation5 + $0x1210] sm:$0xff]  ;;  %2013 = vmatpush.msrb.mxu2 %v874_v8 }
 0x125   : > { %v1206_v5 = vpop.f32.mrf.mxu1  ;;  %1400 = vmatmul.f32.gmra.mxu0 %v5412_v13  ;;  %1833 = vmatpush.msra.mxu3 %v885_v3  ;;  %v7810_v3 = vld [vmem:[#allocation24_spill] sm:$0xff] }
 0x126   : > { %v1207_v16 = vadd.f32 %v1206_v5, %v1142_v4  ;;  %1595 = vmatmul.f32.gmra.mxu3 %v5415_v15  ;;  %v1271_v21 = vpop.f32.mrf.mxu2  ;;  %2014 = vmatpush.msrb.mxu2 %v862_v0 }
 0x128   : > { %v1272_v44 = vadd.f32 %v1271_v21, %v1207_v16  ;;  %1465 = vmatmul.f32.gmra.mxu1 %v5420_v19  ;;  %v345_v19 = vld [vmem:[#allocation5 + $0x130] sm:$0xff]  ;;  %v1066_v21 = vld [vmem:[#allocation5 + $0x17b8] sm:$0xff] }
 0x129   : > { %v1336_v11 = vpop.f32.mrf.mxu3  ;;  %1635 = vmatpush.msra.mxu0 %v345_v19  ;;  %2078 = vmatpush.msrb.mxu3 %v1066_v21  ;;  %v7800_v19 = vld [vmem:[#allocation14_spill] sm:$0xff] }
 0x12a   : > { %v1337_v12 = vadd.f32 %v1336_v11, %v1272_v44  ;;  %v1144_v22 = vpop.f32.mrf.mxu0  ;;  %v682_v11 = vld [vmem:[#allocation5 + $0xbb8] sm:$0xff] }
 0x12b   : > { %v1145_v13 = vadd.f32 %v1144_v22, %v5554_v23  ;;  %1533 = vmatmul.f32.gmra.mxu2 %v5425_v24  ;;  %1948 = vmatpush.msrb.mxu1 %v682_v11  ;;  %v442_v21 = vld [vmem:[#allocation5 + $0x438] sm:$0xff] }
 0x12c   : > { %4307 = vst [vmem:[%s5564_s20 + $0x2a0] sm:$0xff] %v1337_v12  ;;  %2079 = vmatpush.msrb.mxu3 %v1054_v48  ;;  %v5687_v48 = vld [vmem:[%s5286_s28 + $0x38] sm:$0xff] }
 0x12d   : > { %v1209_v15 = vpop.f32.mrf.mxu1  ;;  %1403 = vmatmul.f32.gmra.mxu0 %v5428_v25 }
 0x12e   : > { %v1210_v62 = vadd.f32 %v1209_v15, %v1145_v13  ;;  %1598 = vmatmul.f32.gmra.mxu3 %v5431_v26  ;;  %v1274_v1 = vpop.f32.mrf.mxu2  ;;  %v7798_v13 = vld [vmem:[#allocation12_spill] sm:$0xff]  ;;  %v7799_v15 = vld [vmem:[#allocation13_spill] sm:$0xff] }
 0x130   : > { %v1275_v49 = vadd.f32 %v1274_v1, %v1210_v62  ;;  %1468 = vmatmul.f32.gmra.mxu1 %v5436_v28  ;;  %v333_v28 = vld [vmem:[#allocation5 + $0xd0] sm:$0xff] }
 0x131   : > { %v1339_v50 = vpop.f32.mrf.mxu3  ;;  %1636 = vmatpush.msra.mxu0 %v333_v28 }
 0x132   : > { %v1340_v24 = vadd.f32 %v1339_v50, %v1275_v49  ;;  %v1147_v61 = vpop.f32.mrf.mxu0  ;;  %v670_v50 = vld [vmem:[#allocation5 + $0xb58] sm:$0xff] }
 0x133   : > { %v1148_v25 = vadd.f32 %v1147_v61, %v5554_v23  ;;  %1536 = vmatmul.f32.gmra.mxu2 %v5441_v35  ;;  %1949 = vmatpush.msrb.mxu1 %v670_v50 }
 0x134   : > { %4319 = vst [vmem:[%s5564_s20 + $0x300] sm:$0xff] %v1340_v24 }
 0x135   : > { %v1212_v26 = vpop.f32.mrf.mxu1  ;;  %1406 = vmatmul.f32.gmra.mxu0 %v5444_v37  ;;  %1950 = vmatpush.msrb.mxu1 %v658_v57 }
 0x136   : > { %v1213_v30 = vadd.f32 %v1212_v26, %v1148_v25  ;;  %1601 = vmatmul.f32.gmra.mxu3 %v5447_v38  ;;  %v1277_v32 = vpop.f32.mrf.mxu2  ;;  %v7802_v26 = vld [vmem:[#allocation16_spill] sm:$0xff] }
 0x138   : > { %v1278_v63 = vadd.f32 %v1277_v32, %v1213_v30  ;;  %1471 = vmatmul.f32.gmra.mxu1 %v5452_v43  ;;  %v321_v43 = vld [vmem:[#allocation5 + $0x70] sm:$0xff]  ;;  %v850_v30 = vld [vmem:[#allocation5 + $0x10f8] sm:$0xff] }
 0x139   : > { %v1342_v56 = vpop.f32.mrf.mxu3  ;;  %1637 = vmatpush.msra.mxu0 %v321_v43  ;;  %2015 = vmatpush.msrb.mxu2 %v850_v30 }
 0x13a   : > { %v1343_v35 = vadd.f32 %v1342_v56, %v1278_v63  ;;  %v1150_v33 = vpop.f32.mrf.mxu0  ;;  %v7804_v63 = vld [vmem:[#allocation18_spill] sm:$0xff] }
 0x13b   : > { %v1151_v37 = vadd.f32 %v1150_v33, %v5554_v23  ;;  %1539 = vmatmul.f32.gmra.mxu2 %v5457_v51  ;;  %v1042_v56 = vld [vmem:[#allocation5 + $0x16f8] sm:$0xff] }
 0x13c   : > { %4331 = vst [vmem:[%s5564_s20 + $0x360] sm:$0xff] %v1343_v35  ;;  %2080 = vmatpush.msrb.mxu3 %v1042_v56  ;;  %v5705_v56 = vld [vmem:[%s5286_s28 + $0x58] sm:$0xff] }
 0x13d   : > { %v1215_v38 = vpop.f32.mrf.mxu1  ;;  %1409 = vmatmul.f32.gmra.mxu0 %v5460_v53 }
 0x13e   : > { %v1216_v36 = vadd.f32 %v1215_v38, %v1151_v37  ;;  %1604 = vmatmul.f32.gmra.mxu3 %v5463_v54  ;;  %v1280_v46 = vpop.f32.mrf.mxu2  ;;  %v7805_v37 = vld [vmem:[#allocation19_spill] sm:$0xff] }
 0x13f   : > { %2081 = vmatpush.msrb.mxu3 %v1030_v14  ;;  %v5723_v14 = vld [vmem:[%s5286_s28 + $0x78] sm:$0xff] }
 0x140   : > { %v1281_v60 = vadd.f32 %v1280_v46, %v1216_v36  ;;  %1474 = vmatmul.f32.gmra.mxu1 %v5468_v59  ;;  %v309_v59 = vld [vmem:[#allocation5 + $0x10] sm:$0xff] }
 0x141   : > { %v1345_v47 = vpop.f32.mrf.mxu3  ;;  %1638 = vmatpush.msra.mxu0 %v309_v59  ;;  %v7806_v46 = vld [vmem:[#allocation20_spill] sm:$0xff] }
 0x142   : > { %v1346_v51 = vadd.f32 %v1345_v47, %v1281_v60  ;;  %v1153_v45 = vpop.f32.mrf.mxu0  ;;  %v838_v60 = vld [vmem:[#allocation5 + $0x1098] sm:$0xff] }
 0x143   : > { %v1154_v53 = vadd.f32 %v1153_v45, %v5554_v23  ;;  %1542 = vmatmul.f32.gmra.mxu2 %v5473_v7  ;;  %v7807_v47 = vld [vmem:[#allocation21_spill] sm:$0xff]  ;;  %v7808_v45 = vld [vmem:[#allocation22_spill] sm:$0xff] }
 0x144   : > { %4343 = vst [vmem:[%s5564_s20 + $0x3c0] sm:$0xff] %v1346_v51  ;;  %2016 = vmatpush.msrb.mxu2 %v838_v60 }
 0x145   : > { %v1218_v54 = vpop.f32.mrf.mxu1  ;;  %1412 = vmatmul.f32.gmra.mxu0 %v5476_v9 }
 0x146   : > { %v1219_v40 = vadd.f32 %v1218_v54, %v1154_v53  ;;  %1607 = vmatmul.f32.gmra.mxu3 %v5479_v10  ;;  %v1283_v20 = vpop.f32.mrf.mxu2  ;;  %v454_v53 = vld [vmem:[#allocation5 + $0x498] sm:$0xff] }
 0x148   : > { %v1284_v4 = vadd.f32 %v1283_v20, %v1219_v40  ;;  %1477 = vmatmul.f32.gmra.mxu1 %v5484_v17  ;;  %v490_v17 = vld [vmem:[#allocation5 + $0x5b8] sm:$0xff]  ;;  %v7809_v40 = vld [vmem:[#allocation23_spill] sm:$0xff] }
 0x149   : > { %v1348_v5 = vpop.f32.mrf.mxu3  ;;  %1883 = vmatpush.msrb.mxu0 %v490_v17  ;;  %v5655_v59 = vperm.slane %v7809_v40, 1  ;;  %v646_v20 = vld [vmem:[#allocation5 + $0xa98] sm:$0xff] }
 0x14a   : > { %v1349_v7 = vadd.f32 %v1348_v5, %v1284_v4  ;;  %v1156_v16 = vpop.f32.mrf.mxu0  ;;  %1951 = vmatpush.msrb.mxu1 %v646_v20  ;;  %v5669_v17 = vld [vmem:[%s5286_s28 + $0x18] sm:$0xff]  ;;  %v5727_v20 = vld [vmem:[%s5286_s28 + $0x68] sm:$0xff] }
 0x14b   : > { %v1157_v9 = vadd.f32 %v1156_v16, %v5554_v23  ;;  %1545 = vmatmul.f32.gmra.mxu2 %v5489_v27  ;;  %v5661_v16 = vld [vmem:[%s5286_s28 + $0x10] sm:$0xff]  ;;  %v982_v40 = vld [vmem:[#allocation5 + $0x1518] sm:$0xff] }
 0x14c   : > { %4355 = vst [vmem:[%s5564_s20 + $0x420] sm:$0xff] %v1349_v7 }
 0x14d   : > { %v1221_v10 = vpop.f32.mrf.mxu1  ;;  %1415 = vmatmul.f32.gmra.mxu0 %v5492_v29 }
 0x14e   : > { %v1222_v42 = vadd.f32 %v1221_v10, %v1157_v9  ;;  %1610 = vmatmul.f32.gmra.mxu3 %v5495_v31  ;;  %v1286_v44 = vpop.f32.mrf.mxu2  ;;  %v826_v9 = vld [vmem:[#allocation5 + $0x1038] sm:$0xff]  ;;  %v5665_v10 = vld [vmem:[%s5286_s28] sm:$0xff] }
 0x14f   : > { %2017 = vmatpush.msrb.mxu2 %v826_v9 }
 0x150   : > { %v1287_v18 = vadd.f32 %v1286_v44, %v1222_v42  ;;  %1480 = vmatmul.f32.gmra.mxu1 %v5500_v39  ;;  %v478_v39 = vld [vmem:[#allocation5 + $0x558] sm:$0xff] }
 0x151   : > { %v1351_v12 = vpop.f32.mrf.mxu3  ;;  %1884 = vmatpush.msrb.mxu0 %v478_v39  ;;  %v1018_v44 = vld [vmem:[#allocation5 + $0x1638] sm:$0xff] }
 0x152   : > { %v1352_v27 = vadd.f32 %v1351_v12, %v1287_v18  ;;  %v1159_v22 = vpop.f32.mrf.mxu0  ;;  %2082 = vmatpush.msrb.mxu3 %v1018_v44  ;;  %v5673_v12 = vld [vmem:[%s5286_s28 + $0x8] sm:$0xff]  ;;  %v5737_v44 = vld [vmem:[%s5286_s28 + $0x80] sm:$0xff] }
 0x153   : > { %v1160_v29 = vadd.f32 %v1159_v22, %v5554_v23  ;;  %1548 = vmatmul.f32.gmra.mxu2 %v7798_v13  ;;  %1885 = vmatpush.msrb.mxu0 %v466_v34 }
 0x154   : > { %4367 = vst [vmem:[%s5564_s20 + $0x480] sm:$0xff] %v1352_v27  ;;  %v634_v27 = vld [vmem:[#allocation5 + $0xa38] sm:$0xff] }
 0x155   : > { %v1224_v31 = vpop.f32.mrf.mxu1  ;;  %1418 = vmatmul.f32.gmra.mxu0 %v7799_v15  ;;  %1952 = vmatpush.msrb.mxu1 %v634_v27  ;;  %v814_v15 = vld [vmem:[#allocation5 + $0xfd8] sm:$0xff] }
 0x156   : > { %v1225_v62 = vadd.f32 %v1224_v31, %v1160_v29  ;;  %1613 = vmatmul.f32.gmra.mxu3 %v7800_v19  ;;  %v1289_v1 = vpop.f32.mrf.mxu2  ;;  %1886 = vmatpush.msrb.mxu0 %v454_v53  ;;  %v5679_v31 = vld [vmem:[%s5286_s28 + $0x30] sm:$0xff]  ;;  %v5683_v19 = vld [vmem:[%s5286_s28 + $0x20] sm:$0xff]  ;;  %v394_v27 = vld [vmem:[#allocation5 + $0x2b8] sm:$0xff] }
 0x157   : > { %2018 = vmatpush.msrb.mxu2 %v814_v15  ;;  %v586_v15 = vld [vmem:[#allocation5 + $0x8b8] sm:$0xff] }
 0x158   : > { %v1290_v49 = vadd.f32 %v1289_v1, %v1225_v62  ;;  %1483 = vmatmul.f32.gmra.mxu1 %v7801_v2  ;;  %1887 = vmatpush.msrb.mxu0 %v442_v21  ;;  %v430_v1 = vld [vmem:[#allocation5 + $0x3d8] sm:$0xff] }
 0x159   : > { %v1354_v24 = vpop.f32.mrf.mxu3 }
 0x15a   : > { %v1355_v61 = vadd.f32 %v1354_v24, %v1290_v49  ;;  %v1162_v25 = vpop.f32.mrf.mxu0  ;;  %v1006_v49 = vld [vmem:[#allocation5 + $0x15d8] sm:$0xff]  ;;  %1888 = vmatpush.msrb.mxu0 %v430_v1  ;;  %v5691_v24 = vld [vmem:[%s5286_s28 + $0x28] sm:$0xff] }
 0x15b   : > { %v1163_v52 = vadd.f32 %v1162_v25, %v5554_v23  ;;  %1551 = vmatmul.f32.gmra.mxu2 %v7802_v26  ;;  %2083 = vmatpush.msrb.mxu3 %v1006_v49 }
 0x15c   : > { %4379 = vst [vmem:[%s5564_s20 + $0x4e0] sm:$0xff] %v1355_v61  ;;  %v622_v61 = vld [vmem:[#allocation5 + $0x9d8] sm:$0xff] }
 0x15d   : > { %v1227_v28 = vpop.f32.mrf.mxu1  ;;  %1421 = vmatmul.f32.gmra.mxu0 %v7803_v6  ;;  %1953 = vmatpush.msrb.mxu1 %v622_v61  ;;  %v802_v6 = vld [vmem:[#allocation5 + $0xf78] sm:$0xff] }
 0x15e   : > { %v1228_v32 = vadd.f32 %v1227_v28, %v1163_v52  ;;  %1616 = vmatmul.f32.gmra.mxu3 %v7804_v63  ;;  %v1292_v35 = vpop.f32.mrf.mxu2  ;;  %v5697_v28 = vld [vmem:[%s5286_s28 + $0x50] sm:$0xff]  ;;  %v5701_v63 = vld [vmem:[%s5286_s28 + $0x40] sm:$0xff]  ;;  %2019 = vmatpush.msrb.mxu2 %v802_v6  ;;  %v958_v6 = vld [vmem:[#allocation5 + $0x1458] sm:$0xff] }
 0x160   : > { %v1293_v33 = vadd.f32 %v1292_v35, %v1228_v32  ;;  %1486 = vmatmul.f32.gmra.mxu1 %v7805_v37  ;;  %v418_v35 = vld [vmem:[#allocation5 + $0x378] sm:$0xff] }
 0x161   : > { %v1357_v38 = vpop.f32.mrf.mxu3  ;;  %1889 = vmatpush.msrb.mxu0 %v418_v35  ;;  %v5763_v35 = vld [vmem:[%s5286_s28 + $0xa8] sm:$0xff] }
 0x162   : > { %v1358_v36 = vadd.f32 %v1357_v38, %v1293_v33  ;;  %v1165_v43 = vpop.f32.mrf.mxu0  ;;  %v994_v33 = vld [vmem:[#allocation5 + $0x1578] sm:$0xff]  ;;  %v5709_v38 = vld [vmem:[%s5286_s28 + $0x48] sm:$0xff] }
 0x163   : > { %v1166_v58 = vadd.f32 %v1165_v43, %v5554_v23  ;;  %1554 = vmatmul.f32.gmra.mxu2 %v7806_v46  ;;  %2084 = vmatpush.msrb.mxu3 %v994_v33  ;;  %v574_v33 = vld [vmem:[#allocation5 + $0x858] sm:$0xff] }
 0x164   : > { %4391 = vst [vmem:[%s5564_s20 + $0x540] sm:$0xff] %v1358_v36  ;;  %v610_v36 = vld [vmem:[#allocation5 + $0x978] sm:$0xff] }
 0x165   : > { %v1230_v55 = vpop.f32.mrf.mxu1  ;;  %1424 = vmatmul.f32.gmra.mxu0 %v7807_v47  ;;  %1954 = vmatpush.msrb.mxu1 %v610_v36  ;;  %v790_v47 = vld [vmem:[#allocation5 + $0xf18] sm:$0xff] }
 0x166   : > { %v1231_v51 = vadd.f32 %v1230_v55, %v1166_v58  ;;  %1619 = vmatmul.f32.gmra.mxu3 %v7808_v45  ;;  %v1295_v54 = vpop.f32.mrf.mxu2  ;;  %v5715_v55 = vld [vmem:[%s5286_s28 + $0x70] sm:$0xff]  ;;  %v5719_v45 = vld [vmem:[%s5286_s28 + $0x60] sm:$0xff]  ;;  %2020 = vmatpush.msrb.mxu2 %v790_v47 }
 0x167   : > { %2085 = vmatpush.msrb.mxu3 %v982_v40  ;;  %v5773_v47 = vld [vmem:[%s5286_s28 + $0xc0] sm:$0xff]  ;;  %v946_v40 = vld [vmem:[#allocation5 + $0x13f8] sm:$0xff] }
 0x168   : > { %v1296_v23 = vadd.f32 %v1295_v54, %v1231_v51  ;;  %1489 = vmatmul.f32.gmra.mxu1 %v7810_v3  ;;  %v406_v54 = vld [vmem:[#allocation5 + $0x318] sm:$0xff] }
 0x169   : > { %v1360_v4 = vpop.f32.mrf.mxu3  ;;  %1890 = vmatpush.msrb.mxu0 %v406_v54  ;;  %v370_v54 = vld [vmem:[#allocation5 + $0x1f8] sm:$0xff] }
 0x16a   : > { %v1361_v41 = vadd.f32 %v1360_v4, %v1296_v23  ;;  %v1380_v5 = vpop.f32.mrf.mxu0  ;;  %v598_v4 = vld [vmem:[#allocation5 + $0x918] sm:$0xff] }
 0x16b   : > { %v1381_v7 = vadd.f32 %v1380_v5, %v5655_v59  ;;  %1769 = vmatmul.f32.vlgmr.msra.gmra.mxu2 %v5661_v16  ;;  %1955 = vmatpush.msrb.mxu1 %v598_v4  ;;  %v5781_v4 = vld [vmem:[%s5286_s28 + $0xc8] sm:$0xff] }
 0x16c   : > { %4403 = vst [vmem:[%s5564_s20 + $0x5a0] sm:$0xff] %v1361_v41  ;;  %1891 = vmatpush.msrb.mxu0 %v394_v27 }
 0x16d   : > { %v1445_v8 = vpop.f32.mrf.mxu1  ;;  %1639 = vmatmul.f32.vlgmr.msra.gmra.mxu0 %v5665_v10  ;;  %1956 = vmatpush.msrb.mxu1 %v586_v15  ;;  %v358_v15 = vld [vmem:[#allocation5 + $0x198] sm:$0xff] }
 0x16e   : > { %v1446_v42 = vadd.f32 %v1445_v8, %v1381_v7  ;;  %1834 = vmatmul.f32.vlgmr.msra.gmra.mxu3 %v5669_v17  ;;  %v1510_v18 = vpop.f32.mrf.mxu2  ;;  %v5733_v8 = vld [vmem:[%s5286_s28 + $0x90] sm:$0xff] }
 0x16f   : > { %1957 = vmatpush.msrb.mxu1 %v574_v33 }
 0x170   : > { %v1511_v11 = vadd.f32 %v1510_v18, %v1446_v42  ;;  %1704 = vmatmul.f32.vlgmr.msra.gmra.mxu1 %v5673_v12  ;;  %v778_v42 = vld [vmem:[#allocation5 + $0xeb8] sm:$0xff] }
 0x171   : > { %v1575_v22 = vpop.f32.mrf.mxu3  ;;  %2021 = vmatpush.msrb.mxu2 %v778_v42 }
 0x172   : > { %v1576_v29 = vadd.f32 %v1575_v22, %v1511_v11  ;;  %v1383_v13 = vpop.f32.mrf.mxu0  ;;  %v5741_v11 = vld [vmem:[%s5286_s28 + $0x98] sm:$0xff] }
 0x173   : > { %v1384_v0 = vadd.f32 %v1383_v13, %v5655_v59  ;;  %1772 = vmatmul.f32.gmra.mxu2 %v5679_v31  ;;  %v970_v22 = vld [vmem:[#allocation5 + $0x14b8] sm:$0xff] }
 0x174   : > { %4224 = vst [vmem:[%s5564_s20 + $0x8] sm:$0xff] %v1576_v29  ;;  %2086 = vmatpush.msrb.mxu3 %v970_v22  ;;  %v5791_v22 = vld [vmem:[%s5286_s28 + $0xe0] sm:$0xff] }
 0x175   : > { %v1448_v62 = vpop.f32.mrf.mxu1  ;;  %1642 = vmatmul.f32.gmra.mxu0 %v5683_v19 }
 0x176   : > { %v1449_v39 = vadd.f32 %v1448_v62, %v1384_v0  ;;  %1837 = vmatmul.f32.gmra.mxu3 %v5687_v48  ;;  %v1513_v2 = vpop.f32.mrf.mxu2  ;;  %v5745_v0 = vld [vmem:[%s5286_s28 + $0x88] sm:$0xff] }
 0x177   : > { %2087 = vmatpush.msrb.mxu3 %v958_v6 }
 0x178   : > { %v1514_v50 = vadd.f32 %v1513_v2, %v1449_v39  ;;  %1707 = vmatmul.f32.gmra.mxu1 %v5691_v24  ;;  %v5751_v2 = vld [vmem:[%s5286_s28 + $0xb0] sm:$0xff] }
 0x179   : > { %v1578_v25 = vpop.f32.mrf.mxu3  ;;  %2088 = vmatpush.msrb.mxu3 %v946_v40  ;;  %v538_v40 = vld [vmem:[#allocation5 + $0x738] sm:$0xff] }
 0x17a   : > { %v1579_v52 = vadd.f32 %v1578_v25, %v1514_v50  ;;  %v1386_v26 = vpop.f32.mrf.mxu0  ;;  %v766_v50 = vld [vmem:[#allocation5 + $0xe58] sm:$0xff]  ;;  %v5755_v25 = vld [vmem:[%s5286_s28 + $0xa0] sm:$0xff] }
 0x17b   : > { %v1387_v30 = vadd.f32 %v1386_v26, %v5655_v59  ;;  %1775 = vmatmul.f32.gmra.mxu2 %v5697_v28  ;;  %v5759_v26 = vld [vmem:[%s5286_s28 + $0xb8] sm:$0xff] }
 0x17c   : > { %4236 = vst [vmem:[%s5564_s20 + $0x68] sm:$0xff] %v1579_v52  ;;  %2022 = vmatpush.msrb.mxu2 %v766_v50  ;;  %v550_v50 = vld [vmem:[#allocation5 + $0x798] sm:$0xff] }
 0x17d   : > { %v1451_v32 = vpop.f32.mrf.mxu1  ;;  %1645 = vmatmul.f32.gmra.mxu0 %v5701_v63 }
 0x17e   : > { %v1452_v34 = vadd.f32 %v1451_v32, %v1387_v30  ;;  %1840 = vmatmul.f32.gmra.mxu3 %v5705_v56  ;;  %v1516_v37 = vpop.f32.mrf.mxu2  ;;  %v382_v30 = vld [vmem:[#allocation5 + $0x258] sm:$0xff] }
 0x17f   : > { %1892 = vmatpush.msrb.mxu0 %v382_v30 }
 0x180   : > { %v1517_v57 = vadd.f32 %v1516_v37, %v1452_v34  ;;  %1710 = vmatmul.f32.gmra.mxu1 %v5709_v38 }
 0x181   : > { %v1581_v43 = vpop.f32.mrf.mxu3  ;;  %1893 = vmatpush.msrb.mxu0 %v370_v54  ;;  %v5817_v54 = vld [vmem:[%s5286_s28 + $0x108] sm:$0xff] }
 0x182   : > { %v1582_v58 = vadd.f32 %v1581_v43, %v1517_v57  ;;  %v1389_v46 = vpop.f32.mrf.mxu0 }
 0x183   : > { %v1390_v60 = vadd.f32 %v1389_v46, %v5655_v59  ;;  %1778 = vmatmul.f32.gmra.mxu2 %v5715_v55  ;;  %v754_v46 = vld [vmem:[#allocation5 + $0xdf8] sm:$0xff]  ;;  %1894 = vmatpush.msrb.mxu0 %v358_v15 }
 0x184   : > { %4248 = vst [vmem:[%s5564_s20 + $0xc8] sm:$0xff] %v1582_v58  ;;  %v5769_v58 = vld [vmem:[%s5286_s28 + $0xd0] sm:$0xff]  ;;  %2023 = vmatpush.msrb.mxu2 %v754_v46  ;;  %v922_v46 = vld [vmem:[#allocation5 + $0x1338] sm:$0xff] }
 0x185   : > { %v1454_v51 = vpop.f32.mrf.mxu1  ;;  %1648 = vmatmul.f32.gmra.mxu0 %v5719_v45  ;;  %v334_v15 = vld [vmem:[#allocation5 + $0xd8] sm:$0xff] }
 0x186   : > { %v1455_v53 = vadd.f32 %v1454_v51, %v1390_v60  ;;  %1843 = vmatmul.f32.gmra.mxu3 %v5723_v14  ;;  %v1519_v23 = vpop.f32.mrf.mxu2 }
 0x188   : > { %v1520_v3 = vadd.f32 %v1519_v23, %v1455_v53  ;;  %1713 = vmatmul.f32.gmra.mxu1 %v5727_v20  ;;  %v5777_v53 = vld [vmem:[%s5286_s28 + $0xd8] sm:$0xff] }
 0x189   : > { %v1584_v41 = vpop.f32.mrf.mxu3 }
 0x18a   : > { %v1585_v5 = vadd.f32 %v1584_v41, %v1520_v3  ;;  %v1392_v7 = vpop.f32.mrf.mxu0  ;;  %v562_v41 = vld [vmem:[#allocation5 + $0x7f8] sm:$0xff] }
 0x18b   : > { %v1393_v9 = vadd.f32 %v1392_v7, %v5655_v59  ;;  %1781 = vmatmul.f32.gmra.mxu2 %v5733_v8  ;;  %1958 = vmatpush.msrb.mxu1 %v562_v41 }
 0x18c   : > { %4260 = vst [vmem:[%s5564_s20 + $0x128] sm:$0xff] %v1585_v5 }
 0x18d   : > { %v1457_v21 = vpop.f32.mrf.mxu1  ;;  %1651 = vmatmul.f32.gmra.mxu0 %v5737_v44  ;;  %1959 = vmatpush.msrb.mxu1 %v550_v50  ;;  %v5835_v50 = vld [vmem:[%s5286_s28 + $0x128] sm:$0xff] }
 0x18e   : > { %v1458_v18 = vadd.f32 %v1457_v21, %v1393_v9  ;;  %1846 = vmatmul.f32.gmra.mxu3 %v5741_v11  ;;  %v1522_v29 = vpop.f32.mrf.mxu2  ;;  %v5787_v21 = vld [vmem:[%s5286_s28 + $0xf0] sm:$0xff] }
 0x18f   : > { %1960 = vmatpush.msrb.mxu1 %v538_v40  ;;  %v322_v40 = vld [vmem:[#allocation5 + $0x78] sm:$0xff] }
 0x190   : > { %v1523_v13 = vadd.f32 %v1522_v29, %v1458_v18  ;;  %1716 = vmatmul.f32.gmra.mxu1 %v5745_v0  ;;  %v742_v18 = vld [vmem:[#allocation5 + $0xd98] sm:$0xff] }
 0x191   : > { %v1587_v62 = vpop.f32.mrf.mxu3  ;;  %2024 = vmatpush.msrb.mxu2 %v742_v18  ;;  %v5827_v18 = vld [vmem:[%s5286_s28 + $0x120] sm:$0xff] }
 0x192   : > { %v1588_v39 = vadd.f32 %v1587_v62, %v1523_v13  ;;  %v1395_v1 = vpop.f32.mrf.mxu0  ;;  %v5795_v13 = vld [vmem:[%s5286_s28 + $0xf8] sm:$0xff] }
 0x193   : > { %v1396_v49 = vadd.f32 %v1395_v1, %v5655_v59  ;;  %1784 = vmatmul.f32.gmra.mxu2 %v5751_v2  ;;  %v934_v62 = vld [vmem:[#allocation5 + $0x1398] sm:$0xff] }
 0x194   : > { %4272 = vst [vmem:[%s5564_s20 + $0x188] sm:$0xff] %v1588_v39  ;;  %2089 = vmatpush.msrb.mxu3 %v934_v62  ;;  %v910_v62 = vld [vmem:[#allocation5 + $0x12d8] sm:$0xff] }
 0x195   : > { %v1460_v61 = vpop.f32.mrf.mxu1  ;;  %1654 = vmatmul.f32.gmra.mxu0 %v5755_v25 }
 0x196   : > { %v1461_v52 = vadd.f32 %v1460_v61, %v1396_v49  ;;  %1849 = vmatmul.f32.gmra.mxu3 %v5759_v26  ;;  %v1525_v32 = vpop.f32.mrf.mxu2  ;;  %v5799_v49 = vld [vmem:[%s5286_s28 + $0xe8] sm:$0xff] }
 0x197   : > { %2090 = vmatpush.msrb.mxu3 %v922_v46  ;;  %v5845_v46 = vld [vmem:[%s5286_s28 + $0x140] sm:$0xff] }
 0x198   : > { %v1526_v34 = vadd.f32 %v1525_v32, %v1461_v52  ;;  %1719 = vmatmul.f32.gmra.mxu1 %v5763_v35  ;;  %v5805_v32 = vld [vmem:[%s5286_s28 + $0x110] sm:$0xff] }
 0x199   : > { %v1590_v37 = vpop.f32.mrf.mxu3  ;;  %2091 = vmatpush.msrb.mxu3 %v910_v62 }
 0x19a   : > { %v1591_v57 = vadd.f32 %v1590_v37, %v1526_v34  ;;  %v1398_v36 = vpop.f32.mrf.mxu0  ;;  %v730_v34 = vld [vmem:[#allocation5 + $0xd38] sm:$0xff]  ;;  %v5809_v37 = vld [vmem:[%s5286_s28 + $0x100] sm:$0xff] }
 0x19b   : > { %v1399_v43 = vadd.f32 %v1398_v36, %v5655_v59  ;;  %1787 = vmatmul.f32.gmra.mxu2 %v5769_v58  ;;  %v5813_v36 = vld [vmem:[%s5286_s28 + $0x118] sm:$0xff] }
 0x19c   : > { %4284 = vst [vmem:[%s5564_s20 + $0x1e8] sm:$0xff] %v1591_v57  ;;  %2025 = vmatpush.msrb.mxu2 %v730_v34 }
 0x19d   : > { %v1463_v60 = vpop.f32.mrf.mxu1  ;;  %1657 = vmatmul.f32.gmra.mxu0 %v5773_v47 }
 0x19e   : > { %v1464_v51 = vadd.f32 %v1463_v60, %v1399_v43  ;;  %1852 = vmatmul.f32.gmra.mxu3 %v5777_v53  ;;  %v1528_v23 = vpop.f32.mrf.mxu2  ;;  %v346_v43 = vld [vmem:[#allocation5 + $0x138] sm:$0xff] }
 0x19f   : > { %1895 = vmatpush.msrb.mxu0 %v346_v43 }
 0x1a0   : > { %v1529_v3 = vadd.f32 %v1528_v23, %v1464_v51  ;;  %1722 = vmatmul.f32.gmra.mxu1 %v5781_v4 }
 0x1a1   : > { %v1593_v5 = vpop.f32.mrf.mxu3  ;;  %1896 = vmatpush.msrb.mxu0 %v334_v15 }
 0x1a2   : > { %v1594_v7 = vadd.f32 %v1593_v5, %v1529_v3  ;;  %v1401_v9 = vpop.f32.mrf.mxu0 }
 0x1a3   : > { %v1402_v42 = vadd.f32 %v1401_v9, %v5655_v59  ;;  %1790 = vmatmul.f32.gmra.mxu2 %v5787_v21  ;;  %v718_v9 = vld [vmem:[#allocation5 + $0xcd8] sm:$0xff]  ;;  %1897 = vmatpush.msrb.mxu0 %v322_v40  ;;  %v5871_v40 = vld [vmem:[%s5286_s28 + $0x168] sm:$0xff] }
 0x1a4   : > { %4296 = vst [vmem:[%s5564_s20 + $0x248] sm:$0xff] %v1594_v7  ;;  %v5823_v7 = vld [vmem:[%s5286_s28 + $0x130] sm:$0xff]  ;;  %2026 = vmatpush.msrb.mxu2 %v718_v9  ;;  %v514_v9 = vld [vmem:[#allocation5 + $0x678] sm:$0xff] }
 0x1a5   : > { %v1466_v27 = vpop.f32.mrf.mxu1  ;;  %1660 = vmatmul.f32.gmra.mxu0 %v5791_v22 }
 0x1a6   : > { %v1467_v29 = vadd.f32 %v1466_v27, %v1402_v42  ;;  %1855 = vmatmul.f32.gmra.mxu3 %v5795_v13  ;;  %v1531_v39 = vpop.f32.mrf.mxu2 }
 0x1a8   : > { %v1532_v1 = vadd.f32 %v1531_v39, %v1467_v29  ;;  %1725 = vmatmul.f32.gmra.mxu1 %v5799_v49  ;;  %v5831_v29 = vld [vmem:[%s5286_s28 + $0x138] sm:$0xff] }
 0x1a9   : > { %v1596_v61 = vpop.f32.mrf.mxu3 }
 0x1aa   : > { %v1597_v52 = vadd.f32 %v1596_v61, %v1532_v1  ;;  %v1404_v30 = vpop.f32.mrf.mxu0  ;;  %v526_v61 = vld [vmem:[#allocation5 + $0x6d8] sm:$0xff] }
 0x1ab   : > { %v1405_v6 = vadd.f32 %v1404_v30, %v5655_v59  ;;  %1793 = vmatmul.f32.gmra.mxu2 %v5805_v32  ;;  %1961 = vmatpush.msrb.mxu1 %v526_v61 }
 0x1ac   : > { %4308 = vst [vmem:[%s5564_s20 + $0x2a8] sm:$0xff] %v1597_v52 }
 0x1ad   : > { %v1469_v33 = vpop.f32.mrf.mxu1  ;;  %1663 = vmatmul.f32.gmra.mxu0 %v5809_v37  ;;  %1962 = vmatpush.msrb.mxu1 %v514_v9 }
 0x1ae   : > { %v1470_v57 = vadd.f32 %v1469_v33, %v1405_v6  ;;  %1858 = vmatmul.f32.gmra.mxu3 %v5813_v36  ;;  %v1534_v60 = vpop.f32.mrf.mxu2  ;;  %v5841_v33 = vld [vmem:[%s5286_s28 + $0x150] sm:$0xff] }
 0x1b0   : > { %v1535_v51 = vadd.f32 %v1534_v60, %v1470_v57  ;;  %1728 = vmatmul.f32.gmra.mxu1 %v5817_v54  ;;  %v706_v57 = vld [vmem:[#allocation5 + $0xc78] sm:$0xff] }
 0x1b1   : > { %v1599_v23 = vpop.f32.mrf.mxu3  ;;  %2027 = vmatpush.msrb.mxu2 %v706_v57  ;;  %v886_v57 = vld [vmem:[#allocation5 + $0x1218] sm:$0xff] }
 0x1b2   : > { %v1600_v3 = vadd.f32 %v1599_v23, %v1535_v51  ;;  %v1407_v41 = vpop.f32.mrf.mxu0  ;;  %v5849_v51 = vld [vmem:[%s5286_s28 + $0x158] sm:$0xff] }
 0x1b3   : > { %v1408_v5 = vadd.f32 %v1407_v41, %v5655_v59  ;;  %1796 = vmatmul.f32.gmra.mxu2 %v5823_v7  ;;  %v898_v23 = vld [vmem:[#allocation5 + $0x1278] sm:$0xff] }
 0x1b4   : > { %4320 = vst [vmem:[%s5564_s20 + $0x308] sm:$0xff] %v1600_v3  ;;  %2092 = vmatpush.msrb.mxu3 %v898_v23  ;;  %v502_v23 = vld [vmem:[#allocation5 + $0x618] sm:$0xff] }
 0x1b5   : > { %v1472_v42 = vpop.f32.mrf.mxu1  ;;  %1666 = vmatmul.f32.gmra.mxu0 %v5827_v18  ;;  %1963 = vmatpush.msrb.mxu1 %v502_v23  ;;  %v5889_v23 = vld [vmem:[%s5286_s28 + $0x188] sm:$0xff] }
 0x1b6   : > { %v1473_v27 = vadd.f32 %v1472_v42, %v1408_v5  ;;  %1861 = vmatmul.f32.gmra.mxu3 %v5831_v29  ;;  %v1537_v39 = vpop.f32.mrf.mxu2  ;;  %v5853_v5 = vld [vmem:[%s5286_s28 + $0x148] sm:$0xff]  ;;  %7812 = vst [vmem:[#allocation13_spill] sm:$0xff] %v5889_v23 }
 0x1b7   : > { %2093 = vmatpush.msrb.mxu3 %v886_v57  ;;  %v1067_v57 = vld [vmem:[#allocation5 + $0x17c0] sm:$0xff] }
 0x1b8   : > { %v1538_v1 = vadd.f32 %v1537_v39, %v1473_v27  ;;  %1731 = vmatmul.f32.gmra.mxu1 %v5835_v50  ;;  %v5859_v39 = vld [vmem:[%s5286_s28 + $0x170] sm:$0xff] }
 0x1b9   : > { %v1602_v52 = vpop.f32.mrf.mxu3  ;;  %2338 = vmatpush.msra.mxu3 %v1067_v57  ;;  %v5899_v57 = vld [vmem:[%s5286_s28 + $0x1a0] sm:$0xff] }
 0x1ba   : > { %v1603_v30 = vadd.f32 %v1602_v52, %v1538_v1  ;;  %v1410_v6 = vpop.f32.mrf.mxu0  ;;  %v694_v1 = vld [vmem:[#allocation5 + $0xc18] sm:$0xff]  ;;  %v5863_v52 = vld [vmem:[%s5286_s28 + $0x160] sm:$0xff]  ;;  %7814 = vst [vmem:[#allocation15_spill] sm:$0xff] %v5899_v57 }
 0x1bb   : > { %v1411_v34 = vadd.f32 %v1410_v6, %v5655_v59  ;;  %1799 = vmatmul.f32.gmra.mxu2 %v5841_v33  ;;  %v5867_v6 = vld [vmem:[%s5286_s28 + $0x178] sm:$0xff] }
 0x1bc   : > { %4332 = vst [vmem:[%s5564_s20 + $0x368] sm:$0xff] %v1603_v30  ;;  %2028 = vmatpush.msrb.mxu2 %v694_v1  ;;  %v5881_v1 = vld [vmem:[%s5286_s28 + $0x180] sm:$0xff] }
 0x1bd   : > { %v1475_v43 = vpop.f32.mrf.mxu1  ;;  %1669 = vmatmul.f32.gmra.mxu0 %v5845_v46 }
 0x1be   : > { %v1476_v60 = vadd.f32 %v1475_v43, %v1411_v34  ;;  %1864 = vmatmul.f32.gmra.mxu3 %v5849_v51  ;;  %v1540_v3 = vpop.f32.mrf.mxu2  ;;  %v310_v34 = vld [vmem:[#allocation5 + $0x18] sm:$0xff] }
 0x1bf   : > { %1898 = vmatpush.msrb.mxu0 %v310_v34  ;;  %v491_v34 = vld [vmem:[#allocation5 + $0x5c0] sm:$0xff] }
 0x1c0   : > { %v1541_v41 = vadd.f32 %v1540_v3, %v1476_v60  ;;  %1734 = vmatmul.f32.gmra.mxu1 %v5853_v5 }
 0x1c1   : > { %v1605_v42 = vpop.f32.mrf.mxu3  ;;  %2143 = vmatpush.msra.mxu0 %v491_v34  ;;  %v863_v34 = vld [vmem:[#allocation5 + $0x1160] sm:$0xff] }
 0x1c2   : > { %v1606_v27 = vadd.f32 %v1605_v42, %v1541_v41  ;;  %v1413_v15 = vpop.f32.mrf.mxu0 }
 0x1c3   : > { %v1414_v62 = vadd.f32 %v1413_v15, %v5655_v59  ;;  %1802 = vmatmul.f32.gmra.mxu2 %v5859_v39  ;;  %v875_v15 = vld [vmem:[#allocation5 + $0x11c0] sm:$0xff] }
 0x1c4   : > { %4344 = vst [vmem:[%s5564_s20 + $0x3c8] sm:$0xff] %v1606_v27  ;;  %v5877_v27 = vld [vmem:[%s5286_s28 + $0x190] sm:$0xff]  ;;  %2273 = vmatpush.msra.mxu2 %v875_v15 }
 0x1c5   : > { %v1478_v61 = vpop.f32.mrf.mxu1  ;;  %1672 = vmatmul.f32.gmra.mxu0 %v5863_v52 }
 0x1c6   : > { %v1479_v30 = vadd.f32 %v1478_v61, %v1414_v62  ;;  %1867 = vmatmul.f32.gmra.mxu3 %v5867_v6  ;;  %v1543_v43 = vpop.f32.mrf.mxu2  ;;  %2274 = vmatpush.msra.mxu2 %v863_v34  ;;  %v671_v34 = vld [vmem:[#allocation5 + $0xb60] sm:$0xff] }
 0x1c8   : > { %v1544_v60 = vadd.f32 %v1543_v43, %v1479_v30  ;;  %1737 = vmatmul.f32.gmra.mxu1 %v5871_v40  ;;  %v5885_v30 = vld [vmem:[%s5286_s28 + $0x198] sm:$0xff] }
 0x1c9   : > { %v1608_v3 = vpop.f32.mrf.mxu3  ;;  %7811 = vst [vmem:[#allocation12_spill] sm:$0xff] %v5885_v30 }
 0x1ca   : > { %v1609_v41 = vadd.f32 %v1608_v3, %v1544_v60  ;;  %v1416_v9 = vpop.f32.mrf.mxu0  ;;  %v683_v3 = vld [vmem:[#allocation5 + $0xbc0] sm:$0xff] }
 0x1cb   : > { %v1417_v42 = vadd.f32 %v1416_v9, %v5655_v59  ;;  %1805 = vmatmul.f32.gmra.mxu2 %v5877_v27  ;;  %2208 = vmatpush.msra.mxu1 %v683_v3  ;;  %v1055_v3 = vld [vmem:[#allocation5 + $0x1760] sm:$0xff] }
 0x1cc   : > { %4356 = vst [vmem:[%s5564_s20 + $0x428] sm:$0xff] %v1609_v41  ;;  %2339 = vmatpush.msra.mxu3 %v1055_v3  ;;  %v5917_v3 = vld [vmem:[%s5286_s28 + $0x1c0] sm:$0xff] }
 0x1cd   : > { %v1481_v62 = vpop.f32.mrf.mxu1  ;;  %1675 = vmatmul.f32.gmra.mxu0 %v5881_v1  ;;  %2209 = vmatpush.msra.mxu1 %v671_v34  ;;  %7818 = vst [vmem:[#allocation19_spill] sm:$0xff] %v5917_v3 }
 0x1ce   : > { %v1482_v61 = vadd.f32 %v1481_v62, %v1417_v42  ;;  %1870 = vmatmul.f32.gmra.mxu3 %v5885_v30  ;;  %v1546_v43 = vpop.f32.mrf.mxu2  ;;  %v5895_v62 = vld [vmem:[%s5286_s28 + $0x1b0] sm:$0xff]  ;;  %v827_v30 = vld [vmem:[#allocation5 + $0x1040] sm:$0xff] }
 0x1cf   : > { %7813 = vst [vmem:[#allocation14_spill] sm:$0xff] %v5895_v62 }
 0x1d0   : > { %v1547_v60 = vadd.f32 %v1546_v43, %v1482_v61  ;;  %1740 = vmatmul.f32.gmra.mxu1 %v5889_v23  ;;  %v5903_v23 = vld [vmem:[%s5286_s28 + $0x1b8] sm:$0xff] }
 0x1d1   : > { %v1611_v41 = vpop.f32.mrf.mxu3  ;;  %7815 = vst [vmem:[#allocation16_spill] sm:$0xff] %v5903_v23 }
 0x1d2   : > { %v1612_v9 = vadd.f32 %v1611_v41, %v1547_v60  ;;  %v1419_v42 = vpop.f32.mrf.mxu0  ;;  %v479_v60 = vld [vmem:[#allocation5 + $0x560] sm:$0xff] }
 0x1d3   : > { %v1420_v15 = vadd.f32 %v1419_v42, %v5655_v59  ;;  %1808 = vmatmul.f32.gmra.mxu2 %v5895_v62  ;;  %2144 = vmatpush.msra.mxu0 %v479_v60  ;;  %v5907_v42 = vld [vmem:[%s5286_s28 + $0x1a8] sm:$0xff]  ;;  %v5913_v62 = vld [vmem:[%s5286_s28 + $0x1d0] sm:$0xff]  ;;  %v851_v60 = vld [vmem:[#allocation5 + $0x1100] sm:$0xff] }
 0x1d4   : > { %4368 = vst [vmem:[%s5564_s20 + $0x488] sm:$0xff] %v1612_v9  ;;  %2275 = vmatpush.msra.mxu2 %v851_v60  ;;  %v659_v60 = vld [vmem:[#allocation5 + $0xb00] sm:$0xff] }
 0x1d5   : > { %v1484_v61 = vpop.f32.mrf.mxu1  ;;  %1678 = vmatmul.f32.gmra.mxu0 %v5899_v57  ;;  %7816 = vst [vmem:[#allocation17_spill] sm:$0xff] %v5907_v42  ;;  %2210 = vmatpush.msra.mxu1 %v659_v60  ;;  %v5942_v60 = vld [vmem:[#allocation7] sm:$0xff] }
 0x1d6   : > { %v1485_v43 = vadd.f32 %v1484_v61, %v1420_v15  ;;  %1873 = vmatmul.f32.gmra.mxu3 %v5903_v23  ;;  %v1549_v41 = vpop.f32.mrf.mxu2  ;;  %7817 = vst [vmem:[#allocation18_spill] sm:$0xff] %v5913_v62 }
 0x1d7   : > { %7824 = vst [vmem:[#allocation25_spill] sm:$0xff] %v5942_v60 }
 0x1d8   : > { %v1550_v9 = vadd.f32 %v1549_v41, %v1485_v43  ;;  %1743 = vmatmul.f32.gmra.mxu1 %v5907_v42  ;;  %v5921_v42 = vld [vmem:[%s5286_s28 + $0x1d8] sm:$0xff] }
 0x1d9   : > { %v1614_v15 = vpop.f32.mrf.mxu3  ;;  %7819 = vst [vmem:[#allocation20_spill] sm:$0xff] %v5921_v42 }
 0x1da   : > { %v1615_v61 = vadd.f32 %v1614_v15, %v1550_v9  ;;  %v1422_v57 = vpop.f32.mrf.mxu0  ;;  %v1043_v9 = vld [vmem:[#allocation5 + $0x1700] sm:$0xff] }
 0x1db   : > { %v1423_v23 = vadd.f32 %v1422_v57, %v5655_v59  ;;  %1811 = vmatmul.f32.gmra.mxu2 %v5913_v62  ;;  %v467_v57 = vld [vmem:[#allocation5 + $0x500] sm:$0xff]  ;;  %2340 = vmatpush.msra.mxu3 %v1043_v9  ;;  %v5931_v62 = vld [vmem:[%s5286_s28 + $0x1f0] sm:$0xff] }
 0x1dc   : > { %4380 = vst [vmem:[%s5564_s20 + $0x4e8] sm:$0xff] %v1615_v61  ;;  %2145 = vmatpush.msra.mxu0 %v467_v57  ;;  %v5925_v61 = vld [vmem:[%s5286_s28 + $0x1c8] sm:$0xff]  ;;  %v839_v57 = vld [vmem:[#allocation5 + $0x10a0] sm:$0xff] }
 0x1dd   : > { %v1487_v43 = vpop.f32.mrf.mxu1  ;;  %1681 = vmatmul.f32.gmra.mxu0 %v5917_v3  ;;  %7820 = vst [vmem:[#allocation21_spill] sm:$0xff] %v5925_v61  ;;  %v5935_v9 = vld [vmem:[%s5286_s28 + $0x1e0] sm:$0xff]  ;;  %2276 = vmatpush.msra.mxu2 %v839_v57 }
 0x1de   : > { %v1488_v41 = vadd.f32 %v1487_v43, %v1423_v23  ;;  %1876 = vmatmul.f32.gmra.mxu3 %v5921_v42  ;;  %v1552_v34 = vpop.f32.mrf.mxu2  ;;  %7821 = vst [vmem:[#allocation22_spill] sm:$0xff] %v5931_v62 }
 0x1df   : > { %7822 = vst [vmem:[#allocation23_spill] sm:$0xff] %v5935_v9  ;;  %2277 = vmatpush.msra.mxu2 %v827_v30  ;;  %v815_v30 = vld [vmem:[#allocation5 + $0xfe0] sm:$0xff] }
 0x1e0   : > { %v1553_v15 = vadd.f32 %v1552_v34, %v1488_v41  ;;  %1746 = vmatmul.f32.gmra.mxu1 %v5925_v61  ;;  %v5939_v61 = vld [vmem:[%s5286_s28 + $0x1f8] sm:$0xff] }
 0x1e1   : > { %v1617_v23 = vpop.f32.mrf.mxu3  ;;  %7823 = vst [vmem:[#allocation24_spill] sm:$0xff] %v5939_v61  ;;  %2278 = vmatpush.msra.mxu2 %v815_v30 }
 0x1e2   : > { %v1618_v43 = vadd.f32 %v1617_v23, %v1553_v15  ;;  %v1425_v3 = vpop.f32.mrf.mxu0  ;;  %v455_v15 = vld [vmem:[#allocation5 + $0x4a0] sm:$0xff]  ;;  %v5945_v23 = vperm.slane %v5942_v60, 2 }
 0x1e3   : > { %v1426_v42 = vadd.f32 %v1425_v3, %v5655_v59  ;;  %1814 = vmatmul.f32.gmra.mxu2 %v5931_v62  ;;  %v1031_v59 = vld [vmem:[#allocation5 + $0x16a0] sm:$0xff]  ;;  %2146 = vmatpush.msra.mxu0 %v455_v15  ;;  %v5948_v62 = vld [vmem:[%s5286_s28 + $0x1e8] sm:$0xff] }
 0x1e4   : > { %4392 = vst [vmem:[%s5564_s20 + $0x548] sm:$0xff] %v1618_v43  ;;  %2341 = vmatpush.msra.mxu3 %v1031_v59  ;;  %v443_v15 = vld [vmem:[#allocation5 + $0x440] sm:$0xff] }
 0x1e5   : > { %v1490_v41 = vpop.f32.mrf.mxu1  ;;  %1684 = vmatmul.f32.gmra.mxu0 %v5935_v9  ;;  %v1019_v59 = vld [vmem:[#allocation5 + $0x1640] sm:$0xff] }
 0x1e6   : > { %v1491_v34 = vadd.f32 %v1490_v41, %v1426_v42  ;;  %1879 = vmatmul.f32.gmra.mxu3 %v5939_v61  ;;  %v1555_v3 = vpop.f32.mrf.mxu2  ;;  %v647_v42 = vld [vmem:[#allocation5 + $0xaa0] sm:$0xff]  ;;  %2147 = vmatpush.msra.mxu0 %v443_v15 }
 0x1e7   : > { %2211 = vmatpush.msra.mxu1 %v647_v42  ;;  %2342 = vmatpush.msra.mxu3 %v1019_v59  ;;  %v623_v15 = vld [vmem:[#allocation5 + $0x9e0] sm:$0xff] }
 0x1e8   : > { %v1556_v43 = vadd.f32 %v1555_v3, %v1491_v34  ;;  %1749 = vmatmul.f32.gmra.mxu1 %v5948_v62 }
 0x1e9   : > { %v1620_v57 = vpop.f32.mrf.mxu3 }
 0x1ea   : > { %v1621_v41 = vadd.f32 %v1620_v57, %v1556_v43  ;;  %v1640_v61 = vpop.f32.mrf.mxu0 }
 0x1eb   : > { %v1641_v9 = vadd.f32 %v1640_v61, %v5945_v23  ;;  %2029 = vmatmul.f32.vlgmr.msrb.gmra.mxu2 %v5661_v16  ;;  %v635_v61 = vld [vmem:[#allocation5 + $0xa40] sm:$0xff] }
 0x1ec   : > { %4404 = vst [vmem:[%s5564_s20 + $0x5a8] sm:$0xff] %v1621_v41  ;;  %2212 = vmatpush.msra.mxu1 %v635_v61 }
 0x1ed   : > { %v1705_v60 = vpop.f32.mrf.mxu1  ;;  %1899 = vmatmul.f32.vlgmr.msrb.gmra.mxu0 %v5665_v10 }
 0x1ee   : > { %v1706_v34 = vadd.f32 %v1705_v60, %v1641_v9  ;;  %2094 = vmatmul.f32.vlgmr.msrb.gmra.mxu3 %v5669_v17  ;;  %v1770_v3 = vpop.f32.mrf.mxu2  ;;  %v1007_v60 = vld [vmem:[#allocation5 + $0x15e0] sm:$0xff]  ;;  %2213 = vmatpush.msra.mxu1 %v623_v15 }
 0x1ef   : > { %2343 = vmatpush.msra.mxu3 %v1007_v60  ;;  %v983_v60 = vld [vmem:[#allocation5 + $0x1520] sm:$0xff] }
 0x1f0   : > { %v1771_v43 = vadd.f32 %v1770_v3, %v1706_v34  ;;  %1964 = vmatmul.f32.vlgmr.msrb.gmra.mxu1 %v5673_v12  ;;  %v431_v12 = vld [vmem:[#allocation5 + $0x3e0] sm:$0xff] }
 0x1f1   : > { %v1835_v42 = vpop.f32.mrf.mxu3  ;;  %2148 = vmatpush.msra.mxu0 %v431_v12  ;;  %v599_v15 = vld [vmem:[#allocation5 + $0x920] sm:$0xff] }
 0x1f2   : > { %v1836_v16 = vadd.f32 %v1835_v42, %v1771_v43  ;;  %v1643_v57 = vpop.f32.mrf.mxu0  ;;  %v803_v43 = vld [vmem:[#allocation5 + $0xf80] sm:$0xff] }
 0x1f3   : > { %v1644_v10 = vadd.f32 %v1643_v57, %v5945_v23  ;;  %2032 = vmatmul.f32.gmra.mxu2 %v5679_v31  ;;  %v995_v42 = vld [vmem:[#allocation5 + $0x1580] sm:$0xff] }
 0x1f4   : > { %4225 = vst [vmem:[%s5564_s20 + $0x10] sm:$0xff] %v1836_v16  ;;  %2279 = vmatpush.msra.mxu2 %v803_v43  ;;  %2344 = vmatpush.msra.mxu3 %v995_v42  ;;  %v971_v43 = vld [vmem:[#allocation5 + $0x14c0] sm:$0xff] }
 0x1f5   : > { %v1708_v17 = vpop.f32.mrf.mxu1  ;;  %1902 = vmatmul.f32.gmra.mxu0 %v5683_v19 }
 0x1f6   : > { %v1709_v9 = vadd.f32 %v1708_v17, %v1644_v10  ;;  %2097 = vmatmul.f32.gmra.mxu3 %v5687_v48  ;;  %v1773_v41 = vpop.f32.mrf.mxu2  ;;  %v611_v10 = vld [vmem:[#allocation5 + $0x980] sm:$0xff] }
 0x1f7   : > { %2214 = vmatpush.msra.mxu1 %v611_v10  ;;  %2345 = vmatpush.msra.mxu3 %v983_v60  ;;  %v947_v60 = vld [vmem:[#allocation5 + $0x1400] sm:$0xff] }
 0x1f8   : > { %v1774_v34 = vadd.f32 %v1773_v41, %v1709_v9  ;;  %1967 = vmatmul.f32.gmra.mxu1 %v5691_v24  ;;  %v419_v24 = vld [vmem:[#allocation5 + $0x380] sm:$0xff] }
 0x1f9   : > { %v1838_v59 = vpop.f32.mrf.mxu3  ;;  %2149 = vmatpush.msra.mxu0 %v419_v24  ;;  %v791_v9 = vld [vmem:[#allocation5 + $0xf20] sm:$0xff]  ;;  %2215 = vmatpush.msra.mxu1 %v599_v15 }
 0x1fa   : > { %v1839_v31 = vadd.f32 %v1838_v59, %v1774_v34  ;;  %v1646_v3 = vpop.f32.mrf.mxu0  ;;  %2280 = vmatpush.msra.mxu2 %v791_v9  ;;  %2346 = vmatpush.msra.mxu3 %v971_v43  ;;  %v587_v24 = vld [vmem:[#allocation5 + $0x8c0] sm:$0xff] }
 0x1fb   : > { %v1647_v19 = vadd.f32 %v1646_v3, %v5945_v23  ;;  %2035 = vmatmul.f32.gmra.mxu2 %v5697_v28  ;;  %v779_v3 = vld [vmem:[#allocation5 + $0xec0] sm:$0xff]  ;;  %2216 = vmatpush.msra.mxu1 %v587_v24 }
 0x1fc   : > { %4237 = vst [vmem:[%s5564_s20 + $0x70] sm:$0xff] %v1839_v31  ;;  %2281 = vmatpush.msra.mxu2 %v779_v3  ;;  %v563_v15 = vld [vmem:[#allocation5 + $0x800] sm:$0xff] }
 0x1fd   : > { %v1711_v48 = vpop.f32.mrf.mxu1  ;;  %1905 = vmatmul.f32.gmra.mxu0 %v5701_v63  ;;  %v935_v3 = vld [vmem:[#allocation5 + $0x13a0] sm:$0xff] }
 0x1fe   : > { %v1712_v61 = vadd.f32 %v1711_v48, %v1647_v19  ;;  %2100 = vmatmul.f32.gmra.mxu3 %v5705_v56  ;;  %v1776_v16 = vpop.f32.mrf.mxu2 }
 0x200   : > { %v1777_v57 = vadd.f32 %v1776_v16, %v1712_v61  ;;  %1970 = vmatmul.f32.gmra.mxu1 %v5709_v38  ;;  %v407_v38 = vld [vmem:[#allocation5 + $0x320] sm:$0xff] }
 0x201   : > { %v1841_v30 = vpop.f32.mrf.mxu3  ;;  %2150 = vmatpush.msra.mxu0 %v407_v38 }
 0x202   : > { %v1842_v28 = vadd.f32 %v1841_v30, %v1777_v57  ;;  %v1649_v17 = vpop.f32.mrf.mxu0  ;;  %v767_v57 = vld [vmem:[#allocation5 + $0xe60] sm:$0xff] }
 0x203   : > { %v1650_v63 = vadd.f32 %v1649_v17, %v5945_v23  ;;  %2038 = vmatmul.f32.gmra.mxu2 %v5715_v55  ;;  %v959_v30 = vld [vmem:[#allocation5 + $0x1460] sm:$0xff] }
 0x204   : > { %4249 = vst [vmem:[%s5564_s20 + $0xd0] sm:$0xff] %v1842_v28  ;;  %2282 = vmatpush.msra.mxu2 %v767_v57  ;;  %2347 = vmatpush.msra.mxu3 %v959_v30  ;;  %v911_v30 = vld [vmem:[#allocation5 + $0x12e0] sm:$0xff] }
 0x205   : > { %v1714_v56 = vpop.f32.mrf.mxu1  ;;  %1908 = vmatmul.f32.gmra.mxu0 %v5719_v45 }
 0x206   : > { %v1715_v12 = vadd.f32 %v1714_v56, %v1650_v63  ;;  %2103 = vmatmul.f32.gmra.mxu3 %v5723_v14  ;;  %v1779_v41 = vpop.f32.mrf.mxu2  ;;  %v575_v63 = vld [vmem:[#allocation5 + $0x860] sm:$0xff] }
 0x207   : > { %2217 = vmatpush.msra.mxu1 %v575_v63  ;;  %2348 = vmatpush.msra.mxu3 %v947_v60  ;;  %v527_v63 = vld [vmem:[#allocation5 + $0x6e0] sm:$0xff] }
 0x208   : > { %v1780_v34 = vadd.f32 %v1779_v41, %v1715_v12  ;;  %1973 = vmatmul.f32.gmra.mxu1 %v5727_v20  ;;  %v395_v20 = vld [vmem:[#allocation5 + $0x2c0] sm:$0xff] }
 0x209   : > { %v1844_v59 = vpop.f32.mrf.mxu3  ;;  %2151 = vmatpush.msra.mxu0 %v395_v20  ;;  %v755_v12 = vld [vmem:[#allocation5 + $0xe00] sm:$0xff]  ;;  %2218 = vmatpush.msra.mxu1 %v563_v15 }
 0x20a   : > { %v1845_v55 = vadd.f32 %v1844_v59, %v1780_v34  ;;  %v1652_v31 = vpop.f32.mrf.mxu0  ;;  %2283 = vmatpush.msra.mxu2 %v755_v12  ;;  %2349 = vmatpush.msra.mxu3 %v935_v3  ;;  %v551_v20 = vld [vmem:[#allocation5 + $0x7a0] sm:$0xff]  ;;  %v7825_v3 = vld [vmem:[#allocation12_spill] sm:$0xff] }
 0x20b   : > { %v1653_v45 = vadd.f32 %v1652_v31, %v5945_v23  ;;  %2041 = vmatmul.f32.gmra.mxu2 %v5733_v8  ;;  %v743_v31 = vld [vmem:[#allocation5 + $0xda0] sm:$0xff]  ;;  %2219 = vmatpush.msra.mxu1 %v551_v20 }
 0x20c   : > { %4261 = vst [vmem:[%s5564_s20 + $0x130] sm:$0xff] %v1845_v55  ;;  %2284 = vmatpush.msra.mxu2 %v743_v31  ;;  %v899_v12 = vld [vmem:[#allocation5 + $0x1280] sm:$0xff] }
 0x20d   : > { %v1717_v14 = vpop.f32.mrf.mxu1  ;;  %1911 = vmatmul.f32.gmra.mxu0 %v5737_v44 }
 0x20e   : > { %v1718_v19 = vadd.f32 %v1717_v14, %v1653_v45  ;;  %2106 = vmatmul.f32.gmra.mxu3 %v5741_v11  ;;  %v1782_v48 = vpop.f32.mrf.mxu2 }
 0x210   : > { %v1783_v61 = vadd.f32 %v1782_v48, %v1718_v19  ;;  %1976 = vmatmul.f32.gmra.mxu1 %v5745_v0  ;;  %v383_v0 = vld [vmem:[#allocation5 + $0x260] sm:$0xff] }
 0x211   : > { %v1847_v42 = vpop.f32.mrf.mxu3  ;;  %2152 = vmatpush.msra.mxu0 %v383_v0 }
 0x212   : > { %v1848_v8 = vadd.f32 %v1847_v42, %v1783_v61  ;;  %v1655_v16 = vpop.f32.mrf.mxu0  ;;  %v731_v61 = vld [vmem:[#allocation5 + $0xd40] sm:$0xff] }
 0x213   : > { %v1656_v44 = vadd.f32 %v1655_v16, %v5945_v23  ;;  %2044 = vmatmul.f32.gmra.mxu2 %v5751_v2  ;;  %v923_v42 = vld [vmem:[#allocation5 + $0x1340] sm:$0xff] }
 0x214   : > { %4273 = vst [vmem:[%s5564_s20 + $0x190] sm:$0xff] %v1848_v8  ;;  %2285 = vmatpush.msra.mxu2 %v731_v61  ;;  %2350 = vmatpush.msra.mxu3 %v923_v42  ;;  %v7827_v61 = vld [vmem:[#allocation14_spill] sm:$0xff] }
 0x215   : > { %v1720_v11 = vpop.f32.mrf.mxu1  ;;  %1914 = vmatmul.f32.gmra.mxu0 %v5755_v25 }
 0x216   : > { %v1721_v10 = vadd.f32 %v1720_v11, %v1656_v44  ;;  %2109 = vmatmul.f32.gmra.mxu3 %v5759_v26  ;;  %v1785_v28 = vpop.f32.mrf.mxu2  ;;  %v539_v44 = vld [vmem:[#allocation5 + $0x740] sm:$0xff] }
 0x217   : > { %2220 = vmatpush.msra.mxu1 %v539_v44  ;;  %2351 = vmatpush.msra.mxu3 %v911_v30  ;;  %v1056_v44 = vld [vmem:[#allocation5 + $0x1768] sm:$0xff]  ;;  %v7831_v30 = vld [vmem:[#allocation18_spill] sm:$0xff] }
 0x218   : > { %v1786_v17 = vadd.f32 %v1785_v28, %v1721_v10  ;;  %1979 = vmatmul.f32.gmra.mxu1 %v5763_v35  ;;  %v371_v35 = vld [vmem:[#allocation5 + $0x200] sm:$0xff] }
 0x219   : > { %v1850_v9 = vpop.f32.mrf.mxu3  ;;  %2153 = vmatpush.msra.mxu0 %v371_v35  ;;  %v719_v10 = vld [vmem:[#allocation5 + $0xce0] sm:$0xff]  ;;  %2221 = vmatpush.msra.mxu1 %v527_v63 }
 0x21a   : > { %v1851_v2 = vadd.f32 %v1850_v9, %v1786_v17  ;;  %v1658_v56 = vpop.f32.mrf.mxu0  ;;  %2286 = vmatpush.msra.mxu2 %v719_v10  ;;  %2352 = vmatpush.msra.mxu3 %v899_v12  ;;  %v515_v35 = vld [vmem:[#allocation5 + $0x680] sm:$0xff] }
 0x21b   : > { %v1659_v25 = vadd.f32 %v1658_v56, %v5945_v23  ;;  %2047 = vmatmul.f32.gmra.mxu2 %v5769_v58  ;;  %v707_v56 = vld [vmem:[#allocation5 + $0xc80] sm:$0xff]  ;;  %2222 = vmatpush.msra.mxu1 %v515_v35 }
 0x21c   : > { %4285 = vst [vmem:[%s5564_s20 + $0x1f0] sm:$0xff] %v1851_v2  ;;  %2287 = vmatpush.msra.mxu2 %v707_v56  ;;  %v7832_v63 = vld [vmem:[#allocation19_spill] sm:$0xff] }
 0x21d   : > { %v1723_v26 = vpop.f32.mrf.mxu1  ;;  %1917 = vmatmul.f32.gmra.mxu0 %v5773_v47 }
 0x21e   : > { %v1724_v38 = vadd.f32 %v1723_v26, %v1659_v25  ;;  %2112 = vmatmul.f32.gmra.mxu3 %v5777_v53  ;;  %v1788_v41 = vpop.f32.mrf.mxu2 }
 0x220   : > { %v1789_v34 = vadd.f32 %v1788_v41, %v1724_v38  ;;  %1982 = vmatmul.f32.gmra.mxu1 %v5781_v4  ;;  %v359_v4 = vld [vmem:[#allocation5 + $0x1a0] sm:$0xff] }
 0x221   : > { %v1853_v59 = vpop.f32.mrf.mxu3  ;;  %2154 = vmatpush.msra.mxu0 %v359_v4 }
 0x222   : > { %v1854_v58 = vadd.f32 %v1853_v59, %v1789_v34  ;;  %v1661_v55 = vpop.f32.mrf.mxu0  ;;  %v695_v34 = vld [vmem:[#allocation5 + $0xc20] sm:$0xff] }
 0x223   : > { %v1662_v47 = vadd.f32 %v1661_v55, %v5945_v23  ;;  %2050 = vmatmul.f32.gmra.mxu2 %v5787_v21  ;;  %v887_v59 = vld [vmem:[#allocation5 + $0x1220] sm:$0xff] }
 0x224   : > { %4297 = vst [vmem:[%s5564_s20 + $0x250] sm:$0xff] %v1854_v58  ;;  %2288 = vmatpush.msra.mxu2 %v695_v34  ;;  %2353 = vmatpush.msra.mxu3 %v887_v59 }
 0x225   : > { %v1726_v53 = vpop.f32.mrf.mxu1  ;;  %1920 = vmatmul.f32.gmra.mxu0 %v5791_v22 }
 0x226   : > { %v1727_v45 = vadd.f32 %v1726_v53, %v1662_v47  ;;  %2115 = vmatmul.f32.gmra.mxu3 %v5795_v13  ;;  %v1791_v14 = vpop.f32.mrf.mxu2  ;;  %v503_v47 = vld [vmem:[#allocation5 + $0x620] sm:$0xff] }
 0x227   : > { %2223 = vmatpush.msra.mxu1 %v503_v47  ;;  %v648_v47 = vld [vmem:[#allocation5 + $0xaa8] sm:$0xff] }
 0x228   : > { %v1792_v19 = vadd.f32 %v1791_v14, %v1727_v45  ;;  %1985 = vmatmul.f32.gmra.mxu1 %v5799_v49  ;;  %v347_v49 = vld [vmem:[#allocation5 + $0x140] sm:$0xff]  ;;  %v876_v45 = vld [vmem:[#allocation5 + $0x11c8] sm:$0xff] }
 0x229   : > { %v1856_v43 = vpop.f32.mrf.mxu3  ;;  %2155 = vmatpush.msra.mxu0 %v347_v49  ;;  %2533 = vmatpush.msrb.mxu2 %v876_v45  ;;  %v1068_v14 = vld [vmem:[#allocation5 + $0x17c8] sm:$0xff]  ;;  %v6053_v45 = vld [vmem:[%s5286_s28 + $0x10] sm:$0xff] }
 0x22a   : > { %v1857_v21 = vadd.f32 %v1856_v43, %v1792_v19  ;;  %v1664_v48 = vpop.f32.mrf.mxu0  ;;  %2598 = vmatpush.msrb.mxu3 %v1068_v14  ;;  %v7826_v43 = vld [vmem:[#allocation13_spill] sm:$0xff]  ;;  %v7828_v49 = vld [vmem:[#allocation15_spill] sm:$0xff] }
 0x22b   : > { %v1665_v22 = vadd.f32 %v1664_v48, %v5945_v23  ;;  %2053 = vmatmul.f32.gmra.mxu2 %v5805_v32  ;;  %v444_v14 = vld [vmem:[#allocation5 + $0x448] sm:$0xff] }
 0x22c   : > { %4309 = vst [vmem:[%s5564_s20 + $0x2b0] sm:$0xff] %v1857_v21  ;;  %v684_v21 = vld [vmem:[#allocation5 + $0xbc8] sm:$0xff]  ;;  %2599 = vmatpush.msrb.mxu3 %v1056_v44 }
 0x22d   : > { %v1729_v13 = vpop.f32.mrf.mxu1  ;;  %1923 = vmatmul.f32.gmra.mxu0 %v5809_v37  ;;  %2468 = vmatpush.msrb.mxu1 %v684_v21  ;;  %v6065_v21 = vld [vmem:[%s5286_s28 + $0x8] sm:$0xff] }
 0x22e   : > { %v1730_v24 = vadd.f32 %v1729_v13, %v1665_v22  ;;  %2118 = vmatmul.f32.gmra.mxu3 %v5813_v36  ;;  %v1794_v8 = vpop.f32.mrf.mxu2  ;;  %v864_v13 = vld [vmem:[#allocation5 + $0x1168] sm:$0xff] }
 0x22f   : > { %2534 = vmatpush.msrb.mxu2 %v864_v13  ;;  %v6071_v13 = vld [vmem:[%s5286_s28 + $0x30] sm:$0xff]  ;;  %v432_v44 = vld [vmem:[#allocation5 + $0x3e8] sm:$0xff] }
 0x230   : > { %v1795_v16 = vadd.f32 %v1794_v8, %v1730_v24  ;;  %1988 = vmatmul.f32.gmra.mxu1 %v5817_v54  ;;  %v335_v54 = vld [vmem:[#allocation5 + $0xe0] sm:$0xff]  ;;  %v7829_v8 = vld [vmem:[#allocation16_spill] sm:$0xff] }
 0x231   : > { %v1859_v57 = vpop.f32.mrf.mxu3  ;;  %2156 = vmatpush.msra.mxu0 %v335_v54 }
 0x232   : > { %v1860_v32 = vadd.f32 %v1859_v57, %v1795_v16  ;;  %v1667_v11 = vpop.f32.mrf.mxu0  ;;  %v480_v16 = vld [vmem:[#allocation5 + $0x568] sm:$0xff] }
 0x233   : > { %v1668_v37 = vadd.f32 %v1667_v11, %v5945_v23  ;;  %2056 = vmatmul.f32.gmra.mxu2 %v5823_v7  ;;  %v7830_v11 = vld [vmem:[#allocation17_spill] sm:$0xff] }
 0x234   : > { %4321 = vst [vmem:[%s5564_s20 + $0x310] sm:$0xff] %v1860_v32 }
 0x235   : > { %v1732_v36 = vpop.f32.mrf.mxu1  ;;  %1926 = vmatmul.f32.gmra.mxu0 %v5827_v18 }
 0x236   : > { %v1733_v0 = vadd.f32 %v1732_v36, %v1668_v37  ;;  %2121 = vmatmul.f32.gmra.mxu3 %v5831_v29  ;;  %v1797_v28 = vpop.f32.mrf.mxu2  ;;  %v672_v37 = vld [vmem:[#allocation5 + $0xb68] sm:$0xff] }
 0x237   : > { %2469 = vmatpush.msrb.mxu1 %v672_v37  ;;  %v6083_v37 = vld [vmem:[%s5286_s28 + $0x28] sm:$0xff] }
 0x238   : > { %v1798_v17 = vadd.f32 %v1797_v28, %v1733_v0  ;;  %1991 = vmatmul.f32.gmra.mxu1 %v5835_v50  ;;  %v323_v50 = vld [vmem:[#allocation5 + $0x80] sm:$0xff]  ;;  %v852_v28 = vld [vmem:[#allocation5 + $0x1108] sm:$0xff] }
 0x239   : > { %v1862_v9 = vpop.f32.mrf.mxu3  ;;  %2157 = vmatpush.msra.mxu0 %v323_v50  ;;  %2535 = vmatpush.msrb.mxu2 %v852_v28  ;;  %v660_v50 = vld [vmem:[#allocation5 + $0xb08] sm:$0xff]  ;;  %v6089_v28 = vld [vmem:[%s5286_s28 + $0x50] sm:$0xff] }
 0x23a   : > { %v1863_v7 = vadd.f32 %v1862_v9, %v1798_v17  ;;  %v1670_v2 = vpop.f32.mrf.mxu0  ;;  %2470 = vmatpush.msrb.mxu1 %v660_v50  ;;  %v6101_v50 = vld [vmem:[%s5286_s28 + $0x48] sm:$0xff] }
 0x23b   : > { %v1671_v18 = vadd.f32 %v1670_v2, %v5945_v23  ;;  %2059 = vmatmul.f32.gmra.mxu2 %v5841_v33  ;;  %v468_v2 = vld [vmem:[#allocation5 + $0x508] sm:$0xff] }
 0x23c   : > { %4333 = vst [vmem:[%s5564_s20 + $0x370] sm:$0xff] %v1863_v7  ;;  %v7833_v7 = vld [vmem:[#allocation20_spill] sm:$0xff]  ;;  %2471 = vmatpush.msrb.mxu1 %v648_v47 }
 0x23d   : > { %v1735_v29 = vpop.f32.mrf.mxu1  ;;  %1929 = vmatmul.f32.gmra.mxu0 %v5845_v46  ;;  %v6119_v47 = vld [vmem:[%s5286_s28 + $0x68] sm:$0xff] }
 0x23e   : > { %v1736_v25 = vadd.f32 %v1735_v29, %v1671_v18  ;;  %2124 = vmatmul.f32.gmra.mxu3 %v5849_v51  ;;  %v1800_v26 = vpop.f32.mrf.mxu2  ;;  %v1044_v18 = vld [vmem:[#allocation5 + $0x1708] sm:$0xff] }
 0x23f   : > { %2600 = vmatpush.msrb.mxu3 %v1044_v18  ;;  %v420_v18 = vld [vmem:[#allocation5 + $0x388] sm:$0xff] }
 0x240   : > { %v1801_v38 = vadd.f32 %v1800_v26, %v1736_v25  ;;  %1994 = vmatmul.f32.gmra.mxu1 %v5853_v5  ;;  %v311_v5 = vld [vmem:[#allocation5 + $0x20] sm:$0xff]  ;;  %v7834_v25 = vld [vmem:[#allocation21_spill] sm:$0xff] }
 0x241   : > { %v1865_v60 = vpop.f32.mrf.mxu3  ;;  %2158 = vmatpush.msra.mxu0 %v311_v5  ;;  %v1032_v5 = vld [vmem:[#allocation5 + $0x16a8] sm:$0xff] }
 0x242   : > { %v1866_v33 = vadd.f32 %v1865_v60, %v1801_v38  ;;  %v1673_v41 = vpop.f32.mrf.mxu0  ;;  %v7835_v60 = vld [vmem:[#allocation22_spill] sm:$0xff]  ;;  %2601 = vmatpush.msrb.mxu3 %v1032_v5  ;;  %v408_v5 = vld [vmem:[#allocation5 + $0x328] sm:$0xff] }
 0x243   : > { %v1674_v46 = vadd.f32 %v1673_v41, %v5945_v23  ;;  %2062 = vmatmul.f32.gmra.mxu2 %v5859_v39 }
 0x244   : > { %4345 = vst [vmem:[%s5564_s20 + $0x3d0] sm:$0xff] %v1866_v33  ;;  %v840_v33 = vld [vmem:[#allocation5 + $0x10a8] sm:$0xff] }
 0x245   : > { %v1738_v51 = vpop.f32.mrf.mxu1  ;;  %1932 = vmatmul.f32.gmra.mxu0 %v5863_v52  ;;  %2536 = vmatpush.msrb.mxu2 %v840_v33  ;;  %v6107_v33 = vld [vmem:[%s5286_s28 + $0x70] sm:$0xff] }
 0x246   : > { %v1739_v15 = vadd.f32 %v1738_v51, %v1674_v46  ;;  %2127 = vmatmul.f32.gmra.mxu3 %v5867_v6  ;;  %v1803_v58 = vpop.f32.mrf.mxu2  ;;  %v7836_v46 = vld [vmem:[#allocation23_spill] sm:$0xff]  ;;  %v7837_v51 = vld [vmem:[#allocation24_spill] sm:$0xff] }
 0x248   : > { %v1804_v55 = vadd.f32 %v1803_v58, %v1739_v15  ;;  %1997 = vmatmul.f32.gmra.mxu1 %v5871_v40  ;;  %v492_v40 = vld [vmem:[#allocation5 + $0x5c8] sm:$0xff]  ;;  %v7838_v58 = vld [vmem:[#allocation25_spill] sm:$0xff] }
 0x249   : > { %v1868_v31 = vpop.f32.mrf.mxu3  ;;  %2403 = vmatpush.msrb.mxu0 %v492_v40  ;;  %v456_v15 = vld [vmem:[#allocation5 + $0x4a8] sm:$0xff]  ;;  %v6061_v40 = vld [vmem:[%s5286_s28 + $0x18] sm:$0xff] }
 0x24a   : > { %v1869_v39 = vadd.f32 %v1868_v31, %v1804_v55  ;;  %v1676_v53 = vpop.f32.mrf.mxu0  ;;  %v6047_v55 = vperm.slane %v7838_v58, 3 }
 0x24b   : > { %v1677_v52 = vadd.f32 %v1676_v53, %v5945_v23  ;;  %2065 = vmatmul.f32.gmra.mxu2 %v5877_v27  ;;  %2404 = vmatpush.msrb.mxu0 %v480_v16  ;;  %v6079_v16 = vld [vmem:[%s5286_s28 + $0x38] sm:$0xff] }
 0x24c   : > { %4357 = vst [vmem:[%s5564_s20 + $0x430] sm:$0xff] %v1869_v39 }
 0x24d   : > { %v1741_v6 = vpop.f32.mrf.mxu1  ;;  %1935 = vmatmul.f32.gmra.mxu0 %v5881_v1 }
 0x24e   : > { %v1742_v4 = vadd.f32 %v1741_v6, %v1677_v52  ;;  %2130 = vmatmul.f32.gmra.mxu3 %v7825_v3  ;;  %v1806_v19 = vpop.f32.mrf.mxu2  ;;  %2405 = vmatpush.msrb.mxu0 %v468_v2  ;;  %v828_v6 = vld [vmem:[#allocation5 + $0x1048] sm:$0xff]  ;;  %v6057_v3 = vld [vmem:[%s5286_s28] sm:$0xff]  ;;  %v6097_v2 = vld [vmem:[%s5286_s28 + $0x58] sm:$0xff] }
 0x24f   : > { %2537 = vmatpush.msrb.mxu2 %v828_v6 }
 0x250   : > { %v1807_v20 = vadd.f32 %v1806_v19, %v1742_v4  ;;  %2000 = vmatmul.f32.gmra.mxu1 %v7826_v43  ;;  %2406 = vmatpush.msrb.mxu0 %v456_v15  ;;  %v1020_v19 = vld [vmem:[#allocation5 + $0x1648] sm:$0xff]  ;;  %v6115_v15 = vld [vmem:[%s5286_s28 + $0x78] sm:$0xff] }
 0x251   : > { %v1871_v48 = vpop.f32.mrf.mxu3  ;;  %2602 = vmatpush.msrb.mxu3 %v1020_v19  ;;  %v6129_v19 = vld [vmem:[%s5286_s28 + $0x80] sm:$0xff] }
 0x252   : > { %v1872_v27 = vadd.f32 %v1871_v48, %v1807_v20  ;;  %v1679_v22 = vpop.f32.mrf.mxu0  ;;  %2407 = vmatpush.msrb.mxu0 %v444_v14  ;;  %v636_v48 = vld [vmem:[#allocation5 + $0xa48] sm:$0xff] }
 0x253   : > { %v1680_v1 = vadd.f32 %v1679_v22, %v5945_v23  ;;  %2068 = vmatmul.f32.gmra.mxu2 %v7827_v61  ;;  %2472 = vmatpush.msrb.mxu1 %v636_v48  ;;  %v396_v48 = vld [vmem:[#allocation5 + $0x2c8] sm:$0xff] }
 0x254   : > { %4369 = vst [vmem:[%s5564_s20 + $0x490] sm:$0xff] %v1872_v27  ;;  %2408 = vmatpush.msrb.mxu0 %v432_v44 }
 0x255   : > { %v1744_v24 = vpop.f32.mrf.mxu1  ;;  %1938 = vmatmul.f32.gmra.mxu0 %v7828_v49 }
 0x256   : > { %v1745_v42 = vadd.f32 %v1744_v24, %v1680_v1  ;;  %2133 = vmatmul.f32.gmra.mxu3 %v7829_v8  ;;  %v1809_v57 = vpop.f32.mrf.mxu2  ;;  %v816_v24 = vld [vmem:[#allocation5 + $0xfe8] sm:$0xff]  ;;  %2409 = vmatpush.msrb.mxu0 %v420_v18 }
 0x257   : > { %2538 = vmatpush.msrb.mxu2 %v816_v24  ;;  %v588_v24 = vld [vmem:[#allocation5 + $0x8c8] sm:$0xff] }
 0x258   : > { %v1810_v32 = vadd.f32 %v1809_v57, %v1745_v42  ;;  %2003 = vmatmul.f32.gmra.mxu1 %v7830_v11  ;;  %v6075_v42 = vld [vmem:[%s5286_s28 + $0x20] sm:$0xff]  ;;  %v1008_v57 = vld [vmem:[#allocation5 + $0x15e8] sm:$0xff]  ;;  %2410 = vmatpush.msrb.mxu0 %v408_v5 }
 0x259   : > { %v1874_v10 = vpop.f32.mrf.mxu3  ;;  %2603 = vmatpush.msrb.mxu3 %v1008_v57  ;;  %v6155_v18 = vld [vmem:[%s5286_s28 + $0xa8] sm:$0xff] }
 0x25a   : > { %v1875_v36 = vadd.f32 %v1874_v10, %v1810_v32  ;;  %v1682_v0 = vpop.f32.mrf.mxu0  ;;  %v624_v10 = vld [vmem:[#allocation5 + $0x9e8] sm:$0xff]  ;;  %2411 = vmatpush.msrb.mxu0 %v396_v48 }
 0x25b   : > { %v1683_v54 = vadd.f32 %v1682_v0, %v5945_v23  ;;  %2071 = vmatmul.f32.gmra.mxu2 %v7831_v30  ;;  %2473 = vmatpush.msrb.mxu1 %v624_v10  ;;  %v372_v5 = vld [vmem:[#allocation5 + $0x208] sm:$0xff] }
 0x25c   : > { %4381 = vst [vmem:[%s5564_s20 + $0x4f0] sm:$0xff] %v1875_v36 }
 0x25d   : > { %v1747_v17 = vpop.f32.mrf.mxu1  ;;  %1941 = vmatmul.f32.gmra.mxu0 %v7832_v63 }
 0x25e   : > { %v1748_v9 = vadd.f32 %v1747_v17, %v1683_v54  ;;  %2136 = vmatmul.f32.gmra.mxu3 %v7833_v7  ;;  %v1812_v56 = vpop.f32.mrf.mxu2  ;;  %v804_v17 = vld [vmem:[#allocation5 + $0xf88] sm:$0xff] }
 0x25f   : > { %2539 = vmatpush.msrb.mxu2 %v804_v17  ;;  %v960_v17 = vld [vmem:[#allocation5 + $0x1468] sm:$0xff] }
 0x260   : > { %v1813_v29 = vadd.f32 %v1812_v56, %v1748_v9  ;;  %2006 = vmatmul.f32.gmra.mxu1 %v7834_v25  ;;  %v6093_v9 = vld [vmem:[%s5286_s28 + $0x40] sm:$0xff]  ;;  %v996_v56 = vld [vmem:[#allocation5 + $0x1588] sm:$0xff] }
 0x261   : > { %v1877_v12 = vpop.f32.mrf.mxu3  ;;  %2604 = vmatpush.msrb.mxu3 %v996_v56  ;;  %v576_v56 = vld [vmem:[#allocation5 + $0x868] sm:$0xff] }
 0x262   : > { %v1878_v26 = vadd.f32 %v1877_v12, %v1813_v29  ;;  %v1685_v38 = vpop.f32.mrf.mxu0  ;;  %v612_v12 = vld [vmem:[#allocation5 + $0x988] sm:$0xff] }
 0x263   : > { %v1686_v35 = vadd.f32 %v1685_v38, %v5945_v23  ;;  %2074 = vmatmul.f32.gmra.mxu2 %v7835_v60  ;;  %2474 = vmatpush.msrb.mxu1 %v612_v12 }
 0x264   : > { %4393 = vst [vmem:[%s5564_s20 + $0x550] sm:$0xff] %v1878_v26 }
 0x265   : > { %v1750_v41 = vpop.f32.mrf.mxu1  ;;  %1944 = vmatmul.f32.gmra.mxu0 %v7836_v46 }
 0x266   : > { %v1751_v34 = vadd.f32 %v1750_v41, %v1686_v35  ;;  %2139 = vmatmul.f32.gmra.mxu3 %v7837_v51  ;;  %v1815_v59 = vpop.f32.mrf.mxu2  ;;  %v792_v41 = vld [vmem:[#allocation5 + $0xf28] sm:$0xff] }
 0x267   : > { %2540 = vmatpush.msrb.mxu2 %v792_v41  ;;  %v6165_v41 = vld [vmem:[%s5286_s28 + $0xc0] sm:$0xff] }
 0x268   : > { %v1816_v23 = vadd.f32 %v1815_v59, %v1751_v34  ;;  %2009 = vmatmul.f32.gmra.mxu1 %v5948_v62  ;;  %v6111_v34 = vld [vmem:[%s5286_s28 + $0x60] sm:$0xff]  ;;  %v984_v59 = vld [vmem:[#allocation5 + $0x1528] sm:$0xff] }
 0x269   : > { %v1880_v31 = vpop.f32.mrf.mxu3  ;;  %2605 = vmatpush.msrb.mxu3 %v984_v59  ;;  %v948_v59 = vld [vmem:[#allocation5 + $0x1408] sm:$0xff] }
 0x26a   : > { %v1881_v39 = vadd.f32 %v1880_v31, %v1816_v23  ;;  %v1900_v53 = vpop.f32.mrf.mxu0  ;;  %v600_v31 = vld [vmem:[#allocation5 + $0x928] sm:$0xff] }
 0x26b   : > { %v1901_v52 = vadd.f32 %v1900_v53, %v6047_v55  ;;  %2289 = vmatmul.f32.vlgmr.msra.gmra.mxu2 %v6053_v45  ;;  %2475 = vmatpush.msrb.mxu1 %v600_v31  ;;  %v6173_v31 = vld [vmem:[%s5286_s28 + $0xc8] sm:$0xff] }
 0x26c   : > { %4405 = vst [vmem:[%s5564_s20 + $0x5b0] sm:$0xff] %v1881_v39 }
 0x26d   : > { %v1965_v4 = vpop.f32.mrf.mxu1  ;;  %2159 = vmatmul.f32.vlgmr.msra.gmra.mxu0 %v6057_v3  ;;  %2476 = vmatpush.msrb.mxu1 %v588_v24  ;;  %v360_v24 = vld [vmem:[#allocation5 + $0x1a8] sm:$0xff] }
 0x26e   : > { %v1966_v62 = vadd.f32 %v1965_v4, %v1901_v52  ;;  %2354 = vmatmul.f32.vlgmr.msra.gmra.mxu3 %v6061_v40  ;;  %v2030_v20 = vpop.f32.mrf.mxu2  ;;  %v6125_v4 = vld [vmem:[%s5286_s28 + $0x90] sm:$0xff] }
 0x26f   : > { %2477 = vmatpush.msrb.mxu1 %v576_v56 }
 0x270   : > { %v2031_v43 = vadd.f32 %v2030_v20, %v1966_v62  ;;  %2224 = vmatmul.f32.vlgmr.msra.gmra.mxu1 %v6065_v21  ;;  %v780_v62 = vld [vmem:[#allocation5 + $0xec8] sm:$0xff] }
 0x271   : > { %v2095_v27 = vpop.f32.mrf.mxu3  ;;  %2541 = vmatpush.msrb.mxu2 %v780_v62 }
 0x272   : > { %v2096_v22 = vadd.f32 %v2095_v27, %v2031_v43  ;;  %v1903_v1 = vpop.f32.mrf.mxu0  ;;  %v6133_v43 = vld [vmem:[%s5286_s28 + $0x98] sm:$0xff]  ;;  %v972_v27 = vld [vmem:[#allocation5 + $0x14c8] sm:$0xff] }
 0x273   : > { %v1904_v61 = vadd.f32 %v1903_v1, %v6047_v55  ;;  %2292 = vmatmul.f32.gmra.mxu2 %v6071_v13  ;;  %2606 = vmatpush.msrb.mxu3 %v972_v27  ;;  %v6183_v27 = vld [vmem:[%s5286_s28 + $0xe0] sm:$0xff] }
 0x274   : > { %4226 = vst [vmem:[%s5564_s20 + $0x18] sm:$0xff] %v2096_v22 }
 0x275   : > { %v1968_v49 = vpop.f32.mrf.mxu1  ;;  %2162 = vmatmul.f32.gmra.mxu0 %v6075_v42  ;;  %2607 = vmatpush.msrb.mxu3 %v960_v17 }
 0x276   : > { %v1969_v8 = vadd.f32 %v1968_v49, %v1904_v61  ;;  %2357 = vmatmul.f32.gmra.mxu3 %v6079_v16  ;;  %v2033_v32 = vpop.f32.mrf.mxu2  ;;  %v6137_v61 = vld [vmem:[%s5286_s28 + $0x88] sm:$0xff] }
 0x277   : > { %2608 = vmatpush.msrb.mxu3 %v948_v59  ;;  %v540_v59 = vld [vmem:[#allocation5 + $0x748] sm:$0xff] }
 0x278   : > { %v2034_v11 = vadd.f32 %v2033_v32, %v1969_v8  ;;  %2227 = vmatmul.f32.gmra.mxu1 %v6083_v37  ;;  %v6143_v32 = vld [vmem:[%s5286_s28 + $0xb0] sm:$0xff] }
 0x279   : > { %v2098_v36 = vpop.f32.mrf.mxu3 }
 0x27a   : > { %v2099_v0 = vadd.f32 %v2098_v36, %v2034_v11  ;;  %v1906_v54 = vpop.f32.mrf.mxu0  ;;  %v768_v11 = vld [vmem:[#allocation5 + $0xe68] sm:$0xff]  ;;  %v6147_v36 = vld [vmem:[%s5286_s28 + $0xa0] sm:$0xff] }
 0x27b   : > { %v1907_v30 = vadd.f32 %v1906_v54, %v6047_v55  ;;  %2295 = vmatmul.f32.gmra.mxu2 %v6089_v28  ;;  %v6151_v54 = vld [vmem:[%s5286_s28 + $0xb8] sm:$0xff] }
 0x27c   : > { %4238 = vst [vmem:[%s5564_s20 + $0x78] sm:$0xff] %v2099_v0  ;;  %2542 = vmatpush.msrb.mxu2 %v768_v11  ;;  %v552_v11 = vld [vmem:[#allocation5 + $0x7a8] sm:$0xff] }
 0x27d   : > { %v1971_v63 = vpop.f32.mrf.mxu1  ;;  %2165 = vmatmul.f32.gmra.mxu0 %v6093_v9 }
 0x27e   : > { %v1972_v7 = vadd.f32 %v1971_v63, %v1907_v30  ;;  %2360 = vmatmul.f32.gmra.mxu3 %v6097_v2  ;;  %v2036_v29 = vpop.f32.mrf.mxu2  ;;  %v384_v30 = vld [vmem:[#allocation5 + $0x268] sm:$0xff] }
 0x27f   : > { %2412 = vmatpush.msrb.mxu0 %v384_v30 }
 0x280   : > { %v2037_v25 = vadd.f32 %v2036_v29, %v1972_v7  ;;  %2230 = vmatmul.f32.gmra.mxu1 %v6101_v50 }
 0x281   : > { %v2101_v26 = vpop.f32.mrf.mxu3  ;;  %2413 = vmatpush.msrb.mxu0 %v372_v5  ;;  %v6209_v5 = vld [vmem:[%s5286_s28 + $0x108] sm:$0xff] }
 0x282   : > { %v2102_v38 = vadd.f32 %v2101_v26, %v2037_v25  ;;  %v1909_v35 = vpop.f32.mrf.mxu0 }
 0x283   : > { %v1910_v60 = vadd.f32 %v1909_v35, %v6047_v55  ;;  %2298 = vmatmul.f32.gmra.mxu2 %v6107_v33  ;;  %v756_v35 = vld [vmem:[#allocation5 + $0xe08] sm:$0xff]  ;;  %2414 = vmatpush.msrb.mxu0 %v360_v24 }
 0x284   : > { %4250 = vst [vmem:[%s5564_s20 + $0xd8] sm:$0xff] %v2102_v38  ;;  %v6161_v38 = vld [vmem:[%s5286_s28 + $0xd0] sm:$0xff]  ;;  %2543 = vmatpush.msrb.mxu2 %v756_v35  ;;  %v924_v35 = vld [vmem:[#allocation5 + $0x1348] sm:$0xff] }
 0x285   : > { %v1974_v46 = vpop.f32.mrf.mxu1  ;;  %2168 = vmatmul.f32.gmra.mxu0 %v6111_v34  ;;  %v336_v24 = vld [vmem:[#allocation5 + $0xe8] sm:$0xff] }
 0x286   : > { %v1975_v51 = vadd.f32 %v1974_v46, %v1910_v60  ;;  %2363 = vmatmul.f32.gmra.mxu3 %v6115_v15  ;;  %v2039_v58 = vpop.f32.mrf.mxu2 }
 0x288   : > { %v2040_v23 = vadd.f32 %v2039_v58, %v1975_v51  ;;  %2233 = vmatmul.f32.gmra.mxu1 %v6119_v47  ;;  %v6169_v51 = vld [vmem:[%s5286_s28 + $0xd8] sm:$0xff] }
 0x289   : > { %v2104_v39 = vpop.f32.mrf.mxu3 }
 0x28a   : > { %v2105_v53 = vadd.f32 %v2104_v39, %v2040_v23  ;;  %v1912_v52 = vpop.f32.mrf.mxu0  ;;  %v564_v39 = vld [vmem:[#allocation5 + $0x808] sm:$0xff] }
 0x28b   : > { %v1913_v6 = vadd.f32 %v1912_v52, %v6047_v55  ;;  %2301 = vmatmul.f32.gmra.mxu2 %v6125_v4  ;;  %2478 = vmatpush.msrb.mxu1 %v564_v39 }
 0x28c   : > { %4262 = vst [vmem:[%s5564_s20 + $0x138] sm:$0xff] %v2105_v53 }
 0x28d   : > { %v1977_v14 = vpop.f32.mrf.mxu1  ;;  %2171 = vmatmul.f32.gmra.mxu0 %v6129_v19  ;;  %2479 = vmatpush.msrb.mxu1 %v552_v11  ;;  %v6227_v11 = vld [vmem:[%s5286_s28 + $0x128] sm:$0xff] }
 0x28e   : > { %v1978_v20 = vadd.f32 %v1977_v14, %v1913_v6  ;;  %2366 = vmatmul.f32.gmra.mxu3 %v6133_v43  ;;  %v2042_v22 = vpop.f32.mrf.mxu2  ;;  %v6179_v14 = vld [vmem:[%s5286_s28 + $0xf0] sm:$0xff] }
 0x28f   : > { %2480 = vmatpush.msrb.mxu1 %v540_v59  ;;  %v324_v59 = vld [vmem:[#allocation5 + $0x88] sm:$0xff] }
 0x290   : > { %v2043_v1 = vadd.f32 %v2042_v22, %v1978_v20  ;;  %2236 = vmatmul.f32.gmra.mxu1 %v6137_v61  ;;  %v744_v20 = vld [vmem:[#allocation5 + $0xda8] sm:$0xff] }
 0x291   : > { %v2107_v49 = vpop.f32.mrf.mxu3  ;;  %2544 = vmatpush.msrb.mxu2 %v744_v20  ;;  %v6219_v20 = vld [vmem:[%s5286_s28 + $0x120] sm:$0xff] }
 0x292   : > { %v2108_v8 = vadd.f32 %v2107_v49, %v2043_v1  ;;  %v1915_v44 = vpop.f32.mrf.mxu0  ;;  %v6187_v1 = vld [vmem:[%s5286_s28 + $0xf8] sm:$0xff]  ;;  %v936_v49 = vld [vmem:[#allocation5 + $0x13a8] sm:$0xff] }
 0x293   : > { %v1916_v57 = vadd.f32 %v1915_v44, %v6047_v55  ;;  %2304 = vmatmul.f32.gmra.mxu2 %v6143_v32  ;;  %2609 = vmatpush.msrb.mxu3 %v936_v49  ;;  %v912_v49 = vld [vmem:[#allocation5 + $0x12e8] sm:$0xff] }
 0x294   : > { %4274 = vst [vmem:[%s5564_s20 + $0x198] sm:$0xff] %v2108_v8 }
 0x295   : > { %v1980_v10 = vpop.f32.mrf.mxu1  ;;  %2174 = vmatmul.f32.gmra.mxu0 %v6147_v36  ;;  %2610 = vmatpush.msrb.mxu3 %v924_v35  ;;  %v6237_v35 = vld [vmem:[%s5286_s28 + $0x140] sm:$0xff] }
 0x296   : > { %v1981_v0 = vadd.f32 %v1980_v10, %v1916_v57  ;;  %2369 = vmatmul.f32.gmra.mxu3 %v6151_v54  ;;  %v2045_v63 = vpop.f32.mrf.mxu2  ;;  %v6191_v57 = vld [vmem:[%s5286_s28 + $0xe8] sm:$0xff] }
 0x297   : > { %2611 = vmatpush.msrb.mxu3 %v912_v49 }
 0x298   : > { %v2046_v7 = vadd.f32 %v2045_v63, %v1981_v0  ;;  %2239 = vmatmul.f32.gmra.mxu1 %v6155_v18  ;;  %v6197_v63 = vld [vmem:[%s5286_s28 + $0x110] sm:$0xff] }
 0x299   : > { %v2110_v29 = vpop.f32.mrf.mxu3 }
 0x29a   : > { %v2111_v25 = vadd.f32 %v2110_v29, %v2046_v7  ;;  %v1918_v12 = vpop.f32.mrf.mxu0  ;;  %v732_v7 = vld [vmem:[#allocation5 + $0xd48] sm:$0xff]  ;;  %v6201_v29 = vld [vmem:[%s5286_s28 + $0x100] sm:$0xff] }
 0x29b   : > { %v1919_v26 = vadd.f32 %v1918_v12, %v6047_v55  ;;  %2307 = vmatmul.f32.gmra.mxu2 %v6161_v38  ;;  %v6205_v12 = vld [vmem:[%s5286_s28 + $0x118] sm:$0xff] }
 0x29c   : > { %4286 = vst [vmem:[%s5564_s20 + $0x1f8] sm:$0xff] %v2111_v25  ;;  %2545 = vmatpush.msrb.mxu2 %v732_v7 }
 0x29d   : > { %v1983_v60 = vpop.f32.mrf.mxu1  ;;  %2177 = vmatmul.f32.gmra.mxu0 %v6165_v41 }
 0x29e   : > { %v1984_v46 = vadd.f32 %v1983_v60, %v1919_v26  ;;  %2372 = vmatmul.f32.gmra.mxu3 %v6169_v51  ;;  %v2048_v58 = vpop.f32.mrf.mxu2  ;;  %v348_v26 = vld [vmem:[#allocation5 + $0x148] sm:$0xff] }
 0x29f   : > { %2415 = vmatpush.msrb.mxu0 %v348_v26 }
 0x2a0   : > { %v2049_v23 = vadd.f32 %v2048_v58, %v1984_v46  ;;  %2242 = vmatmul.f32.gmra.mxu1 %v6173_v31 }
 0x2a1   : > { %v2113_v53 = vpop.f32.mrf.mxu3  ;;  %2416 = vmatpush.msrb.mxu0 %v336_v24 }
 0x2a2   : > { %v2114_v52 = vadd.f32 %v2113_v53, %v2049_v23  ;;  %v1921_v6 = vpop.f32.mrf.mxu0 }
 0x2a3   : > { %v1922_v62 = vadd.f32 %v1921_v6, %v6047_v55  ;;  %2310 = vmatmul.f32.gmra.mxu2 %v6179_v14  ;;  %v720_v6 = vld [vmem:[#allocation5 + $0xce8] sm:$0xff]  ;;  %2417 = vmatpush.msrb.mxu0 %v324_v59 }
 0x2a4   : > { %4298 = vst [vmem:[%s5564_s20 + $0x258] sm:$0xff] %v2114_v52  ;;  %v6215_v52 = vld [vmem:[%s5286_s28 + $0x130] sm:$0xff]  ;;  %2546 = vmatpush.msrb.mxu2 %v720_v6  ;;  %v516_v6 = vld [vmem:[#allocation5 + $0x688] sm:$0xff] }
 0x2a5   : > { %v1986_v48 = vpop.f32.mrf.mxu1  ;;  %2180 = vmatmul.f32.gmra.mxu0 %v6183_v27  ;;  %v6263_v59 = vld [vmem:[%s5286_s28 + $0x168] sm:$0xff] }
 0x2a6   : > { %v1987_v22 = vadd.f32 %v1986_v48, %v1922_v62  ;;  %2375 = vmatmul.f32.gmra.mxu3 %v6187_v1  ;;  %v2051_v8 = vpop.f32.mrf.mxu2 }
 0x2a8   : > { %v2052_v44 = vadd.f32 %v2051_v8, %v1987_v22  ;;  %2245 = vmatmul.f32.gmra.mxu1 %v6191_v57  ;;  %v6223_v22 = vld [vmem:[%s5286_s28 + $0x138] sm:$0xff] }
 0x2a9   : > { %v2116_v10 = vpop.f32.mrf.mxu3 }
 0x2aa   : > { %v2117_v0 = vadd.f32 %v2116_v10, %v2052_v44  ;;  %v1924_v30 = vpop.f32.mrf.mxu0  ;;  %v528_v10 = vld [vmem:[#allocation5 + $0x6e8] sm:$0xff] }
 0x2ab   : > { %v1925_v17 = vadd.f32 %v1924_v30, %v6047_v55  ;;  %2313 = vmatmul.f32.gmra.mxu2 %v6197_v63  ;;  %2481 = vmatpush.msrb.mxu1 %v528_v10 }
 0x2ac   : > { %4310 = vst [vmem:[%s5564_s20 + $0x2b8] sm:$0xff] %v2117_v0 }
 0x2ad   : > { %v1989_v56 = vpop.f32.mrf.mxu1  ;;  %2183 = vmatmul.f32.gmra.mxu0 %v6201_v29  ;;  %2482 = vmatpush.msrb.mxu1 %v516_v6 }
 0x2ae   : > { %v1990_v25 = vadd.f32 %v1989_v56, %v1925_v17  ;;  %2378 = vmatmul.f32.gmra.mxu3 %v6205_v12  ;;  %v2054_v60 = vpop.f32.mrf.mxu2  ;;  %v6233_v56 = vld [vmem:[%s5286_s28 + $0x150] sm:$0xff] }
 0x2b0   : > { %v2055_v46 = vadd.f32 %v2054_v60, %v1990_v25  ;;  %2248 = vmatmul.f32.gmra.mxu1 %v6209_v5  ;;  %v708_v25 = vld [vmem:[#allocation5 + $0xc88] sm:$0xff] }
 0x2b1   : > { %v2119_v58 = vpop.f32.mrf.mxu3  ;;  %2547 = vmatpush.msrb.mxu2 %v708_v25  ;;  %v888_v25 = vld [vmem:[#allocation5 + $0x1228] sm:$0xff] }
 0x2b2   : > { %v2120_v23 = vadd.f32 %v2119_v58, %v2055_v46  ;;  %v1927_v39 = vpop.f32.mrf.mxu0  ;;  %v6241_v46 = vld [vmem:[%s5286_s28 + $0x158] sm:$0xff]  ;;  %v900_v58 = vld [vmem:[#allocation5 + $0x1288] sm:$0xff] }
 0x2b3   : > { %v1928_v53 = vadd.f32 %v1927_v39, %v6047_v55  ;;  %2316 = vmatmul.f32.gmra.mxu2 %v6215_v52  ;;  %2612 = vmatpush.msrb.mxu3 %v900_v58  ;;  %v504_v58 = vld [vmem:[#allocation5 + $0x628] sm:$0xff] }
 0x2b4   : > { %4322 = vst [vmem:[%s5564_s20 + $0x318] sm:$0xff] %v2120_v23  ;;  %2483 = vmatpush.msrb.mxu1 %v504_v58  ;;  %v6281_v58 = vld [vmem:[%s5286_s28 + $0x188] sm:$0xff] }
 0x2b5   : > { %v1992_v62 = vpop.f32.mrf.mxu1  ;;  %2186 = vmatmul.f32.gmra.mxu0 %v6219_v20  ;;  %2613 = vmatpush.msrb.mxu3 %v888_v25  ;;  %v1069_v25 = vld [vmem:[#allocation5 + $0x17d0] sm:$0xff]  ;;  %7840 = vst [vmem:[#allocation13_spill] sm:$0xff] %v6281_v58 }
 0x2b6   : > { %v1993_v48 = vadd.f32 %v1992_v62, %v1928_v53  ;;  %2381 = vmatmul.f32.gmra.mxu3 %v6223_v22  ;;  %v2057_v8 = vpop.f32.mrf.mxu2  ;;  %v6245_v53 = vld [vmem:[%s5286_s28 + $0x148] sm:$0xff] }
 0x2b7   : > { %2858 = vmatpush.msra.mxu3 %v1069_v25  ;;  %v6291_v25 = vld [vmem:[%s5286_s28 + $0x1a0] sm:$0xff] }
 0x2b8   : > { %v2058_v44 = vadd.f32 %v2057_v8, %v1993_v48  ;;  %2251 = vmatmul.f32.gmra.mxu1 %v6227_v11  ;;  %v6251_v8 = vld [vmem:[%s5286_s28 + $0x170] sm:$0xff]  ;;  %7842 = vst [vmem:[#allocation15_spill] sm:$0xff] %v6291_v25 }
 0x2b9   : > { %v2122_v0 = vpop.f32.mrf.mxu3 }
 0x2ba   : > { %v2123_v30 = vadd.f32 %v2122_v0, %v2058_v44  ;;  %v1930_v17 = vpop.f32.mrf.mxu0  ;;  %v696_v44 = vld [vmem:[#allocation5 + $0xc28] sm:$0xff]  ;;  %v6255_v0 = vld [vmem:[%s5286_s28 + $0x160] sm:$0xff] }
 0x2bb   : > { %v1931_v7 = vadd.f32 %v1930_v17, %v6047_v55  ;;  %2319 = vmatmul.f32.gmra.mxu2 %v6233_v56  ;;  %v6259_v17 = vld [vmem:[%s5286_s28 + $0x178] sm:$0xff] }
 0x2bc   : > { %4334 = vst [vmem:[%s5564_s20 + $0x378] sm:$0xff] %v2123_v30  ;;  %2548 = vmatpush.msrb.mxu2 %v696_v44  ;;  %v6273_v44 = vld [vmem:[%s5286_s28 + $0x180] sm:$0xff] }
 0x2bd   : > { %v1995_v26 = vpop.f32.mrf.mxu1  ;;  %2189 = vmatmul.f32.gmra.mxu0 %v6237_v35 }
 0x2be   : > { %v1996_v60 = vadd.f32 %v1995_v26, %v1931_v7  ;;  %2384 = vmatmul.f32.gmra.mxu3 %v6241_v46  ;;  %v2060_v23 = vpop.f32.mrf.mxu2  ;;  %v312_v7 = vld [vmem:[#allocation5 + $0x28] sm:$0xff] }
 0x2bf   : > { %2418 = vmatpush.msrb.mxu0 %v312_v7  ;;  %v493_v7 = vld [vmem:[#allocation5 + $0x5d0] sm:$0xff] }
 0x2c0   : > { %v2061_v39 = vadd.f32 %v2060_v23, %v1996_v60  ;;  %2254 = vmatmul.f32.gmra.mxu1 %v6245_v53 }
 0x2c1   : > { %v2125_v62 = vpop.f32.mrf.mxu3  ;;  %2663 = vmatpush.msra.mxu0 %v493_v7  ;;  %v865_v7 = vld [vmem:[#allocation5 + $0x1170] sm:$0xff] }
 0x2c2   : > { %v2126_v48 = vadd.f32 %v2125_v62, %v2061_v39  ;;  %v1933_v24 = vpop.f32.mrf.mxu0 }
 0x2c3   : > { %v1934_v49 = vadd.f32 %v1933_v24, %v6047_v55  ;;  %2322 = vmatmul.f32.gmra.mxu2 %v6251_v8  ;;  %v877_v24 = vld [vmem:[#allocation5 + $0x11d0] sm:$0xff] }
 0x2c4   : > { %4346 = vst [vmem:[%s5564_s20 + $0x3d8] sm:$0xff] %v2126_v48  ;;  %v6269_v48 = vld [vmem:[%s5286_s28 + $0x190] sm:$0xff]  ;;  %2793 = vmatpush.msra.mxu2 %v877_v24 }
 0x2c5   : > { %v1998_v10 = vpop.f32.mrf.mxu1  ;;  %2192 = vmatmul.f32.gmra.mxu0 %v6255_v0 }
 0x2c6   : > { %v1999_v30 = vadd.f32 %v1998_v10, %v1934_v49  ;;  %2387 = vmatmul.f32.gmra.mxu3 %v6259_v17  ;;  %v2063_v26 = vpop.f32.mrf.mxu2  ;;  %2794 = vmatpush.msra.mxu2 %v865_v7  ;;  %v673_v7 = vld [vmem:[#allocation5 + $0xb70] sm:$0xff] }
 0x2c8   : > { %v2064_v60 = vadd.f32 %v2063_v26, %v1999_v30  ;;  %2257 = vmatmul.f32.gmra.mxu1 %v6263_v59  ;;  %v6277_v30 = vld [vmem:[%s5286_s28 + $0x198] sm:$0xff] }
 0x2c9   : > { %v2128_v23 = vpop.f32.mrf.mxu3  ;;  %7839 = vst [vmem:[#allocation12_spill] sm:$0xff] %v6277_v30 }
 0x2ca   : > { %v2129_v39 = vadd.f32 %v2128_v23, %v2064_v60  ;;  %v1936_v6 = vpop.f32.mrf.mxu0  ;;  %v685_v23 = vld [vmem:[#allocation5 + $0xbd0] sm:$0xff] }
 0x2cb   : > { %v1937_v62 = vadd.f32 %v1936_v6, %v6047_v55  ;;  %2325 = vmatmul.f32.gmra.mxu2 %v6269_v48  ;;  %2728 = vmatpush.msra.mxu1 %v685_v23  ;;  %v1057_v23 = vld [vmem:[#allocation5 + $0x1770] sm:$0xff] }
 0x2cc   : > { %4358 = vst [vmem:[%s5564_s20 + $0x438] sm:$0xff] %v2129_v39  ;;  %2859 = vmatpush.msra.mxu3 %v1057_v23  ;;  %v6309_v23 = vld [vmem:[%s5286_s28 + $0x1c0] sm:$0xff] }
 0x2cd   : > { %v2001_v49 = vpop.f32.mrf.mxu1  ;;  %2195 = vmatmul.f32.gmra.mxu0 %v6273_v44  ;;  %2729 = vmatpush.msra.mxu1 %v673_v7  ;;  %7846 = vst [vmem:[#allocation19_spill] sm:$0xff] %v6309_v23 }
 0x2ce   : > { %v2002_v10 = vadd.f32 %v2001_v49, %v1937_v62  ;;  %2390 = vmatmul.f32.gmra.mxu3 %v6277_v30  ;;  %v2066_v26 = vpop.f32.mrf.mxu2  ;;  %v6287_v49 = vld [vmem:[%s5286_s28 + $0x1b0] sm:$0xff] }
 0x2cf   : > { %7841 = vst [vmem:[#allocation14_spill] sm:$0xff] %v6287_v49  ;;  %v829_v30 = vld [vmem:[#allocation5 + $0x1050] sm:$0xff] }
 0x2d0   : > { %v2067_v60 = vadd.f32 %v2066_v26, %v2002_v10  ;;  %2260 = vmatmul.f32.gmra.mxu1 %v6281_v58  ;;  %v6295_v58 = vld [vmem:[%s5286_s28 + $0x1b8] sm:$0xff] }
 0x2d1   : > { %v2131_v39 = vpop.f32.mrf.mxu3  ;;  %7843 = vst [vmem:[#allocation16_spill] sm:$0xff] %v6295_v58 }
 0x2d2   : > { %v2132_v6 = vadd.f32 %v2131_v39, %v2067_v60  ;;  %v1939_v62 = vpop.f32.mrf.mxu0  ;;  %v481_v60 = vld [vmem:[#allocation5 + $0x570] sm:$0xff] }
 0x2d3   : > { %v1940_v24 = vadd.f32 %v1939_v62, %v6047_v55  ;;  %2328 = vmatmul.f32.gmra.mxu2 %v6287_v49  ;;  %2664 = vmatpush.msra.mxu0 %v481_v60  ;;  %v6299_v62 = vld [vmem:[%s5286_s28 + $0x1a8] sm:$0xff]  ;;  %v6305_v49 = vld [vmem:[%s5286_s28 + $0x1d0] sm:$0xff] }
 0x2d4   : > { %4370 = vst [vmem:[%s5564_s20 + $0x498] sm:$0xff] %v2132_v6  ;;  %v853_v60 = vld [vmem:[#allocation5 + $0x1110] sm:$0xff] }
 0x2d5   : > { %v2004_v10 = vpop.f32.mrf.mxu1  ;;  %2198 = vmatmul.f32.gmra.mxu0 %v6291_v25  ;;  %7844 = vst [vmem:[#allocation17_spill] sm:$0xff] %v6299_v62  ;;  %2795 = vmatpush.msra.mxu2 %v853_v60  ;;  %v661_v60 = vld [vmem:[#allocation5 + $0xb10] sm:$0xff] }
 0x2d6   : > { %v2005_v26 = vadd.f32 %v2004_v10, %v1940_v24  ;;  %2393 = vmatmul.f32.gmra.mxu3 %v6295_v58  ;;  %v2069_v39 = vpop.f32.mrf.mxu2  ;;  %7845 = vst [vmem:[#allocation18_spill] sm:$0xff] %v6305_v49  ;;  %2730 = vmatpush.msra.mxu1 %v661_v60  ;;  %v6334_v60 = vld [vmem:[#allocation7] sm:$0xff] }
 0x2d7   : > { %7852 = vst [vmem:[#allocation25_spill] sm:$0xff] %v6334_v60 }
 0x2d8   : > { %v2070_v6 = vadd.f32 %v2069_v39, %v2005_v26  ;;  %2263 = vmatmul.f32.gmra.mxu1 %v6299_v62  ;;  %v6313_v62 = vld [vmem:[%s5286_s28 + $0x1d8] sm:$0xff] }
 0x2d9   : > { %v2134_v24 = vpop.f32.mrf.mxu3  ;;  %7847 = vst [vmem:[#allocation20_spill] sm:$0xff] %v6313_v62 }
 0x2da   : > { %v2135_v10 = vadd.f32 %v2134_v24, %v2070_v6  ;;  %v1942_v25 = vpop.f32.mrf.mxu0  ;;  %v1045_v6 = vld [vmem:[#allocation5 + $0x1710] sm:$0xff] }
 0x2db   : > { %v1943_v58 = vadd.f32 %v1942_v25, %v6047_v55  ;;  %2331 = vmatmul.f32.gmra.mxu2 %v6305_v49  ;;  %v469_v25 = vld [vmem:[#allocation5 + $0x510] sm:$0xff]  ;;  %2860 = vmatpush.msra.mxu3 %v1045_v6  ;;  %v6327_v6 = vld [vmem:[%s5286_s28 + $0x1e0] sm:$0xff] }
 0x2dc   : > { %4382 = vst [vmem:[%s5564_s20 + $0x4f8] sm:$0xff] %v2135_v10  ;;  %2665 = vmatpush.msra.mxu0 %v469_v25  ;;  %v6317_v10 = vld [vmem:[%s5286_s28 + $0x1c8] sm:$0xff]  ;;  %v6323_v49 = vld [vmem:[%s5286_s28 + $0x1f0] sm:$0xff] }
 0x2dd   : > { %v2007_v26 = vpop.f32.mrf.mxu1  ;;  %2201 = vmatmul.f32.gmra.mxu0 %v6309_v23  ;;  %7848 = vst [vmem:[#allocation21_spill] sm:$0xff] %v6317_v10  ;;  %v841_v25 = vld [vmem:[#allocation5 + $0x10b0] sm:$0xff] }
 0x2de   : > { %v2008_v39 = vadd.f32 %v2007_v26, %v1943_v58  ;;  %2396 = vmatmul.f32.gmra.mxu3 %v6313_v62  ;;  %v2072_v7 = vpop.f32.mrf.mxu2  ;;  %7849 = vst [vmem:[#allocation22_spill] sm:$0xff] %v6323_v49  ;;  %2796 = vmatpush.msra.mxu2 %v841_v25 }
 0x2df   : > { %7850 = vst [vmem:[#allocation23_spill] sm:$0xff] %v6327_v6 }
 0x2e0   : > { %v2073_v24 = vadd.f32 %v2072_v7, %v2008_v39  ;;  %2266 = vmatmul.f32.gmra.mxu1 %v6317_v10  ;;  %v6331_v10 = vld [vmem:[%s5286_s28 + $0x1f8] sm:$0xff]  ;;  %2797 = vmatpush.msra.mxu2 %v829_v30  ;;  %v817_v30 = vld [vmem:[#allocation5 + $0xff0] sm:$0xff] }
 0x2e1   : > { %v2137_v58 = vpop.f32.mrf.mxu3  ;;  %7851 = vst [vmem:[#allocation24_spill] sm:$0xff] %v6331_v10 }
 0x2e2   : > { %v2138_v26 = vadd.f32 %v2137_v58, %v2073_v24  ;;  %v1945_v23 = vpop.f32.mrf.mxu0  ;;  %v457_v24 = vld [vmem:[#allocation5 + $0x4b0] sm:$0xff]  ;;  %v6337_v58 = vperm.slane %v6334_v60, 4  ;;  %2798 = vmatpush.msra.mxu2 %v817_v30 }
 0x2e3   : > { %v1946_v62 = vadd.f32 %v1945_v23, %v6047_v55  ;;  %2334 = vmatmul.f32.gmra.mxu2 %v6323_v49  ;;  %v1033_v55 = vld [vmem:[#allocation5 + $0x16b0] sm:$0xff]  ;;  %2666 = vmatpush.msra.mxu0 %v457_v24  ;;  %v6340_v49 = vld [vmem:[%s5286_s28 + $0x1e8] sm:$0xff] }
 0x2e4   : > { %4394 = vst [vmem:[%s5564_s20 + $0x558] sm:$0xff] %v2138_v26  ;;  %2861 = vmatpush.msra.mxu3 %v1033_v55  ;;  %v445_v24 = vld [vmem:[#allocation5 + $0x450] sm:$0xff] }
 0x2e5   : > { %v2010_v39 = vpop.f32.mrf.mxu1  ;;  %2204 = vmatmul.f32.gmra.mxu0 %v6327_v6  ;;  %v1021_v55 = vld [vmem:[#allocation5 + $0x1650] sm:$0xff] }
 0x2e6   : > { %v2011_v7 = vadd.f32 %v2010_v39, %v1946_v62  ;;  %2399 = vmatmul.f32.gmra.mxu3 %v6331_v10  ;;  %v2075_v23 = vpop.f32.mrf.mxu2  ;;  %v649_v62 = vld [vmem:[#allocation5 + $0xab0] sm:$0xff]  ;;  %2667 = vmatpush.msra.mxu0 %v445_v24 }
 0x2e7   : > { %2731 = vmatpush.msra.mxu1 %v649_v62  ;;  %2862 = vmatpush.msra.mxu3 %v1021_v55  ;;  %v625_v24 = vld [vmem:[#allocation5 + $0x9f0] sm:$0xff] }
 0x2e8   : > { %v2076_v26 = vadd.f32 %v2075_v23, %v2011_v7  ;;  %2269 = vmatmul.f32.gmra.mxu1 %v6340_v49 }
 0x2e9   : > { %v2140_v25 = vpop.f32.mrf.mxu3 }
 0x2ea   : > { %v2141_v39 = vadd.f32 %v2140_v25, %v2076_v26  ;;  %v2160_v10 = vpop.f32.mrf.mxu0 }
 0x2eb   : > { %v2161_v6 = vadd.f32 %v2160_v10, %v6337_v58  ;;  %2549 = vmatmul.f32.vlgmr.msrb.gmra.mxu2 %v6053_v45  ;;  %v637_v10 = vld [vmem:[#allocation5 + $0xa50] sm:$0xff] }
 0x2ec   : > { %4406 = vst [vmem:[%s5564_s20 + $0x5b8] sm:$0xff] %v2141_v39  ;;  %2732 = vmatpush.msra.mxu1 %v637_v10 }
 0x2ed   : > { %v2225_v60 = vpop.f32.mrf.mxu1  ;;  %2419 = vmatmul.f32.vlgmr.msrb.gmra.mxu0 %v6057_v3 }
 0x2ee   : > { %v2226_v7 = vadd.f32 %v2225_v60, %v2161_v6  ;;  %2614 = vmatmul.f32.vlgmr.msrb.gmra.mxu3 %v6061_v40  ;;  %v2290_v23 = vpop.f32.mrf.mxu2  ;;  %v1009_v60 = vld [vmem:[#allocation5 + $0x15f0] sm:$0xff]  ;;  %2733 = vmatpush.msra.mxu1 %v625_v24 }
 0x2ef   : > { %2863 = vmatpush.msra.mxu3 %v1009_v60  ;;  %v985_v60 = vld [vmem:[#allocation5 + $0x1530] sm:$0xff] }
 0x2f0   : > { %v2291_v26 = vadd.f32 %v2290_v23, %v2226_v7  ;;  %2484 = vmatmul.f32.vlgmr.msrb.gmra.mxu1 %v6065_v21  ;;  %v433_v21 = vld [vmem:[#allocation5 + $0x3f0] sm:$0xff] }
 0x2f1   : > { %v2355_v62 = vpop.f32.mrf.mxu3  ;;  %2668 = vmatpush.msra.mxu0 %v433_v21  ;;  %v601_v24 = vld [vmem:[#allocation5 + $0x930] sm:$0xff] }
 0x2f2   : > { %v2356_v45 = vadd.f32 %v2355_v62, %v2291_v26  ;;  %v2163_v25 = vpop.f32.mrf.mxu0  ;;  %v805_v26 = vld [vmem:[#allocation5 + $0xf90] sm:$0xff] }
 0x2f3   : > { %v2164_v3 = vadd.f32 %v2163_v25, %v6337_v58  ;;  %2552 = vmatmul.f32.gmra.mxu2 %v6071_v13  ;;  %v997_v62 = vld [vmem:[#allocation5 + $0x1590] sm:$0xff] }
 0x2f4   : > { %4227 = vst [vmem:[%s5564_s20 + $0x20] sm:$0xff] %v2356_v45  ;;  %2799 = vmatpush.msra.mxu2 %v805_v26  ;;  %2864 = vmatpush.msra.mxu3 %v997_v62  ;;  %v973_v26 = vld [vmem:[#allocation5 + $0x14d0] sm:$0xff] }
 0x2f5   : > { %v2228_v40 = vpop.f32.mrf.mxu1  ;;  %2422 = vmatmul.f32.gmra.mxu0 %v6075_v42 }
 0x2f6   : > { %v2229_v6 = vadd.f32 %v2228_v40, %v2164_v3  ;;  %2617 = vmatmul.f32.gmra.mxu3 %v6079_v16  ;;  %v2293_v39 = vpop.f32.mrf.mxu2  ;;  %v613_v3 = vld [vmem:[#allocation5 + $0x990] sm:$0xff] }
 0x2f7   : > { %2734 = vmatpush.msra.mxu1 %v613_v3  ;;  %2865 = vmatpush.msra.mxu3 %v985_v60  ;;  %v949_v60 = vld [vmem:[#allocation5 + $0x1410] sm:$0xff] }
 0x2f8   : > { %v2294_v7 = vadd.f32 %v2293_v39, %v2229_v6  ;;  %2487 = vmatmul.f32.gmra.mxu1 %v6083_v37  ;;  %v421_v37 = vld [vmem:[#allocation5 + $0x390] sm:$0xff] }
 0x2f9   : > { %v2358_v55 = vpop.f32.mrf.mxu3  ;;  %2669 = vmatpush.msra.mxu0 %v421_v37  ;;  %v793_v6 = vld [vmem:[#allocation5 + $0xf30] sm:$0xff]  ;;  %2735 = vmatpush.msra.mxu1 %v601_v24 }
 0x2fa   : > { %v2359_v13 = vadd.f32 %v2358_v55, %v2294_v7  ;;  %v2166_v23 = vpop.f32.mrf.mxu0  ;;  %2800 = vmatpush.msra.mxu2 %v793_v6  ;;  %2866 = vmatpush.msra.mxu3 %v973_v26  ;;  %v589_v37 = vld [vmem:[#allocation5 + $0x8d0] sm:$0xff] }
 0x2fb   : > { %v2167_v42 = vadd.f32 %v2166_v23, %v6337_v58  ;;  %2555 = vmatmul.f32.gmra.mxu2 %v6089_v28  ;;  %v781_v23 = vld [vmem:[#allocation5 + $0xed0] sm:$0xff]  ;;  %2736 = vmatpush.msra.mxu1 %v589_v37 }
 0x2fc   : > { %4239 = vst [vmem:[%s5564_s20 + $0x80] sm:$0xff] %v2359_v13  ;;  %2801 = vmatpush.msra.mxu2 %v781_v23  ;;  %v565_v24 = vld [vmem:[#allocation5 + $0x810] sm:$0xff] }
 0x2fd   : > { %v2231_v16 = vpop.f32.mrf.mxu1  ;;  %2425 = vmatmul.f32.gmra.mxu0 %v6093_v9  ;;  %v937_v23 = vld [vmem:[#allocation5 + $0x13b0] sm:$0xff] }
 0x2fe   : > { %v2232_v10 = vadd.f32 %v2231_v16, %v2167_v42  ;;  %2620 = vmatmul.f32.gmra.mxu3 %v6097_v2  ;;  %v2296_v45 = vpop.f32.mrf.mxu2 }
 0x300   : > { %v2297_v25 = vadd.f32 %v2296_v45, %v2232_v10  ;;  %2490 = vmatmul.f32.gmra.mxu1 %v6101_v50  ;;  %v409_v50 = vld [vmem:[#allocation5 + $0x330] sm:$0xff] }
 0x301   : > { %v2361_v30 = vpop.f32.mrf.mxu3  ;;  %2670 = vmatpush.msra.mxu0 %v409_v50 }
 0x302   : > { %v2362_v28 = vadd.f32 %v2361_v30, %v2297_v25  ;;  %v2169_v40 = vpop.f32.mrf.mxu0  ;;  %v769_v25 = vld [vmem:[#allocation5 + $0xe70] sm:$0xff] }
 0x303   : > { %v2170_v9 = vadd.f32 %v2169_v40, %v6337_v58  ;;  %2558 = vmatmul.f32.gmra.mxu2 %v6107_v33  ;;  %v961_v30 = vld [vmem:[#allocation5 + $0x1470] sm:$0xff] }
 0x304   : > { %4251 = vst [vmem:[%s5564_s20 + $0xe0] sm:$0xff] %v2362_v28  ;;  %2802 = vmatpush.msra.mxu2 %v769_v25  ;;  %2867 = vmatpush.msra.mxu3 %v961_v30  ;;  %v913_v30 = vld [vmem:[#allocation5 + $0x12f0] sm:$0xff] }
 0x305   : > { %v2234_v2 = vpop.f32.mrf.mxu1  ;;  %2428 = vmatmul.f32.gmra.mxu0 %v6111_v34 }
 0x306   : > { %v2235_v21 = vadd.f32 %v2234_v2, %v2170_v9  ;;  %2623 = vmatmul.f32.gmra.mxu3 %v6115_v15  ;;  %v2299_v39 = vpop.f32.mrf.mxu2  ;;  %v577_v9 = vld [vmem:[#allocation5 + $0x870] sm:$0xff] }
 0x307   : > { %2737 = vmatpush.msra.mxu1 %v577_v9  ;;  %2868 = vmatpush.msra.mxu3 %v949_v60  ;;  %v529_v9 = vld [vmem:[#allocation5 + $0x6f0] sm:$0xff] }
 0x308   : > { %v2300_v7 = vadd.f32 %v2299_v39, %v2235_v21  ;;  %2493 = vmatmul.f32.gmra.mxu1 %v6119_v47  ;;  %v397_v47 = vld [vmem:[#allocation5 + $0x2d0] sm:$0xff] }
 0x309   : > { %v2364_v55 = vpop.f32.mrf.mxu3  ;;  %2671 = vmatpush.msra.mxu0 %v397_v47  ;;  %v757_v21 = vld [vmem:[#allocation5 + $0xe10] sm:$0xff]  ;;  %2738 = vmatpush.msra.mxu1 %v565_v24 }
 0x30a   : > { %v2365_v33 = vadd.f32 %v2364_v55, %v2300_v7  ;;  %v2172_v13 = vpop.f32.mrf.mxu0  ;;  %2803 = vmatpush.msra.mxu2 %v757_v21  ;;  %2869 = vmatpush.msra.mxu3 %v937_v23  ;;  %v553_v47 = vld [vmem:[#allocation5 + $0x7b0] sm:$0xff] }
 0x30b   : > { %v2173_v34 = vadd.f32 %v2172_v13, %v6337_v58  ;;  %2561 = vmatmul.f32.gmra.mxu2 %v6125_v4  ;;  %v745_v13 = vld [vmem:[#allocation5 + $0xdb0] sm:$0xff]  ;;  %2739 = vmatpush.msra.mxu1 %v553_v47 }
 0x30c   : > { %4263 = vst [vmem:[%s5564_s20 + $0x140] sm:$0xff] %v2365_v33  ;;  %2804 = vmatpush.msra.mxu2 %v745_v13  ;;  %v901_v21 = vld [vmem:[#allocation5 + $0x1290] sm:$0xff] }
 0x30d   : > { %v2237_v15 = vpop.f32.mrf.mxu1  ;;  %2431 = vmatmul.f32.gmra.mxu0 %v6129_v19  ;;  %v7853_v23 = vld [vmem:[#allocation12_spill] sm:$0xff] }
 0x30e   : > { %v2238_v42 = vadd.f32 %v2237_v15, %v2173_v34  ;;  %2626 = vmatmul.f32.gmra.mxu3 %v6133_v43  ;;  %v2302_v16 = vpop.f32.mrf.mxu2 }
 0x310   : > { %v2303_v10 = vadd.f32 %v2302_v16, %v2238_v42  ;;  %2496 = vmatmul.f32.gmra.mxu1 %v6137_v61  ;;  %v385_v61 = vld [vmem:[#allocation5 + $0x270] sm:$0xff] }
 0x311   : > { %v2367_v62 = vpop.f32.mrf.mxu3  ;;  %2672 = vmatpush.msra.mxu0 %v385_v61 }
 0x312   : > { %v2368_v4 = vadd.f32 %v2367_v62, %v2303_v10  ;;  %v2175_v45 = vpop.f32.mrf.mxu0  ;;  %v733_v10 = vld [vmem:[#allocation5 + $0xd50] sm:$0xff] }
 0x313   : > { %v2176_v19 = vadd.f32 %v2175_v45, %v6337_v58  ;;  %2564 = vmatmul.f32.gmra.mxu2 %v6143_v32  ;;  %v925_v62 = vld [vmem:[#allocation5 + $0x1350] sm:$0xff] }
 0x314   : > { %4275 = vst [vmem:[%s5564_s20 + $0x1a0] sm:$0xff] %v2368_v4  ;;  %2805 = vmatpush.msra.mxu2 %v733_v10  ;;  %2870 = vmatpush.msra.mxu3 %v925_v62  ;;  %v7855_v10 = vld [vmem:[#allocation14_spill] sm:$0xff] }
 0x315   : > { %v2240_v43 = vpop.f32.mrf.mxu1  ;;  %2434 = vmatmul.f32.gmra.mxu0 %v6147_v36 }
 0x316   : > { %v2241_v3 = vadd.f32 %v2240_v43, %v2176_v19  ;;  %2629 = vmatmul.f32.gmra.mxu3 %v6151_v54  ;;  %v2305_v28 = vpop.f32.mrf.mxu2  ;;  %v541_v19 = vld [vmem:[#allocation5 + $0x750] sm:$0xff] }
 0x317   : > { %2740 = vmatpush.msra.mxu1 %v541_v19  ;;  %2871 = vmatpush.msra.mxu3 %v913_v30  ;;  %v1058_v19 = vld [vmem:[#allocation5 + $0x1778] sm:$0xff] }
 0x318   : > { %v2306_v40 = vadd.f32 %v2305_v28, %v2241_v3  ;;  %2499 = vmatmul.f32.gmra.mxu1 %v6155_v18  ;;  %v373_v18 = vld [vmem:[#allocation5 + $0x210] sm:$0xff]  ;;  %v7859_v30 = vld [vmem:[#allocation18_spill] sm:$0xff] }
 0x319   : > { %v2370_v6 = vpop.f32.mrf.mxu3  ;;  %2673 = vmatpush.msra.mxu0 %v373_v18  ;;  %v721_v3 = vld [vmem:[#allocation5 + $0xcf0] sm:$0xff]  ;;  %2741 = vmatpush.msra.mxu1 %v529_v9  ;;  %v7860_v9 = vld [vmem:[#allocation19_spill] sm:$0xff] }
 0x31a   : > { %v2371_v32 = vadd.f32 %v2370_v6, %v2306_v40  ;;  %v2178_v2 = vpop.f32.mrf.mxu0  ;;  %2806 = vmatpush.msra.mxu2 %v721_v3  ;;  %2872 = vmatpush.msra.mxu3 %v901_v21  ;;  %v517_v18 = vld [vmem:[#allocation5 + $0x690] sm:$0xff] }
 0x31b   : > { %v2179_v36 = vadd.f32 %v2178_v2, %v6337_v58  ;;  %2567 = vmatmul.f32.gmra.mxu2 %v6161_v38  ;;  %v709_v2 = vld [vmem:[#allocation5 + $0xc90] sm:$0xff]  ;;  %2742 = vmatpush.msra.mxu1 %v517_v18 }
 0x31c   : > { %4287 = vst [vmem:[%s5564_s20 + $0x200] sm:$0xff] %v2371_v32  ;;  %2807 = vmatpush.msra.mxu2 %v709_v2 }
 0x31d   : > { %v2243_v54 = vpop.f32.mrf.mxu1  ;;  %2437 = vmatmul.f32.gmra.mxu0 %v6165_v41 }
 0x31e   : > { %v2244_v50 = vadd.f32 %v2243_v54, %v2179_v36  ;;  %2632 = vmatmul.f32.gmra.mxu3 %v6169_v51  ;;  %v2308_v39 = vpop.f32.mrf.mxu2 }
 0x320   : > { %v2309_v7 = vadd.f32 %v2308_v39, %v2244_v50  ;;  %2502 = vmatmul.f32.gmra.mxu1 %v6173_v31  ;;  %v361_v31 = vld [vmem:[#allocation5 + $0x1b0] sm:$0xff] }
 0x321   : > { %v2373_v55 = vpop.f32.mrf.mxu3  ;;  %2674 = vmatpush.msra.mxu0 %v361_v31 }
 0x322   : > { %v2374_v38 = vadd.f32 %v2373_v55, %v2309_v7  ;;  %v2181_v33 = vpop.f32.mrf.mxu0  ;;  %v697_v7 = vld [vmem:[#allocation5 + $0xc30] sm:$0xff] }
 0x323   : > { %v2182_v41 = vadd.f32 %v2181_v33, %v6337_v58  ;;  %2570 = vmatmul.f32.gmra.mxu2 %v6179_v14  ;;  %v889_v55 = vld [vmem:[#allocation5 + $0x1230] sm:$0xff] }
 0x324   : > { %4299 = vst [vmem:[%s5564_s20 + $0x260] sm:$0xff] %v2374_v38  ;;  %2808 = vmatpush.msra.mxu2 %v697_v7  ;;  %2873 = vmatpush.msra.mxu3 %v889_v55 }
 0x325   : > { %v2246_v51 = vpop.f32.mrf.mxu1  ;;  %2440 = vmatmul.f32.gmra.mxu0 %v6183_v27 }
 0x326   : > { %v2247_v34 = vadd.f32 %v2246_v51, %v2182_v41  ;;  %2635 = vmatmul.f32.gmra.mxu3 %v6187_v1  ;;  %v2311_v15 = vpop.f32.mrf.mxu2  ;;  %v505_v41 = vld [vmem:[#allocation5 + $0x630] sm:$0xff] }
 0x327   : > { %2743 = vmatpush.msra.mxu1 %v505_v41  ;;  %v650_v41 = vld [vmem:[#allocation5 + $0xab8] sm:$0xff] }
 0x328   : > { %v2312_v42 = vadd.f32 %v2311_v15, %v2247_v34  ;;  %2505 = vmatmul.f32.gmra.mxu1 %v6191_v57  ;;  %v349_v57 = vld [vmem:[#allocation5 + $0x150] sm:$0xff]  ;;  %v878_v34 = vld [vmem:[#allocation5 + $0x11d8] sm:$0xff] }
 0x329   : > { %v2376_v26 = vpop.f32.mrf.mxu3  ;;  %2675 = vmatpush.msra.mxu0 %v349_v57  ;;  %3053 = vmatpush.msrb.mxu2 %v878_v34  ;;  %v1070_v15 = vld [vmem:[#allocation5 + $0x17d8] sm:$0xff]  ;;  %v7856_v57 = vld [vmem:[#allocation15_spill] sm:$0xff]  ;;  %v6445_v34 = vld [vmem:[%s5286_s28 + $0x10] sm:$0xff] }
 0x32a   : > { %v2377_v14 = vadd.f32 %v2376_v26, %v2312_v42  ;;  %v2184_v16 = vpop.f32.mrf.mxu0  ;;  %3118 = vmatpush.msrb.mxu3 %v1070_v15  ;;  %v7854_v26 = vld [vmem:[#allocation13_spill] sm:$0xff] }
 0x32b   : > { %v2185_v27 = vadd.f32 %v2184_v16, %v6337_v58  ;;  %2573 = vmatmul.f32.gmra.mxu2 %v6197_v63  ;;  %v446_v15 = vld [vmem:[#allocation5 + $0x458] sm:$0xff] }
 0x32c   : > { %4311 = vst [vmem:[%s5564_s20 + $0x2c0] sm:$0xff] %v2377_v14  ;;  %v686_v14 = vld [vmem:[#allocation5 + $0xbd8] sm:$0xff]  ;;  %3119 = vmatpush.msrb.mxu3 %v1058_v19 }
 0x32d   : > { %v2249_v1 = vpop.f32.mrf.mxu1  ;;  %2443 = vmatmul.f32.gmra.mxu0 %v6201_v29  ;;  %2988 = vmatpush.msrb.mxu1 %v686_v14  ;;  %v6457_v14 = vld [vmem:[%s5286_s28 + $0x8] sm:$0xff]  ;;  %v434_v19 = vld [vmem:[#allocation5 + $0x3f8] sm:$0xff] }
 0x32e   : > { %v2250_v37 = vadd.f32 %v2249_v1, %v2185_v27  ;;  %2638 = vmatmul.f32.gmra.mxu3 %v6205_v12  ;;  %v2314_v4 = vpop.f32.mrf.mxu2  ;;  %v866_v1 = vld [vmem:[#allocation5 + $0x1178] sm:$0xff] }
 0x32f   : > { %3054 = vmatpush.msrb.mxu2 %v866_v1  ;;  %v6463_v1 = vld [vmem:[%s5286_s28 + $0x30] sm:$0xff] }
 0x330   : > { %v2315_v45 = vadd.f32 %v2314_v4, %v2250_v37  ;;  %2508 = vmatmul.f32.gmra.mxu1 %v6209_v5  ;;  %v337_v5 = vld [vmem:[#allocation5 + $0xf0] sm:$0xff] }
 0x331   : > { %v2379_v25 = vpop.f32.mrf.mxu3  ;;  %2676 = vmatpush.msra.mxu0 %v337_v5  ;;  %v7857_v4 = vld [vmem:[#allocation16_spill] sm:$0xff] }
 0x332   : > { %v2380_v63 = vadd.f32 %v2379_v25, %v2315_v45  ;;  %v2187_v43 = vpop.f32.mrf.mxu0  ;;  %v482_v45 = vld [vmem:[#allocation5 + $0x578] sm:$0xff] }
 0x333   : > { %v2188_v29 = vadd.f32 %v2187_v43, %v6337_v58  ;;  %2576 = vmatmul.f32.gmra.mxu2 %v6215_v52  ;;  %v7858_v43 = vld [vmem:[#allocation17_spill] sm:$0xff] }
 0x334   : > { %4323 = vst [vmem:[%s5564_s20 + $0x320] sm:$0xff] %v2380_v63 }
 0x335   : > { %v2252_v12 = vpop.f32.mrf.mxu1  ;;  %2446 = vmatmul.f32.gmra.mxu0 %v6219_v20 }
 0x336   : > { %v2253_v61 = vadd.f32 %v2252_v12, %v2188_v29  ;;  %2641 = vmatmul.f32.gmra.mxu3 %v6223_v22  ;;  %v2317_v28 = vpop.f32.mrf.mxu2  ;;  %v674_v29 = vld [vmem:[#allocation5 + $0xb78] sm:$0xff] }
 0x337   : > { %2989 = vmatpush.msrb.mxu1 %v674_v29  ;;  %v6475_v29 = vld [vmem:[%s5286_s28 + $0x28] sm:$0xff] }
 0x338   : > { %v2318_v40 = vadd.f32 %v2317_v28, %v2253_v61  ;;  %2511 = vmatmul.f32.gmra.mxu1 %v6227_v11  ;;  %v325_v11 = vld [vmem:[#allocation5 + $0x90] sm:$0xff]  ;;  %v854_v28 = vld [vmem:[#allocation5 + $0x1118] sm:$0xff] }
 0x339   : > { %v2382_v6 = vpop.f32.mrf.mxu3  ;;  %2677 = vmatpush.msra.mxu0 %v325_v11  ;;  %3055 = vmatpush.msrb.mxu2 %v854_v28  ;;  %v662_v11 = vld [vmem:[#allocation5 + $0xb18] sm:$0xff]  ;;  %v6481_v28 = vld [vmem:[%s5286_s28 + $0x50] sm:$0xff] }
 0x33a   : > { %v2383_v52 = vadd.f32 %v2382_v6, %v2318_v40  ;;  %v2190_v32 = vpop.f32.mrf.mxu0  ;;  %2990 = vmatpush.msrb.mxu1 %v662_v11  ;;  %v6493_v11 = vld [vmem:[%s5286_s28 + $0x48] sm:$0xff] }
 0x33b   : > { %v2191_v20 = vadd.f32 %v2190_v32, %v6337_v58  ;;  %2579 = vmatmul.f32.gmra.mxu2 %v6233_v56  ;;  %v470_v32 = vld [vmem:[#allocation5 + $0x518] sm:$0xff] }
 0x33c   : > { %4335 = vst [vmem:[%s5564_s20 + $0x380] sm:$0xff] %v2383_v52  ;;  %v7861_v52 = vld [vmem:[#allocation20_spill] sm:$0xff]  ;;  %2991 = vmatpush.msrb.mxu1 %v650_v41 }
 0x33d   : > { %v2255_v22 = vpop.f32.mrf.mxu1  ;;  %2449 = vmatmul.f32.gmra.mxu0 %v6237_v35  ;;  %v6511_v41 = vld [vmem:[%s5286_s28 + $0x68] sm:$0xff] }
 0x33e   : > { %v2256_v36 = vadd.f32 %v2255_v22, %v2191_v20  ;;  %2644 = vmatmul.f32.gmra.mxu3 %v6241_v46  ;;  %v2320_v54 = vpop.f32.mrf.mxu2  ;;  %v1046_v20 = vld [vmem:[#allocation5 + $0x1718] sm:$0xff] }
 0x33f   : > { %3120 = vmatpush.msrb.mxu3 %v1046_v20  ;;  %v422_v20 = vld [vmem:[#allocation5 + $0x398] sm:$0xff] }
 0x340   : > { %v2321_v50 = vadd.f32 %v2320_v54, %v2256_v36  ;;  %2514 = vmatmul.f32.gmra.mxu1 %v6245_v53  ;;  %v313_v53 = vld [vmem:[#allocation5 + $0x30] sm:$0xff] }
 0x341   : > { %v2385_v60 = vpop.f32.mrf.mxu3  ;;  %2678 = vmatpush.msra.mxu0 %v313_v53  ;;  %v7862_v36 = vld [vmem:[#allocation21_spill] sm:$0xff] }
 0x342   : > { %v2386_v56 = vadd.f32 %v2385_v60, %v2321_v50  ;;  %v2193_v39 = vpop.f32.mrf.mxu0  ;;  %v7863_v60 = vld [vmem:[#allocation22_spill] sm:$0xff] }
 0x343   : > { %v2194_v35 = vadd.f32 %v2193_v39, %v6337_v58  ;;  %2582 = vmatmul.f32.gmra.mxu2 %v6251_v8  ;;  %v1034_v53 = vld [vmem:[#allocation5 + $0x16b8] sm:$0xff] }
 0x344   : > { %4347 = vst [vmem:[%s5564_s20 + $0x3e0] sm:$0xff] %v2386_v56  ;;  %v842_v56 = vld [vmem:[#allocation5 + $0x10b8] sm:$0xff]  ;;  %3121 = vmatpush.msrb.mxu3 %v1034_v53 }
 0x345   : > { %v2258_v46 = vpop.f32.mrf.mxu1  ;;  %2452 = vmatmul.f32.gmra.mxu0 %v6255_v0  ;;  %3056 = vmatpush.msrb.mxu2 %v842_v56  ;;  %v6499_v56 = vld [vmem:[%s5286_s28 + $0x70] sm:$0xff]  ;;  %v410_v53 = vld [vmem:[#allocation5 + $0x338] sm:$0xff] }
 0x346   : > { %v2259_v24 = vadd.f32 %v2258_v46, %v2194_v35  ;;  %2647 = vmatmul.f32.gmra.mxu3 %v6259_v17  ;;  %v2323_v38 = vpop.f32.mrf.mxu2  ;;  %v7864_v35 = vld [vmem:[#allocation23_spill] sm:$0xff]  ;;  %v7865_v46 = vld [vmem:[#allocation24_spill] sm:$0xff] }
 0x348   : > { %v2324_v33 = vadd.f32 %v2323_v38, %v2259_v24  ;;  %2517 = vmatmul.f32.gmra.mxu1 %v6263_v59  ;;  %v494_v59 = vld [vmem:[#allocation5 + $0x5d8] sm:$0xff] }
 0x349   : > { %v2388_v13 = vpop.f32.mrf.mxu3  ;;  %2923 = vmatpush.msrb.mxu0 %v494_v59  ;;  %v458_v24 = vld [vmem:[#allocation5 + $0x4b8] sm:$0xff] }
 0x34a   : > { %v2389_v8 = vadd.f32 %v2388_v13, %v2324_v33  ;;  %v2196_v51 = vpop.f32.mrf.mxu0  ;;  %v7866_v38 = vld [vmem:[#allocation25_spill] sm:$0xff] }
 0x34b   : > { %v2197_v0 = vadd.f32 %v2196_v51, %v6337_v58  ;;  %2585 = vmatmul.f32.gmra.mxu2 %v6269_v48  ;;  %2924 = vmatpush.msrb.mxu0 %v482_v45  ;;  %v6439_v33 = vperm.slane %v7866_v38, 5  ;;  %v6453_v59 = vld [vmem:[%s5286_s28 + $0x18] sm:$0xff] }
 0x34c   : > { %4359 = vst [vmem:[%s5564_s20 + $0x440] sm:$0xff] %v2389_v8  ;;  %v6471_v45 = vld [vmem:[%s5286_s28 + $0x38] sm:$0xff] }
 0x34d   : > { %v2261_v17 = vpop.f32.mrf.mxu1  ;;  %2455 = vmatmul.f32.gmra.mxu0 %v6273_v44 }
 0x34e   : > { %v2262_v31 = vadd.f32 %v2261_v17, %v2197_v0  ;;  %2650 = vmatmul.f32.gmra.mxu3 %v7853_v23  ;;  %v2326_v42 = vpop.f32.mrf.mxu2  ;;  %2925 = vmatpush.msrb.mxu0 %v470_v32  ;;  %v830_v17 = vld [vmem:[#allocation5 + $0x1058] sm:$0xff]  ;;  %v6449_v23 = vld [vmem:[%s5286_s28] sm:$0xff] }
 0x34f   : > { %3057 = vmatpush.msrb.mxu2 %v830_v17  ;;  %v6489_v32 = vld [vmem:[%s5286_s28 + $0x58] sm:$0xff] }
 0x350   : > { %v2327_v47 = vadd.f32 %v2326_v42, %v2262_v31  ;;  %2520 = vmatmul.f32.gmra.mxu1 %v7854_v26  ;;  %2926 = vmatpush.msrb.mxu0 %v458_v24  ;;  %v1022_v42 = vld [vmem:[#allocation5 + $0x1658] sm:$0xff] }
 0x351   : > { %v2391_v16 = vpop.f32.mrf.mxu3  ;;  %3122 = vmatpush.msrb.mxu3 %v1022_v42  ;;  %v6507_v24 = vld [vmem:[%s5286_s28 + $0x78] sm:$0xff]  ;;  %v6521_v42 = vld [vmem:[%s5286_s28 + $0x80] sm:$0xff] }
 0x352   : > { %v2392_v48 = vadd.f32 %v2391_v16, %v2327_v47  ;;  %v2199_v27 = vpop.f32.mrf.mxu0  ;;  %2927 = vmatpush.msrb.mxu0 %v446_v15  ;;  %v638_v16 = vld [vmem:[#allocation5 + $0xa58] sm:$0xff] }
 0x353   : > { %v2200_v44 = vadd.f32 %v2199_v27, %v6337_v58  ;;  %2588 = vmatmul.f32.gmra.mxu2 %v7855_v10  ;;  %2992 = vmatpush.msrb.mxu1 %v638_v16  ;;  %v398_v16 = vld [vmem:[#allocation5 + $0x2d8] sm:$0xff] }
 0x354   : > { %4371 = vst [vmem:[%s5564_s20 + $0x4a0] sm:$0xff] %v2392_v48  ;;  %2928 = vmatpush.msrb.mxu0 %v434_v19 }
 0x355   : > { %v2264_v37 = vpop.f32.mrf.mxu1  ;;  %2458 = vmatmul.f32.gmra.mxu0 %v7856_v57 }
 0x356   : > { %v2265_v62 = vadd.f32 %v2264_v37, %v2200_v44  ;;  %2653 = vmatmul.f32.gmra.mxu3 %v7857_v4  ;;  %v2329_v25 = vpop.f32.mrf.mxu2  ;;  %v818_v37 = vld [vmem:[#allocation5 + $0xff8] sm:$0xff]  ;;  %2929 = vmatpush.msrb.mxu0 %v422_v20  ;;  %v6547_v20 = vld [vmem:[%s5286_s28 + $0xa8] sm:$0xff] }
 0x357   : > { %3058 = vmatpush.msrb.mxu2 %v818_v37  ;;  %v590_v37 = vld [vmem:[#allocation5 + $0x8d8] sm:$0xff] }
 0x358   : > { %v2330_v63 = vadd.f32 %v2329_v25, %v2265_v62  ;;  %2523 = vmatmul.f32.gmra.mxu1 %v7858_v43  ;;  %v6467_v62 = vld [vmem:[%s5286_s28 + $0x20] sm:$0xff]  ;;  %v1010_v25 = vld [vmem:[#allocation5 + $0x15f8] sm:$0xff]  ;;  %2930 = vmatpush.msrb.mxu0 %v410_v53 }
 0x359   : > { %v2394_v3 = vpop.f32.mrf.mxu3  ;;  %3123 = vmatpush.msrb.mxu3 %v1010_v25  ;;  %v374_v53 = vld [vmem:[#allocation5 + $0x218] sm:$0xff] }
 0x35a   : > { %v2395_v12 = vadd.f32 %v2394_v3, %v2330_v63  ;;  %v2202_v61 = vpop.f32.mrf.mxu0  ;;  %v626_v3 = vld [vmem:[#allocation5 + $0x9f8] sm:$0xff]  ;;  %2931 = vmatpush.msrb.mxu0 %v398_v16 }
 0x35b   : > { %v2203_v5 = vadd.f32 %v2202_v61, %v6337_v58  ;;  %2591 = vmatmul.f32.gmra.mxu2 %v7859_v30  ;;  %2993 = vmatpush.msrb.mxu1 %v626_v3 }
 0x35c   : > { %4383 = vst [vmem:[%s5564_s20 + $0x500] sm:$0xff] %v2395_v12 }
 0x35d   : > { %v2267_v40 = vpop.f32.mrf.mxu1  ;;  %2461 = vmatmul.f32.gmra.mxu0 %v7860_v9 }
 0x35e   : > { %v2268_v6 = vadd.f32 %v2267_v40, %v2203_v5  ;;  %2656 = vmatmul.f32.gmra.mxu3 %v7861_v52  ;;  %v2332_v2 = vpop.f32.mrf.mxu2  ;;  %v806_v40 = vld [vmem:[#allocation5 + $0xf98] sm:$0xff] }
 0x35f   : > { %3059 = vmatpush.msrb.mxu2 %v806_v40  ;;  %v962_v40 = vld [vmem:[#allocation5 + $0x1478] sm:$0xff] }
 0x360   : > { %v2333_v22 = vadd.f32 %v2332_v2, %v2268_v6  ;;  %2526 = vmatmul.f32.gmra.mxu1 %v7862_v36  ;;  %v6485_v6 = vld [vmem:[%s5286_s28 + $0x40] sm:$0xff]  ;;  %v998_v2 = vld [vmem:[#allocation5 + $0x1598] sm:$0xff] }
 0x361   : > { %v2397_v21 = vpop.f32.mrf.mxu3  ;;  %3124 = vmatpush.msrb.mxu3 %v998_v2  ;;  %v578_v2 = vld [vmem:[#allocation5 + $0x878] sm:$0xff] }
 0x362   : > { %v2398_v54 = vadd.f32 %v2397_v21, %v2333_v22  ;;  %v2205_v50 = vpop.f32.mrf.mxu0  ;;  %v614_v21 = vld [vmem:[#allocation5 + $0x998] sm:$0xff] }
 0x363   : > { %v2206_v18 = vadd.f32 %v2205_v50, %v6337_v58  ;;  %2594 = vmatmul.f32.gmra.mxu2 %v7863_v60  ;;  %2994 = vmatpush.msrb.mxu1 %v614_v21 }
 0x364   : > { %4395 = vst [vmem:[%s5564_s20 + $0x560] sm:$0xff] %v2398_v54 }
 0x365   : > { %v2270_v39 = vpop.f32.mrf.mxu1  ;;  %2464 = vmatmul.f32.gmra.mxu0 %v7864_v35 }
 0x366   : > { %v2271_v7 = vadd.f32 %v2270_v39, %v2206_v18  ;;  %2659 = vmatmul.f32.gmra.mxu3 %v7865_v46  ;;  %v2335_v55 = vpop.f32.mrf.mxu2  ;;  %v794_v39 = vld [vmem:[#allocation5 + $0xf38] sm:$0xff] }
 0x367   : > { %3060 = vmatpush.msrb.mxu2 %v794_v39  ;;  %v6557_v39 = vld [vmem:[%s5286_s28 + $0xc0] sm:$0xff] }
 0x368   : > { %v2336_v58 = vadd.f32 %v2335_v55, %v2271_v7  ;;  %2529 = vmatmul.f32.gmra.mxu1 %v6340_v49  ;;  %v6503_v7 = vld [vmem:[%s5286_s28 + $0x60] sm:$0xff]  ;;  %v986_v55 = vld [vmem:[#allocation5 + $0x1538] sm:$0xff] }
 0x369   : > { %v2400_v13 = vpop.f32.mrf.mxu3  ;;  %3125 = vmatpush.msrb.mxu3 %v986_v55  ;;  %v950_v55 = vld [vmem:[#allocation5 + $0x1418] sm:$0xff] }
 0x36a   : > { %v2401_v8 = vadd.f32 %v2400_v13, %v2336_v58  ;;  %v2420_v51 = vpop.f32.mrf.mxu0  ;;  %v602_v13 = vld [vmem:[#allocation5 + $0x938] sm:$0xff] }
 0x36b   : > { %v2421_v0 = vadd.f32 %v2420_v51, %v6439_v33  ;;  %2809 = vmatmul.f32.vlgmr.msra.gmra.mxu2 %v6445_v34  ;;  %2995 = vmatpush.msrb.mxu1 %v602_v13  ;;  %v6565_v13 = vld [vmem:[%s5286_s28 + $0xc8] sm:$0xff] }
 0x36c   : > { %4407 = vst [vmem:[%s5564_s20 + $0x5c0] sm:$0xff] %v2401_v8 }
 0x36d   : > { %v2485_v31 = vpop.f32.mrf.mxu1  ;;  %2679 = vmatmul.f32.vlgmr.msra.gmra.mxu0 %v6449_v23  ;;  %2996 = vmatpush.msrb.mxu1 %v590_v37  ;;  %v362_v37 = vld [vmem:[#allocation5 + $0x1b8] sm:$0xff] }
 0x36e   : > { %v2486_v49 = vadd.f32 %v2485_v31, %v2421_v0  ;;  %2874 = vmatmul.f32.vlgmr.msra.gmra.mxu3 %v6453_v59  ;;  %v2550_v47 = vpop.f32.mrf.mxu2  ;;  %v6517_v31 = vld [vmem:[%s5286_s28 + $0x90] sm:$0xff] }
 0x36f   : > { %2997 = vmatpush.msrb.mxu1 %v578_v2 }
 0x370   : > { %v2551_v26 = vadd.f32 %v2550_v47, %v2486_v49  ;;  %2744 = vmatmul.f32.vlgmr.msra.gmra.mxu1 %v6457_v14  ;;  %v782_v49 = vld [vmem:[#allocation5 + $0xed8] sm:$0xff] }
 0x371   : > { %v2615_v48 = vpop.f32.mrf.mxu3  ;;  %3061 = vmatpush.msrb.mxu2 %v782_v49 }
 0x372   : > { %v2616_v27 = vadd.f32 %v2615_v48, %v2551_v26  ;;  %v2423_v44 = vpop.f32.mrf.mxu0  ;;  %v6525_v26 = vld [vmem:[%s5286_s28 + $0x98] sm:$0xff] }
 0x373   : > { %v2424_v10 = vadd.f32 %v2423_v44, %v6439_v33  ;;  %2812 = vmatmul.f32.gmra.mxu2 %v6463_v1  ;;  %v974_v48 = vld [vmem:[#allocation5 + $0x14d8] sm:$0xff] }
 0x374   : > { %4228 = vst [vmem:[%s5564_s20 + $0x28] sm:$0xff] %v2616_v27  ;;  %3126 = vmatpush.msrb.mxu3 %v974_v48  ;;  %v6575_v48 = vld [vmem:[%s5286_s28 + $0xe0] sm:$0xff] }
 0x375   : > { %v2488_v57 = vpop.f32.mrf.mxu1  ;;  %2682 = vmatmul.f32.gmra.mxu0 %v6467_v62 }
 0x376   : > { %v2489_v4 = vadd.f32 %v2488_v57, %v2424_v10  ;;  %2877 = vmatmul.f32.gmra.mxu3 %v6471_v45  ;;  %v2553_v63 = vpop.f32.mrf.mxu2  ;;  %v6529_v10 = vld [vmem:[%s5286_s28 + $0x88] sm:$0xff] }
 0x377   : > { %3127 = vmatpush.msrb.mxu3 %v962_v40 }
 0x378   : > { %v2554_v43 = vadd.f32 %v2553_v63, %v2489_v4  ;;  %2747 = vmatmul.f32.gmra.mxu1 %v6475_v29  ;;  %v6535_v63 = vld [vmem:[%s5286_s28 + $0xb0] sm:$0xff] }
 0x379   : > { %v2618_v12 = vpop.f32.mrf.mxu3  ;;  %3128 = vmatpush.msrb.mxu3 %v950_v55  ;;  %v542_v55 = vld [vmem:[#allocation5 + $0x758] sm:$0xff] }
 0x37a   : > { %v2619_v61 = vadd.f32 %v2618_v12, %v2554_v43  ;;  %v2426_v5 = vpop.f32.mrf.mxu0  ;;  %v770_v43 = vld [vmem:[#allocation5 + $0xe78] sm:$0xff]  ;;  %v6539_v12 = vld [vmem:[%s5286_s28 + $0xa0] sm:$0xff] }
 0x37b   : > { %v2427_v30 = vadd.f32 %v2426_v5, %v6439_v33  ;;  %2815 = vmatmul.f32.gmra.mxu2 %v6481_v28  ;;  %v6543_v5 = vld [vmem:[%s5286_s28 + $0xb8] sm:$0xff] }
 0x37c   : > { %4240 = vst [vmem:[%s5564_s20 + $0x88] sm:$0xff] %v2619_v61  ;;  %3062 = vmatpush.msrb.mxu2 %v770_v43  ;;  %v554_v43 = vld [vmem:[#allocation5 + $0x7b8] sm:$0xff] }
 0x37d   : > { %v2491_v9 = vpop.f32.mrf.mxu1  ;;  %2685 = vmatmul.f32.gmra.mxu0 %v6485_v6 }
 0x37e   : > { %v2492_v52 = vadd.f32 %v2491_v9, %v2427_v30  ;;  %2880 = vmatmul.f32.gmra.mxu3 %v6489_v32  ;;  %v2556_v22 = vpop.f32.mrf.mxu2  ;;  %v386_v30 = vld [vmem:[#allocation5 + $0x278] sm:$0xff] }
 0x37f   : > { %2932 = vmatpush.msrb.mxu0 %v386_v30 }
 0x380   : > { %v2557_v36 = vadd.f32 %v2556_v22, %v2492_v52  ;;  %2750 = vmatmul.f32.gmra.mxu1 %v6493_v11 }
 0x381   : > { %v2621_v54 = vpop.f32.mrf.mxu3  ;;  %2933 = vmatpush.msrb.mxu0 %v374_v53  ;;  %v6601_v53 = vld [vmem:[%s5286_s28 + $0x108] sm:$0xff] }
 0x382   : > { %v2622_v50 = vadd.f32 %v2621_v54, %v2557_v36  ;;  %v2429_v18 = vpop.f32.mrf.mxu0 }
 0x383   : > { %v2430_v60 = vadd.f32 %v2429_v18, %v6439_v33  ;;  %2818 = vmatmul.f32.gmra.mxu2 %v6499_v56  ;;  %v758_v18 = vld [vmem:[#allocation5 + $0xe18] sm:$0xff]  ;;  %2934 = vmatpush.msrb.mxu0 %v362_v37 }
 0x384   : > { %4252 = vst [vmem:[%s5564_s20 + $0xe8] sm:$0xff] %v2622_v50  ;;  %v6553_v50 = vld [vmem:[%s5286_s28 + $0xd0] sm:$0xff]  ;;  %3063 = vmatpush.msrb.mxu2 %v758_v18  ;;  %v926_v18 = vld [vmem:[#allocation5 + $0x1358] sm:$0xff] }
 0x385   : > { %v2494_v35 = vpop.f32.mrf.mxu1  ;;  %2688 = vmatmul.f32.gmra.mxu0 %v6503_v7  ;;  %v338_v37 = vld [vmem:[#allocation5 + $0xf8] sm:$0xff] }
 0x386   : > { %v2495_v46 = vadd.f32 %v2494_v35, %v2430_v60  ;;  %2883 = vmatmul.f32.gmra.mxu3 %v6507_v24  ;;  %v2559_v38 = vpop.f32.mrf.mxu2 }
 0x388   : > { %v2560_v58 = vadd.f32 %v2559_v38, %v2495_v46  ;;  %2753 = vmatmul.f32.gmra.mxu1 %v6511_v41  ;;  %v6561_v46 = vld [vmem:[%s5286_s28 + $0xd8] sm:$0xff] }
 0x389   : > { %v2624_v8 = vpop.f32.mrf.mxu3 }
 0x38a   : > { %v2625_v51 = vadd.f32 %v2624_v8, %v2560_v58  ;;  %v2432_v0 = vpop.f32.mrf.mxu0  ;;  %v566_v8 = vld [vmem:[#allocation5 + $0x818] sm:$0xff] }
 0x38b   : > { %v2433_v17 = vadd.f32 %v2432_v0, %v6439_v33  ;;  %2821 = vmatmul.f32.gmra.mxu2 %v6517_v31  ;;  %2998 = vmatpush.msrb.mxu1 %v566_v8 }
 0x38c   : > { %4264 = vst [vmem:[%s5564_s20 + $0x148] sm:$0xff] %v2625_v51 }
 0x38d   : > { %v2497_v15 = vpop.f32.mrf.mxu1  ;;  %2691 = vmatmul.f32.gmra.mxu0 %v6521_v42  ;;  %2999 = vmatpush.msrb.mxu1 %v554_v43  ;;  %v6619_v43 = vld [vmem:[%s5286_s28 + $0x128] sm:$0xff] }
 0x38e   : > { %v2498_v47 = vadd.f32 %v2497_v15, %v2433_v17  ;;  %2886 = vmatmul.f32.gmra.mxu3 %v6525_v26  ;;  %v2562_v27 = vpop.f32.mrf.mxu2  ;;  %v6571_v15 = vld [vmem:[%s5286_s28 + $0xf0] sm:$0xff] }
 0x38f   : > { %3000 = vmatpush.msrb.mxu1 %v542_v55  ;;  %v326_v55 = vld [vmem:[#allocation5 + $0x98] sm:$0xff] }
 0x390   : > { %v2563_v44 = vadd.f32 %v2562_v27, %v2498_v47  ;;  %2756 = vmatmul.f32.gmra.mxu1 %v6529_v10  ;;  %v746_v47 = vld [vmem:[#allocation5 + $0xdb8] sm:$0xff] }
 0x391   : > { %v2627_v57 = vpop.f32.mrf.mxu3  ;;  %3064 = vmatpush.msrb.mxu2 %v746_v47  ;;  %v6611_v47 = vld [vmem:[%s5286_s28 + $0x120] sm:$0xff] }
 0x392   : > { %v2628_v4 = vadd.f32 %v2627_v57, %v2563_v44  ;;  %v2435_v19 = vpop.f32.mrf.mxu0  ;;  %v6579_v44 = vld [vmem:[%s5286_s28 + $0xf8] sm:$0xff] }
 0x393   : > { %v2436_v25 = vadd.f32 %v2435_v19, %v6439_v33  ;;  %2824 = vmatmul.f32.gmra.mxu2 %v6535_v63  ;;  %v938_v57 = vld [vmem:[#allocation5 + $0x13b8] sm:$0xff] }
 0x394   : > { %4276 = vst [vmem:[%s5564_s20 + $0x1a8] sm:$0xff] %v2628_v4  ;;  %3129 = vmatpush.msrb.mxu3 %v938_v57  ;;  %v914_v57 = vld [vmem:[#allocation5 + $0x12f8] sm:$0xff] }
 0x395   : > { %v2500_v3 = vpop.f32.mrf.mxu1  ;;  %2694 = vmatmul.f32.gmra.mxu0 %v6539_v12 }
 0x396   : > { %v2501_v61 = vadd.f32 %v2500_v3, %v2436_v25  ;;  %2889 = vmatmul.f32.gmra.mxu3 %v6543_v5  ;;  %v2565_v9 = vpop.f32.mrf.mxu2  ;;  %v6583_v25 = vld [vmem:[%s5286_s28 + $0xe8] sm:$0xff] }
 0x397   : > { %3130 = vmatpush.msrb.mxu3 %v926_v18  ;;  %v6629_v18 = vld [vmem:[%s5286_s28 + $0x140] sm:$0xff] }
 0x398   : > { %v2566_v52 = vadd.f32 %v2565_v9, %v2501_v61  ;;  %2759 = vmatmul.f32.gmra.mxu1 %v6547_v20  ;;  %v6589_v9 = vld [vmem:[%s5286_s28 + $0x110] sm:$0xff] }
 0x399   : > { %v2630_v22 = vpop.f32.mrf.mxu3  ;;  %3131 = vmatpush.msrb.mxu3 %v914_v57 }
 0x39a   : > { %v2631_v36 = vadd.f32 %v2630_v22, %v2566_v52  ;;  %v2438_v21 = vpop.f32.mrf.mxu0  ;;  %v734_v52 = vld [vmem:[#allocation5 + $0xd58] sm:$0xff]  ;;  %v6593_v22 = vld [vmem:[%s5286_s28 + $0x100] sm:$0xff] }
 0x39b   : > { %v2439_v54 = vadd.f32 %v2438_v21, %v6439_v33  ;;  %2827 = vmatmul.f32.gmra.mxu2 %v6553_v50  ;;  %v6597_v21 = vld [vmem:[%s5286_s28 + $0x118] sm:$0xff] }
 0x39c   : > { %4288 = vst [vmem:[%s5564_s20 + $0x208] sm:$0xff] %v2631_v36  ;;  %3065 = vmatpush.msrb.mxu2 %v734_v52 }
 0x39d   : > { %v2503_v60 = vpop.f32.mrf.mxu1  ;;  %2697 = vmatmul.f32.gmra.mxu0 %v6557_v39 }
 0x39e   : > { %v2504_v35 = vadd.f32 %v2503_v60, %v2439_v54  ;;  %2892 = vmatmul.f32.gmra.mxu3 %v6561_v46  ;;  %v2568_v38 = vpop.f32.mrf.mxu2  ;;  %v350_v54 = vld [vmem:[#allocation5 + $0x158] sm:$0xff] }
 0x39f   : > { %2935 = vmatpush.msrb.mxu0 %v350_v54 }
 0x3a0   : > { %v2569_v58 = vadd.f32 %v2568_v38, %v2504_v35  ;;  %2762 = vmatmul.f32.gmra.mxu1 %v6565_v13 }
 0x3a1   : > { %v2633_v51 = vpop.f32.mrf.mxu3  ;;  %2936 = vmatpush.msrb.mxu0 %v338_v37 }
 0x3a2   : > { %v2634_v0 = vadd.f32 %v2633_v51, %v2569_v58  ;;  %v2441_v17 = vpop.f32.mrf.mxu0 }
 0x3a3   : > { %v2442_v49 = vadd.f32 %v2441_v17, %v6439_v33  ;;  %2830 = vmatmul.f32.gmra.mxu2 %v6571_v15  ;;  %v722_v17 = vld [vmem:[#allocation5 + $0xcf8] sm:$0xff]  ;;  %2937 = vmatpush.msrb.mxu0 %v326_v55  ;;  %v6655_v55 = vld [vmem:[%s5286_s28 + $0x168] sm:$0xff] }
 0x3a4   : > { %4300 = vst [vmem:[%s5564_s20 + $0x268] sm:$0xff] %v2634_v0  ;;  %v6607_v0 = vld [vmem:[%s5286_s28 + $0x130] sm:$0xff]  ;;  %3066 = vmatpush.msrb.mxu2 %v722_v17  ;;  %v518_v17 = vld [vmem:[#allocation5 + $0x698] sm:$0xff] }
 0x3a5   : > { %v2506_v16 = vpop.f32.mrf.mxu1  ;;  %2700 = vmatmul.f32.gmra.mxu0 %v6575_v48 }
 0x3a6   : > { %v2507_v27 = vadd.f32 %v2506_v16, %v2442_v49  ;;  %2895 = vmatmul.f32.gmra.mxu3 %v6579_v44  ;;  %v2571_v4 = vpop.f32.mrf.mxu2 }
 0x3a8   : > { %v2572_v19 = vadd.f32 %v2571_v4, %v2507_v27  ;;  %2765 = vmatmul.f32.gmra.mxu1 %v6583_v25  ;;  %v6615_v27 = vld [vmem:[%s5286_s28 + $0x138] sm:$0xff] }
 0x3a9   : > { %v2636_v3 = vpop.f32.mrf.mxu3 }
 0x3aa   : > { %v2637_v61 = vadd.f32 %v2636_v3, %v2572_v19  ;;  %v2444_v30 = vpop.f32.mrf.mxu0  ;;  %v530_v3 = vld [vmem:[#allocation5 + $0x6f8] sm:$0xff] }
 0x3ab   : > { %v2445_v40 = vadd.f32 %v2444_v30, %v6439_v33  ;;  %2833 = vmatmul.f32.gmra.mxu2 %v6589_v9  ;;  %3001 = vmatpush.msrb.mxu1 %v530_v3 }
 0x3ac   : > { %4312 = vst [vmem:[%s5564_s20 + $0x2c8] sm:$0xff] %v2637_v61 }
 0x3ad   : > { %v2509_v2 = vpop.f32.mrf.mxu1  ;;  %2703 = vmatmul.f32.gmra.mxu0 %v6593_v22  ;;  %3002 = vmatpush.msrb.mxu1 %v518_v17 }
 0x3ae   : > { %v2510_v36 = vadd.f32 %v2509_v2, %v2445_v40  ;;  %2898 = vmatmul.f32.gmra.mxu3 %v6597_v21  ;;  %v2574_v60 = vpop.f32.mrf.mxu2  ;;  %v6625_v2 = vld [vmem:[%s5286_s28 + $0x150] sm:$0xff] }
 0x3b0   : > { %v2575_v35 = vadd.f32 %v2574_v60, %v2510_v36  ;;  %2768 = vmatmul.f32.gmra.mxu1 %v6601_v53  ;;  %v710_v36 = vld [vmem:[#allocation5 + $0xc98] sm:$0xff] }
 0x3b1   : > { %v2639_v38 = vpop.f32.mrf.mxu3  ;;  %3067 = vmatpush.msrb.mxu2 %v710_v36  ;;  %v890_v36 = vld [vmem:[#allocation5 + $0x1238] sm:$0xff] }
 0x3b2   : > { %v2640_v58 = vadd.f32 %v2639_v38, %v2575_v35  ;;  %v2447_v8 = vpop.f32.mrf.mxu0  ;;  %v6633_v35 = vld [vmem:[%s5286_s28 + $0x158] sm:$0xff] }
 0x3b3   : > { %v2448_v51 = vadd.f32 %v2447_v8, %v6439_v33  ;;  %2836 = vmatmul.f32.gmra.mxu2 %v6607_v0  ;;  %v902_v38 = vld [vmem:[#allocation5 + $0x1298] sm:$0xff] }
 0x3b4   : > { %4324 = vst [vmem:[%s5564_s20 + $0x328] sm:$0xff] %v2640_v58  ;;  %3132 = vmatpush.msrb.mxu3 %v902_v38  ;;  %v506_v38 = vld [vmem:[#allocation5 + $0x638] sm:$0xff] }
 0x3b5   : > { %v2512_v49 = vpop.f32.mrf.mxu1  ;;  %2706 = vmatmul.f32.gmra.mxu0 %v6611_v47  ;;  %3003 = vmatpush.msrb.mxu1 %v506_v38  ;;  %v6673_v38 = vld [vmem:[%s5286_s28 + $0x188] sm:$0xff] }
 0x3b6   : > { %v2513_v16 = vadd.f32 %v2512_v49, %v2448_v51  ;;  %2901 = vmatmul.f32.gmra.mxu3 %v6615_v27  ;;  %v2577_v4 = vpop.f32.mrf.mxu2  ;;  %v6637_v51 = vld [vmem:[%s5286_s28 + $0x148] sm:$0xff]  ;;  %7868 = vst [vmem:[#allocation13_spill] sm:$0xff] %v6673_v38 }
 0x3b7   : > { %3133 = vmatpush.msrb.mxu3 %v890_v36  ;;  %v1071_v36 = vld [vmem:[#allocation5 + $0x17e0] sm:$0xff] }
 0x3b8   : > { %v2578_v19 = vadd.f32 %v2577_v4, %v2513_v16  ;;  %2771 = vmatmul.f32.gmra.mxu1 %v6619_v43  ;;  %v6643_v4 = vld [vmem:[%s5286_s28 + $0x170] sm:$0xff] }
 0x3b9   : > { %v2642_v61 = vpop.f32.mrf.mxu3  ;;  %3378 = vmatpush.msra.mxu3 %v1071_v36  ;;  %v6683_v36 = vld [vmem:[%s5286_s28 + $0x1a0] sm:$0xff] }
 0x3ba   : > { %v2643_v30 = vadd.f32 %v2642_v61, %v2578_v19  ;;  %v2450_v40 = vpop.f32.mrf.mxu0  ;;  %v698_v19 = vld [vmem:[#allocation5 + $0xc38] sm:$0xff]  ;;  %v6647_v61 = vld [vmem:[%s5286_s28 + $0x160] sm:$0xff]  ;;  %7870 = vst [vmem:[#allocation15_spill] sm:$0xff] %v6683_v36 }
 0x3bb   : > { %v2451_v52 = vadd.f32 %v2450_v40, %v6439_v33  ;;  %2839 = vmatmul.f32.gmra.mxu2 %v6625_v2  ;;  %v6651_v40 = vld [vmem:[%s5286_s28 + $0x178] sm:$0xff] }
 0x3bc   : > { %4336 = vst [vmem:[%s5564_s20 + $0x388] sm:$0xff] %v2643_v30  ;;  %3068 = vmatpush.msrb.mxu2 %v698_v19  ;;  %v6665_v19 = vld [vmem:[%s5286_s28 + $0x180] sm:$0xff] }
 0x3bd   : > { %v2515_v54 = vpop.f32.mrf.mxu1  ;;  %2709 = vmatmul.f32.gmra.mxu0 %v6629_v18 }
 0x3be   : > { %v2516_v60 = vadd.f32 %v2515_v54, %v2451_v52  ;;  %2904 = vmatmul.f32.gmra.mxu3 %v6633_v35  ;;  %v2580_v58 = vpop.f32.mrf.mxu2  ;;  %v314_v52 = vld [vmem:[#allocation5 + $0x38] sm:$0xff] }
 0x3bf   : > { %2938 = vmatpush.msrb.mxu0 %v314_v52  ;;  %v495_v52 = vld [vmem:[#allocation5 + $0x5e0] sm:$0xff] }
 0x3c0   : > { %v2581_v8 = vadd.f32 %v2580_v58, %v2516_v60  ;;  %2774 = vmatmul.f32.gmra.mxu1 %v6637_v51 }
 0x3c1   : > { %v2645_v49 = vpop.f32.mrf.mxu3  ;;  %3183 = vmatpush.msra.mxu0 %v495_v52  ;;  %v867_v52 = vld [vmem:[#allocation5 + $0x1180] sm:$0xff] }
 0x3c2   : > { %v2646_v16 = vadd.f32 %v2645_v49, %v2581_v8  ;;  %v2453_v37 = vpop.f32.mrf.mxu0 }
 0x3c3   : > { %v2454_v57 = vadd.f32 %v2453_v37, %v6439_v33  ;;  %2842 = vmatmul.f32.gmra.mxu2 %v6643_v4  ;;  %v879_v37 = vld [vmem:[#allocation5 + $0x11e0] sm:$0xff] }
 0x3c4   : > { %4348 = vst [vmem:[%s5564_s20 + $0x3e8] sm:$0xff] %v2646_v16  ;;  %v6661_v16 = vld [vmem:[%s5286_s28 + $0x190] sm:$0xff]  ;;  %3313 = vmatpush.msra.mxu2 %v879_v37 }
 0x3c5   : > { %v2518_v3 = vpop.f32.mrf.mxu1  ;;  %2712 = vmatmul.f32.gmra.mxu0 %v6647_v61 }
 0x3c6   : > { %v2519_v30 = vadd.f32 %v2518_v3, %v2454_v57  ;;  %2907 = vmatmul.f32.gmra.mxu3 %v6651_v40  ;;  %v2583_v54 = vpop.f32.mrf.mxu2  ;;  %3314 = vmatpush.msra.mxu2 %v867_v52  ;;  %v675_v52 = vld [vmem:[#allocation5 + $0xb80] sm:$0xff] }
 0x3c8   : > { %v2584_v60 = vadd.f32 %v2583_v54, %v2519_v30  ;;  %2777 = vmatmul.f32.gmra.mxu1 %v6655_v55  ;;  %v6669_v30 = vld [vmem:[%s5286_s28 + $0x198] sm:$0xff] }
 0x3c9   : > { %v2648_v58 = vpop.f32.mrf.mxu3  ;;  %7867 = vst [vmem:[#allocation12_spill] sm:$0xff] %v6669_v30 }
 0x3ca   : > { %v2649_v8 = vadd.f32 %v2648_v58, %v2584_v60  ;;  %v2456_v17 = vpop.f32.mrf.mxu0  ;;  %v687_v58 = vld [vmem:[#allocation5 + $0xbe0] sm:$0xff] }
 0x3cb   : > { %v2457_v49 = vadd.f32 %v2456_v17, %v6439_v33  ;;  %2845 = vmatmul.f32.gmra.mxu2 %v6661_v16  ;;  %3248 = vmatpush.msra.mxu1 %v687_v58  ;;  %v1059_v58 = vld [vmem:[#allocation5 + $0x1780] sm:$0xff] }
 0x3cc   : > { %4360 = vst [vmem:[%s5564_s20 + $0x448] sm:$0xff] %v2649_v8  ;;  %3379 = vmatpush.msra.mxu3 %v1059_v58  ;;  %v6701_v58 = vld [vmem:[%s5286_s28 + $0x1c0] sm:$0xff] }
 0x3cd   : > { %v2521_v57 = vpop.f32.mrf.mxu1  ;;  %2715 = vmatmul.f32.gmra.mxu0 %v6665_v19  ;;  %3249 = vmatpush.msra.mxu1 %v675_v52  ;;  %7874 = vst [vmem:[#allocation19_spill] sm:$0xff] %v6701_v58 }
 0x3ce   : > { %v2522_v3 = vadd.f32 %v2521_v57, %v2457_v49  ;;  %2910 = vmatmul.f32.gmra.mxu3 %v6669_v30  ;;  %v2586_v54 = vpop.f32.mrf.mxu2  ;;  %v6679_v57 = vld [vmem:[%s5286_s28 + $0x1b0] sm:$0xff]  ;;  %v831_v30 = vld [vmem:[#allocation5 + $0x1060] sm:$0xff] }
 0x3cf   : > { %7869 = vst [vmem:[#allocation14_spill] sm:$0xff] %v6679_v57 }
 0x3d0   : > { %v2587_v60 = vadd.f32 %v2586_v54, %v2522_v3  ;;  %2780 = vmatmul.f32.gmra.mxu1 %v6673_v38  ;;  %v6687_v38 = vld [vmem:[%s5286_s28 + $0x1b8] sm:$0xff] }
 0x3d1   : > { %v2651_v8 = vpop.f32.mrf.mxu3  ;;  %7871 = vst [vmem:[#allocation16_spill] sm:$0xff] %v6687_v38 }
 0x3d2   : > { %v2652_v17 = vadd.f32 %v2651_v8, %v2587_v60  ;;  %v2459_v49 = vpop.f32.mrf.mxu0  ;;  %v483_v60 = vld [vmem:[#allocation5 + $0x580] sm:$0xff] }
 0x3d3   : > { %v2460_v37 = vadd.f32 %v2459_v49, %v6439_v33  ;;  %2848 = vmatmul.f32.gmra.mxu2 %v6679_v57  ;;  %3184 = vmatpush.msra.mxu0 %v483_v60  ;;  %v6691_v49 = vld [vmem:[%s5286_s28 + $0x1a8] sm:$0xff]  ;;  %v6697_v57 = vld [vmem:[%s5286_s28 + $0x1d0] sm:$0xff]  ;;  %v855_v60 = vld [vmem:[#allocation5 + $0x1120] sm:$0xff] }
 0x3d4   : > { %4372 = vst [vmem:[%s5564_s20 + $0x4a8] sm:$0xff] %v2652_v17  ;;  %3315 = vmatpush.msra.mxu2 %v855_v60  ;;  %v663_v60 = vld [vmem:[#allocation5 + $0xb20] sm:$0xff] }
 0x3d5   : > { %v2524_v3 = vpop.f32.mrf.mxu1  ;;  %2718 = vmatmul.f32.gmra.mxu0 %v6683_v36  ;;  %7872 = vst [vmem:[#allocation17_spill] sm:$0xff] %v6691_v49  ;;  %3250 = vmatpush.msra.mxu1 %v663_v60  ;;  %v6726_v60 = vld [vmem:[#allocation7] sm:$0xff] }
 0x3d6   : > { %v2525_v54 = vadd.f32 %v2524_v3, %v2460_v37  ;;  %2913 = vmatmul.f32.gmra.mxu3 %v6687_v38  ;;  %v2589_v8 = vpop.f32.mrf.mxu2  ;;  %7873 = vst [vmem:[#allocation18_spill] sm:$0xff] %v6697_v57 }
 0x3d7   : > { %7880 = vst [vmem:[#allocation25_spill] sm:$0xff] %v6726_v60 }
 0x3d8   : > { %v2590_v17 = vadd.f32 %v2589_v8, %v2525_v54  ;;  %2783 = vmatmul.f32.gmra.mxu1 %v6691_v49  ;;  %v6705_v49 = vld [vmem:[%s5286_s28 + $0x1d8] sm:$0xff] }
 0x3d9   : > { %v2654_v37 = vpop.f32.mrf.mxu3  ;;  %7875 = vst [vmem:[#allocation20_spill] sm:$0xff] %v6705_v49 }
 0x3da   : > { %v2655_v3 = vadd.f32 %v2654_v37, %v2590_v17  ;;  %v2462_v36 = vpop.f32.mrf.mxu0  ;;  %v1047_v17 = vld [vmem:[#allocation5 + $0x1720] sm:$0xff] }
 0x3db   : > { %v2463_v38 = vadd.f32 %v2462_v36, %v6439_v33  ;;  %2851 = vmatmul.f32.gmra.mxu2 %v6697_v57  ;;  %v471_v36 = vld [vmem:[#allocation5 + $0x520] sm:$0xff]  ;;  %3380 = vmatpush.msra.mxu3 %v1047_v17  ;;  %v6715_v57 = vld [vmem:[%s5286_s28 + $0x1f0] sm:$0xff] }
 0x3dc   : > { %4384 = vst [vmem:[%s5564_s20 + $0x508] sm:$0xff] %v2655_v3  ;;  %3185 = vmatpush.msra.mxu0 %v471_v36  ;;  %v6709_v3 = vld [vmem:[%s5286_s28 + $0x1c8] sm:$0xff]  ;;  %v843_v36 = vld [vmem:[#allocation5 + $0x10c0] sm:$0xff] }
 0x3dd   : > { %v2527_v54 = vpop.f32.mrf.mxu1  ;;  %2721 = vmatmul.f32.gmra.mxu0 %v6701_v58  ;;  %7876 = vst [vmem:[#allocation21_spill] sm:$0xff] %v6709_v3  ;;  %v6719_v17 = vld [vmem:[%s5286_s28 + $0x1e0] sm:$0xff]  ;;  %3316 = vmatpush.msra.mxu2 %v843_v36 }
 0x3de   : > { %v2528_v8 = vadd.f32 %v2527_v54, %v2463_v38  ;;  %2916 = vmatmul.f32.gmra.mxu3 %v6705_v49  ;;  %v2592_v52 = vpop.f32.mrf.mxu2  ;;  %7877 = vst [vmem:[#allocation22_spill] sm:$0xff] %v6715_v57 }
 0x3df   : > { %7878 = vst [vmem:[#allocation23_spill] sm:$0xff] %v6719_v17  ;;  %3317 = vmatpush.msra.mxu2 %v831_v30  ;;  %v819_v30 = vld [vmem:[#allocation5 + $0x1000] sm:$0xff] }
 0x3e0   : > { %v2593_v37 = vadd.f32 %v2592_v52, %v2528_v8  ;;  %2786 = vmatmul.f32.gmra.mxu1 %v6709_v3  ;;  %v6723_v3 = vld [vmem:[%s5286_s28 + $0x1f8] sm:$0xff] }
 0x3e1   : > { %v2657_v38 = vpop.f32.mrf.mxu3  ;;  %7879 = vst [vmem:[#allocation24_spill] sm:$0xff] %v6723_v3  ;;  %3318 = vmatpush.msra.mxu2 %v819_v30 }
 0x3e2   : > { %v2658_v54 = vadd.f32 %v2657_v38, %v2593_v37  ;;  %v2465_v58 = vpop.f32.mrf.mxu0  ;;  %v459_v37 = vld [vmem:[#allocation5 + $0x4c0] sm:$0xff]  ;;  %v6729_v38 = vperm.slane %v6726_v60, 6 }
 0x3e3   : > { %v2466_v49 = vadd.f32 %v2465_v58, %v6439_v33  ;;  %2854 = vmatmul.f32.gmra.mxu2 %v6715_v57  ;;  %v1035_v33 = vld [vmem:[#allocation5 + $0x16c0] sm:$0xff]  ;;  %3186 = vmatpush.msra.mxu0 %v459_v37  ;;  %v6732_v57 = vld [vmem:[%s5286_s28 + $0x1e8] sm:$0xff] }
 0x3e4   : > { %4396 = vst [vmem:[%s5564_s20 + $0x568] sm:$0xff] %v2658_v54  ;;  %3381 = vmatpush.msra.mxu3 %v1035_v33  ;;  %v447_v37 = vld [vmem:[#allocation5 + $0x460] sm:$0xff] }
 0x3e5   : > { %v2530_v8 = vpop.f32.mrf.mxu1  ;;  %2724 = vmatmul.f32.gmra.mxu0 %v6719_v17  ;;  %v1023_v33 = vld [vmem:[#allocation5 + $0x1660] sm:$0xff] }
 0x3e6   : > { %v2531_v52 = vadd.f32 %v2530_v8, %v2466_v49  ;;  %2919 = vmatmul.f32.gmra.mxu3 %v6723_v3  ;;  %v2595_v58 = vpop.f32.mrf.mxu2  ;;  %v651_v49 = vld [vmem:[#allocation5 + $0xac0] sm:$0xff]  ;;  %3187 = vmatpush.msra.mxu0 %v447_v37 }
 0x3e7   : > { %3251 = vmatpush.msra.mxu1 %v651_v49  ;;  %3382 = vmatpush.msra.mxu3 %v1023_v33  ;;  %v627_v37 = vld [vmem:[#allocation5 + $0xa00] sm:$0xff] }
 0x3e8   : > { %v2596_v54 = vadd.f32 %v2595_v58, %v2531_v52  ;;  %2789 = vmatmul.f32.gmra.mxu1 %v6732_v57 }
 0x3e9   : > { %v2660_v36 = vpop.f32.mrf.mxu3 }
 0x3ea   : > { %v2661_v8 = vadd.f32 %v2660_v36, %v2596_v54  ;;  %v2680_v3 = vpop.f32.mrf.mxu0 }
 0x3eb   : > { %v2681_v17 = vadd.f32 %v2680_v3, %v6729_v38  ;;  %3069 = vmatmul.f32.vlgmr.msrb.gmra.mxu2 %v6445_v34  ;;  %v639_v3 = vld [vmem:[#allocation5 + $0xa60] sm:$0xff] }
 0x3ec   : > { %4408 = vst [vmem:[%s5564_s20 + $0x5c8] sm:$0xff] %v2661_v8  ;;  %3252 = vmatpush.msra.mxu1 %v639_v3 }
 0x3ed   : > { %v2745_v60 = vpop.f32.mrf.mxu1  ;;  %2939 = vmatmul.f32.vlgmr.msrb.gmra.mxu0 %v6449_v23 }
 0x3ee   : > { %v2746_v52 = vadd.f32 %v2745_v60, %v2681_v17  ;;  %3134 = vmatmul.f32.vlgmr.msrb.gmra.mxu3 %v6453_v59  ;;  %v2810_v58 = vpop.f32.mrf.mxu2  ;;  %v1011_v60 = vld [vmem:[#allocation5 + $0x1600] sm:$0xff]  ;;  %3253 = vmatpush.msra.mxu1 %v627_v37 }
 0x3ef   : > { %3383 = vmatpush.msra.mxu3 %v1011_v60  ;;  %v987_v60 = vld [vmem:[#allocation5 + $0x1540] sm:$0xff] }
 0x3f0   : > { %v2811_v54 = vadd.f32 %v2810_v58, %v2746_v52  ;;  %3004 = vmatmul.f32.vlgmr.msrb.gmra.mxu1 %v6457_v14  ;;  %v435_v14 = vld [vmem:[#allocation5 + $0x400] sm:$0xff] }
 0x3f1   : > { %v2875_v49 = vpop.f32.mrf.mxu3  ;;  %3188 = vmatpush.msra.mxu0 %v435_v14  ;;  %v603_v37 = vld [vmem:[#allocation5 + $0x940] sm:$0xff] }
 0x3f2   : > { %v2876_v34 = vadd.f32 %v2875_v49, %v2811_v54  ;;  %v2683_v36 = vpop.f32.mrf.mxu0  ;;  %v807_v54 = vld [vmem:[#allocation5 + $0xfa0] sm:$0xff] }
 0x3f3   : > { %v2684_v23 = vadd.f32 %v2683_v36, %v6729_v38  ;;  %3072 = vmatmul.f32.gmra.mxu2 %v6463_v1  ;;  %v999_v49 = vld [vmem:[#allocation5 + $0x15a0] sm:$0xff] }
 0x3f4   : > { %4229 = vst [vmem:[%s5564_s20 + $0x30] sm:$0xff] %v2876_v34  ;;  %3319 = vmatpush.msra.mxu2 %v807_v54  ;;  %3384 = vmatpush.msra.mxu3 %v999_v49  ;;  %v975_v54 = vld [vmem:[#allocation5 + $0x14e0] sm:$0xff] }
 0x3f5   : > { %v2748_v59 = vpop.f32.mrf.mxu1  ;;  %2942 = vmatmul.f32.gmra.mxu0 %v6467_v62 }
 0x3f6   : > { %v2749_v17 = vadd.f32 %v2748_v59, %v2684_v23  ;;  %3137 = vmatmul.f32.gmra.mxu3 %v6471_v45  ;;  %v2813_v8 = vpop.f32.mrf.mxu2  ;;  %v615_v23 = vld [vmem:[#allocation5 + $0x9a0] sm:$0xff] }
 0x3f7   : > { %3254 = vmatpush.msra.mxu1 %v615_v23  ;;  %3385 = vmatpush.msra.mxu3 %v987_v60  ;;  %v951_v60 = vld [vmem:[#allocation5 + $0x1420] sm:$0xff] }
 0x3f8   : > { %v2814_v52 = vadd.f32 %v2813_v8, %v2749_v17  ;;  %3007 = vmatmul.f32.gmra.mxu1 %v6475_v29  ;;  %v423_v29 = vld [vmem:[#allocation5 + $0x3a0] sm:$0xff] }
 0x3f9   : > { %v2878_v33 = vpop.f32.mrf.mxu3  ;;  %3189 = vmatpush.msra.mxu0 %v423_v29  ;;  %v795_v17 = vld [vmem:[#allocation5 + $0xf40] sm:$0xff]  ;;  %3255 = vmatpush.msra.mxu1 %v603_v37 }
 0x3fa   : > { %v2879_v1 = vadd.f32 %v2878_v33, %v2814_v52  ;;  %v2686_v58 = vpop.f32.mrf.mxu0  ;;  %3320 = vmatpush.msra.mxu2 %v795_v17  ;;  %3386 = vmatpush.msra.mxu3 %v975_v54  ;;  %v591_v29 = vld [vmem:[#allocation5 + $0x8e0] sm:$0xff] }
 0x3fb   : > { %v2687_v62 = vadd.f32 %v2686_v58, %v6729_v38  ;;  %3075 = vmatmul.f32.gmra.mxu2 %v6481_v28  ;;  %v783_v58 = vld [vmem:[#allocation5 + $0xee0] sm:$0xff]  ;;  %3256 = vmatpush.msra.mxu1 %v591_v29 }
 0x3fc   : > { %4241 = vst [vmem:[%s5564_s20 + $0x90] sm:$0xff] %v2879_v1  ;;  %3321 = vmatpush.msra.mxu2 %v783_v58  ;;  %v567_v37 = vld [vmem:[#allocation5 + $0x820] sm:$0xff] }
 0x3fd   : > { %v2751_v45 = vpop.f32.mrf.mxu1  ;;  %2945 = vmatmul.f32.gmra.mxu0 %v6485_v6  ;;  %v939_v58 = vld [vmem:[#allocation5 + $0x13c0] sm:$0xff] }
 0x3fe   : > { %v2752_v3 = vadd.f32 %v2751_v45, %v2687_v62  ;;  %3140 = vmatmul.f32.gmra.mxu3 %v6489_v32  ;;  %v2816_v34 = vpop.f32.mrf.mxu2 }
 0x400   : > { %v2817_v36 = vadd.f32 %v2816_v34, %v2752_v3  ;;  %3010 = vmatmul.f32.gmra.mxu1 %v6493_v11  ;;  %v411_v11 = vld [vmem:[#allocation5 + $0x340] sm:$0xff] }
 0x401   : > { %v2881_v30 = vpop.f32.mrf.mxu3  ;;  %3190 = vmatpush.msra.mxu0 %v411_v11 }
 0x402   : > { %v2882_v28 = vadd.f32 %v2881_v30, %v2817_v36  ;;  %v2689_v59 = vpop.f32.mrf.mxu0  ;;  %v771_v36 = vld [vmem:[#allocation5 + $0xe80] sm:$0xff] }
 0x403   : > { %v2690_v6 = vadd.f32 %v2689_v59, %v6729_v38  ;;  %3078 = vmatmul.f32.gmra.mxu2 %v6499_v56  ;;  %v963_v30 = vld [vmem:[#allocation5 + $0x1480] sm:$0xff] }
 0x404   : > { %4253 = vst [vmem:[%s5564_s20 + $0xf0] sm:$0xff] %v2882_v28  ;;  %3322 = vmatpush.msra.mxu2 %v771_v36  ;;  %3387 = vmatpush.msra.mxu3 %v963_v30  ;;  %v915_v30 = vld [vmem:[#allocation5 + $0x1300] sm:$0xff] }
 0x405   : > { %v2754_v32 = vpop.f32.mrf.mxu1  ;;  %2948 = vmatmul.f32.gmra.mxu0 %v6503_v7 }
 0x406   : > { %v2755_v14 = vadd.f32 %v2754_v32, %v2690_v6  ;;  %3143 = vmatmul.f32.gmra.mxu3 %v6507_v24  ;;  %v2819_v8 = vpop.f32.mrf.mxu2  ;;  %v579_v6 = vld [vmem:[#allocation5 + $0x880] sm:$0xff] }
 0x407   : > { %3257 = vmatpush.msra.mxu1 %v579_v6  ;;  %3388 = vmatpush.msra.mxu3 %v951_v60  ;;  %v531_v6 = vld [vmem:[#allocation5 + $0x700] sm:$0xff] }
 0x408   : > { %v2820_v52 = vadd.f32 %v2819_v8, %v2755_v14  ;;  %3013 = vmatmul.f32.gmra.mxu1 %v6511_v41  ;;  %v399_v41 = vld [vmem:[#allocation5 + $0x2e0] sm:$0xff] }
 0x409   : > { %v2884_v33 = vpop.f32.mrf.mxu3  ;;  %3191 = vmatpush.msra.mxu0 %v399_v41  ;;  %v759_v14 = vld [vmem:[#allocation5 + $0xe20] sm:$0xff]  ;;  %3258 = vmatpush.msra.mxu1 %v567_v37 }
 0x40a   : > { %v2885_v56 = vadd.f32 %v2884_v33, %v2820_v52  ;;  %v2692_v1 = vpop.f32.mrf.mxu0  ;;  %3323 = vmatpush.msra.mxu2 %v759_v14  ;;  %3389 = vmatpush.msra.mxu3 %v939_v58  ;;  %v555_v41 = vld [vmem:[#allocation5 + $0x7c0] sm:$0xff]  ;;  %v7881_v58 = vld [vmem:[#allocation12_spill] sm:$0xff] }
 0x40b   : > { %v2693_v7 = vadd.f32 %v2692_v1, %v6729_v38  ;;  %3081 = vmatmul.f32.gmra.mxu2 %v6517_v31  ;;  %v747_v1 = vld [vmem:[#allocation5 + $0xdc0] sm:$0xff]  ;;  %3259 = vmatpush.msra.mxu1 %v555_v41 }
 0x40c   : > { %4265 = vst [vmem:[%s5564_s20 + $0x150] sm:$0xff] %v2885_v56  ;;  %3324 = vmatpush.msra.mxu2 %v747_v1  ;;  %v903_v14 = vld [vmem:[#allocation5 + $0x12a0] sm:$0xff] }
 0x40d   : > { %v2757_v24 = vpop.f32.mrf.mxu1  ;;  %2951 = vmatmul.f32.gmra.mxu0 %v6521_v42 }
 0x40e   : > { %v2758_v62 = vadd.f32 %v2757_v24, %v2693_v7  ;;  %3146 = vmatmul.f32.gmra.mxu3 %v6525_v26  ;;  %v2822_v45 = vpop.f32.mrf.mxu2 }
 0x410   : > { %v2823_v3 = vadd.f32 %v2822_v45, %v2758_v62  ;;  %3016 = vmatmul.f32.gmra.mxu1 %v6529_v10  ;;  %v387_v10 = vld [vmem:[#allocation5 + $0x280] sm:$0xff] }
 0x411   : > { %v2887_v49 = vpop.f32.mrf.mxu3  ;;  %3192 = vmatpush.msra.mxu0 %v387_v10 }
 0x412   : > { %v2888_v31 = vadd.f32 %v2887_v49, %v2823_v3  ;;  %v2695_v34 = vpop.f32.mrf.mxu0  ;;  %v735_v3 = vld [vmem:[#allocation5 + $0xd60] sm:$0xff] }
 0x413   : > { %v2696_v42 = vadd.f32 %v2695_v34, %v6729_v38  ;;  %3084 = vmatmul.f32.gmra.mxu2 %v6535_v63  ;;  %v927_v49 = vld [vmem:[#allocation5 + $0x1360] sm:$0xff] }
 0x414   : > { %4277 = vst [vmem:[%s5564_s20 + $0x1b0] sm:$0xff] %v2888_v31  ;;  %3325 = vmatpush.msra.mxu2 %v735_v3  ;;  %3390 = vmatpush.msra.mxu3 %v927_v49  ;;  %v7883_v3 = vld [vmem:[#allocation14_spill] sm:$0xff] }
 0x415   : > { %v2760_v26 = vpop.f32.mrf.mxu1  ;;  %2954 = vmatmul.f32.gmra.mxu0 %v6539_v12 }
 0x416   : > { %v2761_v23 = vadd.f32 %v2760_v26, %v2696_v42  ;;  %3149 = vmatmul.f32.gmra.mxu3 %v6543_v5  ;;  %v2825_v28 = vpop.f32.mrf.mxu2  ;;  %v543_v42 = vld [vmem:[#allocation5 + $0x760] sm:$0xff] }
 0x417   : > { %3260 = vmatpush.msra.mxu1 %v543_v42  ;;  %3391 = vmatpush.msra.mxu3 %v915_v30  ;;  %v1060_v42 = vld [vmem:[#allocation5 + $0x1788] sm:$0xff]  ;;  %v7887_v30 = vld [vmem:[#allocation18_spill] sm:$0xff] }
 0x418   : > { %v2826_v59 = vadd.f32 %v2825_v28, %v2761_v23  ;;  %3019 = vmatmul.f32.gmra.mxu1 %v6547_v20  ;;  %v375_v20 = vld [vmem:[#allocation5 + $0x220] sm:$0xff] }
 0x419   : > { %v2890_v17 = vpop.f32.mrf.mxu3  ;;  %3193 = vmatpush.msra.mxu0 %v375_v20  ;;  %v723_v23 = vld [vmem:[#allocation5 + $0xd00] sm:$0xff]  ;;  %3261 = vmatpush.msra.mxu1 %v531_v6 }
 0x41a   : > { %v2891_v63 = vadd.f32 %v2890_v17, %v2826_v59  ;;  %v2698_v32 = vpop.f32.mrf.mxu0  ;;  %3326 = vmatpush.msra.mxu2 %v723_v23  ;;  %3392 = vmatpush.msra.mxu3 %v903_v14  ;;  %v519_v20 = vld [vmem:[#allocation5 + $0x6a0] sm:$0xff] }
 0x41b   : > { %v2699_v12 = vadd.f32 %v2698_v32, %v6729_v38  ;;  %3087 = vmatmul.f32.gmra.mxu2 %v6553_v50  ;;  %v711_v32 = vld [vmem:[#allocation5 + $0xca0] sm:$0xff]  ;;  %3262 = vmatpush.msra.mxu1 %v519_v20 }
 0x41c   : > { %4289 = vst [vmem:[%s5564_s20 + $0x210] sm:$0xff] %v2891_v63  ;;  %3327 = vmatpush.msra.mxu2 %v711_v32  ;;  %v7888_v6 = vld [vmem:[#allocation19_spill] sm:$0xff] }
 0x41d   : > { %v2763_v5 = vpop.f32.mrf.mxu1  ;;  %2957 = vmatmul.f32.gmra.mxu0 %v6557_v39 }
 0x41e   : > { %v2764_v11 = vadd.f32 %v2763_v5, %v2699_v12  ;;  %3152 = vmatmul.f32.gmra.mxu3 %v6561_v46  ;;  %v2828_v8 = vpop.f32.mrf.mxu2 }
 0x420   : > { %v2829_v52 = vadd.f32 %v2828_v8, %v2764_v11  ;;  %3022 = vmatmul.f32.gmra.mxu1 %v6565_v13  ;;  %v363_v13 = vld [vmem:[#allocation5 + $0x1c0] sm:$0xff] }
 0x421   : > { %v2893_v33 = vpop.f32.mrf.mxu3  ;;  %3194 = vmatpush.msra.mxu0 %v363_v13 }
 0x422   : > { %v2894_v50 = vadd.f32 %v2893_v33, %v2829_v52  ;;  %v2701_v56 = vpop.f32.mrf.mxu0  ;;  %v699_v52 = vld [vmem:[#allocation5 + $0xc40] sm:$0xff] }
 0x423   : > { %v2702_v39 = vadd.f32 %v2701_v56, %v6729_v38  ;;  %3090 = vmatmul.f32.gmra.mxu2 %v6571_v15  ;;  %v891_v33 = vld [vmem:[#allocation5 + $0x1240] sm:$0xff] }
 0x424   : > { %4301 = vst [vmem:[%s5564_s20 + $0x270] sm:$0xff] %v2894_v50  ;;  %3328 = vmatpush.msra.mxu2 %v699_v52  ;;  %3393 = vmatpush.msra.mxu3 %v891_v33 }
 0x425   : > { %v2766_v46 = vpop.f32.mrf.mxu1  ;;  %2960 = vmatmul.f32.gmra.mxu0 %v6575_v48 }
 0x426   : > { %v2767_v7 = vadd.f32 %v2766_v46, %v2702_v39  ;;  %3155 = vmatmul.f32.gmra.mxu3 %v6579_v44  ;;  %v2831_v24 = vpop.f32.mrf.mxu2  ;;  %v507_v39 = vld [vmem:[#allocation5 + $0x640] sm:$0xff] }
 0x427   : > { %3263 = vmatpush.msra.mxu1 %v507_v39  ;;  %v652_v39 = vld [vmem:[#allocation5 + $0xac8] sm:$0xff] }
 0x428   : > { %v2832_v62 = vadd.f32 %v2831_v24, %v2767_v7  ;;  %3025 = vmatmul.f32.gmra.mxu1 %v6583_v25  ;;  %v351_v25 = vld [vmem:[#allocation5 + $0x160] sm:$0xff]  ;;  %v880_v7 = vld [vmem:[#allocation5 + $0x11e8] sm:$0xff] }
 0x429   : > { %v2896_v54 = vpop.f32.mrf.mxu3  ;;  %3195 = vmatpush.msra.mxu0 %v351_v25  ;;  %3573 = vmatpush.msrb.mxu2 %v880_v7  ;;  %v1072_v24 = vld [vmem:[#allocation5 + $0x17e8] sm:$0xff]  ;;  %v6837_v7 = vld [vmem:[%s5286_s28 + $0x10] sm:$0xff] }
 0x42a   : > { %v2897_v15 = vadd.f32 %v2896_v54, %v2832_v62  ;;  %v2704_v45 = vpop.f32.mrf.mxu0  ;;  %3638 = vmatpush.msrb.mxu3 %v1072_v24  ;;  %v7882_v54 = vld [vmem:[#allocation13_spill] sm:$0xff]  ;;  %v7884_v25 = vld [vmem:[#allocation15_spill] sm:$0xff] }
 0x42b   : > { %v2705_v48 = vadd.f32 %v2704_v45, %v6729_v38  ;;  %3093 = vmatmul.f32.gmra.mxu2 %v6589_v9  ;;  %v448_v24 = vld [vmem:[#allocation5 + $0x468] sm:$0xff] }
 0x42c   : > { %4313 = vst [vmem:[%s5564_s20 + $0x2d0] sm:$0xff] %v2897_v15  ;;  %v688_v15 = vld [vmem:[#allocation5 + $0xbe8] sm:$0xff]  ;;  %3639 = vmatpush.msrb.mxu3 %v1060_v42 }
 0x42d   : > { %v2769_v44 = vpop.f32.mrf.mxu1  ;;  %2963 = vmatmul.f32.gmra.mxu0 %v6593_v22  ;;  %3508 = vmatpush.msrb.mxu1 %v688_v15  ;;  %v6849_v15 = vld [vmem:[%s5286_s28 + $0x8] sm:$0xff] }
 0x42e   : > { %v2770_v29 = vadd.f32 %v2769_v44, %v2705_v48  ;;  %3158 = vmatmul.f32.gmra.mxu3 %v6597_v21  ;;  %v2834_v31 = vpop.f32.mrf.mxu2  ;;  %v868_v44 = vld [vmem:[#allocation5 + $0x1188] sm:$0xff] }
 0x42f   : > { %3574 = vmatpush.msrb.mxu2 %v868_v44  ;;  %v6855_v44 = vld [vmem:[%s5286_s28 + $0x30] sm:$0xff]  ;;  %v436_v42 = vld [vmem:[#allocation5 + $0x408] sm:$0xff] }
 0x430   : > { %v2835_v34 = vadd.f32 %v2834_v31, %v2770_v29  ;;  %3028 = vmatmul.f32.gmra.mxu1 %v6601_v53  ;;  %v339_v53 = vld [vmem:[#allocation5 + $0x100] sm:$0xff]  ;;  %v7885_v31 = vld [vmem:[#allocation16_spill] sm:$0xff] }
 0x431   : > { %v2899_v36 = vpop.f32.mrf.mxu3  ;;  %3196 = vmatpush.msra.mxu0 %v339_v53 }
 0x432   : > { %v2900_v9 = vadd.f32 %v2899_v36, %v2835_v34  ;;  %v2707_v26 = vpop.f32.mrf.mxu0  ;;  %v484_v34 = vld [vmem:[#allocation5 + $0x588] sm:$0xff] }
 0x433   : > { %v2708_v22 = vadd.f32 %v2707_v26, %v6729_v38  ;;  %3096 = vmatmul.f32.gmra.mxu2 %v6607_v0  ;;  %v7886_v26 = vld [vmem:[#allocation17_spill] sm:$0xff] }
 0x434   : > { %4325 = vst [vmem:[%s5564_s20 + $0x330] sm:$0xff] %v2900_v9 }
 0x435   : > { %v2772_v21 = vpop.f32.mrf.mxu1  ;;  %2966 = vmatmul.f32.gmra.mxu0 %v6611_v47 }
 0x436   : > { %v2773_v10 = vadd.f32 %v2772_v21, %v2708_v22  ;;  %3161 = vmatmul.f32.gmra.mxu3 %v6615_v27  ;;  %v2837_v28 = vpop.f32.mrf.mxu2  ;;  %v676_v22 = vld [vmem:[#allocation5 + $0xb88] sm:$0xff] }
 0x437   : > { %3509 = vmatpush.msrb.mxu1 %v676_v22  ;;  %v6867_v22 = vld [vmem:[%s5286_s28 + $0x28] sm:$0xff] }
 0x438   : > { %v2838_v59 = vadd.f32 %v2837_v28, %v2773_v10  ;;  %3031 = vmatmul.f32.gmra.mxu1 %v6619_v43  ;;  %v327_v43 = vld [vmem:[#allocation5 + $0xa0] sm:$0xff]  ;;  %v856_v28 = vld [vmem:[#allocation5 + $0x1128] sm:$0xff] }
 0x439   : > { %v2902_v17 = vpop.f32.mrf.mxu3  ;;  %3197 = vmatpush.msra.mxu0 %v327_v43  ;;  %3575 = vmatpush.msrb.mxu2 %v856_v28  ;;  %v664_v43 = vld [vmem:[#allocation5 + $0xb28] sm:$0xff]  ;;  %v6873_v28 = vld [vmem:[%s5286_s28 + $0x50] sm:$0xff] }
 0x43a   : > { %v2903_v0 = vadd.f32 %v2902_v17, %v2838_v59  ;;  %v2710_v63 = vpop.f32.mrf.mxu0  ;;  %3510 = vmatpush.msrb.mxu1 %v664_v43  ;;  %v6885_v43 = vld [vmem:[%s5286_s28 + $0x48] sm:$0xff] }
 0x43b   : > { %v2711_v47 = vadd.f32 %v2710_v63, %v6729_v38  ;;  %3099 = vmatmul.f32.gmra.mxu2 %v6625_v2  ;;  %v472_v63 = vld [vmem:[#allocation5 + $0x528] sm:$0xff] }
 0x43c   : > { %4337 = vst [vmem:[%s5564_s20 + $0x390] sm:$0xff] %v2903_v0  ;;  %v7889_v0 = vld [vmem:[#allocation20_spill] sm:$0xff]  ;;  %3511 = vmatpush.msrb.mxu1 %v652_v39 }
 0x43d   : > { %v2775_v27 = vpop.f32.mrf.mxu1  ;;  %2969 = vmatmul.f32.gmra.mxu0 %v6629_v18  ;;  %v6903_v39 = vld [vmem:[%s5286_s28 + $0x68] sm:$0xff] }
 0x43e   : > { %v2776_v12 = vadd.f32 %v2775_v27, %v2711_v47  ;;  %3164 = vmatmul.f32.gmra.mxu3 %v6633_v35  ;;  %v2840_v5 = vpop.f32.mrf.mxu2  ;;  %v1048_v47 = vld [vmem:[#allocation5 + $0x1728] sm:$0xff] }
 0x43f   : > { %3640 = vmatpush.msrb.mxu3 %v1048_v47  ;;  %v424_v47 = vld [vmem:[#allocation5 + $0x3a8] sm:$0xff] }
 0x440   : > { %v2841_v11 = vadd.f32 %v2840_v5, %v2776_v12  ;;  %3034 = vmatmul.f32.gmra.mxu1 %v6637_v51  ;;  %v315_v51 = vld [vmem:[#allocation5 + $0x40] sm:$0xff]  ;;  %v7890_v12 = vld [vmem:[#allocation21_spill] sm:$0xff] }
 0x441   : > { %v2905_v60 = vpop.f32.mrf.mxu3  ;;  %3198 = vmatpush.msra.mxu0 %v315_v51  ;;  %v1036_v51 = vld [vmem:[#allocation5 + $0x16c8] sm:$0xff] }
 0x442   : > { %v2906_v2 = vadd.f32 %v2905_v60, %v2841_v11  ;;  %v2713_v8 = vpop.f32.mrf.mxu0  ;;  %v7891_v60 = vld [vmem:[#allocation22_spill] sm:$0xff]  ;;  %3641 = vmatpush.msrb.mxu3 %v1036_v51  ;;  %v412_v51 = vld [vmem:[#allocation5 + $0x348] sm:$0xff] }
 0x443   : > { %v2714_v18 = vadd.f32 %v2713_v8, %v6729_v38  ;;  %3102 = vmatmul.f32.gmra.mxu2 %v6643_v4 }
 0x444   : > { %4349 = vst [vmem:[%s5564_s20 + $0x3f0] sm:$0xff] %v2906_v2  ;;  %v844_v2 = vld [vmem:[#allocation5 + $0x10c8] sm:$0xff] }
 0x445   : > { %v2778_v35 = vpop.f32.mrf.mxu1  ;;  %2972 = vmatmul.f32.gmra.mxu0 %v6647_v61  ;;  %3576 = vmatpush.msrb.mxu2 %v844_v2  ;;  %v6891_v2 = vld [vmem:[%s5286_s28 + $0x70] sm:$0xff] }
 0x446   : > { %v2779_v37 = vadd.f32 %v2778_v35, %v2714_v18  ;;  %3167 = vmatmul.f32.gmra.mxu3 %v6651_v40  ;;  %v2843_v50 = vpop.f32.mrf.mxu2  ;;  %v7892_v18 = vld [vmem:[#allocation23_spill] sm:$0xff]  ;;  %v7893_v35 = vld [vmem:[#allocation24_spill] sm:$0xff] }
 0x448   : > { %v2844_v56 = vadd.f32 %v2843_v50, %v2779_v37  ;;  %3037 = vmatmul.f32.gmra.mxu1 %v6655_v55  ;;  %v496_v55 = vld [vmem:[#allocation5 + $0x5e8] sm:$0xff]  ;;  %v7894_v50 = vld [vmem:[#allocation25_spill] sm:$0xff] }
 0x449   : > { %v2908_v1 = vpop.f32.mrf.mxu3  ;;  %3443 = vmatpush.msrb.mxu0 %v496_v55  ;;  %v460_v37 = vld [vmem:[#allocation5 + $0x4c8] sm:$0xff]  ;;  %v6845_v55 = vld [vmem:[%s5286_s28 + $0x18] sm:$0xff] }
 0x44a   : > { %v2909_v4 = vadd.f32 %v2908_v1, %v2844_v56  ;;  %v2716_v46 = vpop.f32.mrf.mxu0  ;;  %v6831_v56 = vperm.slane %v7894_v50, 7 }
 0x44b   : > { %v2717_v61 = vadd.f32 %v2716_v46, %v6729_v38  ;;  %3105 = vmatmul.f32.gmra.mxu2 %v6661_v16  ;;  %3444 = vmatpush.msrb.mxu0 %v484_v34  ;;  %v6863_v34 = vld [vmem:[%s5286_s28 + $0x38] sm:$0xff] }
 0x44c   : > { %4361 = vst [vmem:[%s5564_s20 + $0x450] sm:$0xff] %v2909_v4 }
 0x44d   : > { %v2781_v40 = vpop.f32.mrf.mxu1  ;;  %2975 = vmatmul.f32.gmra.mxu0 %v6665_v19 }
 0x44e   : > { %v2782_v13 = vadd.f32 %v2781_v40, %v2717_v61  ;;  %3170 = vmatmul.f32.gmra.mxu3 %v7881_v58  ;;  %v2846_v62 = vpop.f32.mrf.mxu2  ;;  %3445 = vmatpush.msrb.mxu0 %v472_v63  ;;  %v832_v40 = vld [vmem:[#allocation5 + $0x1068] sm:$0xff]  ;;  %v6841_v58 = vld [vmem:[%s5286_s28] sm:$0xff]  ;;  %v6881_v63 = vld [vmem:[%s5286_s28 + $0x58] sm:$0xff] }
 0x44f   : > { %3577 = vmatpush.msrb.mxu2 %v832_v40 }
 0x450   : > { %v2847_v41 = vadd.f32 %v2846_v62, %v2782_v13  ;;  %3040 = vmatmul.f32.gmra.mxu1 %v7882_v54  ;;  %3446 = vmatpush.msrb.mxu0 %v460_v37  ;;  %v1024_v62 = vld [vmem:[#allocation5 + $0x1668] sm:$0xff]  ;;  %v6899_v37 = vld [vmem:[%s5286_s28 + $0x78] sm:$0xff] }
 0x451   : > { %v2911_v45 = vpop.f32.mrf.mxu3  ;;  %3642 = vmatpush.msrb.mxu3 %v1024_v62  ;;  %v6913_v62 = vld [vmem:[%s5286_s28 + $0x80] sm:$0xff] }
 0x452   : > { %v2912_v16 = vadd.f32 %v2911_v45, %v2847_v41  ;;  %v2719_v48 = vpop.f32.mrf.mxu0  ;;  %3447 = vmatpush.msrb.mxu0 %v448_v24  ;;  %v640_v45 = vld [vmem:[#allocation5 + $0xa68] sm:$0xff] }
 0x453   : > { %v2720_v19 = vadd.f32 %v2719_v48, %v6729_v38  ;;  %3108 = vmatmul.f32.gmra.mxu2 %v7883_v3  ;;  %3512 = vmatpush.msrb.mxu1 %v640_v45  ;;  %v400_v45 = vld [vmem:[#allocation5 + $0x2e8] sm:$0xff] }
 0x454   : > { %4373 = vst [vmem:[%s5564_s20 + $0x4b0] sm:$0xff] %v2912_v16  ;;  %3448 = vmatpush.msrb.mxu0 %v436_v42 }
 0x455   : > { %v2784_v29 = vpop.f32.mrf.mxu1  ;;  %2978 = vmatmul.f32.gmra.mxu0 %v7884_v25 }
 0x456   : > { %v2785_v49 = vadd.f32 %v2784_v29, %v2720_v19  ;;  %3173 = vmatmul.f32.gmra.mxu3 %v7885_v31  ;;  %v2849_v36 = vpop.f32.mrf.mxu2  ;;  %v820_v29 = vld [vmem:[#allocation5 + $0x1008] sm:$0xff]  ;;  %3449 = vmatpush.msrb.mxu0 %v424_v47 }
 0x457   : > { %3578 = vmatpush.msrb.mxu2 %v820_v29  ;;  %v592_v29 = vld [vmem:[#allocation5 + $0x8e8] sm:$0xff] }
 0x458   : > { %v2850_v9 = vadd.f32 %v2849_v36, %v2785_v49  ;;  %3043 = vmatmul.f32.gmra.mxu1 %v7886_v26  ;;  %v6859_v49 = vld [vmem:[%s5286_s28 + $0x20] sm:$0xff]  ;;  %v1012_v36 = vld [vmem:[#allocation5 + $0x1608] sm:$0xff]  ;;  %3450 = vmatpush.msrb.mxu0 %v412_v51 }
 0x459   : > { %v2914_v23 = vpop.f32.mrf.mxu3  ;;  %3643 = vmatpush.msrb.mxu3 %v1012_v36  ;;  %v6939_v47 = vld [vmem:[%s5286_s28 + $0xa8] sm:$0xff] }
 0x45a   : > { %v2915_v21 = vadd.f32 %v2914_v23, %v2850_v9  ;;  %v2722_v10 = vpop.f32.mrf.mxu0  ;;  %v628_v23 = vld [vmem:[#allocation5 + $0xa08] sm:$0xff]  ;;  %3451 = vmatpush.msrb.mxu0 %v400_v45 }
 0x45b   : > { %v2723_v53 = vadd.f32 %v2722_v10, %v6729_v38  ;;  %3111 = vmatmul.f32.gmra.mxu2 %v7887_v30  ;;  %3513 = vmatpush.msrb.mxu1 %v628_v23  ;;  %v376_v51 = vld [vmem:[#allocation5 + $0x228] sm:$0xff] }
 0x45c   : > { %4385 = vst [vmem:[%s5564_s20 + $0x510] sm:$0xff] %v2915_v21 }
 0x45d   : > { %v2787_v59 = vpop.f32.mrf.mxu1  ;;  %2981 = vmatmul.f32.gmra.mxu0 %v7888_v6 }
 0x45e   : > { %v2788_v17 = vadd.f32 %v2787_v59, %v2723_v53  ;;  %3176 = vmatmul.f32.gmra.mxu3 %v7889_v0  ;;  %v2852_v32 = vpop.f32.mrf.mxu2  ;;  %v808_v59 = vld [vmem:[#allocation5 + $0xfa8] sm:$0xff] }
 0x45f   : > { %3579 = vmatpush.msrb.mxu2 %v808_v59  ;;  %v964_v59 = vld [vmem:[#allocation5 + $0x1488] sm:$0xff] }
 0x460   : > { %v2853_v27 = vadd.f32 %v2852_v32, %v2788_v17  ;;  %3046 = vmatmul.f32.gmra.mxu1 %v7890_v12  ;;  %v6877_v17 = vld [vmem:[%s5286_s28 + $0x40] sm:$0xff]  ;;  %v1000_v32 = vld [vmem:[#allocation5 + $0x15a8] sm:$0xff] }
 0x461   : > { %v2917_v14 = vpop.f32.mrf.mxu3  ;;  %3644 = vmatpush.msrb.mxu3 %v1000_v32  ;;  %v580_v32 = vld [vmem:[#allocation5 + $0x888] sm:$0xff] }
 0x462   : > { %v2918_v5 = vadd.f32 %v2917_v14, %v2853_v27  ;;  %v2725_v11 = vpop.f32.mrf.mxu0  ;;  %v616_v14 = vld [vmem:[#allocation5 + $0x9a8] sm:$0xff] }
 0x463   : > { %v2726_v20 = vadd.f32 %v2725_v11, %v6729_v38  ;;  %3114 = vmatmul.f32.gmra.mxu2 %v7891_v60  ;;  %3514 = vmatpush.msrb.mxu1 %v616_v14 }
 0x464   : > { %4397 = vst [vmem:[%s5564_s20 + $0x570] sm:$0xff] %v2918_v5 }
 0x465   : > { %v2790_v8 = vpop.f32.mrf.mxu1  ;;  %2984 = vmatmul.f32.gmra.mxu0 %v7892_v18 }
 0x466   : > { %v2791_v52 = vadd.f32 %v2790_v8, %v2726_v20  ;;  %3179 = vmatmul.f32.gmra.mxu3 %v7893_v35  ;;  %v2855_v33 = vpop.f32.mrf.mxu2  ;;  %v796_v8 = vld [vmem:[#allocation5 + $0xf48] sm:$0xff] }
 0x467   : > { %3580 = vmatpush.msrb.mxu2 %v796_v8  ;;  %v6949_v8 = vld [vmem:[%s5286_s28 + $0xc0] sm:$0xff] }
 0x468   : > { %v2856_v38 = vadd.f32 %v2855_v33, %v2791_v52  ;;  %3049 = vmatmul.f32.gmra.mxu1 %v6732_v57  ;;  %v6895_v52 = vld [vmem:[%s5286_s28 + $0x60] sm:$0xff]  ;;  %v988_v33 = vld [vmem:[#allocation5 + $0x1548] sm:$0xff] }
 0x469   : > { %v2920_v1 = vpop.f32.mrf.mxu3  ;;  %3645 = vmatpush.msrb.mxu3 %v988_v33  ;;  %v952_v33 = vld [vmem:[#allocation5 + $0x1428] sm:$0xff] }
 0x46a   : > { %v2921_v4 = vadd.f32 %v2920_v1, %v2856_v38  ;;  %v2940_v46 = vpop.f32.mrf.mxu0  ;;  %v604_v1 = vld [vmem:[#allocation5 + $0x948] sm:$0xff] }
 0x46b   : > { %v2941_v61 = vadd.f32 %v2940_v46, %v6831_v56  ;;  %3329 = vmatmul.f32.vlgmr.msra.gmra.mxu2 %v6837_v7  ;;  %3515 = vmatpush.msrb.mxu1 %v604_v1  ;;  %v6957_v1 = vld [vmem:[%s5286_s28 + $0xc8] sm:$0xff] }
 0x46c   : > { %4409 = vst [vmem:[%s5564_s20 + $0x5d0] sm:$0xff] %v2921_v4 }
 0x46d   : > { %v3005_v13 = vpop.f32.mrf.mxu1  ;;  %3199 = vmatmul.f32.vlgmr.msra.gmra.mxu0 %v6841_v58  ;;  %3516 = vmatpush.msrb.mxu1 %v592_v29  ;;  %v364_v29 = vld [vmem:[#allocation5 + $0x1c8] sm:$0xff] }
 0x46e   : > { %v3006_v57 = vadd.f32 %v3005_v13, %v2941_v61  ;;  %3394 = vmatmul.f32.vlgmr.msra.gmra.mxu3 %v6845_v55  ;;  %v3070_v41 = vpop.f32.mrf.mxu2  ;;  %v6909_v13 = vld [vmem:[%s5286_s28 + $0x90] sm:$0xff] }
 0x46f   : > { %3517 = vmatpush.msrb.mxu1 %v580_v32 }
 0x470   : > { %v3071_v54 = vadd.f32 %v3070_v41, %v3006_v57  ;;  %3264 = vmatmul.f32.vlgmr.msra.gmra.mxu1 %v6849_v15  ;;  %v784_v57 = vld [vmem:[#allocation5 + $0xee8] sm:$0xff] }
 0x471   : > { %v3135_v16 = vpop.f32.mrf.mxu3  ;;  %3581 = vmatpush.msrb.mxu2 %v784_v57 }
 0x472   : > { %v3136_v48 = vadd.f32 %v3135_v16, %v3071_v54  ;;  %v2943_v19 = vpop.f32.mrf.mxu0  ;;  %v6917_v54 = vld [vmem:[%s5286_s28 + $0x98] sm:$0xff]  ;;  %v976_v16 = vld [vmem:[#allocation5 + $0x14e8] sm:$0xff] }
 0x473   : > { %v2944_v3 = vadd.f32 %v2943_v19, %v6831_v56  ;;  %3332 = vmatmul.f32.gmra.mxu2 %v6855_v44  ;;  %3646 = vmatpush.msrb.mxu3 %v976_v16  ;;  %v6967_v16 = vld [vmem:[%s5286_s28 + $0xe0] sm:$0xff] }
 0x474   : > { %4230 = vst [vmem:[%s5564_s20 + $0x38] sm:$0xff] %v3136_v48 }
 0x475   : > { %v3008_v25 = vpop.f32.mrf.mxu1  ;;  %3202 = vmatmul.f32.gmra.mxu0 %v6859_v49  ;;  %3647 = vmatpush.msrb.mxu3 %v964_v59 }
 0x476   : > { %v3009_v31 = vadd.f32 %v3008_v25, %v2944_v3  ;;  %3397 = vmatmul.f32.gmra.mxu3 %v6863_v34  ;;  %v3073_v9 = vpop.f32.mrf.mxu2  ;;  %v6921_v3 = vld [vmem:[%s5286_s28 + $0x88] sm:$0xff] }
 0x477   : > { %3648 = vmatpush.msrb.mxu3 %v952_v33  ;;  %v544_v33 = vld [vmem:[#allocation5 + $0x768] sm:$0xff] }
 0x478   : > { %v3074_v26 = vadd.f32 %v3073_v9, %v3009_v31  ;;  %3267 = vmatmul.f32.gmra.mxu1 %v6867_v22  ;;  %v6927_v9 = vld [vmem:[%s5286_s28 + $0xb0] sm:$0xff] }
 0x479   : > { %v3138_v21 = vpop.f32.mrf.mxu3 }
 0x47a   : > { %v3139_v10 = vadd.f32 %v3138_v21, %v3074_v26  ;;  %v2946_v53 = vpop.f32.mrf.mxu0  ;;  %v772_v26 = vld [vmem:[#allocation5 + $0xe88] sm:$0xff]  ;;  %v6931_v21 = vld [vmem:[%s5286_s28 + $0xa0] sm:$0xff] }
 0x47b   : > { %v2947_v30 = vadd.f32 %v2946_v53, %v6831_v56  ;;  %3335 = vmatmul.f32.gmra.mxu2 %v6873_v28  ;;  %v6935_v53 = vld [vmem:[%s5286_s28 + $0xb8] sm:$0xff] }
 0x47c   : > { %4242 = vst [vmem:[%s5564_s20 + $0x98] sm:$0xff] %v3139_v10  ;;  %3582 = vmatpush.msrb.mxu2 %v772_v26  ;;  %v556_v26 = vld [vmem:[#allocation5 + $0x7c8] sm:$0xff] }
 0x47d   : > { %v3011_v6 = vpop.f32.mrf.mxu1  ;;  %3205 = vmatmul.f32.gmra.mxu0 %v6877_v17 }
 0x47e   : > { %v3012_v0 = vadd.f32 %v3011_v6, %v2947_v30  ;;  %3400 = vmatmul.f32.gmra.mxu3 %v6881_v63  ;;  %v3076_v27 = vpop.f32.mrf.mxu2  ;;  %v388_v30 = vld [vmem:[#allocation5 + $0x288] sm:$0xff] }
 0x47f   : > { %3452 = vmatpush.msrb.mxu0 %v388_v30 }
 0x480   : > { %v3077_v12 = vadd.f32 %v3076_v27, %v3012_v0  ;;  %3270 = vmatmul.f32.gmra.mxu1 %v6885_v43 }
 0x481   : > { %v3141_v5 = vpop.f32.mrf.mxu3  ;;  %3453 = vmatpush.msrb.mxu0 %v376_v51  ;;  %v6993_v51 = vld [vmem:[%s5286_s28 + $0x108] sm:$0xff] }
 0x482   : > { %v3142_v11 = vadd.f32 %v3141_v5, %v3077_v12  ;;  %v2949_v20 = vpop.f32.mrf.mxu0 }
 0x483   : > { %v2950_v60 = vadd.f32 %v2949_v20, %v6831_v56  ;;  %3338 = vmatmul.f32.gmra.mxu2 %v6891_v2  ;;  %v760_v20 = vld [vmem:[#allocation5 + $0xe28] sm:$0xff]  ;;  %3454 = vmatpush.msrb.mxu0 %v364_v29 }
 0x484   : > { %4254 = vst [vmem:[%s5564_s20 + $0xf8] sm:$0xff] %v3142_v11  ;;  %v6945_v11 = vld [vmem:[%s5286_s28 + $0xd0] sm:$0xff]  ;;  %3583 = vmatpush.msrb.mxu2 %v760_v20  ;;  %v928_v20 = vld [vmem:[#allocation5 + $0x1368] sm:$0xff] }
 0x485   : > { %v3014_v18 = vpop.f32.mrf.mxu1  ;;  %3208 = vmatmul.f32.gmra.mxu0 %v6895_v52  ;;  %v340_v29 = vld [vmem:[#allocation5 + $0x108] sm:$0xff] }
 0x486   : > { %v3015_v35 = vadd.f32 %v3014_v18, %v2950_v60  ;;  %3403 = vmatmul.f32.gmra.mxu3 %v6899_v37  ;;  %v3079_v50 = vpop.f32.mrf.mxu2 }
 0x488   : > { %v3080_v38 = vadd.f32 %v3079_v50, %v3015_v35  ;;  %3273 = vmatmul.f32.gmra.mxu1 %v6903_v39  ;;  %v6953_v35 = vld [vmem:[%s5286_s28 + $0xd8] sm:$0xff] }
 0x489   : > { %v3144_v4 = vpop.f32.mrf.mxu3 }
 0x48a   : > { %v3145_v46 = vadd.f32 %v3144_v4, %v3080_v38  ;;  %v2952_v61 = vpop.f32.mrf.mxu0  ;;  %v568_v4 = vld [vmem:[#allocation5 + $0x828] sm:$0xff] }
 0x48b   : > { %v2953_v40 = vadd.f32 %v2952_v61, %v6831_v56  ;;  %3341 = vmatmul.f32.gmra.mxu2 %v6909_v13  ;;  %3518 = vmatpush.msrb.mxu1 %v568_v4 }
 0x48c   : > { %4266 = vst [vmem:[%s5564_s20 + $0x158] sm:$0xff] %v3145_v46 }
 0x48d   : > { %v3017_v24 = vpop.f32.mrf.mxu1  ;;  %3211 = vmatmul.f32.gmra.mxu0 %v6913_v62  ;;  %3519 = vmatpush.msrb.mxu1 %v556_v26  ;;  %v7011_v26 = vld [vmem:[%s5286_s28 + $0x128] sm:$0xff] }
 0x48e   : > { %v3018_v41 = vadd.f32 %v3017_v24, %v2953_v40  ;;  %3406 = vmatmul.f32.gmra.mxu3 %v6917_v54  ;;  %v3082_v48 = vpop.f32.mrf.mxu2  ;;  %v6963_v24 = vld [vmem:[%s5286_s28 + $0xf0] sm:$0xff] }
 0x48f   : > { %3520 = vmatpush.msrb.mxu1 %v544_v33  ;;  %v328_v33 = vld [vmem:[#allocation5 + $0xa8] sm:$0xff] }
 0x490   : > { %v3083_v19 = vadd.f32 %v3082_v48, %v3018_v41  ;;  %3276 = vmatmul.f32.gmra.mxu1 %v6921_v3  ;;  %v748_v41 = vld [vmem:[#allocation5 + $0xdc8] sm:$0xff] }
 0x491   : > { %v3147_v25 = vpop.f32.mrf.mxu3  ;;  %3584 = vmatpush.msrb.mxu2 %v748_v41  ;;  %v7003_v41 = vld [vmem:[%s5286_s28 + $0x120] sm:$0xff] }
 0x492   : > { %v3148_v31 = vadd.f32 %v3147_v25, %v3083_v19  ;;  %v2955_v42 = vpop.f32.mrf.mxu0  ;;  %v6971_v19 = vld [vmem:[%s5286_s28 + $0xf8] sm:$0xff]  ;;  %v940_v25 = vld [vmem:[#allocation5 + $0x13c8] sm:$0xff] }
 0x493   : > { %v2956_v36 = vadd.f32 %v2955_v42, %v6831_v56  ;;  %3344 = vmatmul.f32.gmra.mxu2 %v6927_v9  ;;  %3649 = vmatpush.msrb.mxu3 %v940_v25  ;;  %v916_v25 = vld [vmem:[#allocation5 + $0x1308] sm:$0xff] }
 0x494   : > { %4278 = vst [vmem:[%s5564_s20 + $0x1b8] sm:$0xff] %v3148_v31 }
 0x495   : > { %v3020_v23 = vpop.f32.mrf.mxu1  ;;  %3214 = vmatmul.f32.gmra.mxu0 %v6931_v21  ;;  %3650 = vmatpush.msrb.mxu3 %v928_v20  ;;  %v7021_v20 = vld [vmem:[%s5286_s28 + $0x140] sm:$0xff] }
 0x496   : > { %v3021_v10 = vadd.f32 %v3020_v23, %v2956_v36  ;;  %3409 = vmatmul.f32.gmra.mxu3 %v6935_v53  ;;  %v3085_v6 = vpop.f32.mrf.mxu2  ;;  %v6975_v36 = vld [vmem:[%s5286_s28 + $0xe8] sm:$0xff] }
 0x497   : > { %3651 = vmatpush.msrb.mxu3 %v916_v25 }
 0x498   : > { %v3086_v0 = vadd.f32 %v3085_v6, %v3021_v10  ;;  %3279 = vmatmul.f32.gmra.mxu1 %v6939_v47  ;;  %v6981_v6 = vld [vmem:[%s5286_s28 + $0x110] sm:$0xff] }
 0x499   : > { %v3150_v27 = vpop.f32.mrf.mxu3 }
 0x49a   : > { %v3151_v12 = vadd.f32 %v3150_v27, %v3086_v0  ;;  %v2958_v14 = vpop.f32.mrf.mxu0  ;;  %v736_v0 = vld [vmem:[#allocation5 + $0xd68] sm:$0xff]  ;;  %v6985_v27 = vld [vmem:[%s5286_s28 + $0x100] sm:$0xff] }
 0x49b   : > { %v2959_v5 = vadd.f32 %v2958_v14, %v6831_v56  ;;  %3347 = vmatmul.f32.gmra.mxu2 %v6945_v11  ;;  %v6989_v14 = vld [vmem:[%s5286_s28 + $0x118] sm:$0xff] }
 0x49c   : > { %4290 = vst [vmem:[%s5564_s20 + $0x218] sm:$0xff] %v3151_v12  ;;  %3585 = vmatpush.msrb.mxu2 %v736_v0 }
 0x49d   : > { %v3023_v60 = vpop.f32.mrf.mxu1  ;;  %3217 = vmatmul.f32.gmra.mxu0 %v6949_v8 }
 0x49e   : > { %v3024_v18 = vadd.f32 %v3023_v60, %v2959_v5  ;;  %3412 = vmatmul.f32.gmra.mxu3 %v6953_v35  ;;  %v3088_v50 = vpop.f32.mrf.mxu2  ;;  %v352_v5 = vld [vmem:[#allocation5 + $0x168] sm:$0xff] }
 0x49f   : > { %3455 = vmatpush.msrb.mxu0 %v352_v5 }
 0x4a0   : > { %v3089_v38 = vadd.f32 %v3088_v50, %v3024_v18  ;;  %3282 = vmatmul.f32.gmra.mxu1 %v6957_v1 }
 0x4a1   : > { %v3153_v46 = vpop.f32.mrf.mxu3  ;;  %3456 = vmatpush.msrb.mxu0 %v340_v29 }
 0x4a2   : > { %v3154_v61 = vadd.f32 %v3153_v46, %v3089_v38  ;;  %v2961_v40 = vpop.f32.mrf.mxu0 }
 0x4a3   : > { %v2962_v57 = vadd.f32 %v2961_v40, %v6831_v56  ;;  %3350 = vmatmul.f32.gmra.mxu2 %v6963_v24  ;;  %v724_v40 = vld [vmem:[#allocation5 + $0xd08] sm:$0xff]  ;;  %3457 = vmatpush.msrb.mxu0 %v328_v33 }
 0x4a4   : > { %4302 = vst [vmem:[%s5564_s20 + $0x278] sm:$0xff] %v3154_v61  ;;  %v6999_v61 = vld [vmem:[%s5286_s28 + $0x130] sm:$0xff]  ;;  %3586 = vmatpush.msrb.mxu2 %v724_v40  ;;  %v520_v40 = vld [vmem:[#allocation5 + $0x6a8] sm:$0xff] }
 0x4a5   : > { %v3026_v45 = vpop.f32.mrf.mxu1  ;;  %3220 = vmatmul.f32.gmra.mxu0 %v6967_v16  ;;  %v7047_v33 = vld [vmem:[%s5286_s28 + $0x168] sm:$0xff] }
 0x4a6   : > { %v3027_v48 = vadd.f32 %v3026_v45, %v2962_v57  ;;  %3415 = vmatmul.f32.gmra.mxu3 %v6971_v19  ;;  %v3091_v31 = vpop.f32.mrf.mxu2 }
 0x4a8   : > { %v3092_v42 = vadd.f32 %v3091_v31, %v3027_v48  ;;  %3285 = vmatmul.f32.gmra.mxu1 %v6975_v36  ;;  %v7007_v48 = vld [vmem:[%s5286_s28 + $0x138] sm:$0xff] }
 0x4a9   : > { %v3156_v23 = vpop.f32.mrf.mxu3 }
 0x4aa   : > { %v3157_v10 = vadd.f32 %v3156_v23, %v3092_v42  ;;  %v2964_v30 = vpop.f32.mrf.mxu0  ;;  %v532_v23 = vld [vmem:[#allocation5 + $0x708] sm:$0xff] }
 0x4ab   : > { %v2965_v59 = vadd.f32 %v2964_v30, %v6831_v56  ;;  %3353 = vmatmul.f32.gmra.mxu2 %v6981_v6  ;;  %3521 = vmatpush.msrb.mxu1 %v532_v23 }
 0x4ac   : > { %4314 = vst [vmem:[%s5564_s20 + $0x2d8] sm:$0xff] %v3157_v10 }
 0x4ad   : > { %v3029_v32 = vpop.f32.mrf.mxu1  ;;  %3223 = vmatmul.f32.gmra.mxu0 %v6985_v27  ;;  %3522 = vmatpush.msrb.mxu1 %v520_v40 }
 0x4ae   : > { %v3030_v12 = vadd.f32 %v3029_v32, %v2965_v59  ;;  %3418 = vmatmul.f32.gmra.mxu3 %v6989_v14  ;;  %v3094_v60 = vpop.f32.mrf.mxu2  ;;  %v7017_v32 = vld [vmem:[%s5286_s28 + $0x150] sm:$0xff] }
 0x4b0   : > { %v3095_v18 = vadd.f32 %v3094_v60, %v3030_v12  ;;  %3288 = vmatmul.f32.gmra.mxu1 %v6993_v51  ;;  %v712_v12 = vld [vmem:[#allocation5 + $0xca8] sm:$0xff] }
 0x4b1   : > { %v3159_v50 = vpop.f32.mrf.mxu3  ;;  %3587 = vmatpush.msrb.mxu2 %v712_v12  ;;  %v892_v12 = vld [vmem:[#allocation5 + $0x1248] sm:$0xff] }
 0x4b2   : > { %v3160_v38 = vadd.f32 %v3159_v50, %v3095_v18  ;;  %v2967_v4 = vpop.f32.mrf.mxu0  ;;  %v7025_v18 = vld [vmem:[%s5286_s28 + $0x158] sm:$0xff]  ;;  %v904_v50 = vld [vmem:[#allocation5 + $0x12a8] sm:$0xff] }
 0x4b3   : > { %v2968_v46 = vadd.f32 %v2967_v4, %v6831_v56  ;;  %3356 = vmatmul.f32.gmra.mxu2 %v6999_v61  ;;  %3652 = vmatpush.msrb.mxu3 %v904_v50  ;;  %v508_v50 = vld [vmem:[#allocation5 + $0x648] sm:$0xff] }
 0x4b4   : > { %4326 = vst [vmem:[%s5564_s20 + $0x338] sm:$0xff] %v3160_v38  ;;  %3523 = vmatpush.msrb.mxu1 %v508_v50  ;;  %v7065_v50 = vld [vmem:[%s5286_s28 + $0x188] sm:$0xff] }
 0x4b5   : > { %v3032_v57 = vpop.f32.mrf.mxu1  ;;  %3226 = vmatmul.f32.gmra.mxu0 %v7003_v41  ;;  %3653 = vmatpush.msrb.mxu3 %v892_v12  ;;  %v1073_v12 = vld [vmem:[#allocation5 + $0x17f0] sm:$0xff]  ;;  %7896 = vst [vmem:[#allocation13_spill] sm:$0xff] %v7065_v50 }
 0x4b6   : > { %v3033_v45 = vadd.f32 %v3032_v57, %v2968_v46  ;;  %3421 = vmatmul.f32.gmra.mxu3 %v7007_v48  ;;  %v3097_v31 = vpop.f32.mrf.mxu2  ;;  %v7029_v46 = vld [vmem:[%s5286_s28 + $0x148] sm:$0xff] }
 0x4b7   : > { %3898 = vmatpush.msra.mxu3 %v1073_v12  ;;  %v7075_v12 = vld [vmem:[%s5286_s28 + $0x1a0] sm:$0xff] }
 0x4b8   : > { %v3098_v42 = vadd.f32 %v3097_v31, %v3033_v45  ;;  %3291 = vmatmul.f32.gmra.mxu1 %v7011_v26  ;;  %v7035_v31 = vld [vmem:[%s5286_s28 + $0x170] sm:$0xff]  ;;  %7898 = vst [vmem:[#allocation15_spill] sm:$0xff] %v7075_v12 }
 0x4b9   : > { %v3162_v10 = vpop.f32.mrf.mxu3 }
 0x4ba   : > { %v3163_v30 = vadd.f32 %v3162_v10, %v3098_v42  ;;  %v2970_v59 = vpop.f32.mrf.mxu0  ;;  %v700_v42 = vld [vmem:[#allocation5 + $0xc48] sm:$0xff]  ;;  %v7039_v10 = vld [vmem:[%s5286_s28 + $0x160] sm:$0xff] }
 0x4bb   : > { %v2971_v0 = vadd.f32 %v2970_v59, %v6831_v56  ;;  %3359 = vmatmul.f32.gmra.mxu2 %v7017_v32  ;;  %v7043_v59 = vld [vmem:[%s5286_s28 + $0x178] sm:$0xff] }
 0x4bc   : > { %4338 = vst [vmem:[%s5564_s20 + $0x398] sm:$0xff] %v3163_v30  ;;  %3588 = vmatpush.msrb.mxu2 %v700_v42  ;;  %v7057_v42 = vld [vmem:[%s5286_s28 + $0x180] sm:$0xff] }
 0x4bd   : > { %v3035_v5 = vpop.f32.mrf.mxu1  ;;  %3229 = vmatmul.f32.gmra.mxu0 %v7021_v20 }
 0x4be   : > { %v3036_v60 = vadd.f32 %v3035_v5, %v2971_v0  ;;  %3424 = vmatmul.f32.gmra.mxu3 %v7025_v18  ;;  %v3100_v38 = vpop.f32.mrf.mxu2  ;;  %v316_v0 = vld [vmem:[#allocation5 + $0x48] sm:$0xff] }
 0x4bf   : > { %3458 = vmatpush.msrb.mxu0 %v316_v0  ;;  %v497_v0 = vld [vmem:[#allocation5 + $0x5f0] sm:$0xff] }
 0x4c0   : > { %v3101_v4 = vadd.f32 %v3100_v38, %v3036_v60  ;;  %3294 = vmatmul.f32.gmra.mxu1 %v7029_v46 }
 0x4c1   : > { %v3165_v57 = vpop.f32.mrf.mxu3  ;;  %3703 = vmatpush.msra.mxu0 %v497_v0  ;;  %v869_v0 = vld [vmem:[#allocation5 + $0x1190] sm:$0xff] }
 0x4c2   : > { %v3166_v45 = vadd.f32 %v3165_v57, %v3101_v4  ;;  %v2973_v29 = vpop.f32.mrf.mxu0 }
 0x4c3   : > { %v2974_v25 = vadd.f32 %v2973_v29, %v6831_v56  ;;  %3362 = vmatmul.f32.gmra.mxu2 %v7035_v31  ;;  %v881_v29 = vld [vmem:[#allocation5 + $0x11f0] sm:$0xff] }
 0x4c4   : > { %4350 = vst [vmem:[%s5564_s20 + $0x3f8] sm:$0xff] %v3166_v45  ;;  %v7053_v45 = vld [vmem:[%s5286_s28 + $0x190] sm:$0xff]  ;;  %3833 = vmatpush.msra.mxu2 %v881_v29 }
 0x4c5   : > { %v3038_v23 = vpop.f32.mrf.mxu1  ;;  %3232 = vmatmul.f32.gmra.mxu0 %v7039_v10 }
 0x4c6   : > { %v3039_v30 = vadd.f32 %v3038_v23, %v2974_v25  ;;  %3427 = vmatmul.f32.gmra.mxu3 %v7043_v59  ;;  %v3103_v5 = vpop.f32.mrf.mxu2  ;;  %3834 = vmatpush.msra.mxu2 %v869_v0  ;;  %v677_v0 = vld [vmem:[#allocation5 + $0xb90] sm:$0xff] }
 0x4c8   : > { %v3104_v60 = vadd.f32 %v3103_v5, %v3039_v30  ;;  %3297 = vmatmul.f32.gmra.mxu1 %v7047_v33  ;;  %v7061_v30 = vld [vmem:[%s5286_s28 + $0x198] sm:$0xff] }
 0x4c9   : > { %v3168_v38 = vpop.f32.mrf.mxu3  ;;  %7895 = vst [vmem:[#allocation12_spill] sm:$0xff] %v7061_v30 }
 0x4ca   : > { %v3169_v4 = vadd.f32 %v3168_v38, %v3104_v60  ;;  %v2976_v40 = vpop.f32.mrf.mxu0  ;;  %v689_v38 = vld [vmem:[#allocation5 + $0xbf0] sm:$0xff] }
 0x4cb   : > { %v2977_v57 = vadd.f32 %v2976_v40, %v6831_v56  ;;  %3365 = vmatmul.f32.gmra.mxu2 %v7053_v45  ;;  %3768 = vmatpush.msra.mxu1 %v689_v38  ;;  %v1061_v38 = vld [vmem:[#allocation5 + $0x1790] sm:$0xff] }
 0x4cc   : > { %4362 = vst [vmem:[%s5564_s20 + $0x458] sm:$0xff] %v3169_v4  ;;  %3899 = vmatpush.msra.mxu3 %v1061_v38  ;;  %v7093_v38 = vld [vmem:[%s5286_s28 + $0x1c0] sm:$0xff] }
 0x4cd   : > { %v3041_v25 = vpop.f32.mrf.mxu1  ;;  %3235 = vmatmul.f32.gmra.mxu0 %v7057_v42  ;;  %3769 = vmatpush.msra.mxu1 %v677_v0  ;;  %7902 = vst [vmem:[#allocation19_spill] sm:$0xff] %v7093_v38 }
 0x4ce   : > { %v3042_v23 = vadd.f32 %v3041_v25, %v2977_v57  ;;  %3430 = vmatmul.f32.gmra.mxu3 %v7061_v30  ;;  %v3106_v5 = vpop.f32.mrf.mxu2  ;;  %v7071_v25 = vld [vmem:[%s5286_s28 + $0x1b0] sm:$0xff] }
 0x4cf   : > { %7897 = vst [vmem:[#allocation14_spill] sm:$0xff] %v7071_v25  ;;  %v833_v30 = vld [vmem:[#allocation5 + $0x1070] sm:$0xff] }
 0x4d0   : > { %v3107_v60 = vadd.f32 %v3106_v5, %v3042_v23  ;;  %3300 = vmatmul.f32.gmra.mxu1 %v7065_v50  ;;  %v7079_v50 = vld [vmem:[%s5286_s28 + $0x1b8] sm:$0xff] }
 0x4d1   : > { %v3171_v4 = vpop.f32.mrf.mxu3  ;;  %7899 = vst [vmem:[#allocation16_spill] sm:$0xff] %v7079_v50 }
 0x4d2   : > { %v3172_v40 = vadd.f32 %v3171_v4, %v3107_v60  ;;  %v2979_v57 = vpop.f32.mrf.mxu0  ;;  %v485_v60 = vld [vmem:[#allocation5 + $0x590] sm:$0xff] }
 0x4d3   : > { %v2980_v29 = vadd.f32 %v2979_v57, %v6831_v56  ;;  %3368 = vmatmul.f32.gmra.mxu2 %v7071_v25  ;;  %3704 = vmatpush.msra.mxu0 %v485_v60  ;;  %v7083_v57 = vld [vmem:[%s5286_s28 + $0x1a8] sm:$0xff]  ;;  %v7089_v25 = vld [vmem:[%s5286_s28 + $0x1d0] sm:$0xff] }
 0x4d4   : > { %4374 = vst [vmem:[%s5564_s20 + $0x4b8] sm:$0xff] %v3172_v40  ;;  %v857_v60 = vld [vmem:[#allocation5 + $0x1130] sm:$0xff] }
 0x4d5   : > { %v3044_v23 = vpop.f32.mrf.mxu1  ;;  %3238 = vmatmul.f32.gmra.mxu0 %v7075_v12  ;;  %7900 = vst [vmem:[#allocation17_spill] sm:$0xff] %v7083_v57  ;;  %3835 = vmatpush.msra.mxu2 %v857_v60 }
 0x4d6   : > { %v3045_v5 = vadd.f32 %v3044_v23, %v2980_v29  ;;  %3433 = vmatmul.f32.gmra.mxu3 %v7079_v50  ;;  %v3109_v4 = vpop.f32.mrf.mxu2  ;;  %7901 = vst [vmem:[#allocation18_spill] sm:$0xff] %v7089_v25 }
 0x4d8   : > { %v3110_v40 = vadd.f32 %v3109_v4, %v3045_v5  ;;  %3303 = vmatmul.f32.gmra.mxu1 %v7083_v57  ;;  %v7097_v57 = vld [vmem:[%s5286_s28 + $0x1d8] sm:$0xff] }
 0x4d9   : > { %v3174_v29 = vpop.f32.mrf.mxu3  ;;  %7903 = vst [vmem:[#allocation20_spill] sm:$0xff] %v7097_v57 }
 0x4da   : > { %v3175_v23 = vadd.f32 %v3174_v29, %v3110_v40  ;;  %v2982_v12 = vpop.f32.mrf.mxu0  ;;  %v1049_v40 = vld [vmem:[#allocation5 + $0x1730] sm:$0xff] }
 0x4db   : > { %v2983_v50 = vadd.f32 %v2982_v12, %v6831_v56  ;;  %3371 = vmatmul.f32.gmra.mxu2 %v7089_v25  ;;  %v473_v12 = vld [vmem:[#allocation5 + $0x530] sm:$0xff]  ;;  %3900 = vmatpush.msra.mxu3 %v1049_v40 }
 0x4dc   : > { %4386 = vst [vmem:[%s5564_s20 + $0x518] sm:$0xff] %v3175_v23  ;;  %3705 = vmatpush.msra.mxu0 %v473_v12  ;;  %v7101_v23 = vld [vmem:[%s5286_s28 + $0x1c8] sm:$0xff]  ;;  %v7107_v25 = vld [vmem:[%s5286_s28 + $0x1f0] sm:$0xff] }
 0x4dd   : > { %v3047_v5 = vpop.f32.mrf.mxu1  ;;  %3241 = vmatmul.f32.gmra.mxu0 %v7093_v38  ;;  %7904 = vst [vmem:[#allocation21_spill] sm:$0xff] %v7101_v23  ;;  %v665_v38 = vld [vmem:[#allocation5 + $0xb30] sm:$0xff]  ;;  %v7110_v12 = vld [vmem:[#allocation7 + $0x8] sm:$0xf] }
 0x4de   : > { %v3048_v4 = vadd.f32 %v3047_v5, %v2983_v50  ;;  %3436 = vmatmul.f32.gmra.mxu3 %v7097_v57  ;;  %v3112_v0 = vpop.f32.mrf.mxu2  ;;  %3770 = vmatpush.msra.mxu1 %v665_v38  ;;  %7905 = vst [vmem:[#allocation22_spill] sm:$0xff] %v7107_v25 }
 0x4df   : > { %7906 = vst [vmem:[#allocation23_spill] sm:$0xff] %v7110_v12 }
 0x4e0   : > { %v3113_v29 = vadd.f32 %v3112_v0, %v3048_v4  ;;  %3306 = vmatmul.f32.gmra.mxu1 %v7101_v23  ;;  %v845_v4 = vld [vmem:[#allocation5 + $0x10d0] sm:$0xff]  ;;  %v7113_v0 = vld [vmem:[%s5286_s28 + $0x1e0] sm:$0xff]  ;;  %v7124_v23 = vld [vmem:[%s5286_s28 + $0x1e8] sm:$0xff] }
 0x4e1   : > { %v3177_v50 = vpop.f32.mrf.mxu3  ;;  %7907 = vst [vmem:[#allocation24_spill] sm:$0xff] %v7113_v0  ;;  %3836 = vmatpush.msra.mxu2 %v845_v4  ;;  %v653_v4 = vld [vmem:[#allocation5 + $0xad0] sm:$0xff] }
 0x4e2   : > { %v3178_v60 = vadd.f32 %v3177_v50, %v3113_v29  ;;  %v2985_v5 = vpop.f32.mrf.mxu0  ;;  %v7117_v29 = vld [vmem:[%s5286_s28 + $0x1f8] sm:$0xff]  ;;  %v1037_v50 = vld [vmem:[#allocation5 + $0x16d0] sm:$0xff]  ;;  %3771 = vmatpush.msra.mxu1 %v653_v4 }
 0x4e3   : > { %v2986_v57 = vadd.f32 %v2985_v5, %v6831_v56  ;;  %3374 = vmatmul.f32.gmra.mxu2 %v7107_v25  ;;  %7908 = vst [vmem:[#allocation25_spill] sm:$0xff] %v7117_v29  ;;  %v461_v56 = vld [vmem:[#allocation5 + $0x4d0] sm:$0xff]  ;;  %v7121_v5 = vperm.slane %v7110_v12, 0  ;;  %3901 = vmatpush.msra.mxu3 %v1037_v50 }
 0x4e4   : > { %4398 = vst [vmem:[%s5564_s20 + $0x578] sm:$0xff] %v3178_v60  ;;  %3706 = vmatpush.msra.mxu0 %v461_v56  ;;  %3837 = vmatpush.msra.mxu2 %v833_v30  ;;  %v449_v56 = vld [vmem:[#allocation5 + $0x470] sm:$0xff] }
 0x4e5   : > { %v3050_v40 = vpop.f32.mrf.mxu1  ;;  %3244 = vmatmul.f32.gmra.mxu0 %v7113_v0  ;;  %v1025_v50 = vld [vmem:[#allocation5 + $0x1670] sm:$0xff] }
 0x4e6   : > { %v3051_v38 = vadd.f32 %v3050_v40, %v2986_v57  ;;  %3439 = vmatmul.f32.gmra.mxu3 %v7117_v29  ;;  %v3115_v60 = vpop.f32.mrf.mxu2  ;;  %3707 = vmatpush.msra.mxu0 %v449_v56  ;;  %v821_v30 = vld [vmem:[#allocation5 + $0x1010] sm:$0xff] }
 0x4e7   : > { %3902 = vmatpush.msra.mxu3 %v1025_v50  ;;  %3838 = vmatpush.msra.mxu2 %v821_v30  ;;  %v629_v56 = vld [vmem:[#allocation5 + $0xa10] sm:$0xff] }
 0x4e8   : > { %v3116_v25 = vadd.f32 %v3115_v60, %v3051_v38  ;;  %3309 = vmatmul.f32.gmra.mxu1 %v7124_v23 }
 0x4e9   : > { %v3180_v57 = vpop.f32.mrf.mxu3 }
 0x4ea   : > { %v3181_v40 = vadd.f32 %v3180_v57, %v3116_v25  ;;  %v3200_v0 = vpop.f32.mrf.mxu0 }
 0x4eb   : > { %v3201_v29 = vadd.f32 %v3200_v0, %v7121_v5  ;;  %3589 = vmatmul.f32.vlgmr.msrb.gmra.mxu2 %v6837_v7  ;;  %v641_v0 = vld [vmem:[#allocation5 + $0xa70] sm:$0xff] }
 0x4ec   : > { %4410 = vst [vmem:[%s5564_s20 + $0x5d8] sm:$0xff] %v3181_v40  ;;  %3772 = vmatpush.msra.mxu1 %v641_v0 }
 0x4ed   : > { %v3265_v12 = vpop.f32.mrf.mxu1  ;;  %3459 = vmatmul.f32.vlgmr.msrb.gmra.mxu0 %v6841_v58 }
 0x4ee   : > { %v3266_v38 = vadd.f32 %v3265_v12, %v3201_v29  ;;  %3654 = vmatmul.f32.vlgmr.msrb.gmra.mxu3 %v6845_v55  ;;  %v3330_v60 = vpop.f32.mrf.mxu2  ;;  %v1013_v29 = vld [vmem:[#allocation5 + $0x1610] sm:$0xff]  ;;  %3773 = vmatpush.msra.mxu1 %v629_v56 }
 0x4ef   : > { %3903 = vmatpush.msra.mxu3 %v1013_v29  ;;  %v989_v29 = vld [vmem:[#allocation5 + $0x1550] sm:$0xff] }
 0x4f0   : > { %v3331_v25 = vadd.f32 %v3330_v60, %v3266_v38  ;;  %3524 = vmatmul.f32.vlgmr.msrb.gmra.mxu1 %v6849_v15  ;;  %v437_v15 = vld [vmem:[#allocation5 + $0x410] sm:$0xff] }
 0x4f1   : > { %v3395_v4 = vpop.f32.mrf.mxu3  ;;  %3708 = vmatpush.msra.mxu0 %v437_v15  ;;  %v605_v56 = vld [vmem:[#allocation5 + $0x950] sm:$0xff] }
 0x4f2   : > { %v3396_v7 = vadd.f32 %v3395_v4, %v3331_v25  ;;  %v3203_v57 = vpop.f32.mrf.mxu0  ;;  %v809_v25 = vld [vmem:[#allocation5 + $0xfb0] sm:$0xff] }
 0x4f3   : > { %v3204_v58 = vadd.f32 %v3203_v57, %v7121_v5  ;;  %3592 = vmatmul.f32.gmra.mxu2 %v6855_v44  ;;  %v1001_v4 = vld [vmem:[#allocation5 + $0x15b0] sm:$0xff] }
 0x4f4   : > { %4231 = vst [vmem:[%s5564_s20 + $0x40] sm:$0xff] %v3396_v7  ;;  %3839 = vmatpush.msra.mxu2 %v809_v25  ;;  %3904 = vmatpush.msra.mxu3 %v1001_v4  ;;  %v977_v25 = vld [vmem:[#allocation5 + $0x14f0] sm:$0xff] }
 0x4f5   : > { %v3268_v55 = vpop.f32.mrf.mxu1  ;;  %3462 = vmatmul.f32.gmra.mxu0 %v6859_v49 }
 0x4f6   : > { %v3269_v12 = vadd.f32 %v3268_v55, %v3204_v58  ;;  %3657 = vmatmul.f32.gmra.mxu3 %v6863_v34  ;;  %v3333_v40 = vpop.f32.mrf.mxu2  ;;  %v617_v58 = vld [vmem:[#allocation5 + $0x9b0] sm:$0xff] }
 0x4f7   : > { %3774 = vmatpush.msra.mxu1 %v617_v58  ;;  %3905 = vmatpush.msra.mxu3 %v989_v29  ;;  %v953_v29 = vld [vmem:[#allocation5 + $0x1430] sm:$0xff] }
 0x4f8   : > { %v3334_v38 = vadd.f32 %v3333_v40, %v3269_v12  ;;  %3527 = vmatmul.f32.gmra.mxu1 %v6867_v22  ;;  %v425_v22 = vld [vmem:[#allocation5 + $0x3b0] sm:$0xff] }
 0x4f9   : > { %v3398_v50 = vpop.f32.mrf.mxu3  ;;  %3709 = vmatpush.msra.mxu0 %v425_v22  ;;  %v797_v12 = vld [vmem:[#allocation5 + $0xf50] sm:$0xff]  ;;  %3775 = vmatpush.msra.mxu1 %v605_v56 }
 0x4fa   : > { %v3399_v44 = vadd.f32 %v3398_v50, %v3334_v38  ;;  %v3206_v60 = vpop.f32.mrf.mxu0  ;;  %3840 = vmatpush.msra.mxu2 %v797_v12  ;;  %3906 = vmatpush.msra.mxu3 %v977_v25  ;;  %v593_v22 = vld [vmem:[#allocation5 + $0x8f0] sm:$0xff] }
 0x4fb   : > { %v3207_v49 = vadd.f32 %v3206_v60, %v7121_v5  ;;  %3595 = vmatmul.f32.gmra.mxu2 %v6873_v28  ;;  %v785_v60 = vld [vmem:[#allocation5 + $0xef0] sm:$0xff]  ;;  %3776 = vmatpush.msra.mxu1 %v593_v22 }
 0x4fc   : > { %4243 = vst [vmem:[%s5564_s20 + $0xa0] sm:$0xff] %v3399_v44  ;;  %3841 = vmatpush.msra.mxu2 %v785_v60  ;;  %v569_v56 = vld [vmem:[#allocation5 + $0x830] sm:$0xff] }
 0x4fd   : > { %v3271_v34 = vpop.f32.mrf.mxu1  ;;  %3465 = vmatmul.f32.gmra.mxu0 %v6877_v17  ;;  %v941_v60 = vld [vmem:[#allocation5 + $0x13d0] sm:$0xff] }
 0x4fe   : > { %v3272_v0 = vadd.f32 %v3271_v34, %v3207_v49  ;;  %3660 = vmatmul.f32.gmra.mxu3 %v6881_v63  ;;  %v3336_v7 = vpop.f32.mrf.mxu2 }
 0x500   : > { %v3337_v57 = vadd.f32 %v3336_v7, %v3272_v0  ;;  %3530 = vmatmul.f32.gmra.mxu1 %v6885_v43  ;;  %v413_v43 = vld [vmem:[#allocation5 + $0x350] sm:$0xff] }
 0x501   : > { %v3401_v30 = vpop.f32.mrf.mxu3  ;;  %3710 = vmatpush.msra.mxu0 %v413_v43 }
 0x502   : > { %v3402_v28 = vadd.f32 %v3401_v30, %v3337_v57  ;;  %v3209_v55 = vpop.f32.mrf.mxu0  ;;  %v773_v57 = vld [vmem:[#allocation5 + $0xe90] sm:$0xff] }
 0x503   : > { %v3210_v17 = vadd.f32 %v3209_v55, %v7121_v5  ;;  %3598 = vmatmul.f32.gmra.mxu2 %v6891_v2  ;;  %v965_v30 = vld [vmem:[#allocation5 + $0x1490] sm:$0xff] }
 0x504   : > { %4255 = vst [vmem:[%s5564_s20 + $0x100] sm:$0xff] %v3402_v28  ;;  %3842 = vmatpush.msra.mxu2 %v773_v57  ;;  %3907 = vmatpush.msra.mxu3 %v965_v30  ;;  %v917_v30 = vld [vmem:[#allocation5 + $0x1310] sm:$0xff] }
 0x505   : > { %v3274_v63 = vpop.f32.mrf.mxu1  ;;  %3468 = vmatmul.f32.gmra.mxu0 %v6895_v52 }
 0x506   : > { %v3275_v15 = vadd.f32 %v3274_v63, %v3210_v17  ;;  %3663 = vmatmul.f32.gmra.mxu3 %v6899_v37  ;;  %v3339_v40 = vpop.f32.mrf.mxu2  ;;  %v581_v17 = vld [vmem:[#allocation5 + $0x890] sm:$0xff] }
 0x507   : > { %3777 = vmatpush.msra.mxu1 %v581_v17  ;;  %3908 = vmatpush.msra.mxu3 %v953_v29  ;;  %v533_v17 = vld [vmem:[#allocation5 + $0x710] sm:$0xff] }
 0x508   : > { %v3340_v38 = vadd.f32 %v3339_v40, %v3275_v15  ;;  %3533 = vmatmul.f32.gmra.mxu1 %v6903_v39  ;;  %v401_v39 = vld [vmem:[#allocation5 + $0x2f0] sm:$0xff] }
 0x509   : > { %v3404_v50 = vpop.f32.mrf.mxu3  ;;  %3711 = vmatpush.msra.mxu0 %v401_v39  ;;  %v761_v15 = vld [vmem:[#allocation5 + $0xe30] sm:$0xff]  ;;  %3778 = vmatpush.msra.mxu1 %v569_v56 }
 0x50a   : > { %v3405_v2 = vadd.f32 %v3404_v50, %v3340_v38  ;;  %v3212_v44 = vpop.f32.mrf.mxu0  ;;  %3843 = vmatpush.msra.mxu2 %v761_v15  ;;  %3909 = vmatpush.msra.mxu3 %v941_v60  ;;  %v557_v39 = vld [vmem:[#allocation5 + $0x7d0] sm:$0xff] }
 0x50b   : > { %v3213_v52 = vadd.f32 %v3212_v44, %v7121_v5  ;;  %3601 = vmatmul.f32.gmra.mxu2 %v6909_v13  ;;  %v749_v44 = vld [vmem:[#allocation5 + $0xdd0] sm:$0xff]  ;;  %3779 = vmatpush.msra.mxu1 %v557_v39 }
 0x50c   : > { %4267 = vst [vmem:[%s5564_s20 + $0x160] sm:$0xff] %v3405_v2  ;;  %3844 = vmatpush.msra.mxu2 %v749_v44  ;;  %v905_v15 = vld [vmem:[#allocation5 + $0x12b0] sm:$0xff] }
 0x50d   : > { %v3277_v37 = vpop.f32.mrf.mxu1  ;;  %3471 = vmatmul.f32.gmra.mxu0 %v6913_v62  ;;  %v7909_v60 = vld [vmem:[#allocation12_spill] sm:$0xff] }
 0x50e   : > { %v3278_v49 = vadd.f32 %v3277_v37, %v3213_v52  ;;  %3666 = vmatmul.f32.gmra.mxu3 %v6917_v54  ;;  %v3342_v34 = vpop.f32.mrf.mxu2 }
 0x510   : > { %v3343_v0 = vadd.f32 %v3342_v34, %v3278_v49  ;;  %3536 = vmatmul.f32.gmra.mxu1 %v6921_v3  ;;  %v389_v3 = vld [vmem:[#allocation5 + $0x290] sm:$0xff] }
 0x511   : > { %v3407_v4 = vpop.f32.mrf.mxu3  ;;  %3712 = vmatpush.msra.mxu0 %v389_v3 }
 0x512   : > { %v3408_v13 = vadd.f32 %v3407_v4, %v3343_v0  ;;  %v3215_v7 = vpop.f32.mrf.mxu0  ;;  %v737_v0 = vld [vmem:[#allocation5 + $0xd70] sm:$0xff] }
 0x513   : > { %v3216_v62 = vadd.f32 %v3215_v7, %v7121_v5  ;;  %3604 = vmatmul.f32.gmra.mxu2 %v6927_v9  ;;  %v929_v4 = vld [vmem:[#allocation5 + $0x1370] sm:$0xff] }
 0x514   : > { %4279 = vst [vmem:[%s5564_s20 + $0x1c0] sm:$0xff] %v3408_v13  ;;  %3845 = vmatpush.msra.mxu2 %v737_v0  ;;  %3910 = vmatpush.msra.mxu3 %v929_v4  ;;  %v7911_v0 = vld [vmem:[#allocation14_spill] sm:$0xff] }
 0x515   : > { %v3280_v54 = vpop.f32.mrf.mxu1  ;;  %3474 = vmatmul.f32.gmra.mxu0 %v6931_v21 }
 0x516   : > { %v3281_v58 = vadd.f32 %v3280_v54, %v3216_v62  ;;  %3669 = vmatmul.f32.gmra.mxu3 %v6935_v53  ;;  %v3345_v28 = vpop.f32.mrf.mxu2  ;;  %v545_v62 = vld [vmem:[#allocation5 + $0x770] sm:$0xff] }
 0x517   : > { %3780 = vmatpush.msra.mxu1 %v545_v62  ;;  %3911 = vmatpush.msra.mxu3 %v917_v30  ;;  %v1062_v62 = vld [vmem:[#allocation5 + $0x1798] sm:$0xff] }
 0x518   : > { %v3346_v55 = vadd.f32 %v3345_v28, %v3281_v58  ;;  %3539 = vmatmul.f32.gmra.mxu1 %v6939_v47  ;;  %v377_v47 = vld [vmem:[#allocation5 + $0x230] sm:$0xff]  ;;  %v7915_v30 = vld [vmem:[#allocation18_spill] sm:$0xff] }
 0x519   : > { %v3410_v12 = vpop.f32.mrf.mxu3  ;;  %3713 = vmatpush.msra.mxu0 %v377_v47  ;;  %v725_v58 = vld [vmem:[#allocation5 + $0xd10] sm:$0xff]  ;;  %3781 = vmatpush.msra.mxu1 %v533_v17  ;;  %v7916_v17 = vld [vmem:[#allocation19_spill] sm:$0xff] }
 0x51a   : > { %v3411_v9 = vadd.f32 %v3410_v12, %v3346_v55  ;;  %v3218_v63 = vpop.f32.mrf.mxu0  ;;  %3846 = vmatpush.msra.mxu2 %v725_v58  ;;  %3912 = vmatpush.msra.mxu3 %v905_v15  ;;  %v521_v47 = vld [vmem:[#allocation5 + $0x6b0] sm:$0xff] }
 0x51b   : > { %v3219_v21 = vadd.f32 %v3218_v63, %v7121_v5  ;;  %3607 = vmatmul.f32.gmra.mxu2 %v6945_v11  ;;  %v713_v63 = vld [vmem:[#allocation5 + $0xcb0] sm:$0xff]  ;;  %3782 = vmatpush.msra.mxu1 %v521_v47 }
 0x51c   : > { %4291 = vst [vmem:[%s5564_s20 + $0x220] sm:$0xff] %v3411_v9  ;;  %3847 = vmatpush.msra.mxu2 %v713_v63 }
 0x51d   : > { %v3283_v53 = vpop.f32.mrf.mxu1  ;;  %3477 = vmatmul.f32.gmra.mxu0 %v6949_v8 }
 0x51e   : > { %v3284_v43 = vadd.f32 %v3283_v53, %v3219_v21  ;;  %3672 = vmatmul.f32.gmra.mxu3 %v6953_v35  ;;  %v3348_v40 = vpop.f32.mrf.mxu2 }
 0x520   : > { %v3349_v38 = vadd.f32 %v3348_v40, %v3284_v43  ;;  %3542 = vmatmul.f32.gmra.mxu1 %v6957_v1  ;;  %v365_v1 = vld [vmem:[#allocation5 + $0x1d0] sm:$0xff] }
 0x521   : > { %v3413_v50 = vpop.f32.mrf.mxu3  ;;  %3714 = vmatpush.msra.mxu0 %v365_v1 }
 0x522   : > { %v3414_v11 = vadd.f32 %v3413_v50, %v3349_v38  ;;  %v3221_v2 = vpop.f32.mrf.mxu0  ;;  %v701_v38 = vld [vmem:[#allocation5 + $0xc50] sm:$0xff] }
 0x523   : > { %v3222_v8 = vadd.f32 %v3221_v2, %v7121_v5  ;;  %3610 = vmatmul.f32.gmra.mxu2 %v6963_v24  ;;  %v893_v50 = vld [vmem:[#allocation5 + $0x1250] sm:$0xff] }
 0x524   : > { %4303 = vst [vmem:[%s5564_s20 + $0x280] sm:$0xff] %v3414_v11  ;;  %3848 = vmatpush.msra.mxu2 %v701_v38  ;;  %3913 = vmatpush.msra.mxu3 %v893_v50 }
 0x525   : > { %v3286_v35 = vpop.f32.mrf.mxu1  ;;  %3480 = vmatmul.f32.gmra.mxu0 %v6967_v16 }
 0x526   : > { %v3287_v52 = vadd.f32 %v3286_v35, %v3222_v8  ;;  %3675 = vmatmul.f32.gmra.mxu3 %v6971_v19  ;;  %v3351_v37 = vpop.f32.mrf.mxu2  ;;  %v509_v8 = vld [vmem:[#allocation5 + $0x650] sm:$0xff] }
 0x527   : > { %3783 = vmatpush.msra.mxu1 %v509_v8  ;;  %v654_v8 = vld [vmem:[#allocation5 + $0xad8] sm:$0xff] }
 0x528   : > { %v3352_v49 = vadd.f32 %v3351_v37, %v3287_v52  ;;  %3545 = vmatmul.f32.gmra.mxu1 %v6975_v36  ;;  %v353_v36 = vld [vmem:[#allocation5 + $0x170] sm:$0xff]  ;;  %v882_v52 = vld [vmem:[#allocation5 + $0x11f8] sm:$0xff] }
 0x529   : > { %v3416_v25 = vpop.f32.mrf.mxu3  ;;  %3715 = vmatpush.msra.mxu0 %v353_v36  ;;  %4093 = vmatpush.msrb.mxu2 %v882_v52  ;;  %v1074_v37 = vld [vmem:[#allocation5 + $0x17f8] sm:$0xff]  ;;  %v7912_v36 = vld [vmem:[#allocation15_spill] sm:$0xff]  ;;  %v7229_v52 = vld [vmem:[%s5286_s28 + $0x10] sm:$0xff] }
 0x52a   : > { %v3417_v24 = vadd.f32 %v3416_v25, %v3352_v49  ;;  %v3224_v34 = vpop.f32.mrf.mxu0  ;;  %4158 = vmatpush.msrb.mxu3 %v1074_v37  ;;  %v7910_v25 = vld [vmem:[#allocation13_spill] sm:$0xff] }
 0x52b   : > { %v3225_v16 = vadd.f32 %v3224_v34, %v7121_v5  ;;  %3613 = vmatmul.f32.gmra.mxu2 %v6981_v6  ;;  %v450_v37 = vld [vmem:[#allocation5 + $0x478] sm:$0xff] }
 0x52c   : > { %4315 = vst [vmem:[%s5564_s20 + $0x2e0] sm:$0xff] %v3417_v24  ;;  %v690_v24 = vld [vmem:[#allocation5 + $0xbf8] sm:$0xff]  ;;  %4159 = vmatpush.msrb.mxu3 %v1062_v62 }
 0x52d   : > { %v3289_v19 = vpop.f32.mrf.mxu1  ;;  %3483 = vmatmul.f32.gmra.mxu0 %v6985_v27  ;;  %4028 = vmatpush.msrb.mxu1 %v690_v24  ;;  %v7241_v24 = vld [vmem:[%s5286_s28 + $0x8] sm:$0xff]  ;;  %v438_v62 = vld [vmem:[#allocation5 + $0x418] sm:$0xff] }
 0x52e   : > { %v3290_v22 = vadd.f32 %v3289_v19, %v3225_v16  ;;  %3678 = vmatmul.f32.gmra.mxu3 %v6989_v14  ;;  %v3354_v13 = vpop.f32.mrf.mxu2  ;;  %v870_v19 = vld [vmem:[#allocation5 + $0x1198] sm:$0xff] }
 0x52f   : > { %4094 = vmatpush.msrb.mxu2 %v870_v19  ;;  %v7247_v19 = vld [vmem:[%s5286_s28 + $0x30] sm:$0xff] }
 0x530   : > { %v3355_v7 = vadd.f32 %v3354_v13, %v3290_v22  ;;  %3548 = vmatmul.f32.gmra.mxu1 %v6993_v51  ;;  %v341_v51 = vld [vmem:[#allocation5 + $0x110] sm:$0xff] }
 0x531   : > { %v3419_v57 = vpop.f32.mrf.mxu3  ;;  %3716 = vmatpush.msra.mxu0 %v341_v51  ;;  %v7913_v13 = vld [vmem:[#allocation16_spill] sm:$0xff] }
 0x532   : > { %v3420_v6 = vadd.f32 %v3419_v57, %v3355_v7  ;;  %v3227_v54 = vpop.f32.mrf.mxu0  ;;  %v486_v7 = vld [vmem:[#allocation5 + $0x598] sm:$0xff] }
 0x533   : > { %v3228_v27 = vadd.f32 %v3227_v54, %v7121_v5  ;;  %3616 = vmatmul.f32.gmra.mxu2 %v6999_v61  ;;  %v7914_v54 = vld [vmem:[#allocation17_spill] sm:$0xff] }
 0x534   : > { %4327 = vst [vmem:[%s5564_s20 + $0x340] sm:$0xff] %v3420_v6 }
 0x535   : > { %v3292_v14 = vpop.f32.mrf.mxu1  ;;  %3486 = vmatmul.f32.gmra.mxu0 %v7003_v41 }
 0x536   : > { %v3293_v3 = vadd.f32 %v3292_v14, %v3228_v27  ;;  %3681 = vmatmul.f32.gmra.mxu3 %v7007_v48  ;;  %v3357_v28 = vpop.f32.mrf.mxu2  ;;  %v678_v27 = vld [vmem:[#allocation5 + $0xb98] sm:$0xff] }
 0x537   : > { %4029 = vmatpush.msrb.mxu1 %v678_v27  ;;  %v7259_v27 = vld [vmem:[%s5286_s28 + $0x28] sm:$0xff] }
 0x538   : > { %v3358_v55 = vadd.f32 %v3357_v28, %v3293_v3  ;;  %3551 = vmatmul.f32.gmra.mxu1 %v7011_v26  ;;  %v329_v26 = vld [vmem:[#allocation5 + $0xb0] sm:$0xff]  ;;  %v858_v28 = vld [vmem:[#allocation5 + $0x1138] sm:$0xff] }
 0x539   : > { %v3422_v12 = vpop.f32.mrf.mxu3  ;;  %3717 = vmatpush.msra.mxu0 %v329_v26  ;;  %4095 = vmatpush.msrb.mxu2 %v858_v28  ;;  %v666_v26 = vld [vmem:[#allocation5 + $0xb38] sm:$0xff]  ;;  %v7265_v28 = vld [vmem:[%s5286_s28 + $0x50] sm:$0xff] }
 0x53a   : > { %v3423_v61 = vadd.f32 %v3422_v12, %v3358_v55  ;;  %v3230_v9 = vpop.f32.mrf.mxu0  ;;  %4030 = vmatpush.msrb.mxu1 %v666_v26  ;;  %v7277_v26 = vld [vmem:[%s5286_s28 + $0x48] sm:$0xff] }
 0x53b   : > { %v3231_v41 = vadd.f32 %v3230_v9, %v7121_v5  ;;  %3619 = vmatmul.f32.gmra.mxu2 %v7017_v32  ;;  %v474_v9 = vld [vmem:[#allocation5 + $0x538] sm:$0xff] }
 0x53c   : > { %4339 = vst [vmem:[%s5564_s20 + $0x3a0] sm:$0xff] %v3423_v61  ;;  %v7917_v61 = vld [vmem:[#allocation20_spill] sm:$0xff]  ;;  %4031 = vmatpush.msrb.mxu1 %v654_v8 }
 0x53d   : > { %v3295_v48 = vpop.f32.mrf.mxu1  ;;  %3489 = vmatmul.f32.gmra.mxu0 %v7021_v20  ;;  %v7295_v8 = vld [vmem:[%s5286_s28 + $0x68] sm:$0xff] }
 0x53e   : > { %v3296_v21 = vadd.f32 %v3295_v48, %v3231_v41  ;;  %3684 = vmatmul.f32.gmra.mxu3 %v7025_v18  ;;  %v3360_v53 = vpop.f32.mrf.mxu2  ;;  %v1050_v41 = vld [vmem:[#allocation5 + $0x1738] sm:$0xff] }
 0x53f   : > { %4160 = vmatpush.msrb.mxu3 %v1050_v41  ;;  %v426_v41 = vld [vmem:[#allocation5 + $0x3b8] sm:$0xff] }
 0x540   : > { %v3361_v43 = vadd.f32 %v3360_v53, %v3296_v21  ;;  %3554 = vmatmul.f32.gmra.mxu1 %v7029_v46  ;;  %v317_v46 = vld [vmem:[#allocation5 + $0x50] sm:$0xff] }
 0x541   : > { %v3425_v29 = vpop.f32.mrf.mxu3  ;;  %3718 = vmatpush.msra.mxu0 %v317_v46  ;;  %v7918_v21 = vld [vmem:[#allocation21_spill] sm:$0xff] }
 0x542   : > { %v3426_v32 = vadd.f32 %v3425_v29, %v3361_v43  ;;  %v3233_v40 = vpop.f32.mrf.mxu0  ;;  %v7919_v29 = vld [vmem:[#allocation22_spill] sm:$0xff] }
 0x543   : > { %v3234_v20 = vadd.f32 %v3233_v40, %v7121_v5  ;;  %3622 = vmatmul.f32.gmra.mxu2 %v7035_v31  ;;  %v1038_v46 = vld [vmem:[#allocation5 + $0x16d8] sm:$0xff] }
 0x544   : > { %4351 = vst [vmem:[%s5564_s20 + $0x400] sm:$0xff] %v3426_v32  ;;  %v846_v32 = vld [vmem:[#allocation5 + $0x10d8] sm:$0xff]  ;;  %4161 = vmatpush.msrb.mxu3 %v1038_v46 }
 0x545   : > { %v3298_v18 = vpop.f32.mrf.mxu1  ;;  %3492 = vmatmul.f32.gmra.mxu0 %v7039_v10  ;;  %4096 = vmatpush.msrb.mxu2 %v846_v32  ;;  %v7283_v32 = vld [vmem:[%s5286_s28 + $0x70] sm:$0xff]  ;;  %v414_v46 = vld [vmem:[#allocation5 + $0x358] sm:$0xff] }
 0x546   : > { %v3299_v56 = vadd.f32 %v3298_v18, %v3234_v20  ;;  %3687 = vmatmul.f32.gmra.mxu3 %v7043_v59  ;;  %v3363_v11 = vpop.f32.mrf.mxu2  ;;  %v7920_v20 = vld [vmem:[#allocation24_spill] sm:$0xff]  ;;  %v7921_v18 = vld [vmem:[#allocation25_spill] sm:$0xff] }
 0x548   : > { %v3364_v2 = vadd.f32 %v3363_v11, %v3299_v56  ;;  %3557 = vmatmul.f32.gmra.mxu1 %v7047_v33  ;;  %v498_v33 = vld [vmem:[#allocation5 + $0x5f8] sm:$0xff]  ;;  %v7922_v11 = vld [vmem:[#allocation23_spill] sm:$0xff] }
 0x549   : > { %v3428_v44 = vpop.f32.mrf.mxu3  ;;  %3963 = vmatpush.msrb.mxu0 %v498_v33  ;;  %v462_v56 = vld [vmem:[#allocation5 + $0x4d8] sm:$0xff] }
 0x54a   : > { %v3429_v31 = vadd.f32 %v3428_v44, %v3364_v2  ;;  %v3236_v35 = vpop.f32.mrf.mxu0  ;;  %v7223_v2 = vperm.slane %v7922_v11, 1  ;;  %v7237_v33 = vld [vmem:[%s5286_s28 + $0x18] sm:$0xff] }
 0x54b   : > { %v3237_v10 = vadd.f32 %v3236_v35, %v7121_v5  ;;  %3625 = vmatmul.f32.gmra.mxu2 %v7053_v45  ;;  %3964 = vmatpush.msrb.mxu0 %v486_v7  ;;  %v7255_v7 = vld [vmem:[%s5286_s28 + $0x38] sm:$0xff] }
 0x54c   : > { %4363 = vst [vmem:[%s5564_s20 + $0x460] sm:$0xff] %v3429_v31 }
 0x54d   : > { %v3301_v59 = vpop.f32.mrf.mxu1  ;;  %3495 = vmatmul.f32.gmra.mxu0 %v7057_v42 }
 0x54e   : > { %v3302_v1 = vadd.f32 %v3301_v59, %v3237_v10  ;;  %3690 = vmatmul.f32.gmra.mxu3 %v7909_v60  ;;  %v3366_v49 = vpop.f32.mrf.mxu2  ;;  %3965 = vmatpush.msrb.mxu0 %v474_v9  ;;  %v834_v59 = vld [vmem:[#allocation5 + $0x1078] sm:$0xff]  ;;  %v7233_v60 = vld [vmem:[%s5286_s28] sm:$0xff] }
 0x54f   : > { %4097 = vmatpush.msrb.mxu2 %v834_v59  ;;  %v7273_v9 = vld [vmem:[%s5286_s28 + $0x58] sm:$0xff] }
 0x550   : > { %v3367_v39 = vadd.f32 %v3366_v49, %v3302_v1  ;;  %3560 = vmatmul.f32.gmra.mxu1 %v7910_v25  ;;  %3966 = vmatpush.msrb.mxu0 %v462_v56  ;;  %v1026_v49 = vld [vmem:[#allocation5 + $0x1678] sm:$0xff] }
 0x551   : > { %v3431_v34 = vpop.f32.mrf.mxu3  ;;  %4162 = vmatpush.msrb.mxu3 %v1026_v49  ;;  %v7291_v56 = vld [vmem:[%s5286_s28 + $0x78] sm:$0xff]  ;;  %v7305_v49 = vld [vmem:[%s5286_s28 + $0x80] sm:$0xff] }
 0x552   : > { %v3432_v45 = vadd.f32 %v3431_v34, %v3367_v39  ;;  %v3239_v16 = vpop.f32.mrf.mxu0  ;;  %3967 = vmatpush.msrb.mxu0 %v450_v37  ;;  %v642_v34 = vld [vmem:[#allocation5 + $0xa78] sm:$0xff] }
 0x553   : > { %v3240_v42 = vadd.f32 %v3239_v16, %v7121_v5  ;;  %3628 = vmatmul.f32.gmra.mxu2 %v7911_v0  ;;  %4032 = vmatpush.msrb.mxu1 %v642_v34  ;;  %v402_v34 = vld [vmem:[#allocation5 + $0x2f8] sm:$0xff] }
 0x554   : > { %4375 = vst [vmem:[%s5564_s20 + $0x4c0] sm:$0xff] %v3432_v45  ;;  %3968 = vmatpush.msrb.mxu0 %v438_v62 }
 0x555   : > { %v3304_v22 = vpop.f32.mrf.mxu1  ;;  %3498 = vmatmul.f32.gmra.mxu0 %v7912_v36 }
 0x556   : > { %v3305_v4 = vadd.f32 %v3304_v22, %v3240_v42  ;;  %3693 = vmatmul.f32.gmra.mxu3 %v7913_v13  ;;  %v3369_v57 = vpop.f32.mrf.mxu2  ;;  %v822_v22 = vld [vmem:[#allocation5 + $0x1018] sm:$0xff]  ;;  %3969 = vmatpush.msrb.mxu0 %v426_v41  ;;  %v7331_v41 = vld [vmem:[%s5286_s28 + $0xa8] sm:$0xff] }
 0x557   : > { %4098 = vmatpush.msrb.mxu2 %v822_v22  ;;  %v594_v22 = vld [vmem:[#allocation5 + $0x8f8] sm:$0xff] }
 0x558   : > { %v3370_v6 = vadd.f32 %v3369_v57, %v3305_v4  ;;  %3563 = vmatmul.f32.gmra.mxu1 %v7914_v54  ;;  %v7251_v4 = vld [vmem:[%s5286_s28 + $0x20] sm:$0xff]  ;;  %v1014_v57 = vld [vmem:[#allocation5 + $0x1618] sm:$0xff]  ;;  %3970 = vmatpush.msrb.mxu0 %v414_v46 }
 0x559   : > { %v3434_v58 = vpop.f32.mrf.mxu3  ;;  %4163 = vmatpush.msrb.mxu3 %v1014_v57  ;;  %v378_v46 = vld [vmem:[#allocation5 + $0x238] sm:$0xff] }
 0x55a   : > { %v3435_v14 = vadd.f32 %v3434_v58, %v3370_v6  ;;  %v3242_v3 = vpop.f32.mrf.mxu0  ;;  %v630_v58 = vld [vmem:[#allocation5 + $0xa18] sm:$0xff]  ;;  %3971 = vmatpush.msrb.mxu0 %v402_v34 }
 0x55b   : > { %v3243_v51 = vadd.f32 %v3242_v3, %v7121_v5  ;;  %3631 = vmatmul.f32.gmra.mxu2 %v7915_v30  ;;  %4033 = vmatpush.msrb.mxu1 %v630_v58 }
 0x55c   : > { %4387 = vst [vmem:[%s5564_s20 + $0x520] sm:$0xff] %v3435_v14 }
 0x55d   : > { %v3307_v55 = vpop.f32.mrf.mxu1  ;;  %3501 = vmatmul.f32.gmra.mxu0 %v7916_v17 }
 0x55e   : > { %v3308_v12 = vadd.f32 %v3307_v55, %v3243_v51  ;;  %3696 = vmatmul.f32.gmra.mxu3 %v7917_v61  ;;  %v3372_v63 = vpop.f32.mrf.mxu2  ;;  %v810_v55 = vld [vmem:[#allocation5 + $0xfb8] sm:$0xff] }
 0x55f   : > { %4099 = vmatpush.msrb.mxu2 %v810_v55  ;;  %v966_v55 = vld [vmem:[#allocation5 + $0x1498] sm:$0xff] }
 0x560   : > { %v3373_v48 = vadd.f32 %v3372_v63, %v3308_v12  ;;  %3566 = vmatmul.f32.gmra.mxu1 %v7918_v21  ;;  %v7269_v12 = vld [vmem:[%s5286_s28 + $0x40] sm:$0xff]  ;;  %v1002_v63 = vld [vmem:[#allocation5 + $0x15b8] sm:$0xff] }
 0x561   : > { %v3437_v15 = vpop.f32.mrf.mxu3  ;;  %4164 = vmatpush.msrb.mxu3 %v1002_v63  ;;  %v582_v63 = vld [vmem:[#allocation5 + $0x898] sm:$0xff] }
 0x562   : > { %v3438_v53 = vadd.f32 %v3437_v15, %v3373_v48  ;;  %v3245_v43 = vpop.f32.mrf.mxu0  ;;  %v618_v15 = vld [vmem:[#allocation5 + $0x9b8] sm:$0xff] }
 0x563   : > { %v3246_v47 = vadd.f32 %v3245_v43, %v7121_v5  ;;  %3634 = vmatmul.f32.gmra.mxu2 %v7919_v29  ;;  %4034 = vmatpush.msrb.mxu1 %v618_v15 }
 0x564   : > { %4399 = vst [vmem:[%s5564_s20 + $0x580] sm:$0xff] %v3438_v53 }
 0x565   : > { %v3310_v40 = vpop.f32.mrf.mxu1  ;;  %3504 = vmatmul.f32.gmra.mxu0 %v7920_v20 }
 0x566   : > { %v3311_v38 = vadd.f32 %v3310_v40, %v3246_v47  ;;  %3699 = vmatmul.f32.gmra.mxu3 %v7921_v18  ;;  %v3375_v50 = vpop.f32.mrf.mxu2  ;;  %v798_v40 = vld [vmem:[#allocation5 + $0xf58] sm:$0xff] }
 0x567   : > { %4100 = vmatpush.msrb.mxu2 %v798_v40  ;;  %v7341_v40 = vld [vmem:[%s5286_s28 + $0xc0] sm:$0xff] }
 0x568   : > { %v3376_v5 = vadd.f32 %v3375_v50, %v3311_v38  ;;  %3569 = vmatmul.f32.gmra.mxu1 %v7124_v23  ;;  %v7287_v38 = vld [vmem:[%s5286_s28 + $0x60] sm:$0xff]  ;;  %v990_v50 = vld [vmem:[#allocation5 + $0x1558] sm:$0xff] }
 0x569   : > { %v3440_v44 = vpop.f32.mrf.mxu3  ;;  %4165 = vmatpush.msrb.mxu3 %v990_v50  ;;  %v954_v50 = vld [vmem:[#allocation5 + $0x1438] sm:$0xff] }
 0x56a   : > { %v3441_v31 = vadd.f32 %v3440_v44, %v3376_v5  ;;  %v3460_v35 = vpop.f32.mrf.mxu0  ;;  %v606_v44 = vld [vmem:[#allocation5 + $0x958] sm:$0xff] }
 0x56b   : > { %v3461_v10 = vadd.f32 %v3460_v35, %v7223_v2  ;;  %3849 = vmatmul.f32.vlgmr.msra.gmra.mxu2 %v7229_v52  ;;  %4035 = vmatpush.msrb.mxu1 %v606_v44  ;;  %v7349_v44 = vld [vmem:[%s5286_s28 + $0xc8] sm:$0xff] }
 0x56c   : > { %4411 = vst [vmem:[%s5564_s20 + $0x5e0] sm:$0xff] %v3441_v31 }
 0x56d   : > { %v3525_v1 = vpop.f32.mrf.mxu1  ;;  %3719 = vmatmul.f32.vlgmr.msra.gmra.mxu0 %v7233_v60  ;;  %4036 = vmatpush.msrb.mxu1 %v594_v22  ;;  %v366_v22 = vld [vmem:[#allocation5 + $0x1d8] sm:$0xff] }
 0x56e   : > { %v3526_v23 = vadd.f32 %v3525_v1, %v3461_v10  ;;  %3914 = vmatmul.f32.vlgmr.msra.gmra.mxu3 %v7237_v33  ;;  %v3590_v39 = vpop.f32.mrf.mxu2  ;;  %v7301_v1 = vld [vmem:[%s5286_s28 + $0x90] sm:$0xff] }
 0x56f   : > { %4037 = vmatpush.msrb.mxu1 %v582_v63 }
 0x570   : > { %v3591_v25 = vadd.f32 %v3590_v39, %v3526_v23  ;;  %3784 = vmatmul.f32.vlgmr.msra.gmra.mxu1 %v7241_v24  ;;  %v786_v23 = vld [vmem:[#allocation5 + $0xef8] sm:$0xff] }
 0x571   : > { %v3655_v45 = vpop.f32.mrf.mxu3  ;;  %4101 = vmatpush.msrb.mxu2 %v786_v23 }
 0x572   : > { %v3656_v16 = vadd.f32 %v3655_v45, %v3591_v25  ;;  %v3463_v42 = vpop.f32.mrf.mxu0  ;;  %v7309_v25 = vld [vmem:[%s5286_s28 + $0x98] sm:$0xff] }
 0x573   : > { %v3464_v0 = vadd.f32 %v3463_v42, %v7223_v2  ;;  %3852 = vmatmul.f32.gmra.mxu2 %v7247_v19  ;;  %v978_v45 = vld [vmem:[#allocation5 + $0x14f8] sm:$0xff] }
 0x574   : > { %4232 = vst [vmem:[%s5564_s20 + $0x48] sm:$0xff] %v3656_v16  ;;  %4166 = vmatpush.msrb.mxu3 %v978_v45  ;;  %v7359_v45 = vld [vmem:[%s5286_s28 + $0xe0] sm:$0xff] }
 0x575   : > { %v3528_v36 = vpop.f32.mrf.mxu1  ;;  %3722 = vmatmul.f32.gmra.mxu0 %v7251_v4 }
 0x576   : > { %v3529_v13 = vadd.f32 %v3528_v36, %v3464_v0  ;;  %3917 = vmatmul.f32.gmra.mxu3 %v7255_v7  ;;  %v3593_v6 = vpop.f32.mrf.mxu2  ;;  %v7313_v0 = vld [vmem:[%s5286_s28 + $0x88] sm:$0xff] }
 0x577   : > { %4167 = vmatpush.msrb.mxu3 %v966_v55 }
 0x578   : > { %v3594_v54 = vadd.f32 %v3593_v6, %v3529_v13  ;;  %3787 = vmatmul.f32.gmra.mxu1 %v7259_v27  ;;  %v7319_v6 = vld [vmem:[%s5286_s28 + $0xb0] sm:$0xff] }
 0x579   : > { %v3658_v14 = vpop.f32.mrf.mxu3  ;;  %4168 = vmatpush.msrb.mxu3 %v954_v50  ;;  %v546_v50 = vld [vmem:[#allocation5 + $0x778] sm:$0xff] }
 0x57a   : > { %v3659_v3 = vadd.f32 %v3658_v14, %v3594_v54  ;;  %v3466_v51 = vpop.f32.mrf.mxu0  ;;  %v774_v54 = vld [vmem:[#allocation5 + $0xe98] sm:$0xff]  ;;  %v7323_v14 = vld [vmem:[%s5286_s28 + $0xa0] sm:$0xff] }
 0x57b   : > { %v3467_v30 = vadd.f32 %v3466_v51, %v7223_v2  ;;  %3855 = vmatmul.f32.gmra.mxu2 %v7265_v28  ;;  %v7327_v51 = vld [vmem:[%s5286_s28 + $0xb8] sm:$0xff] }
 0x57c   : > { %4244 = vst [vmem:[%s5564_s20 + $0xa8] sm:$0xff] %v3659_v3  ;;  %4102 = vmatpush.msrb.mxu2 %v774_v54  ;;  %v558_v54 = vld [vmem:[#allocation5 + $0x7d8] sm:$0xff] }
 0x57d   : > { %v3531_v17 = vpop.f32.mrf.mxu1  ;;  %3725 = vmatmul.f32.gmra.mxu0 %v7269_v12 }
 0x57e   : > { %v3532_v61 = vadd.f32 %v3531_v17, %v3467_v30  ;;  %3920 = vmatmul.f32.gmra.mxu3 %v7273_v9  ;;  %v3596_v48 = vpop.f32.mrf.mxu2  ;;  %v390_v30 = vld [vmem:[#allocation5 + $0x298] sm:$0xff] }
 0x57f   : > { %3972 = vmatpush.msrb.mxu0 %v390_v30 }
 0x580   : > { %v3597_v21 = vadd.f32 %v3596_v48, %v3532_v61  ;;  %3790 = vmatmul.f32.gmra.mxu1 %v7277_v26 }
 0x581   : > { %v3661_v53 = vpop.f32.mrf.mxu3  ;;  %3973 = vmatpush.msrb.mxu0 %v378_v46  ;;  %v7385_v46 = vld [vmem:[%s5286_s28 + $0x108] sm:$0xff] }
 0x582   : > { %v3662_v43 = vadd.f32 %v3661_v53, %v3597_v21  ;;  %v3469_v47 = vpop.f32.mrf.mxu0 }
 0x583   : > { %v3470_v29 = vadd.f32 %v3469_v47, %v7223_v2  ;;  %3858 = vmatmul.f32.gmra.mxu2 %v7283_v32  ;;  %v762_v47 = vld [vmem:[#allocation5 + $0xe38] sm:$0xff]  ;;  %3974 = vmatpush.msrb.mxu0 %v366_v22 }
 0x584   : > { %4256 = vst [vmem:[%s5564_s20 + $0x108] sm:$0xff] %v3662_v43  ;;  %v7337_v43 = vld [vmem:[%s5286_s28 + $0xd0] sm:$0xff]  ;;  %4103 = vmatpush.msrb.mxu2 %v762_v47  ;;  %v930_v47 = vld [vmem:[#allocation5 + $0x1378] sm:$0xff] }
 0x585   : > { %v3534_v20 = vpop.f32.mrf.mxu1  ;;  %3728 = vmatmul.f32.gmra.mxu0 %v7287_v38  ;;  %v342_v22 = vld [vmem:[#allocation5 + $0x118] sm:$0xff] }
 0x586   : > { %v3535_v18 = vadd.f32 %v3534_v20, %v3470_v29  ;;  %3923 = vmatmul.f32.gmra.mxu3 %v7291_v56  ;;  %v3599_v11 = vpop.f32.mrf.mxu2 }
 0x588   : > { %v3600_v5 = vadd.f32 %v3599_v11, %v3535_v18  ;;  %3793 = vmatmul.f32.gmra.mxu1 %v7295_v8  ;;  %v7345_v18 = vld [vmem:[%s5286_s28 + $0xd8] sm:$0xff] }
 0x589   : > { %v3664_v31 = vpop.f32.mrf.mxu3 }
 0x58a   : > { %v3665_v35 = vadd.f32 %v3664_v31, %v3600_v5  ;;  %v3472_v10 = vpop.f32.mrf.mxu0  ;;  %v570_v31 = vld [vmem:[#allocation5 + $0x838] sm:$0xff] }
 0x58b   : > { %v3473_v59 = vadd.f32 %v3472_v10, %v7223_v2  ;;  %3861 = vmatmul.f32.gmra.mxu2 %v7301_v1  ;;  %4038 = vmatpush.msrb.mxu1 %v570_v31 }
 0x58c   : > { %4268 = vst [vmem:[%s5564_s20 + $0x168] sm:$0xff] %v3665_v35 }
 0x58d   : > { %v3537_v37 = vpop.f32.mrf.mxu1  ;;  %3731 = vmatmul.f32.gmra.mxu0 %v7305_v49  ;;  %4039 = vmatpush.msrb.mxu1 %v558_v54  ;;  %v7403_v54 = vld [vmem:[%s5286_s28 + $0x128] sm:$0xff] }
 0x58e   : > { %v3538_v39 = vadd.f32 %v3537_v37, %v3473_v59  ;;  %3926 = vmatmul.f32.gmra.mxu3 %v7309_v25  ;;  %v3602_v16 = vpop.f32.mrf.mxu2  ;;  %v7355_v37 = vld [vmem:[%s5286_s28 + $0xf0] sm:$0xff] }
 0x58f   : > { %4040 = vmatpush.msrb.mxu1 %v546_v50  ;;  %v330_v50 = vld [vmem:[#allocation5 + $0xb8] sm:$0xff] }
 0x590   : > { %v3603_v42 = vadd.f32 %v3602_v16, %v3538_v39  ;;  %3796 = vmatmul.f32.gmra.mxu1 %v7313_v0  ;;  %v750_v39 = vld [vmem:[#allocation5 + $0xdd8] sm:$0xff] }
 0x591   : > { %v3667_v36 = vpop.f32.mrf.mxu3  ;;  %4104 = vmatpush.msrb.mxu2 %v750_v39  ;;  %v7395_v39 = vld [vmem:[%s5286_s28 + $0x120] sm:$0xff] }
 0x592   : > { %v3668_v13 = vadd.f32 %v3667_v36, %v3603_v42  ;;  %v3475_v62 = vpop.f32.mrf.mxu0  ;;  %v7363_v42 = vld [vmem:[%s5286_s28 + $0xf8] sm:$0xff] }
 0x593   : > { %v3476_v57 = vadd.f32 %v3475_v62, %v7223_v2  ;;  %3864 = vmatmul.f32.gmra.mxu2 %v7319_v6  ;;  %v942_v36 = vld [vmem:[#allocation5 + $0x13d8] sm:$0xff] }
 0x594   : > { %4280 = vst [vmem:[%s5564_s20 + $0x1c8] sm:$0xff] %v3668_v13  ;;  %4169 = vmatpush.msrb.mxu3 %v942_v36  ;;  %v918_v36 = vld [vmem:[#allocation5 + $0x1318] sm:$0xff] }
 0x595   : > { %v3540_v58 = vpop.f32.mrf.mxu1  ;;  %3734 = vmatmul.f32.gmra.mxu0 %v7323_v14 }
 0x596   : > { %v3541_v3 = vadd.f32 %v3540_v58, %v3476_v57  ;;  %3929 = vmatmul.f32.gmra.mxu3 %v7327_v51  ;;  %v3605_v17 = vpop.f32.mrf.mxu2  ;;  %v7367_v57 = vld [vmem:[%s5286_s28 + $0xe8] sm:$0xff] }
 0x597   : > { %4170 = vmatpush.msrb.mxu3 %v930_v47  ;;  %v7413_v47 = vld [vmem:[%s5286_s28 + $0x140] sm:$0xff] }
 0x598   : > { %v3606_v61 = vadd.f32 %v3605_v17, %v3541_v3  ;;  %3799 = vmatmul.f32.gmra.mxu1 %v7331_v41  ;;  %v7373_v17 = vld [vmem:[%s5286_s28 + $0x110] sm:$0xff] }
 0x599   : > { %v3670_v48 = vpop.f32.mrf.mxu3  ;;  %4171 = vmatpush.msrb.mxu3 %v918_v36 }
 0x59a   : > { %v3671_v21 = vadd.f32 %v3670_v48, %v3606_v61  ;;  %v3478_v15 = vpop.f32.mrf.mxu0  ;;  %v738_v61 = vld [vmem:[#allocation5 + $0xd78] sm:$0xff]  ;;  %v7377_v48 = vld [vmem:[%s5286_s28 + $0x100] sm:$0xff] }
 0x59b   : > { %v3479_v53 = vadd.f32 %v3478_v15, %v7223_v2  ;;  %3867 = vmatmul.f32.gmra.mxu2 %v7337_v43  ;;  %v7381_v15 = vld [vmem:[%s5286_s28 + $0x118] sm:$0xff] }
 0x59c   : > { %4292 = vst [vmem:[%s5564_s20 + $0x228] sm:$0xff] %v3671_v21  ;;  %4105 = vmatpush.msrb.mxu2 %v738_v61 }
 0x59d   : > { %v3543_v29 = vpop.f32.mrf.mxu1  ;;  %3737 = vmatmul.f32.gmra.mxu0 %v7341_v40 }
 0x59e   : > { %v3544_v20 = vadd.f32 %v3543_v29, %v3479_v53  ;;  %3932 = vmatmul.f32.gmra.mxu3 %v7345_v18  ;;  %v3608_v11 = vpop.f32.mrf.mxu2  ;;  %v354_v53 = vld [vmem:[#allocation5 + $0x178] sm:$0xff] }
 0x59f   : > { %3975 = vmatpush.msrb.mxu0 %v354_v53 }
 0x5a0   : > { %v3609_v5 = vadd.f32 %v3608_v11, %v3544_v20  ;;  %3802 = vmatmul.f32.gmra.mxu1 %v7349_v44 }
 0x5a1   : > { %v3673_v35 = vpop.f32.mrf.mxu3  ;;  %3976 = vmatpush.msrb.mxu0 %v342_v22 }
 0x5a2   : > { %v3674_v10 = vadd.f32 %v3673_v35, %v3609_v5  ;;  %v3481_v59 = vpop.f32.mrf.mxu0 }
 0x5a3   : > { %v3482_v23 = vadd.f32 %v3481_v59, %v7223_v2  ;;  %3870 = vmatmul.f32.gmra.mxu2 %v7355_v37  ;;  %v726_v59 = vld [vmem:[#allocation5 + $0xd18] sm:$0xff]  ;;  %3977 = vmatpush.msrb.mxu0 %v330_v50  ;;  %v7439_v50 = vld [vmem:[%s5286_s28 + $0x168] sm:$0xff] }
 0x5a4   : > { %4304 = vst [vmem:[%s5564_s20 + $0x288] sm:$0xff] %v3674_v10  ;;  %v7391_v10 = vld [vmem:[%s5286_s28 + $0x130] sm:$0xff]  ;;  %4106 = vmatpush.msrb.mxu2 %v726_v59  ;;  %v522_v59 = vld [vmem:[#allocation5 + $0x6b8] sm:$0xff] }
 0x5a5   : > { %v3546_v34 = vpop.f32.mrf.mxu1  ;;  %3740 = vmatmul.f32.gmra.mxu0 %v7359_v45 }
 0x5a6   : > { %v3547_v16 = vadd.f32 %v3546_v34, %v3482_v23  ;;  %3935 = vmatmul.f32.gmra.mxu3 %v7363_v42  ;;  %v3611_v13 = vpop.f32.mrf.mxu2 }
 0x5a8   : > { %v3612_v62 = vadd.f32 %v3611_v13, %v3547_v16  ;;  %3805 = vmatmul.f32.gmra.mxu1 %v7367_v57  ;;  %v7399_v16 = vld [vmem:[%s5286_s28 + $0x138] sm:$0xff] }
 0x5a9   : > { %v3676_v58 = vpop.f32.mrf.mxu3 }
 0x5aa   : > { %v3677_v3 = vadd.f32 %v3676_v58, %v3612_v62  ;;  %v3484_v30 = vpop.f32.mrf.mxu0  ;;  %v534_v58 = vld [vmem:[#allocation5 + $0x718] sm:$0xff] }
 0x5ab   : > { %v3485_v55 = vadd.f32 %v3484_v30, %v7223_v2  ;;  %3873 = vmatmul.f32.gmra.mxu2 %v7373_v17  ;;  %4041 = vmatpush.msrb.mxu1 %v534_v58 }
 0x5ac   : > { %4316 = vst [vmem:[%s5564_s20 + $0x2e8] sm:$0xff] %v3677_v3 }
 0x5ad   : > { %v3549_v63 = vpop.f32.mrf.mxu1  ;;  %3743 = vmatmul.f32.gmra.mxu0 %v7377_v48  ;;  %4042 = vmatpush.msrb.mxu1 %v522_v59 }
 0x5ae   : > { %v3550_v21 = vadd.f32 %v3549_v63, %v3485_v55  ;;  %3938 = vmatmul.f32.gmra.mxu3 %v7381_v15  ;;  %v3614_v29 = vpop.f32.mrf.mxu2  ;;  %v7409_v63 = vld [vmem:[%s5286_s28 + $0x150] sm:$0xff] }
 0x5b0   : > { %v3615_v20 = vadd.f32 %v3614_v29, %v3550_v21  ;;  %3808 = vmatmul.f32.gmra.mxu1 %v7385_v46  ;;  %v714_v21 = vld [vmem:[#allocation5 + $0xcb8] sm:$0xff] }
 0x5b1   : > { %v3679_v11 = vpop.f32.mrf.mxu3  ;;  %4107 = vmatpush.msrb.mxu2 %v714_v21  ;;  %v894_v21 = vld [vmem:[#allocation5 + $0x1258] sm:$0xff] }
 0x5b2   : > { %v3680_v5 = vadd.f32 %v3679_v11, %v3615_v20  ;;  %v3487_v31 = vpop.f32.mrf.mxu0  ;;  %v7417_v20 = vld [vmem:[%s5286_s28 + $0x158] sm:$0xff] }
 0x5b3   : > { %v3488_v35 = vadd.f32 %v3487_v31, %v7223_v2  ;;  %3876 = vmatmul.f32.gmra.mxu2 %v7391_v10  ;;  %v906_v11 = vld [vmem:[#allocation5 + $0x12b8] sm:$0xff] }
 0x5b4   : > { %4328 = vst [vmem:[%s5564_s20 + $0x348] sm:$0xff] %v3680_v5  ;;  %4172 = vmatpush.msrb.mxu3 %v906_v11  ;;  %v510_v11 = vld [vmem:[#allocation5 + $0x658] sm:$0xff] }
 0x5b5   : > { %v3552_v23 = vpop.f32.mrf.mxu1  ;;  %3746 = vmatmul.f32.gmra.mxu0 %v7395_v39  ;;  %4043 = vmatpush.msrb.mxu1 %v510_v11 }
 0x5b6   : > { %v3553_v34 = vadd.f32 %v3552_v23, %v3488_v35  ;;  %3941 = vmatmul.f32.gmra.mxu3 %v7399_v16  ;;  %v3617_v13 = vpop.f32.mrf.mxu2  ;;  %v7421_v35 = vld [vmem:[%s5286_s28 + $0x148] sm:$0xff] }
 0x5b7   : > { %4173 = vmatpush.msrb.mxu3 %v894_v21  ;;  %v7457_v21 = vld [vmem:[%s5286_s28 + $0x188] sm:$0xff] }
 0x5b8   : > { %v3618_v62 = vadd.f32 %v3617_v13, %v3553_v34  ;;  %3811 = vmatmul.f32.gmra.mxu1 %v7403_v54  ;;  %v7427_v13 = vld [vmem:[%s5286_s28 + $0x170] sm:$0xff]  ;;  %7923 = vst [vmem:[#allocation12_spill] sm:$0xff] %v7457_v21 }
 0x5b9   : > { %v3682_v3 = vpop.f32.mrf.mxu3 }
 0x5ba   : > { %v3683_v30 = vadd.f32 %v3682_v3, %v3618_v62  ;;  %v3490_v55 = vpop.f32.mrf.mxu0  ;;  %v702_v62 = vld [vmem:[#allocation5 + $0xc58] sm:$0xff]  ;;  %v7431_v3 = vld [vmem:[%s5286_s28 + $0x160] sm:$0xff] }
 0x5bb   : > { %v3491_v61 = vadd.f32 %v3490_v55, %v7223_v2  ;;  %3879 = vmatmul.f32.gmra.mxu2 %v7409_v63  ;;  %v7435_v55 = vld [vmem:[%s5286_s28 + $0x178] sm:$0xff] }
 0x5bc   : > { %4340 = vst [vmem:[%s5564_s20 + $0x3a8] sm:$0xff] %v3683_v30  ;;  %4108 = vmatpush.msrb.mxu2 %v702_v62 }
 0x5bd   : > { %v3555_v53 = vpop.f32.mrf.mxu1  ;;  %3749 = vmatmul.f32.gmra.mxu0 %v7413_v47 }
 0x5be   : > { %v3556_v29 = vadd.f32 %v3555_v53, %v3491_v61  ;;  %3944 = vmatmul.f32.gmra.mxu3 %v7417_v20  ;;  %v3620_v5 = vpop.f32.mrf.mxu2  ;;  %v318_v61 = vld [vmem:[#allocation5 + $0x58] sm:$0xff] }
 0x5bf   : > { %3978 = vmatpush.msrb.mxu0 %v318_v61 }
 0x5c0   : > { %v3621_v31 = vadd.f32 %v3620_v5, %v3556_v29  ;;  %3814 = vmatmul.f32.gmra.mxu1 %v7421_v35 }
 0x5c1   : > { %v3685_v23 = vpop.f32.mrf.mxu3 }
 0x5c2   : > { %v3686_v34 = vadd.f32 %v3685_v23, %v3621_v31  ;;  %v3493_v22 = vpop.f32.mrf.mxu0 }
 0x5c3   : > { %v3494_v36 = vadd.f32 %v3493_v22, %v7223_v2  ;;  %3882 = vmatmul.f32.gmra.mxu2 %v7427_v13 }
 0x5c4   : > { %4352 = vst [vmem:[%s5564_s20 + $0x408] sm:$0xff] %v3686_v34  ;;  %v7445_v34 = vld [vmem:[%s5286_s28 + $0x190] sm:$0xff] }
 0x5c5   : > { %v3558_v58 = vpop.f32.mrf.mxu1  ;;  %3752 = vmatmul.f32.gmra.mxu0 %v7431_v3 }
 0x5c6   : > { %v3559_v30 = vadd.f32 %v3558_v58, %v3494_v36  ;;  %3947 = vmatmul.f32.gmra.mxu3 %v7435_v55  ;;  %v3623_v53 = vpop.f32.mrf.mxu2  ;;  %v7449_v36 = vld [vmem:[%s5286_s28 + $0x180] sm:$0xff]  ;;  %v7453_v58 = vld [vmem:[%s5286_s28 + $0x198] sm:$0xff] }
 0x5c8   : > { %v3624_v29 = vadd.f32 %v3623_v53, %v3559_v30  ;;  %3817 = vmatmul.f32.gmra.mxu1 %v7439_v50 }
 0x5c9   : > { %v3688_v5 = vpop.f32.mrf.mxu3 }
 0x5ca   : > { %v3689_v31 = vadd.f32 %v3688_v5, %v3624_v29  ;;  %v3496_v59 = vpop.f32.mrf.mxu0 }
 0x5cb   : > { %v3497_v23 = vadd.f32 %v3496_v59, %v7223_v2  ;;  %3885 = vmatmul.f32.gmra.mxu2 %v7445_v34 }
 0x5cc   : > { %4364 = vst [vmem:[%s5564_s20 + $0x468] sm:$0xff] %v3689_v31  ;;  %v7463_v31 = vld [vmem:[%s5286_s28 + $0x1b0] sm:$0xff] }
 0x5cd   : > { %v3561_v22 = vpop.f32.mrf.mxu1  ;;  %3755 = vmatmul.f32.gmra.mxu0 %v7449_v36  ;;  %7924 = vst [vmem:[#allocation13_spill] sm:$0xff] %v7463_v31 }
 0x5ce   : > { %v3562_v62 = vadd.f32 %v3561_v22, %v3497_v23  ;;  %3950 = vmatmul.f32.gmra.mxu3 %v7453_v58  ;;  %v3626_v30 = vpop.f32.mrf.mxu2  ;;  %v7467_v23 = vld [vmem:[%s5286_s28 + $0x1a0] sm:$0xff] }
 0x5cf   : > { %7925 = vst [vmem:[#allocation14_spill] sm:$0xff] %v7467_v23 }
 0x5d0   : > { %v3627_v61 = vadd.f32 %v3626_v30, %v3562_v62  ;;  %3820 = vmatmul.f32.gmra.mxu1 %v7457_v21  ;;  %v7471_v62 = vld [vmem:[%s5286_s28 + $0x1b8] sm:$0xff] }
 0x5d1   : > { %v3691_v53 = vpop.f32.mrf.mxu3  ;;  %7926 = vst [vmem:[#allocation15_spill] sm:$0xff] %v7471_v62 }
 0x5d2   : > { %v3692_v29 = vadd.f32 %v3691_v53, %v3627_v61  ;;  %v3499_v11 = vpop.f32.mrf.mxu0  ;;  %v7475_v53 = vld [vmem:[%s5286_s28 + $0x1a8] sm:$0xff] }
 0x5d3   : > { %v3500_v5 = vadd.f32 %v3499_v11, %v7223_v2  ;;  %3888 = vmatmul.f32.gmra.mxu2 %v7463_v31  ;;  %7927 = vst [vmem:[#allocation16_spill] sm:$0xff] %v7475_v53 }
 0x5d4   : > { %4376 = vst [vmem:[%s5564_s20 + $0x4c8] sm:$0xff] %v3692_v29 }
 0x5d5   : > { %v3564_v59 = vpop.f32.mrf.mxu1  ;;  %3758 = vmatmul.f32.gmra.mxu0 %v7467_v23  ;;  %v7481_v23 = vld [vmem:[%s5286_s28 + $0x1d0] sm:$0xff] }
 0x5d6   : > { %v3565_v22 = vadd.f32 %v3564_v59, %v3500_v5  ;;  %3953 = vmatmul.f32.gmra.mxu3 %v7471_v62  ;;  %v3629_v30 = vpop.f32.mrf.mxu2  ;;  %7928 = vst [vmem:[#allocation17_spill] sm:$0xff] %v7481_v23  ;;  %v7485_v59 = vld [vmem:[%s5286_s28 + $0x1c0] sm:$0xff] }
 0x5d7   : > { %7929 = vst [vmem:[#allocation18_spill] sm:$0xff] %v7485_v59 }
 0x5d8   : > { %v3630_v61 = vadd.f32 %v3629_v30, %v3565_v22  ;;  %3823 = vmatmul.f32.gmra.mxu1 %v7475_v53  ;;  %v7489_v30 = vld [vmem:[%s5286_s28 + $0x1d8] sm:$0xff] }
 0x5d9   : > { %v3694_v29 = vpop.f32.mrf.mxu3 }
 0x5da   : > { %v3695_v11 = vadd.f32 %v3694_v29, %v3630_v61  ;;  %v3502_v31 = vpop.f32.mrf.mxu0  ;;  %v7493_v29 = vld [vmem:[%s5286_s28 + $0x1c8] sm:$0xff] }
 0x5db   : > { %v3503_v21 = vadd.f32 %v3502_v31, %v7223_v2  ;;  %3891 = vmatmul.f32.gmra.mxu2 %v7481_v23  ;;  %7930 = vst [vmem:[#allocation19_spill] sm:$0xff] %v7493_v29 }
 0x5dc   : > { %4388 = vst [vmem:[%s5564_s20 + $0x528] sm:$0xff] %v3695_v11 }
 0x5dd   : > { %v3567_v5 = vpop.f32.mrf.mxu1  ;;  %3761 = vmatmul.f32.gmra.mxu0 %v7485_v59  ;;  %v7499_v59 = vld [vmem:[%s5286_s28 + $0x1f0] sm:$0xff] }
 0x5de   : > { %v3568_v22 = vadd.f32 %v3567_v5, %v3503_v21  ;;  %3956 = vmatmul.f32.gmra.mxu3 %v7489_v30  ;;  %v3632_v31 = vpop.f32.mrf.mxu2  ;;  %7931 = vst [vmem:[#allocation20_spill] sm:$0xff] %v7499_v59  ;;  %v7503_v5 = vld [vmem:[%s5286_s28 + $0x1e0] sm:$0xff] }
 0x5df   : > { %7932 = vst [vmem:[#allocation21_spill] sm:$0xff] %v7503_v5 }
 0x5e0   : > { %v3633_v61 = vadd.f32 %v3632_v31, %v3568_v22  ;;  %3826 = vmatmul.f32.gmra.mxu1 %v7493_v29  ;;  %v7507_v31 = vld [vmem:[%s5286_s28 + $0x1f8] sm:$0xff] }
 0x5e1   : > { %v3697_v11 = vpop.f32.mrf.mxu3  ;;  %7933 = vst [vmem:[#allocation22_spill] sm:$0xff] %v7507_v31 }
 0x5e2   : > { %v3698_v23 = vadd.f32 %v3697_v11, %v3633_v61  ;;  %v3505_v53 = vpop.f32.mrf.mxu0  ;;  %v7510_v11 = vld [vmem:[#allocation7 + $0x8] sm:$0xf] }
 0x5e3   : > { %v3506_v62 = vadd.f32 %v3505_v53, %v7223_v2  ;;  %3894 = vmatmul.f32.gmra.mxu2 %v7499_v59  ;;  %7934 = vst [vmem:[#allocation24_spill] sm:$0xff] %v7510_v11  ;;  %v7513_v2 = vperm.slane %v7510_v11, 2  ;;  %v7516_v53 = vld [vmem:[%s5286_s28 + $0x1e8] sm:$0xff] }
 0x5e4   : > { %4400 = vst [vmem:[%s5564_s20 + $0x588] sm:$0xff] %v3698_v23 }
 0x5e5   : > { %v3570_v21 = vpop.f32.mrf.mxu1  ;;  %3764 = vmatmul.f32.gmra.mxu0 %v7503_v5  ;;  %7935 = vst [vmem:[#allocation25_spill] sm:$0xff] %v7516_v53 }
 0x5e6   : > { %v3571_v22 = vadd.f32 %v3570_v21, %v3506_v62  ;;  %3959 = vmatmul.f32.gmra.mxu3 %v7507_v31  ;;  %v3635_v61 = vpop.f32.mrf.mxu2 }
 0x5e8   : > { %v3636_v23 = vadd.f32 %v3635_v61, %v3571_v22  ;;  %3829 = vmatmul.f32.gmra.mxu1 %v7516_v53 }
 0x5e9   : > { %v3700_v59 = vpop.f32.mrf.mxu3 }
 0x5ea   : > { %v3701_v29 = vadd.f32 %v3700_v59, %v3636_v23  ;;  %v3720_v5 = vpop.f32.mrf.mxu0 }
 0x5eb   : > { %v3721_v62 = vadd.f32 %v3720_v5, %v7513_v2  ;;  %4109 = vmatmul.f32.vlgmr.msrb.gmra.mxu2 %v7229_v52 }
 0x5ec   : > { %4412 = vst [vmem:[%s5564_s20 + $0x5e8] sm:$0xff] %v3701_v29 }
 0x5ed   : > { %v3785_v21 = vpop.f32.mrf.mxu1  ;;  %3979 = vmatmul.f32.vlgmr.msrb.gmra.mxu0 %v7233_v60 }
 0x5ee   : > { %v3786_v31 = vadd.f32 %v3785_v21, %v3721_v62  ;;  %4174 = vmatmul.f32.vlgmr.msrb.gmra.mxu3 %v7237_v33  ;;  %v3850_v22 = vpop.f32.mrf.mxu2 }
 0x5f0   : > { %v3851_v61 = vadd.f32 %v3850_v22, %v3786_v31  ;;  %4044 = vmatmul.f32.vlgmr.msrb.gmra.mxu1 %v7241_v24 }
 0x5f1   : > { %v3915_v53 = vpop.f32.mrf.mxu3 }
 0x5f2   : > { %v3916_v11 = vadd.f32 %v3915_v53, %v3851_v61  ;;  %v3723_v59 = vpop.f32.mrf.mxu0 }
 0x5f3   : > { %v3724_v23 = vadd.f32 %v3723_v59, %v7513_v2  ;;  %4112 = vmatmul.f32.gmra.mxu2 %v7247_v19 }
 0x5f4   : > { %4233 = vst [vmem:[%s5564_s20 + $0x50] sm:$0xff] %v3916_v11 }
 0x5f5   : > { %v3788_v52 = vpop.f32.mrf.mxu1  ;;  %3982 = vmatmul.f32.gmra.mxu0 %v7251_v4 }
 0x5f6   : > { %v3789_v60 = vadd.f32 %v3788_v52, %v3724_v23  ;;  %4177 = vmatmul.f32.gmra.mxu3 %v7255_v7  ;;  %v3853_v33 = vpop.f32.mrf.mxu2 }
 0x5f8   : > { %v3854_v29 = vadd.f32 %v3853_v33, %v3789_v60  ;;  %4047 = vmatmul.f32.gmra.mxu1 %v7259_v27 }
 0x5f9   : > { %v3918_v24 = vpop.f32.mrf.mxu3 }
 0x5fa   : > { %v3919_v5 = vadd.f32 %v3918_v24, %v3854_v29  ;;  %v3726_v31 = vpop.f32.mrf.mxu0 }
 0x5fb   : > { %v3727_v53 = vadd.f32 %v3726_v31, %v7513_v2  ;;  %4115 = vmatmul.f32.gmra.mxu2 %v7265_v28 }
 0x5fc   : > { %4245 = vst [vmem:[%s5564_s20 + $0xb0] sm:$0xff] %v3919_v5 }
 0x5fd   : > { %v3791_v19 = vpop.f32.mrf.mxu1  ;;  %3985 = vmatmul.f32.gmra.mxu0 %v7269_v12 }
 0x5fe   : > { %v3792_v4 = vadd.f32 %v3791_v19, %v3727_v53  ;;  %4180 = vmatmul.f32.gmra.mxu3 %v7273_v9  ;;  %v3856_v7 = vpop.f32.mrf.mxu2 }
 0x600   : > { %v3857_v11 = vadd.f32 %v3856_v7, %v3792_v4  ;;  %4050 = vmatmul.f32.gmra.mxu1 %v7277_v26 }
 0x601   : > { %v3921_v27 = vpop.f32.mrf.mxu3 }
 0x602   : > { %v3922_v62 = vadd.f32 %v3921_v27, %v3857_v11  ;;  %v3729_v21 = vpop.f32.mrf.mxu0 }
 0x603   : > { %v3730_v22 = vadd.f32 %v3729_v21, %v7513_v2  ;;  %4118 = vmatmul.f32.gmra.mxu2 %v7283_v32 }
 0x604   : > { %4257 = vst [vmem:[%s5564_s20 + $0x110] sm:$0xff] %v3922_v62 }
 0x605   : > { %v3794_v28 = vpop.f32.mrf.mxu1  ;;  %3988 = vmatmul.f32.gmra.mxu0 %v7287_v38 }
 0x606   : > { %v3795_v12 = vadd.f32 %v3794_v28, %v3730_v22  ;;  %4183 = vmatmul.f32.gmra.mxu3 %v7291_v56  ;;  %v3859_v9 = vpop.f32.mrf.mxu2 }
 0x608   : > { %v3860_v61 = vadd.f32 %v3859_v9, %v3795_v12  ;;  %4053 = vmatmul.f32.gmra.mxu1 %v7295_v8 }
 0x609   : > { %v3924_v26 = vpop.f32.mrf.mxu3 }
 0x60a   : > { %v3925_v59 = vadd.f32 %v3924_v26, %v3860_v61  ;;  %v3732_v23 = vpop.f32.mrf.mxu0 }
 0x60b   : > { %v3733_v52 = vadd.f32 %v3732_v23, %v7513_v2  ;;  %4121 = vmatmul.f32.gmra.mxu2 %v7301_v1 }
 0x60c   : > { %4269 = vst [vmem:[%s5564_s20 + $0x170] sm:$0xff] %v3925_v59 }
 0x60d   : > { %v3797_v32 = vpop.f32.mrf.mxu1  ;;  %3991 = vmatmul.f32.gmra.mxu0 %v7305_v49 }
 0x60e   : > { %v3798_v38 = vadd.f32 %v3797_v32, %v3733_v52  ;;  %4186 = vmatmul.f32.gmra.mxu3 %v7309_v25  ;;  %v3862_v56 = vpop.f32.mrf.mxu2 }
 0x610   : > { %v3863_v60 = vadd.f32 %v3862_v56, %v3798_v38  ;;  %4056 = vmatmul.f32.gmra.mxu1 %v7313_v0 }
 0x611   : > { %v3927_v8 = vpop.f32.mrf.mxu3 }
 0x612   : > { %v3928_v33 = vadd.f32 %v3927_v8, %v3863_v60  ;;  %v3735_v29 = vpop.f32.mrf.mxu0 }
 0x613   : > { %v3736_v24 = vadd.f32 %v3735_v29, %v7513_v2  ;;  %4124 = vmatmul.f32.gmra.mxu2 %v7319_v6 }
 0x614   : > { %4281 = vst [vmem:[%s5564_s20 + $0x1d0] sm:$0xff] %v3928_v33 }
 0x615   : > { %v3800_v1 = vpop.f32.mrf.mxu1  ;;  %3994 = vmatmul.f32.gmra.mxu0 %v7323_v14 }
 0x616   : > { %v3801_v49 = vadd.f32 %v3800_v1, %v3736_v24  ;;  %4189 = vmatmul.f32.gmra.mxu3 %v7327_v51  ;;  %v3865_v25 = vpop.f32.mrf.mxu2 }
 0x618   : > { %v3866_v5 = vadd.f32 %v3865_v25, %v3801_v49  ;;  %4059 = vmatmul.f32.gmra.mxu1 %v7331_v41  ;;  %v7936_v25 = vld [vmem:[#allocation12_spill] sm:$0xff] }
 0x619   : > { %v3930_v0 = vpop.f32.mrf.mxu3 }
 0x61a   : > { %v3931_v31 = vadd.f32 %v3930_v0, %v3866_v5  ;;  %v3738_v53 = vpop.f32.mrf.mxu0 }
 0x61b   : > { %v3739_v19 = vadd.f32 %v3738_v53, %v7513_v2  ;;  %4127 = vmatmul.f32.gmra.mxu2 %v7337_v43  ;;  %v7937_v53 = vld [vmem:[#allocation13_spill] sm:$0xff] }
 0x61c   : > { %4293 = vst [vmem:[%s5564_s20 + $0x230] sm:$0xff] %v3931_v31 }
 0x61d   : > { %v3803_v6 = vpop.f32.mrf.mxu1  ;;  %3997 = vmatmul.f32.gmra.mxu0 %v7341_v40 }
 0x61e   : > { %v3804_v14 = vadd.f32 %v3803_v6, %v3739_v19  ;;  %4192 = vmatmul.f32.gmra.mxu3 %v7345_v18  ;;  %v3868_v51 = vpop.f32.mrf.mxu2  ;;  %v7938_v19 = vld [vmem:[#allocation14_spill] sm:$0xff]  ;;  %v7939_v6 = vld [vmem:[#allocation15_spill] sm:$0xff] }
 0x620   : > { %v3869_v4 = vadd.f32 %v3868_v51, %v3804_v14  ;;  %4062 = vmatmul.f32.gmra.mxu1 %v7349_v44  ;;  %v7940_v51 = vld [vmem:[#allocation16_spill] sm:$0xff] }
 0x621   : > { %v3933_v41 = vpop.f32.mrf.mxu3 }
 0x622   : > { %v3934_v7 = vadd.f32 %v3933_v41, %v3869_v4  ;;  %v3741_v11 = vpop.f32.mrf.mxu0 }
 0x623   : > { %v3742_v27 = vadd.f32 %v3741_v11, %v7513_v2  ;;  %4130 = vmatmul.f32.gmra.mxu2 %v7355_v37 }
 0x624   : > { %4305 = vst [vmem:[%s5564_s20 + $0x290] sm:$0xff] %v3934_v7 }
 0x625   : > { %v3806_v43 = vpop.f32.mrf.mxu1  ;;  %4000 = vmatmul.f32.gmra.mxu0 %v7359_v45 }
 0x626   : > { %v3807_v40 = vadd.f32 %v3806_v43, %v3742_v27  ;;  %4195 = vmatmul.f32.gmra.mxu3 %v7363_v42  ;;  %v3871_v18 = vpop.f32.mrf.mxu2  ;;  %v7941_v27 = vld [vmem:[#allocation17_spill] sm:$0xff] }
 0x628   : > { %v3872_v62 = vadd.f32 %v3871_v18, %v3807_v40  ;;  %4065 = vmatmul.f32.gmra.mxu1 %v7367_v57  ;;  %v7942_v40 = vld [vmem:[#allocation18_spill] sm:$0xff] }
 0x629   : > { %v3936_v44 = vpop.f32.mrf.mxu3 }
 0x62a   : > { %v3937_v21 = vadd.f32 %v3936_v44, %v3872_v62  ;;  %v3744_v22 = vpop.f32.mrf.mxu0 }
 0x62b   : > { %v3745_v28 = vadd.f32 %v3744_v22, %v7513_v2  ;;  %4133 = vmatmul.f32.gmra.mxu2 %v7373_v17 }
 0x62c   : > { %4317 = vst [vmem:[%s5564_s20 + $0x2f0] sm:$0xff] %v3937_v21  ;;  %v7943_v21 = vld [vmem:[#allocation19_spill] sm:$0xff] }
 0x62d   : > { %v3809_v37 = vpop.f32.mrf.mxu1  ;;  %4003 = vmatmul.f32.gmra.mxu0 %v7377_v48 }
 0x62e   : > { %v3810_v45 = vadd.f32 %v3809_v37, %v3745_v28  ;;  %4198 = vmatmul.f32.gmra.mxu3 %v7381_v15  ;;  %v3874_v42 = vpop.f32.mrf.mxu2 }
 0x630   : > { %v3875_v12 = vadd.f32 %v3874_v42, %v3810_v45  ;;  %4068 = vmatmul.f32.gmra.mxu1 %v7385_v46  ;;  %v7944_v42 = vld [vmem:[#allocation20_spill] sm:$0xff] }
 0x631   : > { %v3939_v57 = vpop.f32.mrf.mxu3 }
 0x632   : > { %v3940_v9 = vadd.f32 %v3939_v57, %v3875_v12  ;;  %v3747_v61 = vpop.f32.mrf.mxu0  ;;  %v7945_v57 = vld [vmem:[#allocation21_spill] sm:$0xff] }
 0x633   : > { %v3748_v26 = vadd.f32 %v3747_v61, %v7513_v2  ;;  %4136 = vmatmul.f32.gmra.mxu2 %v7391_v10  ;;  %v7946_v61 = vld [vmem:[#allocation22_spill] sm:$0xff] }
 0x634   : > { %4329 = vst [vmem:[%s5564_s20 + $0x350] sm:$0xff] %v3940_v9 }
 0x635   : > { %v3812_v17 = vpop.f32.mrf.mxu1  ;;  %4006 = vmatmul.f32.gmra.mxu0 %v7395_v39 }
 0x636   : > { %v3813_v48 = vadd.f32 %v3812_v17, %v3748_v26  ;;  %4201 = vmatmul.f32.gmra.mxu3 %v7399_v16  ;;  %v3877_v15 = vpop.f32.mrf.mxu2  ;;  %v7947_v26 = vld [vmem:[#allocation24_spill] sm:$0xff] }
 0x637   : > { %v7615_v17 = vperm.slane %v7947_v26, 3 }
 0x638   : > { %v3878_v59 = vadd.f32 %v3877_v15, %v3813_v48  ;;  %4071 = vmatmul.f32.gmra.mxu1 %v7403_v54  ;;  %v7948_v15 = vld [vmem:[#allocation25_spill] sm:$0xff] }
 0x639   : > { %v3942_v46 = vpop.f32.mrf.mxu3 }
 0x63a   : > { %v3943_v23 = vadd.f32 %v3942_v46, %v3878_v59  ;;  %v3750_v52 = vpop.f32.mrf.mxu0 }
 0x63b   : > { %v3751_v32 = vadd.f32 %v3750_v52, %v7513_v2  ;;  %4139 = vmatmul.f32.gmra.mxu2 %v7409_v63 }
 0x63c   : > { %4341 = vst [vmem:[%s5564_s20 + $0x3b0] sm:$0xff] %v3943_v23 }
 0x63d   : > { %v3815_v10 = vpop.f32.mrf.mxu1  ;;  %4009 = vmatmul.f32.gmra.mxu0 %v7413_v47 }
 0x63e   : > { %v3816_v39 = vadd.f32 %v3815_v10, %v3751_v32  ;;  %4204 = vmatmul.f32.gmra.mxu3 %v7417_v20  ;;  %v3880_v16 = vpop.f32.mrf.mxu2 }
 0x640   : > { %v3881_v38 = vadd.f32 %v3880_v16, %v3816_v39  ;;  %4074 = vmatmul.f32.gmra.mxu1 %v7421_v35 }
 0x641   : > { %v3945_v54 = vpop.f32.mrf.mxu3 }
 0x642   : > { %v3946_v56 = vadd.f32 %v3945_v54, %v3881_v38  ;;  %v3753_v60 = vpop.f32.mrf.mxu0 }
 0x643   : > { %v3754_v8 = vadd.f32 %v3753_v60, %v7513_v2  ;;  %4142 = vmatmul.f32.gmra.mxu2 %v7427_v13 }
 0x644   : > { %4353 = vst [vmem:[%s5564_s20 + $0x410] sm:$0xff] %v3946_v56 }
 0x645   : > { %v3818_v63 = vpop.f32.mrf.mxu1  ;;  %4012 = vmatmul.f32.gmra.mxu0 %v7431_v3 }
 0x646   : > { %v3819_v47 = vadd.f32 %v3818_v63, %v3754_v8  ;;  %4207 = vmatmul.f32.gmra.mxu3 %v7435_v55  ;;  %v3883_v20 = vpop.f32.mrf.mxu2 }
 0x648   : > { %v3884_v33 = vadd.f32 %v3883_v20, %v3819_v47  ;;  %4077 = vmatmul.f32.gmra.mxu1 %v7439_v50 }
 0x649   : > { %v3948_v35 = vpop.f32.mrf.mxu3 }
 0x64a   : > { %v3949_v29 = vadd.f32 %v3948_v35, %v3884_v33  ;;  %v3756_v24 = vpop.f32.mrf.mxu0 }
 0x64b   : > { %v3757_v1 = vadd.f32 %v3756_v24, %v7513_v2  ;;  %4145 = vmatmul.f32.gmra.mxu2 %v7445_v34 }
 0x64c   : > { %4365 = vst [vmem:[%s5564_s20 + $0x470] sm:$0xff] %v3949_v29 }
 0x64d   : > { %v3821_v13 = vpop.f32.mrf.mxu1  ;;  %4015 = vmatmul.f32.gmra.mxu0 %v7449_v36 }
 0x64e   : > { %v3822_v3 = vadd.f32 %v3821_v13, %v3757_v1  ;;  %4210 = vmatmul.f32.gmra.mxu3 %v7453_v58  ;;  %v3886_v55 = vpop.f32.mrf.mxu2 }
 0x650   : > { %v3887_v49 = vadd.f32 %v3886_v55, %v3822_v3  ;;  %4080 = vmatmul.f32.gmra.mxu1 %v7936_v25 }
 0x651   : > { %v3951_v50 = vpop.f32.mrf.mxu3 }
 0x652   : > { %v3952_v5 = vadd.f32 %v3951_v50, %v3887_v49  ;;  %v3759_v0 = vpop.f32.mrf.mxu0 }
 0x653   : > { %v3760_v31 = vadd.f32 %v3759_v0, %v7513_v2  ;;  %4148 = vmatmul.f32.gmra.mxu2 %v7937_v53 }
 0x654   : > { %4377 = vst [vmem:[%s5564_s20 + $0x4d0] sm:$0xff] %v3952_v5 }
 0x655   : > { %v3824_v34 = vpop.f32.mrf.mxu1  ;;  %4018 = vmatmul.f32.gmra.mxu0 %v7938_v19 }
 0x656   : > { %v3825_v36 = vadd.f32 %v3824_v34, %v3760_v31  ;;  %4213 = vmatmul.f32.gmra.mxu3 %v7939_v6  ;;  %v3889_v58 = vpop.f32.mrf.mxu2 }
 0x658   : > { %v3890_v14 = vadd.f32 %v3889_v58, %v3825_v36  ;;  %4083 = vmatmul.f32.gmra.mxu1 %v7940_v51 }
 0x659   : > { %v3954_v4 = vpop.f32.mrf.mxu3 }
 0x65a   : > { %v3955_v41 = vadd.f32 %v3954_v4, %v3890_v14  ;;  %v3762_v7 = vpop.f32.mrf.mxu0 }
 0x65b   : > { %v3763_v11 = vadd.f32 %v3762_v7, %v7513_v2  ;;  %4151 = vmatmul.f32.gmra.mxu2 %v7941_v27 }
 0x65c   : > { %4389 = vst [vmem:[%s5564_s20 + $0x530] sm:$0xff] %v3955_v41 }
 0x65d   : > { %v3827_v43 = vpop.f32.mrf.mxu1  ;;  %4021 = vmatmul.f32.gmra.mxu0 %v7942_v40 }
 0x65e   : > { %v3828_v18 = vadd.f32 %v3827_v43, %v3763_v11  ;;  %4216 = vmatmul.f32.gmra.mxu3 %v7489_v30  ;;  %v3892_v62 = vpop.f32.mrf.mxu2 }
 0x660   : > { %v3893_v44 = vadd.f32 %v3892_v62, %v3828_v18  ;;  %4086 = vmatmul.f32.gmra.mxu1 %v7943_v21 }
 0x661   : > { %v3957_v22 = vpop.f32.mrf.mxu3 }
 0x662   : > { %v3958_v28 = vadd.f32 %v3957_v22, %v3893_v44  ;;  %v3765_v37 = vpop.f32.mrf.mxu0 }
 0x663   : > { %v3766_v45 = vadd.f32 %v3765_v37, %v7513_v2  ;;  %4154 = vmatmul.f32.gmra.mxu2 %v7944_v42 }
 0x664   : > { %4401 = vst [vmem:[%s5564_s20 + $0x590] sm:$0xff] %v3958_v28 }
 0x665   : > { %v3830_v12 = vpop.f32.mrf.mxu1  ;;  %4024 = vmatmul.f32.gmra.mxu0 %v7945_v57 }
 0x666   : > { %v3831_v9 = vadd.f32 %v3830_v12, %v3766_v45  ;;  %4219 = vmatmul.f32.gmra.mxu3 %v7946_v61  ;;  %v3895_v30 = vpop.f32.mrf.mxu2 }
 0x668   : > { %v3896_v48 = vadd.f32 %v3895_v30, %v3831_v9  ;;  %4089 = vmatmul.f32.gmra.mxu1 %v7948_v15 }
 0x669   : > { %v3960_v59 = vpop.f32.mrf.mxu3 }
 0x66a   : > { %v3961_v46 = vadd.f32 %v3960_v59, %v3896_v48  ;;  %v3980_v2 = vpop.f32.mrf.mxu0 }
 0x66b   : > { %v3981_v23 = vadd.f32 %v3980_v2, %v7615_v17 }
 0x66c   : > { %4413 = vst [vmem:[%s5564_s20 + $0x5f0] sm:$0xff] %v3961_v46 }
 0x66d   : > { %v4045_v52 = vpop.f32.mrf.mxu1 }
 0x66e   : > { %v4046_v32 = vadd.f32 %v4045_v52, %v3981_v23  ;;  %v4110_v10 = vpop.f32.mrf.mxu2 }
 0x670   : > { %v4111_v39 = vadd.f32 %v4110_v10, %v4046_v32 }
 0x671   : > { %v4175_v16 = vpop.f32.mrf.mxu3 }
 0x672   : > { %v4176_v38 = vadd.f32 %v4175_v16, %v4111_v39  ;;  %v3983_v54 = vpop.f32.mrf.mxu0 }
 0x673   : > { %v3984_v56 = vadd.f32 %v3983_v54, %v7615_v17 }
 0x674   : > { %4234 = vst [vmem:[%s5564_s20 + $0x58] sm:$0xff] %v4176_v38 }
 0x675   : > { %v4048_v60 = vpop.f32.mrf.mxu1 }
 0x676   : > { %v4049_v8 = vadd.f32 %v4048_v60, %v3984_v56  ;;  %v4113_v63 = vpop.f32.mrf.mxu2 }
 0x678   : > { %v4114_v47 = vadd.f32 %v4113_v63, %v4049_v8 }
 0x679   : > { %v4178_v20 = vpop.f32.mrf.mxu3 }
 0x67a   : > { %v4179_v33 = vadd.f32 %v4178_v20, %v4114_v47  ;;  %v3986_v35 = vpop.f32.mrf.mxu0 }
 0x67b   : > { %v3987_v29 = vadd.f32 %v3986_v35, %v7615_v17 }
 0x67c   : > { %4246 = vst [vmem:[%s5564_s20 + $0xb8] sm:$0xff] %v4179_v33 }
 0x67d   : > { %v4051_v24 = vpop.f32.mrf.mxu1 }
 0x67e   : > { %v4052_v1 = vadd.f32 %v4051_v24, %v3987_v29  ;;  %v4116_v13 = vpop.f32.mrf.mxu2 }
 0x680   : > { %v4117_v3 = vadd.f32 %v4116_v13, %v4052_v1 }
 0x681   : > { %v4181_v55 = vpop.f32.mrf.mxu3 }
 0x682   : > { %v4182_v49 = vadd.f32 %v4181_v55, %v4117_v3  ;;  %v3989_v25 = vpop.f32.mrf.mxu0 }
 0x683   : > { %v3990_v50 = vadd.f32 %v3989_v25, %v7615_v17 }
 0x684   : > { %4258 = vst [vmem:[%s5564_s20 + $0x118] sm:$0xff] %v4182_v49 }
 0x685   : > { %v4054_v5 = vpop.f32.mrf.mxu1 }
 0x686   : > { %v4055_v0 = vadd.f32 %v4054_v5, %v3990_v50  ;;  %v4119_v31 = vpop.f32.mrf.mxu2 }
 0x688   : > { %v4120_v53 = vadd.f32 %v4119_v31, %v4055_v0 }
 0x689   : > { %v4184_v34 = vpop.f32.mrf.mxu3 }
 0x68a   : > { %v4185_v19 = vadd.f32 %v4184_v34, %v4120_v53  ;;  %v3992_v36 = vpop.f32.mrf.mxu0 }
 0x68b   : > { %v3993_v6 = vadd.f32 %v3992_v36, %v7615_v17 }
 0x68c   : > { %4270 = vst [vmem:[%s5564_s20 + $0x178] sm:$0xff] %v4185_v19 }
 0x68d   : > { %v4057_v58 = vpop.f32.mrf.mxu1 }
 0x68e   : > { %v4058_v14 = vadd.f32 %v4057_v58, %v3993_v6  ;;  %v4122_v51 = vpop.f32.mrf.mxu2 }
 0x690   : > { %v4123_v4 = vadd.f32 %v4122_v51, %v4058_v14 }
 0x691   : > { %v4187_v41 = vpop.f32.mrf.mxu3 }
 0x692   : > { %v4188_v7 = vadd.f32 %v4187_v41, %v4123_v4  ;;  %v3995_v11 = vpop.f32.mrf.mxu0 }
 0x693   : > { %v3996_v27 = vadd.f32 %v3995_v11, %v7615_v17 }
 0x694   : > { %4282 = vst [vmem:[%s5564_s20 + $0x1d8] sm:$0xff] %v4188_v7 }
 0x695   : > { %v4060_v43 = vpop.f32.mrf.mxu1 }
 0x696   : > { %v4061_v40 = vadd.f32 %v4060_v43, %v3996_v27  ;;  %v4125_v18 = vpop.f32.mrf.mxu2 }
 0x698   : > { %v4126_v62 = vadd.f32 %v4125_v18, %v4061_v40 }
 0x699   : > { %v4190_v44 = vpop.f32.mrf.mxu3 }
 0x69a   : > { %v4191_v21 = vadd.f32 %v4190_v44, %v4126_v62  ;;  %v3998_v22 = vpop.f32.mrf.mxu0 }
 0x69b   : > { %v3999_v28 = vadd.f32 %v3998_v22, %v7615_v17 }
 0x69c   : > { %4294 = vst [vmem:[%s5564_s20 + $0x238] sm:$0xff] %v4191_v21 }
 0x69d   : > { %v4063_v37 = vpop.f32.mrf.mxu1 }
 0x69e   : > { %v4064_v45 = vadd.f32 %v4063_v37, %v3999_v28  ;;  %v4128_v42 = vpop.f32.mrf.mxu2 }
 0x6a0   : > { %v4129_v12 = vadd.f32 %v4128_v42, %v4064_v45 }
 0x6a1   : > { %v4193_v57 = vpop.f32.mrf.mxu3 }
 0x6a2   : > { %v4194_v9 = vadd.f32 %v4193_v57, %v4129_v12  ;;  %v4001_v61 = vpop.f32.mrf.mxu0 }
 0x6a3   : > { %v4002_v30 = vadd.f32 %v4001_v61, %v7615_v17 }
 0x6a4   : > { %4306 = vst [vmem:[%s5564_s20 + $0x298] sm:$0xff] %v4194_v9 }
 0x6a5   : > { %v4066_v26 = vpop.f32.mrf.mxu1 }
 0x6a6   : > { %v4067_v48 = vadd.f32 %v4066_v26, %v4002_v30  ;;  %v4131_v15 = vpop.f32.mrf.mxu2 }
 0x6a8   : > { %v4132_v59 = vadd.f32 %v4131_v15, %v4067_v48 }
 0x6a9   : > { %v4196_v46 = vpop.f32.mrf.mxu3 }
 0x6aa   : > { %v4197_v2 = vadd.f32 %v4196_v46, %v4132_v59  ;;  %v4004_v23 = vpop.f32.mrf.mxu0 }
 0x6ab   : > { %v4005_v52 = vadd.f32 %v4004_v23, %v7615_v17 }
 0x6ac   : > { %4318 = vst [vmem:[%s5564_s20 + $0x2f8] sm:$0xff] %v4197_v2 }
 0x6ad   : > { %v4069_v32 = vpop.f32.mrf.mxu1 }
 0x6ae   : > { %v4070_v10 = vadd.f32 %v4069_v32, %v4005_v52  ;;  %v4134_v39 = vpop.f32.mrf.mxu2 }
 0x6b0   : > { %v4135_v16 = vadd.f32 %v4134_v39, %v4070_v10 }
 0x6b1   : > { %v4199_v38 = vpop.f32.mrf.mxu3 }
 0x6b2   : > { %v4200_v54 = vadd.f32 %v4199_v38, %v4135_v16  ;;  %v4007_v56 = vpop.f32.mrf.mxu0 }
 0x6b3   : > { %v4008_v60 = vadd.f32 %v4007_v56, %v7615_v17 }
 0x6b4   : > { %4330 = vst [vmem:[%s5564_s20 + $0x358] sm:$0xff] %v4200_v54 }
 0x6b5   : > { %v4072_v8 = vpop.f32.mrf.mxu1 }
 0x6b6   : > { %v4073_v63 = vadd.f32 %v4072_v8, %v4008_v60  ;;  %v4137_v47 = vpop.f32.mrf.mxu2 }
 0x6b8   : > { %v4138_v20 = vadd.f32 %v4137_v47, %v4073_v63 }
 0x6b9   : > { %v4202_v33 = vpop.f32.mrf.mxu3 }
 0x6ba   : > { %v4203_v35 = vadd.f32 %v4202_v33, %v4138_v20  ;;  %v4010_v29 = vpop.f32.mrf.mxu0 }
 0x6bb   : > { %v4011_v24 = vadd.f32 %v4010_v29, %v7615_v17 }
 0x6bc   : > { %4342 = vst [vmem:[%s5564_s20 + $0x3b8] sm:$0xff] %v4203_v35 }
 0x6bd   : > { %v4075_v1 = vpop.f32.mrf.mxu1 }
 0x6be   : > { %v4076_v13 = vadd.f32 %v4075_v1, %v4011_v24  ;;  %v4140_v3 = vpop.f32.mrf.mxu2 }
 0x6c0   : > { %v4141_v55 = vadd.f32 %v4140_v3, %v4076_v13 }
 0x6c1   : > { %v4205_v49 = vpop.f32.mrf.mxu3 }
 0x6c2   : > { %v4206_v25 = vadd.f32 %v4205_v49, %v4141_v55  ;;  %v4013_v50 = vpop.f32.mrf.mxu0 }
 0x6c3   : > { %v4014_v5 = vadd.f32 %v4013_v50, %v7615_v17 }
 0x6c4   : > { %4354 = vst [vmem:[%s5564_s20 + $0x418] sm:$0xff] %v4206_v25 }
 0x6c5   : > { %v4078_v0 = vpop.f32.mrf.mxu1 }
 0x6c6   : > { %v4079_v31 = vadd.f32 %v4078_v0, %v4014_v5  ;;  %v4143_v53 = vpop.f32.mrf.mxu2 }
 0x6c8   : > { %v4144_v34 = vadd.f32 %v4143_v53, %v4079_v31 }
 0x6c9   : > { %v4208_v19 = vpop.f32.mrf.mxu3 }
 0x6ca   : > { %v4209_v36 = vadd.f32 %v4208_v19, %v4144_v34  ;;  %v4016_v6 = vpop.f32.mrf.mxu0 }
 0x6cb   : > { %v4017_v58 = vadd.f32 %v4016_v6, %v7615_v17 }
 0x6cc   : > { %4366 = vst [vmem:[%s5564_s20 + $0x478] sm:$0xff] %v4209_v36 }
 0x6cd   : > { %v4081_v14 = vpop.f32.mrf.mxu1 }
 0x6ce   : > { %v4082_v51 = vadd.f32 %v4081_v14, %v4017_v58  ;;  %v4146_v4 = vpop.f32.mrf.mxu2 }
 0x6d0   : > { %v4147_v41 = vadd.f32 %v4146_v4, %v4082_v51 }
 0x6d1   : > { %v4211_v7 = vpop.f32.mrf.mxu3 }
 0x6d2   : > { %v4212_v11 = vadd.f32 %v4211_v7, %v4147_v41  ;;  %v4019_v27 = vpop.f32.mrf.mxu0 }
 0x6d3   : > { %v4020_v43 = vadd.f32 %v4019_v27, %v7615_v17 }
 0x6d4   : > { %4378 = vst [vmem:[%s5564_s20 + $0x4d8] sm:$0xff] %v4212_v11 }
 0x6d5   : > { %v4084_v40 = vpop.f32.mrf.mxu1 }
 0x6d6   : > { %v4085_v18 = vadd.f32 %v4084_v40, %v4020_v43  ;;  %v4149_v62 = vpop.f32.mrf.mxu2 }
 0x6d8   : > { %v4150_v44 = vadd.f32 %v4149_v62, %v4085_v18 }
 0x6d9   : > { %v4214_v21 = vpop.f32.mrf.mxu3 }
 0x6da   : > { %v4215_v22 = vadd.f32 %v4214_v21, %v4150_v44  ;;  %v4022_v28 = vpop.f32.mrf.mxu0 }
 0x6db   : > { %v4023_v37 = vadd.f32 %v4022_v28, %v7615_v17 }
 0x6dc   : > { %4390 = vst [vmem:[%s5564_s20 + $0x538] sm:$0xff] %v4215_v22 }
 0x6dd   : > { %v4087_v45 = vpop.f32.mrf.mxu1 }
 0x6de   : > { %v4088_v42 = vadd.f32 %v4087_v45, %v4023_v37  ;;  %v4152_v12 = vpop.f32.mrf.mxu2 }
 0x6e0   : > { %v4153_v57 = vadd.f32 %v4152_v12, %v4088_v42 }
 0x6e1   : > { %v4217_v9 = vpop.f32.mrf.mxu3 }
 0x6e2   : > { %v4218_v61 = vadd.f32 %v4217_v9, %v4153_v57  ;;  %v4025_v30 = vpop.f32.mrf.mxu0 }
 0x6e3   : > { %v4026_v26 = vadd.f32 %v4025_v30, %v7615_v17 }
 0x6e4   : > { %4402 = vst [vmem:[%s5564_s20 + $0x598] sm:$0xff] %v4218_v61 }
 0x6e5   : > { %v4090_v48 = vpop.f32.mrf.mxu1 }
 0x6e6   : > { %v4091_v15 = vadd.f32 %v4090_v48, %v4026_v26  ;;  %v4155_v59 = vpop.f32.mrf.mxu2 }
 0x6e8   : > { %v4156_v46 = vadd.f32 %v4155_v59, %v4091_v15 }
 0x6e9   : > { %v4220_v2 = vpop.f32.mrf.mxu3 }
 0x6ea   : > { %v4221_v23 = vadd.f32 %v4220_v2, %v4156_v46 }
 0x6ec   : > { %4414 = vst [vmem:[%s5564_s20 + $0x5f8] sm:$0xff] %v4221_v23 }
 0x6ed   : > { %5089 = shalt.err (!%p5086_p0)
}
 0x6ee   : > { %s5156_s11 = smov 1536   ;;  %s5157_s26 = smov 96  }
 0x6ef   : > { %4569 = dma.vmem_to_hbm [thread:$0]  (%p5261_p7), %s4432_s30, 24576, %s4434_s4, %s4416_s15, %s5156_s11, %s5156_s11, %s5157_s26  }
 0x6f0 PF: > { %s4448_s28 = sand.u32 1, %s5128_s12   ;;  %p4583_p3 = pnand %p4545_p11, %p5227_p6 }
 0x6f1   : > { %s4449_s1 = scalar_lea.sflag [#allocation4], %s4448_s28 }
 0x6f2   : > { %p4584_p5 = pneg %p4583_p3 }
 0x6f4   : > { %5123 = dma.done.wait (%p4584_p5), %s4449_s1, 24576  }
 0x6f5   : > { %5125 = vsyncadd (%p4584_p5), %s4449_s1, 4294942720  ;;  %s20_s17 = sadd.s32 1, %s5148_s17   ;;  %s7949_s12 = smov %s5132_s13 }
 0x6f6   : > { %p17_p9 = scmp.ge.s32.totalorder %s20_s17, 4   ;;  %s7950_s13 = smov %s5136_s14 }
 0x6f7   : > { %s7951_s14 = smov %s5270_s29  ;;  %s7952_s15 = smov %s5144_s16 }
 0x6f8   : > { %s7953_s16 = smov %s7955_s10  ;;  %19 = sbr.rel (!%p17_p9) target bundleno = 9 (0x9), region = 85 }
 0x6fd   :  { %4455 = vsyncpa [#allocation3], 1 }
 0x6fe   :  { %4457 = vsyncpa [#allocation3 + $0x1], 1 }
 0x6ff   :  { %4458 = vsyncpa [#allocation6], 1 }
 0x700   :  { %4459 = vsyncpa [#allocation4], 1 }
 0x701   :  { %4461 = vsyncpa [#allocation4 + $0x1], 1 }

</bundles_post_ra>
